<compile_context>
chip_gen: v7x
topology: tpu7x:2x2x1
jax: 0.10.0
libtpu: 0.0.40
codegen_flags: <defaults>
</compile_context>

<pallas_src>
import functools

import jax
import jax.numpy as jnp
from jax.experimental import pallas as pl
from jax.experimental.pallas import tpu as pltpu


# ---------------------------------------------------------------------------
# Config / small helpers
# ---------------------------------------------------------------------------
# (in_ch, out_ch, kernel, stride, pad) — torchvision AlexNet.features conv layers
_CONV_CFG = [
    (3,   64,  11, 4, 2),
    (64,  192, 5,  1, 2),
    (192, 384, 3,  1, 1),
    (384, 256, 3,  1, 1),
    (256, 256, 3,  1, 1),
]
_POOL_AFTER = (0, 1)              # MaxPool after conv1/conv2; final pool is dead code
_LANE = 128                       # TPU lane width / MXU column grain

# Tile sizing: TM=512 keeps worst-case VMEM (~12 MiB with K_pad=3456, TN=256, 2x buffers)
# comfortably inside v7x's 64 MiB; raise toward 1024-2048 on v5e/v6e (128 MiB VMEM).
_TM_MAX = 512
_VMEM_LIMIT_BYTES = 48 * 1024 * 1024


def _round_up(v, m):
    return ((v + m - 1) // m) * m


# ---------------------------------------------------------------------------
# Pallas kernels
# ---------------------------------------------------------------------------
def _conv_mm_relu_kernel(p_ref, w_ref, b_ref, o_ref):
    """o = relu(p @ w + b).  p:(TM,K) bf16, w:(K,TN) bf16, b:(1,TN) f32, o:(TM,TN) f32."""
    acc = jnp.dot(p_ref[...], w_ref[...], preferred_element_type=jnp.float32)
    o_ref[...] = jnp.maximum(acc + b_ref[...], 0.0).astype(o_ref.dtype)


def _maxpool9_kernel(*refs):
    """refs[:-1]: nine (1,1,OW,C) shifted window views; refs[-1]: output. Elementwise max."""
    o_ref = refs[-1]
    acc = refs[0][...]
    for r in refs[1:-1]:
        acc = jnp.maximum(acc, r[...])
    o_ref[...] = acc


# ---------------------------------------------------------------------------
# Conv2d + ReLU  (im2col in JAX glue, tiled matmul kernel on the MXU)
# ---------------------------------------------------------------------------
def _im2col(x_nhwc, kh, kw, stride, pad):
    """x: (N,H,W,C) -> patches (N*OH*OW, kh*kw*C) in (kh, kw, c) order."""
    N, H, W, C = x_nhwc.shape
    xp = jnp.pad(x_nhwc, ((0, 0), (pad, pad), (pad, pad), (0, 0)))
    OH = (H + 2 * pad - kh) // stride + 1
    OW = (W + 2 * pad - kw) // stride + 1
    cols = []
    for i in range(kh):
        for j in range(kw):
            cols.append(
                xp[:, i:i + stride * (OH - 1) + 1:stride,
                      j:j + stride * (OW - 1) + 1:stride, :]
            )  # (N, OH, OW, C)
    patches = jnp.concatenate(cols, axis=-1)            # (N, OH, OW, kh*kw*C)
    return patches.reshape(N * OH * OW, kh * kw * C), OH, OW


def conv2d_relu(x_nhwc, w_packed, b_packed, *, kernel, stride, pad):
    """PyTorch-semantics Conv2d + ReLU.  w_packed: (K_pad, OC_pad) bf16, b_packed: (1, OC_pad) f32.

    Returns (N, OH, OW, OC_pad) float32 (extra OC columns are zeros -> relu(0)=0)."""
    N = x_nhwc.shape[0]
    K_pad, OC_pad = w_packed.shape

    patches, OH, OW = _im2col(x_nhwc, kernel, kernel, stride, pad)
    M, K = patches.shape

    TM = _TM_MAX if M >= _TM_MAX else _round_up(M, 8)
    M_pad = _round_up(M, TM)
    TN = 256 if OC_pad % 256 == 0 else 128

    # bf16 MXU operands (halves patch DMA bytes); zero-pad rows (M) and contraction (K).
    patches = jnp.pad(patches.astype(jnp.bfloat16),
                      ((0, M_pad - M), (0, K_pad - K)))

    grid = (M_pad // TM, OC_pad // TN)
    out = pl.pallas_call(
        _conv_mm_relu_kernel,
        out_shape=jax.ShapeDtypeStruct((M_pad, OC_pad), jnp.float32),
        grid=grid,
        in_specs=[
            pl.BlockSpec((TM, K_pad), lambda i, j: (i, 0)),   # patch row-tile, full K
            pl.BlockSpec((K_pad, TN), lambda i, j: (0, j)),   # weight column-tile
            pl.BlockSpec((1, TN), lambda i, j: (0, j)),       # bias column-tile
        ],
        out_specs=pl.BlockSpec((TM, TN), lambda i, j: (i, j)),
        compiler_params=pltpu.CompilerParams(
            dimension_semantics=("parallel", "parallel"),
            vmem_limit_bytes=_VMEM_LIMIT_BYTES),
    )(patches, w_packed, b_packed)

    return out[:M].reshape(N, OH, OW, OC_pad)


# ---------------------------------------------------------------------------
# MaxPool2d(kernel=3, stride=2), PyTorch floor mode, no padding
# ---------------------------------------------------------------------------
def maxpool_3x3_s2(x_nhwc):
    """x: (N, H, W, C) with C a multiple of 128 (padded channels) -> (N, OH, OW, C)."""
    N, H, W, C = x_nhwc.shape
    OH = (H - 3) // 2 + 1
    OW = (W - 3) // 2 + 1

    # Three thin stride-2 column phases (JAX strided slices); row offsets handled by
    # BlockSpec index maps over the same buffers, so no (9, M, C) stack is materialized.
    phases = [x_nhwc[:, :, j:j + 2 * (OW - 1) + 1:2, :] for j in range(3)]  # (N,H,OW,C)

    in_specs = []
    operands = []
    for j in range(3):
        for k in range(3):
            in_specs.append(
                pl.BlockSpec((1, 1, OW, C), lambda n, r, k=k: (n, 2 * r + k, 0, 0)))
            operands.append(phases[j])

    out = pl.pallas_call(
        _maxpool9_kernel,
        out_shape=jax.ShapeDtypeStruct((N, OH, OW, C), x_nhwc.dtype),
        grid=(N, OH),
        in_specs=in_specs,
        out_specs=pl.BlockSpec((1, 1, OW, C), lambda n, r: (n, r, 0, 0)),
        compiler_params=pltpu.CompilerParams(
            dimension_semantics=("parallel", "parallel"),
            vmem_limit_bytes=_VMEM_LIMIT_BYTES),
    )(*operands)
    return out


# ---------------------------------------------------------------------------
# Parameters (deterministic synthetic weights, pre-packed for the kernels)
# ---------------------------------------------------------------------------
def _raw_conv_params(key):
    """PyTorch-layout (OC, IC, KH, KW) f32 weights + biases (synthetic, deterministic)."""
    raw = []
    for idx, (ic, oc, k, _, _) in enumerate(_CONV_CFG):
        kw_key, kb_key = jax.random.split(jax.random.fold_in(key, idx))
        w = 0.05 * jax.random.normal(kw_key, (oc, ic, k, k), dtype=jnp.float32)
        b = 0.05 * jax.random.normal(kb_key, (oc,), dtype=jnp.float32)
        raw.append((w, b))
    return raw


def init_alexnet_params(key):
    """Pack weights once: (OC,IC,KH,KW) -> (K_pad, OC_pad) bf16 matching im2col ordering."""
    params = []
    for (ic, oc, k, _, _), (w, b) in zip(_CONV_CFG, _raw_conv_params(key)):
        K = k * k * ic
        K_pad = _round_up(K, _LANE)
        OC_pad = _round_up(oc, _LANE)
        w2d = jnp.transpose(w, (2, 3, 1, 0)).reshape(K, oc)          # (kh, kw, ic) order
        w2d = jnp.pad(w2d, ((0, K_pad - K), (0, OC_pad - oc))).astype(jnp.bfloat16)
        b2d = jnp.pad(b, (0, OC_pad - oc)).reshape(1, OC_pad).astype(jnp.float32)
        params.append((w2d, b2d))
    return params


# ---------------------------------------------------------------------------
# Forward pass (returns the 5 post-ReLU feature maps, NCHW, like the PyTorch module)
# ---------------------------------------------------------------------------
@jax.jit
def alexnet_forward(x_nchw, params):
    x = jnp.transpose(x_nchw, (0, 2, 3, 1))           # NCHW -> NHWC internally
    fmaps = []
    for li, ((ic, oc, k, s, p), (w2d, b2d)) in enumerate(zip(_CONV_CFG, params)):
        x = conv2d_relu(x[..., :ic], w2d, b2d, kernel=k, stride=s, pad=p)
        fmaps.append(x[..., :oc])                     # drop OC padding for returned map
        if li in _POOL_AFTER:
            x = maxpool_3x3_s2(x)                     # pool on padded (lane-dense) channels
    # Final MaxPool of AlexNet.features is intentionally omitted: its output is unused.
    return [jnp.transpose(f, (0, 3, 1, 2)) for f in fmaps]


# ---------------------------------------------------------------------------
# Plain-XLA reference (f32) for a relaxed-tolerance numerical check
# ---------------------------------------------------------------------------
def _reference_forward(x_nchw, raw_params):
    fmaps = []
    x = x_nchw
    for li, ((ic, oc, k, s, p), (w, b)) in enumerate(zip(_CONV_CFG, raw_params)):
        x = jax.lax.conv_general_dilated(
            x, w, window_strides=(s, s), padding=[(p, p), (p, p)],
            dimension_numbers=("NCHW", "OIHW", "NCHW"),
            precision=jax.lax.Precision.HIGHEST)
        x = jnp.maximum(x + b.reshape(1, oc, 1, 1), 0.0)
        fmaps.append(x)
        if li in _POOL_AFTER:
            x = jax.lax.reduce_window(x, -jnp.inf, jax.lax.max,
                                      (1, 1, 3, 3), (1, 1, 2, 2), "VALID")
    return fmaps


if __name__ == "__main__":
    key = jax.random.PRNGKey(0)
    x_key, p_key = jax.random.split(key)

    # Small input consistent with AlexNet's stride/pool stack: (N=2, C=3, H=W=64).
    x = jax.random.normal(x_key, (2, 3, 64, 64), dtype=jnp.float32)
    params = init_alexnet_params(p_key)

    fmaps = alexnet_forward(x, params)
    fmaps = [jax.block_until_ready(f) for f in fmaps]

    expected_shapes = [
        (2, 64, 15, 15),
        (2, 192, 7, 7),
        (2, 384, 3, 3),
        (2, 256, 3, 3),
        (2, 256, 3, 3),
    ]
    assert [tuple(f.shape) for f in fmaps] == expected_shapes, \
        [tuple(f.shape) for f in fmaps]
    assert all(f.dtype == jnp.float32 for f in fmaps)
    assert all(bool(jnp.all(f >= 0)) for f in fmaps)   # post-ReLU maps are non-negative

    # Relaxed-tolerance check vs the f32 XLA reference (MXU operands are bf16 by design).
    refs = _reference_forward(x, _raw_conv_params(p_key))
    for i, (got, ref) in enumerate(zip(fmaps, refs)):
        err = float(jnp.max(jnp.abs(got - ref)))
        scale = float(jnp.max(jnp.abs(ref)))
        assert err <= 0.1 * scale + 0.1, ("fmap", i, err, scale)

    print("KERNEL_OK")
</pallas_src>

<mosaic_0001>
module attributes {stable_mosaic.version = 11 : i64} {
  func.func @_conv_mm_relu_kernel(%arg0: i32, %arg1: i32, %arg2: memref<456x384xbf16, #tpu.memory_space<vmem>>, %arg3: memref<384x128xbf16, #tpu.memory_space<vmem>>, %arg4: memref<1x128xf32, #tpu.memory_space<vmem>>, %arg5: memref<456x128xf32, #tpu.memory_space<vmem>>) attributes {dimension_semantics = [#tpu.dimension_semantics<parallel>, #tpu.dimension_semantics<parallel>], iteration_bounds = array<i64: 1, 1>, scalar_prefetch = 0 : i64, scratch_operands = 0 : i64, tpu.core_type = #tpu.core_type<tc>, window_params = [{transform_indices = @transform_0, window_bounds = array<i64: 456, 384>}, {transform_indices = @transform_1, window_bounds = array<i64: 384, 128>}, {transform_indices = @transform_2, window_bounds = array<i64: 1, 128>}, {transform_indices = @transform_3, window_bounds = array<i64: 456, 128>}]} {
    %c0 = arith.constant 0 : index
    %c0_0 = arith.constant 0 : index
    %0 = vector.load %arg2[%c0, %c0_0] : memref<456x384xbf16, #tpu.memory_space<vmem>>, vector<456x384xbf16>
    %c0_1 = arith.constant 0 : index
    %c0_2 = arith.constant 0 : index
    %1 = vector.load %arg3[%c0_1, %c0_2] : memref<384x128xbf16, #tpu.memory_space<vmem>>, vector<384x128xbf16>
    %cst = arith.constant dense<0.000000e+00> : vector<456x128xf32>
    %2 = tpu.matmul %0, %1, %cst {dimension_numbers = #tpu.dot_dimension_numbers<[1], [0], [0], [1], [0, 0, 1, 1], [], []>} : vector<456x384xbf16>, vector<384x128xbf16>, vector<456x128xf32> -> vector<456x128xf32>
    %c0_3 = arith.constant 0 : index
    %c0_4 = arith.constant 0 : index
    %3 = vector.load %arg4[%c0_3, %c0_4] : memref<1x128xf32, #tpu.memory_space<vmem>>, vector<1x128xf32>
    %4 = vector.broadcast %3 : vector<1x128xf32> to vector<456x128xf32>
    %5 = arith.addf %2, %4 : vector<456x128xf32>
    %cst_5 = arith.constant 0.000000e+00 : f32
    %6 = vector.broadcast %cst_5 : f32 to vector<456x128xf32>
    %7 = arith.maximumf %5, %6 : vector<456x128xf32>
    %c0_6 = arith.constant 0 : index
    %c0_7 = arith.constant 0 : index
    %8 = vector.load %arg5[%c0_6, %c0_7] : memref<456x128xf32, #tpu.memory_space<vmem>>, vector<456x128xf32>
    tpu.vector_store %arg5[%c0_6, %c0_7], %7 {strides = array<i32>} : memref<456x128xf32, #tpu.memory_space<vmem>>, vector<456x128xf32>,
    return
  }
  func.func @transform_0(%arg0: i32, %arg1: i32) -> (i32, i32) {
    %c0_i32 = arith.constant 0 : i32
    %c0_i32_0 = arith.constant 0 : i32
    return %arg0, %c0_i32 : i32, i32
  }
  func.func @transform_1(%arg0: i32, %arg1: i32) -> (i32, i32) {
    %c0_i32 = arith.constant 0 : i32
    %c0_i32_0 = arith.constant 0 : i32
    return %c0_i32, %arg1 : i32, i32
  }
  func.func @transform_2(%arg0: i32, %arg1: i32) -> (i32, i32) {
    %c0_i32 = arith.constant 0 : i32
    %c0_i32_0 = arith.constant 0 : i32
    return %c0_i32, %arg1 : i32, i32
  }
  func.func @transform_3(%arg0: i32, %arg1: i32) -> (i32, i32) {
    %c0_i32 = arith.constant 0 : i32
    return %arg0, %arg1 : i32, i32
  }
}

module attributes {stable_mosaic.version = 11 : i64} {
  func.func @_maxpool9_kernel(%arg0: i32, %arg1: i32, %arg2: memref<1x1x7x128xf32, #tpu.memory_space<vmem>>, %arg3: memref<1x1x7x128xf32, #tpu.memory_space<vmem>>, %arg4: memref<1x1x7x128xf32, #tpu.memory_space<vmem>>, %arg5: memref<1x1x7x128xf32, #tpu.memory_space<vmem>>, %arg6: memref<1x1x7x128xf32, #tpu.memory_space<vmem>>, %arg7: memref<1x1x7x128xf32, #tpu.memory_space<vmem>>, %arg8: memref<1x1x7x128xf32, #tpu.memory_space<vmem>>, %arg9: memref<1x1x7x128xf32, #tpu.memory_space<vmem>>, %arg10: memref<1x1x7x128xf32, #tpu.memory_space<vmem>>, %arg11: memref<1x1x7x128xf32, #tpu.memory_space<vmem>>) attributes {dimension_semantics = [#tpu.dimension_semantics<parallel>, #tpu.dimension_semantics<parallel>], iteration_bounds = array<i64: 2, 7>, scalar_prefetch = 0 : i64, scratch_operands = 0 : i64, tpu.core_type = #tpu.core_type<tc>, window_params = [{transform_indices = @transform_0, window_bounds = array<i64: 1, 1, 7, 128>}, {transform_indices = @transform_1, window_bounds = array<i64: 1, 1, 7, 128>}, {transform_indices = @transform_2, window_bounds = array<i64: 1, 1, 7, 128>}, {transform_indices = @transform_3, window_bounds = array<i64: 1, 1, 7, 128>}, {transform_indices = @transform_4, window_bounds = array<i64: 1, 1, 7, 128>}, {transform_indices = @transform_5, window_bounds = array<i64: 1, 1, 7, 128>}, {transform_indices = @transform_6, window_bounds = array<i64: 1, 1, 7, 128>}, {transform_indices = @transform_7, window_bounds = array<i64: 1, 1, 7, 128>}, {transform_indices = @transform_8, window_bounds = array<i64: 1, 1, 7, 128>}, {transform_indices = @transform_9, window_bounds = array<i64: 1, 1, 7, 128>}]} {
    %c0 = arith.constant 0 : index
    %c0_0 = arith.constant 0 : index
    %c0_1 = arith.constant 0 : index
    %c0_2 = arith.constant 0 : index
    %0 = vector.load %arg2[%c0, %c0_0, %c0_1, %c0_2] : memref<1x1x7x128xf32, #tpu.memory_space<vmem>>, vector<1x1x7x128xf32>
    %c0_3 = arith.constant 0 : index
    %c0_4 = arith.constant 0 : index
    %c0_5 = arith.constant 0 : index
    %c0_6 = arith.constant 0 : index
    %1 = vector.load %arg3[%c0_3, %c0_4, %c0_5, %c0_6] : memref<1x1x7x128xf32, #tpu.memory_space<vmem>>, vector<1x1x7x128xf32>
    %2 = arith.maximumf %0, %1 : vector<1x1x7x128xf32>
    %c0_7 = arith.constant 0 : index
    %c0_8 = arith.constant 0 : index
    %c0_9 = arith.constant 0 : index
    %c0_10 = arith.constant 0 : index
    %3 = vector.load %arg4[%c0_7, %c0_8, %c0_9, %c0_10] : memref<1x1x7x128xf32, #tpu.memory_space<vmem>>, vector<1x1x7x128xf32>
    %4 = arith.maximumf %2, %3 : vector<1x1x7x128xf32>
    %c0_11 = arith.constant 0 : index
    %c0_12 = arith.constant 0 : index
    %c0_13 = arith.constant 0 : index
    %c0_14 = arith.constant 0 : index
    %5 = vector.load %arg5[%c0_11, %c0_12, %c0_13, %c0_14] : memref<1x1x7x128xf32, #tpu.memory_space<vmem>>, vector<1x1x7x128xf32>
    %6 = arith.maximumf %4, %5 : vector<1x1x7x128xf32>
    %c0_15 = arith.constant 0 : index
    %c0_16 = arith.constant 0 : index
    %c0_17 = arith.constant 0 : index
    %c0_18 = arith.constant 0 : index
    %7 = vector.load %arg6[%c0_15, %c0_16, %c0_17, %c0_18] : memref<1x1x7x128xf32, #tpu.memory_space<vmem>>, vector<1x1x7x128xf32>
    %8 = arith.maximumf %6, %7 : vector<1x1x7x128xf32>
    %c0_19 = arith.constant 0 : index
    %c0_20 = arith.constant 0 : index
    %c0_21 = arith.constant 0 : index
    %c0_22 = arith.constant 0 : index
    %9 = vector.load %arg7[%c0_19, %c0_20, %c0_21, %c0_22] : memref<1x1x7x128xf32, #tpu.memory_space<vmem>>, vector<1x1x7x128xf32>
    %10 = arith.maximumf %8, %9 : vector<1x1x7x128xf32>
    %c0_23 = arith.constant 0 : index
    %c0_24 = arith.constant 0 : index
    %c0_25 = arith.constant 0 : index
    %c0_26 = arith.constant 0 : index
    %11 = vector.load %arg8[%c0_23, %c0_24, %c0_25, %c0_26] : memref<1x1x7x128xf32, #tpu.memory_space<vmem>>, vector<1x1x7x128xf32>
    %12 = arith.maximumf %10, %11 : vector<1x1x7x128xf32>
    %c0_27 = arith.constant 0 : index
    %c0_28 = arith.constant 0 : index
    %c0_29 = arith.constant 0 : index
    %c0_30 = arith.constant 0 : index
    %13 = vector.load %arg9[%c0_27, %c0_28, %c0_29, %c0_30] : memref<1x1x7x128xf32, #tpu.memory_space<vmem>>, vector<1x1x7x128xf32>
    %14 = arith.maximumf %12, %13 : vector<1x1x7x128xf32>
    %c0_31 = arith.constant 0 : index
    %c0_32 = arith.constant 0 : index
    %c0_33 = arith.constant 0 : index
    %c0_34 = arith.constant 0 : index
    %15 = vector.load %arg10[%c0_31, %c0_32, %c0_33, %c0_34] : memref<1x1x7x128xf32, #tpu.memory_space<vmem>>, vector<1x1x7x128xf32>
    %16 = arith.maximumf %14, %15 : vector<1x1x7x128xf32>
    %c0_35 = arith.constant 0 : index
    %c0_36 = arith.constant 0 : index
    %c0_37 = arith.constant 0 : index
    %c0_38 = arith.constant 0 : index
    %17 = vector.load %arg11[%c0_35, %c0_36, %c0_37, %c0_38] : memref<1x1x7x128xf32, #tpu.memory_space<vmem>>, vector<1x1x7x128xf32>
    tpu.vector_store %arg11[%c0_35, %c0_36, %c0_37, %c0_38], %16 {strides = array<i32>} : memref<1x1x7x128xf32, #tpu.memory_space<vmem>>, vector<1x1x7x128xf32>,
    return
  }
  func.func @transform_0(%arg0: i32, %arg1: i32) -> (i32, i32, i32, i32) {
    %c2_i32 = arith.constant 2 : i32
    %0 = arith.muli %c2_i32, %arg1 : i32
    %c0_i32 = arith.constant 0 : i32
    %1 = arith.addi %0, %c0_i32 : i32
    %c0_i32_0 = arith.constant 0 : i32
    %c0_i32_1 = arith.constant 0 : i32
    %c0_i32_2 = arith.constant 0 : i32
    return %arg0, %1, %c0_i32_0, %c0_i32_1 : i32, i32, i32, i32
  }
  func.func @transform_1(%arg0: i32, %arg1: i32) -> (i32, i32, i32, i32) {
    %c2_i32 = arith.constant 2 : i32
    %0 = arith.muli %c2_i32, %arg1 : i32
    %c1_i32 = arith.constant 1 : i32
    %1 = arith.addi %0, %c1_i32 : i32
    %c0_i32 = arith.constant 0 : i32
    %c0_i32_0 = arith.constant 0 : i32
    %c0_i32_1 = arith.constant 0 : i32
    return %arg0, %1, %c0_i32, %c0_i32_0 : i32, i32, i32, i32
  }
  func.func @transform_2(%arg0: i32, %arg1: i32) -> (i32, i32, i32, i32) {
    %c2_i32 = arith.constant 2 : i32
    %0 = arith.muli %c2_i32, %arg1 : i32
    %c2_i32_0 = arith.constant 2 : i32
    %1 = arith.addi %0, %c2_i32_0 : i32
    %c0_i32 = arith.constant 0 : i32
    %c0_i32_1 = arith.constant 0 : i32
    %c0_i32_2 = arith.constant 0 : i32
    return %arg0, %1, %c0_i32, %c0_i32_1 : i32, i32, i32, i32
  }
  func.func @transform_3(%arg0: i32, %arg1: i32) -> (i32, i32, i32, i32) {
    %c2_i32 = arith.constant 2 : i32
    %0 = arith.muli %c2_i32, %arg1 : i32
    %c0_i32 = arith.constant 0 : i32
    %1 = arith.addi %0, %c0_i32 : i32
    %c0_i32_0 = arith.constant 0 : i32
    %c0_i32_1 = arith.constant 0 : i32
    %c0_i32_2 = arith.constant 0 : i32
    return %arg0, %1, %c0_i32_0, %c0_i32_1 : i32, i32, i32, i32
  }
  func.func @transform_4(%arg0: i32, %arg1: i32) -> (i32, i32, i32, i32) {
    %c2_i32 = arith.constant 2 : i32
    %0 = arith.muli %c2_i32, %arg1 : i32
    %c1_i32 = arith.constant 1 : i32
    %1 = arith.addi %0, %c1_i32 : i32
    %c0_i32 = arith.constant 0 : i32
    %c0_i32_0 = arith.constant 0 : i32
    %c0_i32_1 = arith.constant 0 : i32
    return %arg0, %1, %c0_i32, %c0_i32_0 : i32, i32, i32, i32
  }
  func.func @transform_5(%arg0: i32, %arg1: i32) -> (i32, i32, i32, i32) {
    %c2_i32 = arith.constant 2 : i32
    %0 = arith.muli %c2_i32, %arg1 : i32
    %c2_i32_0 = arith.constant 2 : i32
    %1 = arith.addi %0, %c2_i32_0 : i32
    %c0_i32 = arith.constant 0 : i32
    %c0_i32_1 = arith.constant 0 : i32
    %c0_i32_2 = arith.constant 0 : i32
    return %arg0, %1, %c0_i32, %c0_i32_1 : i32, i32, i32, i32
  }
  func.func @transform_6(%arg0: i32, %arg1: i32) -> (i32, i32, i32, i32) {
    %c2_i32 = arith.constant 2 : i32
    %0 = arith.muli %c2_i32, %arg1 : i32
    %c0_i32 = arith.constant 0 : i32
    %1 = arith.addi %0, %c0_i32 : i32
    %c0_i32_0 = arith.constant 0 : i32
    %c0_i32_1 = arith.constant 0 : i32
    %c0_i32_2 = arith.constant 0 : i32
    return %arg0, %1, %c0_i32_0, %c0_i32_1 : i32, i32, i32, i32
  }
  func.func @transform_7(%arg0: i32, %arg1: i32) -> (i32, i32, i32, i32) {
    %c2_i32 = arith.constant 2 : i32
    %0 = arith.muli %c2_i32, %arg1 : i32
    %c1_i32 = arith.constant 1 : i32
    %1 = arith.addi %0, %c1_i32 : i32
    %c0_i32 = arith.constant 0 : i32
    %c0_i32_0 = arith.constant 0 : i32
    %c0_i32_1 = arith.constant 0 : i32
    return %arg0, %1, %c0_i32, %c0_i32_0 : i32, i32, i32, i32
  }
  func.func @transform_8(%arg0: i32, %arg1: i32) -> (i32, i32, i32, i32) {
    %c2_i32 = arith.constant 2 : i32
    %0 = arith.muli %c2_i32, %arg1 : i32
    %c2_i32_0 = arith.constant 2 : i32
    %1 = arith.addi %0, %c2_i32_0 : i32
    %c0_i32 = arith.constant 0 : i32
    %c0_i32_1 = arith.constant 0 : i32
    %c0_i32_2 = arith.constant 0 : i32
    return %arg0, %1, %c0_i32, %c0_i32_1 : i32, i32, i32, i32
  }
  func.func @transform_9(%arg0: i32, %arg1: i32) -> (i32, i32, i32, i32) {
    %c0_i32 = arith.constant 0 : i32
    %c0_i32_0 = arith.constant 0 : i32
    %c0_i32_1 = arith.constant 0 : i32
    return %arg0, %arg1, %c0_i32, %c0_i32_0 : i32, i32, i32, i32
  }
}

module attributes {stable_mosaic.version = 11 : i64} {
  func.func @_conv_mm_relu_kernel(%arg0: i32, %arg1: i32, %arg2: memref<104x1664xbf16, #tpu.memory_space<vmem>>, %arg3: memref<1664x256xbf16, #tpu.memory_space<vmem>>, %arg4: memref<1x256xf32, #tpu.memory_space<vmem>>, %arg5: memref<104x256xf32, #tpu.memory_space<vmem>>) attributes {dimension_semantics = [#tpu.dimension_semantics<parallel>, #tpu.dimension_semantics<parallel>], iteration_bounds = array<i64: 1, 1>, scalar_prefetch = 0 : i64, scratch_operands = 0 : i64, tpu.core_type = #tpu.core_type<tc>, window_params = [{transform_indices = @transform_0, window_bounds = array<i64: 104, 1664>}, {transform_indices = @transform_1, window_bounds = array<i64: 1664, 256>}, {transform_indices = @transform_2, window_bounds = array<i64: 1, 256>}, {transform_indices = @transform_3, window_bounds = array<i64: 104, 256>}]} {
    %c0 = arith.constant 0 : index
    %c0_0 = arith.constant 0 : index
    %0 = vector.load %arg2[%c0, %c0_0] : memref<104x1664xbf16, #tpu.memory_space<vmem>>, vector<104x1664xbf16>
    %c0_1 = arith.constant 0 : index
    %c0_2 = arith.constant 0 : index
    %1 = vector.load %arg3[%c0_1, %c0_2] : memref<1664x256xbf16, #tpu.memory_space<vmem>>, vector<1664x256xbf16>
    %cst = arith.constant dense<0.000000e+00> : vector<104x256xf32>
    %2 = tpu.matmul %0, %1, %cst {dimension_numbers = #tpu.dot_dimension_numbers<[1], [0], [0], [1], [0, 0, 1, 1], [], []>} : vector<104x1664xbf16>, vector<1664x256xbf16>, vector<104x256xf32> -> vector<104x256xf32>
    %c0_3 = arith.constant 0 : index
    %c0_4 = arith.constant 0 : index
    %3 = vector.load %arg4[%c0_3, %c0_4] : memref<1x256xf32, #tpu.memory_space<vmem>>, vector<1x256xf32>
    %4 = vector.broadcast %3 : vector<1x256xf32> to vector<104x256xf32>
    %5 = arith.addf %2, %4 : vector<104x256xf32>
    %cst_5 = arith.constant 0.000000e+00 : f32
    %6 = vector.broadcast %cst_5 : f32 to vector<104x256xf32>
    %7 = arith.maximumf %5, %6 : vector<104x256xf32>
    %c0_6 = arith.constant 0 : index
    %c0_7 = arith.constant 0 : index
    %8 = vector.load %arg5[%c0_6, %c0_7] : memref<104x256xf32, #tpu.memory_space<vmem>>, vector<104x256xf32>
    tpu.vector_store %arg5[%c0_6, %c0_7], %7 {strides = array<i32>} : memref<104x256xf32, #tpu.memory_space<vmem>>, vector<104x256xf32>,
    return
  }
  func.func @transform_0(%arg0: i32, %arg1: i32) -> (i32, i32) {
    %c0_i32 = arith.constant 0 : i32
    %c0_i32_0 = arith.constant 0 : i32
    return %arg0, %c0_i32 : i32, i32
  }
  func.func @transform_1(%arg0: i32, %arg1: i32) -> (i32, i32) {
    %c0_i32 = arith.constant 0 : i32
    %c0_i32_0 = arith.constant 0 : i32
    return %c0_i32, %arg1 : i32, i32
  }
  func.func @transform_2(%arg0: i32, %arg1: i32) -> (i32, i32) {
    %c0_i32 = arith.constant 0 : i32
    %c0_i32_0 = arith.constant 0 : i32
    return %c0_i32, %arg1 : i32, i32
  }
  func.func @transform_3(%arg0: i32, %arg1: i32) -> (i32, i32) {
    %c0_i32 = arith.constant 0 : i32
    return %arg0, %arg1 : i32, i32
  }
}

module attributes {stable_mosaic.version = 11 : i64} {
  func.func @_maxpool9_kernel(%arg0: i32, %arg1: i32, %arg2: memref<1x1x3x256xf32, #tpu.memory_space<vmem>>, %arg3: memref<1x1x3x256xf32, #tpu.memory_space<vmem>>, %arg4: memref<1x1x3x256xf32, #tpu.memory_space<vmem>>, %arg5: memref<1x1x3x256xf32, #tpu.memory_space<vmem>>, %arg6: memref<1x1x3x256xf32, #tpu.memory_space<vmem>>, %arg7: memref<1x1x3x256xf32, #tpu.memory_space<vmem>>, %arg8: memref<1x1x3x256xf32, #tpu.memory_space<vmem>>, %arg9: memref<1x1x3x256xf32, #tpu.memory_space<vmem>>, %arg10: memref<1x1x3x256xf32, #tpu.memory_space<vmem>>, %arg11: memref<1x1x3x256xf32, #tpu.memory_space<vmem>>) attributes {dimension_semantics = [#tpu.dimension_semantics<parallel>, #tpu.dimension_semantics<parallel>], iteration_bounds = array<i64: 2, 3>, scalar_prefetch = 0 : i64, scratch_operands = 0 : i64, tpu.core_type = #tpu.core_type<tc>, window_params = [{transform_indices = @transform_0, window_bounds = array<i64: 1, 1, 3, 256>}, {transform_indices = @transform_1, window_bounds = array<i64: 1, 1, 3, 256>}, {transform_indices = @transform_2, window_bounds = array<i64: 1, 1, 3, 256>}, {transform_indices = @transform_3, window_bounds = array<i64: 1, 1, 3, 256>}, {transform_indices = @transform_4, window_bounds = array<i64: 1, 1, 3, 256>}, {transform_indices = @transform_5, window_bounds = array<i64: 1, 1, 3, 256>}, {transform_indices = @transform_6, window_bounds = array<i64: 1, 1, 3, 256>}, {transform_indices = @transform_7, window_bounds = array<i64: 1, 1, 3, 256>}, {transform_indices = @transform_8, window_bounds = array<i64: 1, 1, 3, 256>}, {transform_indices = @transform_9, window_bounds = array<i64: 1, 1, 3, 256>}]} {
    %c0 = arith.constant 0 : index
    %c0_0 = arith.constant 0 : index
    %c0_1 = arith.constant 0 : index
    %c0_2 = arith.constant 0 : index
    %0 = vector.load %arg2[%c0, %c0_0, %c0_1, %c0_2] : memref<1x1x3x256xf32, #tpu.memory_space<vmem>>, vector<1x1x3x256xf32>
    %c0_3 = arith.constant 0 : index
    %c0_4 = arith.constant 0 : index
    %c0_5 = arith.constant 0 : index
    %c0_6 = arith.constant 0 : index
    %1 = vector.load %arg3[%c0_3, %c0_4, %c0_5, %c0_6] : memref<1x1x3x256xf32, #tpu.memory_space<vmem>>, vector<1x1x3x256xf32>
    %2 = arith.maximumf %0, %1 : vector<1x1x3x256xf32>
    %c0_7 = arith.constant 0 : index
    %c0_8 = arith.constant 0 : index
    %c0_9 = arith.constant 0 : index
    %c0_10 = arith.constant 0 : index
    %3 = vector.load %arg4[%c0_7, %c0_8, %c0_9, %c0_10] : memref<1x1x3x256xf32, #tpu.memory_space<vmem>>, vector<1x1x3x256xf32>
    %4 = arith.maximumf %2, %3 : vector<1x1x3x256xf32>
    %c0_11 = arith.constant 0 : index
    %c0_12 = arith.constant 0 : index
    %c0_13 = arith.constant 0 : index
    %c0_14 = arith.constant 0 : index
    %5 = vector.load %arg5[%c0_11, %c0_12, %c0_13, %c0_14] : memref<1x1x3x256xf32, #tpu.memory_space<vmem>>, vector<1x1x3x256xf32>
    %6 = arith.maximumf %4, %5 : vector<1x1x3x256xf32>
    %c0_15 = arith.constant 0 : index
    %c0_16 = arith.constant 0 : index
    %c0_17 = arith.constant 0 : index
    %c0_18 = arith.constant 0 : index
    %7 = vector.load %arg6[%c0_15, %c0_16, %c0_17, %c0_18] : memref<1x1x3x256xf32, #tpu.memory_space<vmem>>, vector<1x1x3x256xf32>
    %8 = arith.maximumf %6, %7 : vector<1x1x3x256xf32>
    %c0_19 = arith.constant 0 : index
    %c0_20 = arith.constant 0 : index
    %c0_21 = arith.constant 0 : index
    %c0_22 = arith.constant 0 : index
    %9 = vector.load %arg7[%c0_19, %c0_20, %c0_21, %c0_22] : memref<1x1x3x256xf32, #tpu.memory_space<vmem>>, vector<1x1x3x256xf32>
    %10 = arith.maximumf %8, %9 : vector<1x1x3x256xf32>
    %c0_23 = arith.constant 0 : index
    %c0_24 = arith.constant 0 : index
    %c0_25 = arith.constant 0 : index
    %c0_26 = arith.constant 0 : index
    %11 = vector.load %arg8[%c0_23, %c0_24, %c0_25, %c0_26] : memref<1x1x3x256xf32, #tpu.memory_space<vmem>>, vector<1x1x3x256xf32>
    %12 = arith.maximumf %10, %11 : vector<1x1x3x256xf32>
    %c0_27 = arith.constant 0 : index
    %c0_28 = arith.constant 0 : index
    %c0_29 = arith.constant 0 : index
    %c0_30 = arith.constant 0 : index
    %13 = vector.load %arg9[%c0_27, %c0_28, %c0_29, %c0_30] : memref<1x1x3x256xf32, #tpu.memory_space<vmem>>, vector<1x1x3x256xf32>
    %14 = arith.maximumf %12, %13 : vector<1x1x3x256xf32>
    %c0_31 = arith.constant 0 : index
    %c0_32 = arith.constant 0 : index
    %c0_33 = arith.constant 0 : index
    %c0_34 = arith.constant 0 : index
    %15 = vector.load %arg10[%c0_31, %c0_32, %c0_33, %c0_34] : memref<1x1x3x256xf32, #tpu.memory_space<vmem>>, vector<1x1x3x256xf32>
    %16 = arith.maximumf %14, %15 : vector<1x1x3x256xf32>
    %c0_35 = arith.constant 0 : index
    %c0_36 = arith.constant 0 : index
    %c0_37 = arith.constant 0 : index
    %c0_38 = arith.constant 0 : index
    %17 = vector.load %arg11[%c0_35, %c0_36, %c0_37, %c0_38] : memref<1x1x3x256xf32, #tpu.memory_space<vmem>>, vector<1x1x3x256xf32>
    tpu.vector_store %arg11[%c0_35, %c0_36, %c0_37, %c0_38], %16 {strides = array<i32>} : memref<1x1x3x256xf32, #tpu.memory_space<vmem>>, vector<1x1x3x256xf32>,
    return
  }
  func.func @transform_0(%arg0: i32, %arg1: i32) -> (i32, i32, i32, i32) {
    %c2_i32 = arith.constant 2 : i32
    %0 = arith.muli %c2_i32, %arg1 : i32
    %c0_i32 = arith.constant 0 : i32
    %1 = arith.addi %0, %c0_i32 : i32
    %c0_i32_0 = arith.constant 0 : i32
    %c0_i32_1 = arith.constant 0 : i32
    %c0_i32_2 = arith.constant 0 : i32
    return %arg0, %1, %c0_i32_0, %c0_i32_1 : i32, i32, i32, i32
  }
  func.func @transform_1(%arg0: i32, %arg1: i32) -> (i32, i32, i32, i32) {
    %c2_i32 = arith.constant 2 : i32
    %0 = arith.muli %c2_i32, %arg1 : i32
    %c1_i32 = arith.constant 1 : i32
    %1 = arith.addi %0, %c1_i32 : i32
    %c0_i32 = arith.constant 0 : i32
    %c0_i32_0 = arith.constant 0 : i32
    %c0_i32_1 = arith.constant 0 : i32
    return %arg0, %1, %c0_i32, %c0_i32_0 : i32, i32, i32, i32
  }
  func.func @transform_2(%arg0: i32, %arg1: i32) -> (i32, i32, i32, i32) {
    %c2_i32 = arith.constant 2 : i32
    %0 = arith.muli %c2_i32, %arg1 : i32
    %c2_i32_0 = arith.constant 2 : i32
    %1 = arith.addi %0, %c2_i32_0 : i32
    %c0_i32 = arith.constant 0 : i32
    %c0_i32_1 = arith.constant 0 : i32
    %c0_i32_2 = arith.constant 0 : i32
    return %arg0, %1, %c0_i32, %c0_i32_1 : i32, i32, i32, i32
  }
  func.func @transform_3(%arg0: i32, %arg1: i32) -> (i32, i32, i32, i32) {
    %c2_i32 = arith.constant 2 : i32
    %0 = arith.muli %c2_i32, %arg1 : i32
    %c0_i32 = arith.constant 0 : i32
    %1 = arith.addi %0, %c0_i32 : i32
    %c0_i32_0 = arith.constant 0 : i32
    %c0_i32_1 = arith.constant 0 : i32
    %c0_i32_2 = arith.constant 0 : i32
    return %arg0, %1, %c0_i32_0, %c0_i32_1 : i32, i32, i32, i32
  }
  func.func @transform_4(%arg0: i32, %arg1: i32) -> (i32, i32, i32, i32) {
    %c2_i32 = arith.constant 2 : i32
    %0 = arith.muli %c2_i32, %arg1 : i32
    %c1_i32 = arith.constant 1 : i32
    %1 = arith.addi %0, %c1_i32 : i32
    %c0_i32 = arith.constant 0 : i32
    %c0_i32_0 = arith.constant 0 : i32
    %c0_i32_1 = arith.constant 0 : i32
    return %arg0, %1, %c0_i32, %c0_i32_0 : i32, i32, i32, i32
  }
  func.func @transform_5(%arg0: i32, %arg1: i32) -> (i32, i32, i32, i32) {
    %c2_i32 = arith.constant 2 : i32
    %0 = arith.muli %c2_i32, %arg1 : i32
    %c2_i32_0 = arith.constant 2 : i32
    %1 = arith.addi %0, %c2_i32_0 : i32
    %c0_i32 = arith.constant 0 : i32
    %c0_i32_1 = arith.constant 0 : i32
    %c0_i32_2 = arith.constant 0 : i32
    return %arg0, %1, %c0_i32, %c0_i32_1 : i32, i32, i32, i32
  }
  func.func @transform_6(%arg0: i32, %arg1: i32) -> (i32, i32, i32, i32) {
    %c2_i32 = arith.constant 2 : i32
    %0 = arith.muli %c2_i32, %arg1 : i32
    %c0_i32 = arith.constant 0 : i32
    %1 = arith.addi %0, %c0_i32 : i32
    %c0_i32_0 = arith.constant 0 : i32
    %c0_i32_1 = arith.constant 0 : i32
    %c0_i32_2 = arith.constant 0 : i32
    return %arg0, %1, %c0_i32_0, %c0_i32_1 : i32, i32, i32, i32
  }
  func.func @transform_7(%arg0: i32, %arg1: i32) -> (i32, i32, i32, i32) {
    %c2_i32 = arith.constant 2 : i32
    %0 = arith.muli %c2_i32, %arg1 : i32
    %c1_i32 = arith.constant 1 : i32
    %1 = arith.addi %0, %c1_i32 : i32
    %c0_i32 = arith.constant 0 : i32
    %c0_i32_0 = arith.constant 0 : i32
    %c0_i32_1 = arith.constant 0 : i32
    return %arg0, %1, %c0_i32, %c0_i32_0 : i32, i32, i32, i32
  }
  func.func @transform_8(%arg0: i32, %arg1: i32) -> (i32, i32, i32, i32) {
    %c2_i32 = arith.constant 2 : i32
    %0 = arith.muli %c2_i32, %arg1 : i32
    %c2_i32_0 = arith.constant 2 : i32
    %1 = arith.addi %0, %c2_i32_0 : i32
    %c0_i32 = arith.constant 0 : i32
    %c0_i32_1 = arith.constant 0 : i32
    %c0_i32_2 = arith.constant 0 : i32
    return %arg0, %1, %c0_i32, %c0_i32_1 : i32, i32, i32, i32
  }
  func.func @transform_9(%arg0: i32, %arg1: i32) -> (i32, i32, i32, i32) {
    %c0_i32 = arith.constant 0 : i32
    %c0_i32_0 = arith.constant 0 : i32
    %c0_i32_1 = arith.constant 0 : i32
    return %arg0, %arg1, %c0_i32, %c0_i32_0 : i32, i32, i32, i32
  }
}

module attributes {stable_mosaic.version = 11 : i64} {
  func.func @_conv_mm_relu_kernel(%arg0: i32, %arg1: i32, %arg2: memref<24x1792xbf16, #tpu.memory_space<vmem>>, %arg3: memref<1792x128xbf16, #tpu.memory_space<vmem>>, %arg4: memref<1x128xf32, #tpu.memory_space<vmem>>, %arg5: memref<24x128xf32, #tpu.memory_space<vmem>>) attributes {dimension_semantics = [#tpu.dimension_semantics<parallel>, #tpu.dimension_semantics<parallel>], iteration_bounds = array<i64: 1, 3>, scalar_prefetch = 0 : i64, scratch_operands = 0 : i64, tpu.core_type = #tpu.core_type<tc>, window_params = [{transform_indices = @transform_0, window_bounds = array<i64: 24, 1792>}, {transform_indices = @transform_1, window_bounds = array<i64: 1792, 128>}, {transform_indices = @transform_2, window_bounds = array<i64: 1, 128>}, {transform_indices = @transform_3, window_bounds = array<i64: 24, 128>}]} {
    %c0 = arith.constant 0 : index
    %c0_0 = arith.constant 0 : index
    %0 = vector.load %arg2[%c0, %c0_0] : memref<24x1792xbf16, #tpu.memory_space<vmem>>, vector<24x1792xbf16>
    %c0_1 = arith.constant 0 : index
    %c0_2 = arith.constant 0 : index
    %1 = vector.load %arg3[%c0_1, %c0_2] : memref<1792x128xbf16, #tpu.memory_space<vmem>>, vector<1792x128xbf16>
    %cst = arith.constant dense<0.000000e+00> : vector<24x128xf32>
    %2 = tpu.matmul %0, %1, %cst {dimension_numbers = #tpu.dot_dimension_numbers<[1], [0], [0], [1], [0, 0, 1, 1], [], []>} : vector<24x1792xbf16>, vector<1792x128xbf16>, vector<24x128xf32> -> vector<24x128xf32>
    %c0_3 = arith.constant 0 : index
    %c0_4 = arith.constant 0 : index
    %3 = vector.load %arg4[%c0_3, %c0_4] : memref<1x128xf32, #tpu.memory_space<vmem>>, vector<1x128xf32>
    %4 = vector.broadcast %3 : vector<1x128xf32> to vector<24x128xf32>
    %5 = arith.addf %2, %4 : vector<24x128xf32>
    %cst_5 = arith.constant 0.000000e+00 : f32
    %6 = vector.broadcast %cst_5 : f32 to vector<24x128xf32>
    %7 = arith.maximumf %5, %6 : vector<24x128xf32>
    %c0_6 = arith.constant 0 : index
    %c0_7 = arith.constant 0 : index
    %8 = vector.load %arg5[%c0_6, %c0_7] : memref<24x128xf32, #tpu.memory_space<vmem>>, vector<24x128xf32>
    tpu.vector_store %arg5[%c0_6, %c0_7], %7 {strides = array<i32>} : memref<24x128xf32, #tpu.memory_space<vmem>>, vector<24x128xf32>,
    return
  }
  func.func @transform_0(%arg0: i32, %arg1: i32) -> (i32, i32) {
    %c0_i32 = arith.constant 0 : i32
    %c0_i32_0 = arith.constant 0 : i32
    return %arg0, %c0_i32 : i32, i32
  }
  func.func @transform_1(%arg0: i32, %arg1: i32) -> (i32, i32) {
    %c0_i32 = arith.constant 0 : i32
    %c0_i32_0 = arith.constant 0 : i32
    return %c0_i32, %arg1 : i32, i32
  }
  func.func @transform_2(%arg0: i32, %arg1: i32) -> (i32, i32) {
    %c0_i32 = arith.constant 0 : i32
    %c0_i32_0 = arith.constant 0 : i32
    return %c0_i32, %arg1 : i32, i32
  }
  func.func @transform_3(%arg0: i32, %arg1: i32) -> (i32, i32) {
    %c0_i32 = arith.constant 0 : i32
    return %arg0, %arg1 : i32, i32
  }
}

module attributes {stable_mosaic.version = 11 : i64} {
  func.func @_conv_mm_relu_kernel(%arg0: i32, %arg1: i32, %arg2: memref<24x3456xbf16, #tpu.memory_space<vmem>>, %arg3: memref<3456x256xbf16, #tpu.memory_space<vmem>>, %arg4: memref<1x256xf32, #tpu.memory_space<vmem>>, %arg5: memref<24x256xf32, #tpu.memory_space<vmem>>) attributes {dimension_semantics = [#tpu.dimension_semantics<parallel>, #tpu.dimension_semantics<parallel>], iteration_bounds = array<i64: 1, 1>, scalar_prefetch = 0 : i64, scratch_operands = 0 : i64, tpu.core_type = #tpu.core_type<tc>, window_params = [{transform_indices = @transform_0, window_bounds = array<i64: 24, 3456>}, {transform_indices = @transform_1, window_bounds = array<i64: 3456, 256>}, {transform_indices = @transform_2, window_bounds = array<i64: 1, 256>}, {transform_indices = @transform_3, window_bounds = array<i64: 24, 256>}]} {
    %c0 = arith.constant 0 : index
    %c0_0 = arith.constant 0 : index
    %0 = vector.load %arg2[%c0, %c0_0] : memref<24x3456xbf16, #tpu.memory_space<vmem>>, vector<24x3456xbf16>
    %c0_1 = arith.constant 0 : index
    %c0_2 = arith.constant 0 : index
    %1 = vector.load %arg3[%c0_1, %c0_2] : memref<3456x256xbf16, #tpu.memory_space<vmem>>, vector<3456x256xbf16>
    %cst = arith.constant dense<0.000000e+00> : vector<24x256xf32>
    %2 = tpu.matmul %0, %1, %cst {dimension_numbers = #tpu.dot_dimension_numbers<[1], [0], [0], [1], [0, 0, 1, 1], [], []>} : vector<24x3456xbf16>, vector<3456x256xbf16>, vector<24x256xf32> -> vector<24x256xf32>
    %c0_3 = arith.constant 0 : index
    %c0_4 = arith.constant 0 : index
    %3 = vector.load %arg4[%c0_3, %c0_4] : memref<1x256xf32, #tpu.memory_space<vmem>>, vector<1x256xf32>
    %4 = vector.broadcast %3 : vector<1x256xf32> to vector<24x256xf32>
    %5 = arith.addf %2, %4 : vector<24x256xf32>
    %cst_5 = arith.constant 0.000000e+00 : f32
    %6 = vector.broadcast %cst_5 : f32 to vector<24x256xf32>
    %7 = arith.maximumf %5, %6 : vector<24x256xf32>
    %c0_6 = arith.constant 0 : index
    %c0_7 = arith.constant 0 : index
    %8 = vector.load %arg5[%c0_6, %c0_7] : memref<24x256xf32, #tpu.memory_space<vmem>>, vector<24x256xf32>
    tpu.vector_store %arg5[%c0_6, %c0_7], %7 {strides = array<i32>} : memref<24x256xf32, #tpu.memory_space<vmem>>, vector<24x256xf32>,
    return
  }
  func.func @transform_0(%arg0: i32, %arg1: i32) -> (i32, i32) {
    %c0_i32 = arith.constant 0 : i32
    %c0_i32_0 = arith.constant 0 : i32
    return %arg0, %c0_i32 : i32, i32
  }
  func.func @transform_1(%arg0: i32, %arg1: i32) -> (i32, i32) {
    %c0_i32 = arith.constant 0 : i32
    %c0_i32_0 = arith.constant 0 : i32
    return %c0_i32, %arg1 : i32, i32
  }
  func.func @transform_2(%arg0: i32, %arg1: i32) -> (i32, i32) {
    %c0_i32 = arith.constant 0 : i32
    %c0_i32_0 = arith.constant 0 : i32
    return %c0_i32, %arg1 : i32, i32
  }
  func.func @transform_3(%arg0: i32, %arg1: i32) -> (i32, i32) {
    %c0_i32 = arith.constant 0 : i32
    return %arg0, %arg1 : i32, i32
  }
}

module attributes {stable_mosaic.version = 11 : i64} {
  func.func @_conv_mm_relu_kernel(%arg0: i32, %arg1: i32, %arg2: memref<24x2304xbf16, #tpu.memory_space<vmem>>, %arg3: memref<2304x256xbf16, #tpu.memory_space<vmem>>, %arg4: memref<1x256xf32, #tpu.memory_space<vmem>>, %arg5: memref<24x256xf32, #tpu.memory_space<vmem>>) attributes {dimension_semantics = [#tpu.dimension_semantics<parallel>, #tpu.dimension_semantics<parallel>], iteration_bounds = array<i64: 1, 1>, scalar_prefetch = 0 : i64, scratch_operands = 0 : i64, tpu.core_type = #tpu.core_type<tc>, window_params = [{transform_indices = @transform_0, window_bounds = array<i64: 24, 2304>}, {transform_indices = @transform_1, window_bounds = array<i64: 2304, 256>}, {transform_indices = @transform_2, window_bounds = array<i64: 1, 256>}, {transform_indices = @transform_3, window_bounds = array<i64: 24, 256>}]} {
    %c0 = arith.constant 0 : index
    %c0_0 = arith.constant 0 : index
    %0 = vector.load %arg2[%c0, %c0_0] : memref<24x2304xbf16, #tpu.memory_space<vmem>>, vector<24x2304xbf16>
    %c0_1 = arith.constant 0 : index
    %c0_2 = arith.constant 0 : index
    %1 = vector.load %arg3[%c0_1, %c0_2] : memref<2304x256xbf16, #tpu.memory_space<vmem>>, vector<2304x256xbf16>
    %cst = arith.constant dense<0.000000e+00> : vector<24x256xf32>
    %2 = tpu.matmul %0, %1, %cst {dimension_numbers = #tpu.dot_dimension_numbers<[1], [0], [0], [1], [0, 0, 1, 1], [], []>} : vector<24x2304xbf16>, vector<2304x256xbf16>, vector<24x256xf32> -> vector<24x256xf32>
    %c0_3 = arith.constant 0 : index
    %c0_4 = arith.constant 0 : index
    %3 = vector.load %arg4[%c0_3, %c0_4] : memref<1x256xf32, #tpu.memory_space<vmem>>, vector<1x256xf32>
    %4 = vector.broadcast %3 : vector<1x256xf32> to vector<24x256xf32>
    %5 = arith.addf %2, %4 : vector<24x256xf32>
    %cst_5 = arith.constant 0.000000e+00 : f32
    %6 = vector.broadcast %cst_5 : f32 to vector<24x256xf32>
    %7 = arith.maximumf %5, %6 : vector<24x256xf32>
    %c0_6 = arith.constant 0 : index
    %c0_7 = arith.constant 0 : index
    %8 = vector.load %arg5[%c0_6, %c0_7] : memref<24x256xf32, #tpu.memory_space<vmem>>, vector<24x256xf32>
    tpu.vector_store %arg5[%c0_6, %c0_7], %7 {strides = array<i32>} : memref<24x256xf32, #tpu.memory_space<vmem>>, vector<24x256xf32>,
    return
  }
  func.func @transform_0(%arg0: i32, %arg1: i32) -> (i32, i32) {
    %c0_i32 = arith.constant 0 : i32
    %c0_i32_0 = arith.constant 0 : i32
    return %arg0, %c0_i32 : i32, i32
  }
  func.func @transform_1(%arg0: i32, %arg1: i32) -> (i32, i32) {
    %c0_i32 = arith.constant 0 : i32
    %c0_i32_0 = arith.constant 0 : i32
    return %c0_i32, %arg1 : i32, i32
  }
  func.func @transform_2(%arg0: i32, %arg1: i32) -> (i32, i32) {
    %c0_i32 = arith.constant 0 : i32
    %c0_i32_0 = arith.constant 0 : i32
    return %c0_i32, %arg1 : i32, i32
  }
  func.func @transform_3(%arg0: i32, %arg1: i32) -> (i32, i32) {
    %c0_i32 = arith.constant 0 : i32
    return %arg0, %arg1 : i32, i32
  }
}

</mosaic_0001>

<bundles_post_ra>
// kernel: alexnet_forward.7
= control target key start
LH: loop header
LB: loop body
LE: loop exit
PB: predicated region body
PF: predicated region fallthrough
CT: control target
= control target key end

     0   :  { %v1970_v0 = vmov 0   ;;  %v1971_v2 = vmov 0.0   ;;  %vm1972_vm0 = vmmov 0   ;;  %s2638_s1 = inlined_call_operand.vmem [shape: bf16[384,128], index: 1, kind: input, shape index: {}]   ;;  %s2639_s0 = inlined_call_operand.vmem [shape: bf16[456,384], index: 0, kind: input, shape index: {}]   ;;  %s2640_s2 = inlined_call_operand.vmem [shape: f32[1,128], index: 2, kind: input, shape index: {}]   ;;  %s2641_s3 = inlined_call_operand.vmem [shape: f32[456,128], index: 3, kind: output, shape index: {}]  }
   0x1   :  { %787 = vmatprep.subr.bf16.mxu1 %v1970_v0  ;;  %v1831_v1 = vld [vmem:[%s2638_s1] sm:$0xff]   ;;  %1582 = vmatprep.subr.bf16.mxu0 %v1971_v2  ;;  %v1832_v3 = vld [vmem:[%s2638_s1 + $0x8] sm:$0xff]   ;;  %v1833_v4 = vld [vmem:[%s2638_s1 + $0x10] sm:$0xff]  }
   0x2   :  { %1598 = vmatprep.mubr.msk.bf16.mxu0 %vm1972_vm0, %v1971_v2  ;;  %788 = vmatpush1.bf16.msra.mxu1 %v1831_v1  ;;  %v1839_v5 = vld [vmem:[%s2638_s1 + $0x80] sm:$0xff]   ;;  %v1834_v6 = vld [vmem:[%s2638_s1 + $0x18] sm:$0xff]   ;;  %v1841_v7 = vld [vmem:[%s2638_s1 + $0x88] sm:$0xff]  }
   0x3   :  { %789 = vmatprep.subr.bf16.mxu1 %v1970_v0  ;;  %1583 = vmatpush3.bf16.msra.mxu0 %v1839_v5  ;;  %v1835_v8 = vld [vmem:[%s2638_s1 + $0x20] sm:$0xff]   ;;  %v1843_v9 = vld [vmem:[%s2638_s1 + $0x90] sm:$0xff]   ;;  %v1836_v10 = vld [vmem:[%s2638_s1 + $0x28] sm:$0xff]  }
   0x4   :  { %1584 = vmatprep.subr.bf16.mxu0 %v1971_v2  ;;  %v1845_v11 = vld [vmem:[%s2638_s1 + $0x98] sm:$0xff]   ;;  %v1837_v12 = vld [vmem:[%s2638_s1 + $0x30] sm:$0xff]   ;;  %v1847_v13 = vld [vmem:[%s2638_s1 + $0xa0] sm:$0xff]  }
   0x5   :  { %v1838_v14 = vld [vmem:[%s2638_s1 + $0x38] sm:$0xff]   ;;  %v1857_v15 = vld [vmem:[%s2639_s0 + $0x4] ss:$12 sps:$4 sm:$0xff]   ;;  %v1849_v16 = vld [vmem:[%s2638_s1 + $0xa8] sm:$0xff]  }
   0x6   :  { %790 = vmatpush1.bf16.msra.mxu1 %v1832_v3  ;;  %819 = vmatprep.mubr.bf16.mxu1 %v1857_v15  ;;  %v1840_v17 = vld [vmem:[%s2638_s1 + $0x40] sm:$0xff]   ;;  %v1851_v18 = vld [vmem:[%s2638_s1 + $0xb0] sm:$0xff]   ;;  %v1842_v19 = vld [vmem:[%s2638_s1 + $0x48] sm:$0xff]  }
   0x7   :  { %791 = vmatprep.subr.bf16.mxu1 %v1970_v0  ;;  %1585 = vmatpush3.bf16.msra.mxu0 %v1841_v7  ;;  %v1853_v20 = vld [vmem:[%s2638_s1 + $0xb8] sm:$0xff]   ;;  %v1858_v21 = vld [vmem:[%s2639_s0 + $0x8] ss:$12 sps:$4 sm:$0xff]   ;;  %v1861_v24 = vld [vmem:[%s2639_s0 + $0x20] ss:$12 sps:$4 sm:$0xff]  }
   0x8   :  { %1586 = vmatprep.subr.bf16.mxu0 %v1971_v2  ;;  %v1844_v22 = vld [vmem:[%s2638_s1 + $0x50] sm:$0xff]   ;;  %v1846_v23 = vld [vmem:[%s2638_s1 + $0x58] sm:$0xff]   ;;  %v1848_v25 = vld [vmem:[%s2638_s1 + $0x60] sm:$0xff]  }
   0x9   :  { %v1850_v26 = vld [vmem:[%s2638_s1 + $0x68] sm:$0xff]   ;;  %v1865_v27 = vld [vmem:[%s2639_s0 + $0x38] ss:$12 sps:$4 sm:$0xff]   ;;  %v1852_v28 = vld [vmem:[%s2638_s1 + $0x70] sm:$0xff]  }
   0xa   :  { %792 = vmatpush1.bf16.msra.mxu1 %v1833_v4  ;;  %v1854_v29 = vld [vmem:[%s2638_s1 + $0x78] sm:$0xff]   ;;  %v1855_v30 = vld [vmem:[%s2639_s0] ss:$12 sps:$4 sm:$0xff]   ;;  %v1873_v34 = vld [vmem:[%s2639_s0 + $0x68] ss:$12 sps:$4 sm:$0xff]  }
   0xb   :  { %793 = vmatprep.subr.bf16.mxu1 %v1970_v0  ;;  %1587 = vmatpush3.bf16.msra.mxu0 %v1843_v9  ;;  %v1869_v31 = vld [vmem:[%s2639_s0 + $0x50] ss:$12 sps:$4 sm:$0xff]   ;;  %v1862_v33 = vld [vmem:[%s2639_s0 + $0x18] ss:$12 sps:$4 sm:$0xff]   ;;  %v1863_v35 = vld [vmem:[%s2639_s0 + $0x34] ss:$12 sps:$4 sm:$0xff]  }
   0xc   :  { %1588 = vmatprep.subr.bf16.mxu0 %v1971_v2  ;;  %v1859_v32 = vld [vmem:[%s2639_s0 + $0x1c] ss:$12 sps:$4 sm:$0xff]   ;;  %v1877_v37 = vld [vmem:[%s2639_s0 + $0x80] ss:$12 sps:$4 sm:$0xff]   ;;  %v1881_v40 = vld [vmem:[%s2639_s0 + $0x98] ss:$12 sps:$4 sm:$0xff]  }
   0xd   :  { %v1866_v36 = vld [vmem:[%s2639_s0 + $0x30] ss:$12 sps:$4 sm:$0xff]   ;;  %v1867_v38 = vld [vmem:[%s2639_s0 + $0x4c] ss:$12 sps:$4 sm:$0xff]   ;;  %v1870_v39 = vld [vmem:[%s2639_s0 + $0x48] ss:$12 sps:$4 sm:$0xff]  }
   0xe   :  { %794 = vmatpush1.bf16.msra.mxu1 %v1834_v6  ;;  %v1871_v41 = vld [vmem:[%s2639_s0 + $0x64] ss:$12 sps:$4 sm:$0xff]   ;;  %v1874_v42 = vld [vmem:[%s2639_s0 + $0x60] ss:$12 sps:$4 sm:$0xff]   ;;  %v1875_v44 = vld [vmem:[%s2639_s0 + $0x7c] ss:$12 sps:$4 sm:$0xff]  }
   0xf   :  { %795 = vmatprep.subr.bf16.mxu1 %v1970_v0  ;;  %1589 = vmatpush3.bf16.msra.mxu0 %v1845_v11  ;;  %v1885_v43 = vld [vmem:[%s2639_s0 + $0xb0] ss:$12 sps:$4 sm:$0xff]   ;;  %v1878_v45 = vld [vmem:[%s2639_s0 + $0x78] ss:$12 sps:$4 sm:$0xff]   ;;  %v1889_v46 = vld [vmem:[%s2639_s0 + $0xc8] ss:$12 sps:$4 sm:$0xff]  }
  0x10   :  { %1590 = vmatprep.subr.bf16.mxu0 %v1971_v2  ;;  %v1879_v47 = vld [vmem:[%s2639_s0 + $0x94] ss:$12 sps:$4 sm:$0xff]   ;;  %v1882_v48 = vld [vmem:[%s2639_s0 + $0x90] ss:$12 sps:$4 sm:$0xff]   ;;  %v1883_v50 = vld [vmem:[%s2639_s0 + $0xac] ss:$12 sps:$4 sm:$0xff]  }
  0x11   :  { %v1893_v49 = vld [vmem:[%s2639_s0 + $0xe0] ss:$12 sps:$4 sm:$0xff]   ;;  %v1886_v51 = vld [vmem:[%s2639_s0 + $0xa8] ss:$12 sps:$4 sm:$0xff]   ;;  %v1897_v52 = vld [vmem:[%s2639_s0 + $0xf8] ss:$12 sps:$4 sm:$0xff]  }
  0x12   :  { %796 = vmatpush1.bf16.msra.mxu1 %v1835_v8  ;;  %v1887_v53 = vld [vmem:[%s2639_s0 + $0xc4] ss:$12 sps:$4 sm:$0xff]   ;;  %v1890_v54 = vld [vmem:[%s2639_s0 + $0xc0] ss:$12 sps:$4 sm:$0xff]   ;;  %v1891_v56 = vld [vmem:[%s2639_s0 + $0xdc] ss:$12 sps:$4 sm:$0xff]  }
  0x13   :  { %797 = vmatprep.subr.bf16.mxu1 %v1970_v0  ;;  %1591 = vmatpush3.bf16.msra.mxu0 %v1847_v13  ;;  %v1901_v55 = vld [vmem:[%s2639_s0 + $0x110] ss:$12 sps:$4 sm:$0xff]   ;;  %v1894_v57 = vld [vmem:[%s2639_s0 + $0xd8] ss:$12 sps:$4 sm:$0xff]   ;;  %v1905_v58 = vld [vmem:[%s2639_s0 + $0x128] ss:$12 sps:$4 sm:$0xff]  }
  0x14   :  { %1592 = vmatprep.subr.bf16.mxu0 %v1971_v2  ;;  %v1895_v59 = vld [vmem:[%s2639_s0 + $0xf4] ss:$12 sps:$4 sm:$0xff]   ;;  %v1898_v60 = vld [vmem:[%s2639_s0 + $0xf0] ss:$12 sps:$4 sm:$0xff]   ;;  %v1899_v62 = vld [vmem:[%s2639_s0 + $0x10c] ss:$12 sps:$4 sm:$0xff]  }
  0x15   :  { %v1909_v61 = vld [vmem:[%s2639_s0 + $0x140] ss:$12 sps:$4 sm:$0xff]   ;;  %v1902_v63 = vld [vmem:[%s2639_s0 + $0x108] ss:$12 sps:$4 sm:$0xff]   ;;  %v1903_v1 = vld [vmem:[%s2639_s0 + $0x124] ss:$12 sps:$4 sm:$0xff]  }
  0x16   :  { %798 = vmatpush1.bf16.msra.mxu1 %v1836_v10  ;;  %v1906_v3 = vld [vmem:[%s2639_s0 + $0x120] ss:$12 sps:$4 sm:$0xff]   ;;  %v1917_v4 = vld [vmem:[%s2639_s0 + $0x170] ss:$12 sps:$4 sm:$0xff]   ;;  %v1910_v6 = vld [vmem:[%s2639_s0 + $0x138] ss:$12 sps:$4 sm:$0xff]  }
  0x17   :  { %799 = vmatprep.subr.bf16.mxu1 %v1970_v0  ;;  %1593 = vmatpush3.bf16.msra.mxu0 %v1849_v16  ;;  %v1907_v5 = vld [vmem:[%s2639_s0 + $0x13c] ss:$12 sps:$4 sm:$0xff]   ;;  %v1911_v8 = vld [vmem:[%s2639_s0 + $0x154] ss:$12 sps:$4 sm:$0xff]   ;;  %v1915_v11 = vld [vmem:[%s2639_s0 + $0x16c] ss:$12 sps:$4 sm:$0xff]  }
  0x18   :  { %1594 = vmatprep.subr.bf16.mxu0 %v1971_v2  ;;  %v1921_v7 = vld [vmem:[%s2639_s0 + $0x188] ss:$12 sps:$4 sm:$0xff]   ;;  %v1914_v9 = vld [vmem:[%s2639_s0 + $0x150] ss:$12 sps:$4 sm:$0xff]   ;;  %v1925_v10 = vld [vmem:[%s2639_s0 + $0x1a0] ss:$12 sps:$4 sm:$0xff]  }
  0x19   :  { %v1929_v13 = vld [vmem:[%s2639_s0 + $0x1b8] ss:$12 sps:$4 sm:$0xff]   ;;  %v1922_v15 = vld [vmem:[%s2639_s0 + $0x180] ss:$12 sps:$4 sm:$0xff]   ;;  %v1933_v16 = vld [vmem:[%s2639_s0 + $0x1d0] ss:$12 sps:$4 sm:$0xff]  }
  0x1a   :  { %800 = vmatpush1.bf16.msra.mxu1 %v1837_v12  ;;  %v1918_v12 = vld [vmem:[%s2639_s0 + $0x168] ss:$12 sps:$4 sm:$0xff]  }
  0x1b   :  { %801 = vmatprep.subr.bf16.mxu1 %v1970_v0  ;;  %1595 = vmatpush3.bf16.msra.mxu0 %v1851_v18  ;;  %v1926_v18 = vld [vmem:[%s2639_s0 + $0x198] ss:$12 sps:$4 sm:$0xff]  }
  0x1c   :  { %1596 = vmatprep.subr.bf16.mxu0 %v1971_v2 }
  0x1e   :  { %802 = vmatpush1.bf16.msra.mxu1 %v1838_v14  ;;  %v1919_v14 = vld [vmem:[%s2639_s0 + $0x184] ss:$12 sps:$4 sm:$0xff]  }
  0x1f   :  { %803 = vmatprep.subr.bf16.mxu1 %v1970_v0  ;;  %1597 = vmatpush3.bf16.msra.mxu0 %v1853_v20  ;;  %v1927_v20 = vld [vmem:[%s2639_s0 + $0x1b4] ss:$12 sps:$4 sm:$0xff]  }
  0x22   :  { %804 = vmatpush1.bf16.msra.mxu1 %v1840_v17  ;;  %1599 = vmatmul.mubr.bf16.vlgmr.msra.gmra.mrb[0].mxu0 %v1858_v21  ;;  %v1923_v17 = vld [vmem:[%s2639_s0 + $0x19c] ss:$12 sps:$4 sm:$0xff]  }
  0x23   :  { %805 = vmatprep.subr.bf16.mxu1 %v1970_v0  ;;  %1602 = vmatprep.mubr.msk.bf16.mxu0 %vm1972_vm0, %v1971_v2  ;;  %v1930_v21 = vld [vmem:[%s2639_s0 + $0x1b0] ss:$12 sps:$4 sm:$0xff]  }
  0x26   :  { %806 = vmatpush1.bf16.msra.mxu1 %v1842_v19  ;;  %v1937_v19 = vld [vmem:[%s2639_s0 + $0x1e8] ss:$12 sps:$4 sm:$0xff]  }
  0x27   :  { %807 = vmatprep.subr.bf16.mxu1 %v1970_v0 }
  0x2a   :  { %808 = vmatpush1.bf16.msra.mxu1 %v1844_v22  ;;  %1603 = vmatmul.mubr.bf16.gmra.mrb[4].mxu0 %v1861_v24  ;;  %v1941_v22 = vld [vmem:[%s2639_s0 + $0x200] ss:$12 sps:$4 sm:$0xff]   ;;  %v1934_v24 = vld [vmem:[%s2639_s0 + $0x1c8] ss:$12 sps:$4 sm:$0xff]  }
  0x2b   :  { %809 = vmatprep.subr.bf16.mxu1 %v1970_v0  ;;  %1606 = vmatprep.mubr.msk.bf16.mxu0 %vm1972_vm0, %v1971_v2 }
  0x2e   :  { %810 = vmatpush1.bf16.msra.mxu1 %v1846_v23  ;;  %v1931_v23 = vld [vmem:[%s2639_s0 + $0x1cc] ss:$12 sps:$4 sm:$0xff]  }
  0x2f   :  { %811 = vmatprep.subr.bf16.mxu1 %v1970_v0 }
  0x32   :  { %812 = vmatpush1.bf16.msra.mxu1 %v1848_v25  ;;  %1607 = vmatmul.mubr.bf16.gmra.mrb[8].mxu0 %v1865_v27  ;;  %v1945_v25 = vld [vmem:[%s2639_s0 + $0x218] ss:$12 sps:$4 sm:$0xff]   ;;  %v1938_v27 = vld [vmem:[%s2639_s0 + $0x1e0] ss:$12 sps:$4 sm:$0xff]  }
  0x33   :  { %813 = vmatprep.subr.bf16.mxu1 %v1970_v0  ;;  %1610 = vmatprep.mubr.msk.bf16.mxu0 %vm1972_vm0, %v1971_v2 }
  0x36   :  { %814 = vmatpush1.bf16.msra.mxu1 %v1850_v26  ;;  %v1935_v26 = vld [vmem:[%s2639_s0 + $0x1e4] ss:$12 sps:$4 sm:$0xff]  }
  0x37   :  { %815 = vmatprep.subr.bf16.mxu1 %v1970_v0 }
  0x3a   :  { %816 = vmatpush1.bf16.msra.mxu1 %v1852_v28  ;;  %1611 = vmatmul.mubr.bf16.gmra.mrb[12].mxu0 %v1869_v31  ;;  %v1949_v28 = vld [vmem:[%s2639_s0 + $0x230] ss:$12 sps:$4 sm:$0xff]   ;;  %v1953_v31 = vld [vmem:[%s2639_s0 + $0x248] ss:$12 sps:$4 sm:$0xff]  }
  0x3b   :  { %817 = vmatprep.subr.bf16.mxu1 %v1970_v0  ;;  %1614 = vmatprep.mubr.msk.bf16.mxu0 %vm1972_vm0, %v1971_v2  ;;  %v1913_v0 = vld [vmem:[%s2639_s0 + $0x158] ss:$12 sps:$4 sm:$0xff]  }
  0x3e   :  { %818 = vmatpush1.bf16.msra.mxu1 %v1854_v29  ;;  %v1939_v29 = vld [vmem:[%s2639_s0 + $0x1fc] ss:$12 sps:$4 sm:$0xff]  }
  0x41   :  { %820 = vmatmul.mubr.bf16.vlgmr.msra.gmra.mrb[0].mxu1 %v1855_v30  ;;  %v1942_v30 = vld [vmem:[%s2639_s0 + $0x1f8] ss:$12 sps:$4 sm:$0xff]  }
  0x42   :  { %827 = vmatprep.mubr.bf16.mxu1 %v1859_v32  ;;  %1615 = vmatmul.mubr.bf16.gmra.mrb[16].mxu0 %v1873_v34  ;;  %v1943_v32 = vld [vmem:[%s2639_s0 + $0x214] ss:$12 sps:$4 sm:$0xff]  }
  0x43   :  { %1618 = vmatprep.mubr.msk.bf16.mxu0 %vm1972_vm0, %v1971_v2  ;;  %v1957_v34 = vld [vmem:[%s2639_s0 + $0x260] ss:$12 sps:$4 sm:$0xff]  }
  0x49   :  { %828 = vmatmul.mubr.bf16.gmra.mrb[4].mxu1 %v1862_v33  ;;  %v1946_v33 = vld [vmem:[%s2639_s0 + $0x210] ss:$12 sps:$4 sm:$0xff]  }
  0x4a   :  { %835 = vmatprep.mubr.bf16.mxu1 %v1863_v35  ;;  %1619 = vmatmul.mubr.bf16.gmra.mrb[20].mxu0 %v1877_v37  ;;  %v1947_v35 = vld [vmem:[%s2639_s0 + $0x22c] ss:$12 sps:$4 sm:$0xff]  }
  0x4b   :  { %1622 = vmatprep.mubr.msk.bf16.mxu0 %vm1972_vm0, %v1971_v2  ;;  %v1961_v37 = vld [vmem:[%s2639_s0 + $0x278] ss:$12 sps:$4 sm:$0xff]  }
  0x51   :  { %836 = vmatmul.mubr.bf16.gmra.mrb[8].mxu1 %v1866_v36  ;;  %v1950_v36 = vld [vmem:[%s2639_s0 + $0x228] ss:$12 sps:$4 sm:$0xff]  }
  0x52   :  { %843 = vmatprep.mubr.bf16.mxu1 %v1867_v38  ;;  %1623 = vmatmul.mubr.bf16.gmra.mrb[24].mxu0 %v1881_v40  ;;  %v1951_v38 = vld [vmem:[%s2639_s0 + $0x244] ss:$12 sps:$4 sm:$0xff]   ;;  %v1954_v40 = vld [vmem:[%s2639_s0 + $0x240] ss:$12 sps:$4 sm:$0xff]  }
  0x53   :  { %1626 = vmatprep.mubr.msk.bf16.mxu0 %vm1972_vm0, %v1971_v2 }
  0x59   :  { %844 = vmatmul.mubr.bf16.gmra.mrb[12].mxu1 %v1870_v39 }
  0x5a   :  { %851 = vmatprep.mubr.bf16.mxu1 %v1871_v41  ;;  %1627 = vmatmul.mubr.bf16.gmra.mrb[28].mxu0 %v1885_v43  ;;  %v1955_v43 = vld [vmem:[%s2639_s0 + $0x25c] ss:$12 sps:$4 sm:$0xff]  }
  0x5b   :  { %1630 = vmatprep.mubr.msk.bf16.mxu0 %vm1972_vm0, %v1971_v2 }
  0x61   :  { %852 = vmatmul.mubr.bf16.gmra.mrb[16].mxu1 %v1874_v42  ;;  %v1965_v42 = vld [vmem:[%s2639_s0 + $0x290] ss:$12 sps:$4 sm:$0xff]  }
  0x62   :  { %859 = vmatprep.mubr.bf16.mxu1 %v1875_v44  ;;  %1631 = vmatmul.mubr.bf16.gmra.mrb[32].mxu0 %v1889_v46 }
  0x63   :  { %1634 = vmatprep.mubr.msk.bf16.mxu0 %vm1972_vm0, %v1971_v2 }
  0x69   :  { %860 = vmatmul.mubr.bf16.gmra.mrb[20].mxu1 %v1878_v45 }
  0x6a   :  { %867 = vmatprep.mubr.bf16.mxu1 %v1879_v47  ;;  %1635 = vmatmul.mubr.bf16.gmra.mrb[36].mxu0 %v1893_v49  ;;  %v1958_v47 = vld [vmem:[%s2639_s0 + $0x258] ss:$12 sps:$4 sm:$0xff]   ;;  %v1968_v49 = vld [vmem:[%s2639_s0 + $0x2a8] ss:$0 sps:$4 sm:$0xff]  }
  0x6b   :  { %1638 = vmatprep.mubr.msk.bf16.mxu0 %vm1972_vm0, %v1971_v2 }
  0x71   :  { %868 = vmatmul.mubr.bf16.gmra.mrb[24].mxu1 %v1882_v48 }
  0x72   :  { %875 = vmatprep.mubr.bf16.mxu1 %v1883_v50  ;;  %1639 = vmatmul.mubr.bf16.gmra.mrb[40].mxu0 %v1897_v52  ;;  %v1959_v50 = vld [vmem:[%s2639_s0 + $0x274] ss:$12 sps:$4 sm:$0xff]  }
  0x73   :  { %1642 = vmatprep.mubr.msk.bf16.mxu0 %vm1972_vm0, %v1971_v2 }
  0x79   :  { %876 = vmatmul.mubr.bf16.gmra.mrb[28].mxu1 %v1886_v51 }
  0x7a   :  { %883 = vmatprep.mubr.bf16.mxu1 %v1887_v53  ;;  %1643 = vmatmul.mubr.bf16.gmra.mrb[44].mxu0 %v1901_v55  ;;  %v1962_v53 = vld [vmem:[%s2639_s0 + $0x270] ss:$12 sps:$4 sm:$0xff]   ;;  %v1963_v55 = vld [vmem:[%s2639_s0 + $0x28c] ss:$12 sps:$4 sm:$0xff]  }
  0x7b   :  { %1646 = vmatprep.mubr.msk.bf16.mxu0 %vm1972_vm0, %v1971_v2 }
  0x81   :  { %884 = vmatmul.mubr.bf16.gmra.mrb[32].mxu1 %v1890_v54 }
  0x82   :  { %891 = vmatprep.mubr.bf16.mxu1 %v1891_v56  ;;  %1647 = vmatmul.mubr.bf16.gmra.mrb[48].mxu0 %v1905_v58  ;;  %v2402_v58 = vld [vmem:[%s2640_s2] ss:$0 sm:$0xff] }
  0x83   :  { %1650 = vmatprep.mubr.msk.bf16.mxu0 %vm1972_vm0, %v1971_v2 }
  0x89   :  { %892 = vmatmul.mubr.bf16.gmra.mrb[36].mxu1 %v1894_v57 }
  0x8a   :  { %899 = vmatprep.mubr.bf16.mxu1 %v1895_v59  ;;  %1651 = vmatmul.mubr.bf16.gmra.mrb[52].mxu0 %v1909_v61  ;;  %v127_v59 = vld [vmem:[%s2639_s0 + $0x2a0] sm:$0xff] }
  0x8b   :  { %1654 = vmatprep.mubr.msk.bf16.mxu0 %vm1972_vm0, %v1971_v2 }
  0x91   :  { %900 = vmatmul.mubr.bf16.gmra.mrb[40].mxu1 %v1898_v60 }
  0x92   :  { %907 = vmatprep.mubr.bf16.mxu1 %v1899_v62  ;;  %1655 = vmatmul.mubr.bf16.gmra.mrb[56].mxu0 %v1913_v0  ;;  %v1966_v0 = vld [vmem:[%s2639_s0 + $0x288] ss:$12 sps:$4 sm:$0xff]  }
  0x93   :  { %1658 = vmatprep.mubr.msk.bf16.mxu0 %vm1972_vm0, %v1971_v2 }
  0x99   :  { %908 = vmatmul.mubr.bf16.gmra.mrb[44].mxu1 %v1902_v63 }
  0x9a   :  { %915 = vmatprep.mubr.bf16.mxu1 %v1903_v1  ;;  %1659 = vmatmul.mubr.bf16.gmra.mrb[60].mxu0 %v1917_v4  ;;  %v1519_v4 = vcombine.high %v127_v59, %v127_v59 }
  0x9b   :  { %1662 = vmatprep.mubr.msk.bf16.mxu0 %vm1972_vm0, %v1971_v2 }
  0xa1   :  { %916 = vmatmul.mubr.bf16.gmra.mrb[48].mxu1 %v1906_v3 }
  0xa2   :  { %923 = vmatprep.mubr.bf16.mxu1 %v1907_v5  ;;  %1663 = vmatmul.mubr.bf16.gmra.mrb[64].mxu0 %v1921_v7 }
  0xa3   :  { %1666 = vmatprep.mubr.msk.bf16.mxu0 %vm1972_vm0, %v1971_v2 }
  0xa9   :  { %924 = vmatmul.mubr.bf16.gmra.mrb[52].mxu1 %v1910_v6 }
  0xaa   :  { %931 = vmatprep.mubr.bf16.mxu1 %v1911_v8  ;;  %1667 = vmatmul.mubr.bf16.gmra.mrb[68].mxu0 %v1925_v10 }
  0xab   :  { %1670 = vmatprep.mubr.msk.bf16.mxu0 %vm1972_vm0, %v1971_v2 }
  0xb1   :  { %932 = vmatmul.mubr.bf16.gmra.mrb[56].mxu1 %v1914_v9 }
  0xb2   :  { %939 = vmatprep.mubr.bf16.mxu1 %v1915_v11  ;;  %1671 = vmatmul.mubr.bf16.gmra.mrb[72].mxu0 %v1929_v13 }
  0xb3   :  { %1674 = vmatprep.mubr.msk.bf16.mxu0 %vm1972_vm0, %v1971_v2 }
  0xb9   :  { %940 = vmatmul.mubr.bf16.gmra.mrb[60].mxu1 %v1918_v12 }
  0xba   :  { %947 = vmatprep.mubr.bf16.mxu1 %v1919_v14  ;;  %1675 = vmatmul.mubr.bf16.gmra.mrb[76].mxu0 %v1933_v16 }
  0xbb   :  { %1678 = vmatprep.mubr.msk.bf16.mxu0 %vm1972_vm0, %v1971_v2 }
  0xc1   :  { %948 = vmatmul.mubr.bf16.gmra.mrb[64].mxu1 %v1922_v15 }
  0xc2   :  { %955 = vmatprep.mubr.bf16.mxu1 %v1923_v17  ;;  %1679 = vmatmul.mubr.bf16.gmra.mrb[80].mxu0 %v1937_v19  ;;  %v1518_v17 = vcombine.low %v127_v59, %v127_v59 }
  0xc3   :  { %1682 = vmatprep.mubr.msk.bf16.mxu0 %vm1972_vm0, %v1971_v2 }
  0xc9   :  { %956 = vmatmul.mubr.bf16.gmra.mrb[68].mxu1 %v1926_v18 }
  0xca   :  { %963 = vmatprep.mubr.bf16.mxu1 %v1927_v20  ;;  %1683 = vmatmul.mubr.bf16.gmra.mrb[84].mxu0 %v1941_v22 }
  0xcb   :  { %1686 = vmatprep.mubr.msk.bf16.mxu0 %vm1972_vm0, %v1971_v2 }
  0xd1   :  { %964 = vmatmul.mubr.bf16.gmra.mrb[72].mxu1 %v1930_v21 }
  0xd2   :  { %971 = vmatprep.mubr.bf16.mxu1 %v1931_v23  ;;  %1687 = vmatmul.mubr.bf16.gmra.mrb[88].mxu0 %v1945_v25 }
  0xd3   :  { %1690 = vmatprep.mubr.msk.bf16.mxu0 %vm1972_vm0, %v1971_v2 }
  0xd9   :  { %972 = vmatmul.mubr.bf16.gmra.mrb[76].mxu1 %v1934_v24 }
  0xda   :  { %979 = vmatprep.mubr.bf16.mxu1 %v1935_v26  ;;  %1691 = vmatmul.mubr.bf16.gmra.mrb[92].mxu0 %v1949_v28 }
  0xdb   :  { %1694 = vmatprep.mubr.msk.bf16.mxu0 %vm1972_vm0, %v1971_v2 }
  0xe1   :  { %980 = vmatmul.mubr.bf16.gmra.mrb[80].mxu1 %v1938_v27 }
  0xe2   :  { %987 = vmatprep.mubr.bf16.mxu1 %v1939_v29  ;;  %1695 = vmatmul.mubr.bf16.gmra.mrb[96].mxu0 %v1953_v31 }
  0xe3   :  { %1698 = vmatprep.mubr.msk.bf16.mxu0 %vm1972_vm0, %v1971_v2 }
  0xe9   :  { %988 = vmatmul.mubr.bf16.gmra.mrb[84].mxu1 %v1942_v30 }
  0xea   :  { %995 = vmatprep.mubr.bf16.mxu1 %v1943_v32  ;;  %1699 = vmatmul.mubr.bf16.gmra.mrb[100].mxu0 %v1957_v34 }
  0xeb   :  { %1702 = vmatprep.mubr.msk.bf16.mxu0 %vm1972_vm0, %v1971_v2 }
  0xf1   :  { %996 = vmatmul.mubr.bf16.gmra.mrb[88].mxu1 %v1946_v33 }
  0xf2   :  { %1003 = vmatprep.mubr.bf16.mxu1 %v1947_v35  ;;  %1703 = vmatmul.mubr.bf16.gmra.mrb[104].mxu0 %v1961_v37 }
  0xf3   :  { %1706 = vmatprep.mubr.msk.bf16.mxu0 %vm1972_vm0, %v1971_v2 }
  0xf5   :  { %v1085_v39 = vpop.f32.mrb[0].mxu0 }
  0xf6   :  { %v1600_v41 = vpop.f32.mrb[1].mxu0 }
  0xf7   :  { %v1088_v44 = vpop.f32.mrb[2].mxu0 }
  0xf8   :  { %v1601_v45 = vpop.f32.mrb[3].mxu0 }
  0xf9   :  { %1004 = vmatmul.mubr.bf16.gmra.mrb[92].mxu1 %v1950_v36 }
  0xfa   :  { %1011 = vmatprep.mubr.bf16.mxu1 %v1951_v38  ;;  %1707 = vmatmul.mubr.bf16.gmra.mrb[108].mxu0 %v1965_v42 }
  0xfb   :  { %1710 = vmatprep.mubr.msk.bf16.mxu0 %vm1972_vm0, %v1971_v2 }
  0xfd   :  { %v1093_v46 = vpop.f32.mrb[4].mxu0 }
  0xfe   :  { %v1604_v48 = vpop.f32.mrb[5].mxu0 }
  0xff   :  { %v1096_v51 = vpop.f32.mrb[6].mxu0 }
 0x100   :  { %v1605_v52 = vpop.f32.mrb[7].mxu0 }
 0x101   :  { %1012 = vmatmul.mubr.bf16.gmra.mrb[96].mxu1 %v1954_v40 }
 0x102   :  { %1019 = vmatprep.mubr.bf16.mxu1 %v1955_v43  ;;  %1711 = vmatmul.mubr.bf16.gmra.mrb[112].mxu0 %v1968_v49 }
 0x105   :  { %v1101_v2 = vpop.f32.mrb[8].mxu0 }
 0x106   :  { %v1608_v54 = vpop.f32.mrb[9].mxu0 }
 0x107   :  { %v1104_v56 = vpop.f32.mrb[10].mxu0 }
 0x108   :  { %v1609_v57 = vpop.f32.mrb[11].mxu0 }
 0x109   :  { %1020 = vmatmul.mubr.bf16.gmra.mrb[100].mxu1 %v1958_v47 }
 0x10a   :  { %1027 = vmatprep.mubr.bf16.mxu1 %v1959_v50 }
 0x10d   :  { %v1109_v61 = vpop.f32.mrb[12].mxu0 }
 0x10e   :  { %v1612_v1 = vpop.f32.mrb[13].mxu0 }
 0x10f   :  { %v1112_v5 = vpop.f32.mrb[14].mxu0 }
 0x110   :  { %v1613_v9 = vpop.f32.mrb[15].mxu0 }
 0x111   :  { %1028 = vmatmul.mubr.bf16.gmra.mrb[104].mxu1 %v1962_v53 }
 0x112   :  { %1035 = vmatprep.mubr.bf16.mxu1 %v1963_v55 }
 0x114   :  { %v821_v60 = vpop.f32.mrb[0].mxu1 }
 0x115   :  { %v822_v62 = vadd.f32 %v2402_v58, %v821_v60  ;;  %v823_v63 = vpop.f32.mrb[1].mxu1  ;;  %v1117_v14 = vpop.f32.mrb[16].mxu0 }
 0x116   :  { %v824_v3 = vpop.f32.mrb[2].mxu1  ;;  %v1616_v18 = vpop.f32.mrb[17].mxu0 }
 0x117   :  { %v1086_v6 = vadd.f32 %v1085_v39, %v822_v62  ;;  %v825_v7 = vadd.f32 %v2402_v58, %v824_v3  ;;  %v826_v8 = vpop.f32.mrb[3].mxu1  ;;  %v1120_v20 = vpop.f32.mrb[18].mxu0 }
 0x118   :  { %v1617_v24 = vpop.f32.mrb[19].mxu0 }
 0x119   :  { %v1315_v10 = vmax.f32 %v1086_v6, 0.0  ;;  %v1089_v11 = vadd.f32 %v1088_v44, %v825_v7  ;;  %1036 = vmatmul.mubr.bf16.gmra.mrb[108].mxu1 %v1966_v0 }
 0x11a   :  { %1043 = vmatprep.mubr.bf16.mxu1 %v1519_v4 }
 0x11b   :  { %1372 = vst [vmem:[%s2641_s3] sm:$0xff] %v1315_v10  ;;  %v1316_v12 = vmax.f32 %v1089_v11, 0.0 }
 0x11c   :  { %v829_v13 = vpop.f32.mrb[4].mxu1 }
 0x11d   :  { %1373 = vst [vmem:[%s2641_s3 + $0x8] sm:$0xff] %v1316_v12  ;;  %v830_v15 = vadd.f32 %v2402_v58, %v829_v13  ;;  %v831_v16 = vpop.f32.mrb[5].mxu1  ;;  %v1125_v29 = vpop.f32.mrb[20].mxu0 }
 0x11e   :  { %v832_v19 = vpop.f32.mrb[6].mxu1  ;;  %v1620_v32 = vpop.f32.mrb[21].mxu0 }
 0x11f   :  { %v1094_v21 = vadd.f32 %v1093_v46, %v830_v15  ;;  %v833_v22 = vadd.f32 %v2402_v58, %v832_v19  ;;  %v834_v23 = vpop.f32.mrb[7].mxu1  ;;  %v1128_v34 = vpop.f32.mrb[22].mxu0 }
 0x120   :  { %v1621_v38 = vpop.f32.mrb[23].mxu0 }
 0x121   :  { %v1317_v25 = vmax.f32 %v1094_v21, 0.0  ;;  %v1097_v26 = vadd.f32 %v1096_v51, %v833_v22  ;;  %1044 = vmatmul.mubr.bf16.gmra.mrb[112].mxu1 %v1518_v17 }
 0x123   :  { %1374 = vst [vmem:[%s2641_s3 + $0x10] sm:$0xff] %v1317_v25  ;;  %v1318_v27 = vmax.f32 %v1097_v26, 0.0 }
 0x124   :  { %v837_v28 = vpop.f32.mrb[8].mxu1 }
 0x125   :  { %1375 = vst [vmem:[%s2641_s3 + $0x18] sm:$0xff] %v1318_v27  ;;  %v838_v30 = vadd.f32 %v2402_v58, %v837_v28  ;;  %v839_v31 = vpop.f32.mrb[9].mxu1  ;;  %v1133_v43 = vpop.f32.mrb[24].mxu0 }
 0x126   :  { %v840_v33 = vpop.f32.mrb[10].mxu1  ;;  %v1624_v46 = vpop.f32.mrb[25].mxu0 }
 0x127   :  { %v1102_v35 = vadd.f32 %v1101_v2, %v838_v30  ;;  %v841_v36 = vadd.f32 %v2402_v58, %v840_v33  ;;  %v842_v37 = vpop.f32.mrb[11].mxu1  ;;  %v1136_v48 = vpop.f32.mrb[26].mxu0 }
 0x128   :  { %v1625_v52 = vpop.f32.mrb[27].mxu0 }
 0x129   :  { %v1319_v39 = vmax.f32 %v1102_v35, 0.0  ;;  %v1105_v40 = vadd.f32 %v1104_v56, %v841_v36 }
 0x12b   :  { %1376 = vst [vmem:[%s2641_s3 + $0x20] sm:$0xff] %v1319_v39  ;;  %v1320_v41 = vmax.f32 %v1105_v40, 0.0 }
 0x12c   :  { %v845_v42 = vpop.f32.mrb[12].mxu1 }
 0x12d   :  { %1377 = vst [vmem:[%s2641_s3 + $0x28] sm:$0xff] %v1320_v41  ;;  %v846_v44 = vadd.f32 %v2402_v58, %v845_v42  ;;  %v847_v45 = vpop.f32.mrb[13].mxu1  ;;  %v1141_v56 = vpop.f32.mrb[28].mxu0 }
 0x12e   :  { %v848_v47 = vpop.f32.mrb[14].mxu1  ;;  %v1628_v60 = vpop.f32.mrb[29].mxu0 }
 0x12f   :  { %v1110_v49 = vadd.f32 %v1109_v61, %v846_v44  ;;  %v849_v50 = vadd.f32 %v2402_v58, %v848_v47  ;;  %v850_v51 = vpop.f32.mrb[15].mxu1  ;;  %v1144_v62 = vpop.f32.mrb[30].mxu0 }
 0x130   :  { %v1629_v3 = vpop.f32.mrb[31].mxu0 }
 0x131   :  { %v1321_v2 = vmax.f32 %v1110_v49, 0.0  ;;  %v1113_v53 = vadd.f32 %v1112_v5, %v849_v50 }
 0x133   :  { %1378 = vst [vmem:[%s2641_s3 + $0x30] sm:$0xff] %v1321_v2  ;;  %v1322_v54 = vmax.f32 %v1113_v53, 0.0 }
 0x134   :  { %v853_v55 = vpop.f32.mrb[16].mxu1 }
 0x135   :  { %1379 = vst [vmem:[%s2641_s3 + $0x38] sm:$0xff] %v1322_v54  ;;  %v854_v57 = vadd.f32 %v2402_v58, %v853_v55  ;;  %v855_v59 = vpop.f32.mrb[17].mxu1  ;;  %v1149_v8 = vpop.f32.mrb[32].mxu0 }
 0x136   :  { %v856_v61 = vpop.f32.mrb[18].mxu1  ;;  %v1632_v11 = vpop.f32.mrb[33].mxu0 }
 0x137   :  { %v1118_v63 = vadd.f32 %v1117_v14, %v854_v57  ;;  %v857_v0 = vadd.f32 %v2402_v58, %v856_v61  ;;  %v858_v1 = vpop.f32.mrb[19].mxu1  ;;  %v1152_v13 = vpop.f32.mrb[34].mxu0 }
 0x138   :  { %v1633_v17 = vpop.f32.mrb[35].mxu0 }
 0x139   :  { %v1323_v4 = vmax.f32 %v1118_v63, 0.0  ;;  %v1121_v5 = vadd.f32 %v1120_v20, %v857_v0 }
 0x13b   :  { %1380 = vst [vmem:[%s2641_s3 + $0x40] sm:$0xff] %v1323_v4  ;;  %v1324_v6 = vmax.f32 %v1121_v5, 0.0 }
 0x13c   :  { %v861_v7 = vpop.f32.mrb[20].mxu1 }
 0x13d   :  { %1381 = vst [vmem:[%s2641_s3 + $0x48] sm:$0xff] %v1324_v6  ;;  %v862_v9 = vadd.f32 %v2402_v58, %v861_v7  ;;  %v863_v10 = vpop.f32.mrb[21].mxu1  ;;  %v1157_v22 = vpop.f32.mrb[36].mxu0 }
 0x13e   :  { %v864_v12 = vpop.f32.mrb[22].mxu1  ;;  %v1636_v25 = vpop.f32.mrb[37].mxu0 }
 0x13f   :  { %v1126_v14 = vadd.f32 %v1125_v29, %v862_v9  ;;  %v865_v15 = vadd.f32 %v2402_v58, %v864_v12  ;;  %v866_v16 = vpop.f32.mrb[23].mxu1  ;;  %v1160_v27 = vpop.f32.mrb[38].mxu0 }
 0x140   :  { %v1637_v31 = vpop.f32.mrb[39].mxu0 }
 0x141   :  { %v1325_v18 = vmax.f32 %v1126_v14, 0.0  ;;  %v1129_v19 = vadd.f32 %v1128_v34, %v865_v15 }
 0x143   :  { %1382 = vst [vmem:[%s2641_s3 + $0x50] sm:$0xff] %v1325_v18  ;;  %v1326_v20 = vmax.f32 %v1129_v19, 0.0 }
 0x144   :  { %v869_v21 = vpop.f32.mrb[24].mxu1 }
 0x145   :  { %1383 = vst [vmem:[%s2641_s3 + $0x58] sm:$0xff] %v1326_v20  ;;  %v870_v23 = vadd.f32 %v2402_v58, %v869_v21  ;;  %v871_v24 = vpop.f32.mrb[25].mxu1  ;;  %v1165_v36 = vpop.f32.mrb[40].mxu0 }
 0x146   :  { %v872_v26 = vpop.f32.mrb[26].mxu1  ;;  %v1640_v39 = vpop.f32.mrb[41].mxu0 }
 0x147   :  { %v1134_v28 = vadd.f32 %v1133_v43, %v870_v23  ;;  %v873_v29 = vadd.f32 %v2402_v58, %v872_v26  ;;  %v874_v30 = vpop.f32.mrb[27].mxu1  ;;  %v1168_v41 = vpop.f32.mrb[42].mxu0 }
 0x148   :  { %v1641_v45 = vpop.f32.mrb[43].mxu0 }
 0x149   :  { %v1327_v32 = vmax.f32 %v1134_v28, 0.0  ;;  %v1137_v33 = vadd.f32 %v1136_v48, %v873_v29 }
 0x14b   :  { %1384 = vst [vmem:[%s2641_s3 + $0x60] sm:$0xff] %v1327_v32  ;;  %v1328_v34 = vmax.f32 %v1137_v33, 0.0 }
 0x14c   :  { %v877_v35 = vpop.f32.mrb[28].mxu1 }
 0x14d   :  { %1385 = vst [vmem:[%s2641_s3 + $0x68] sm:$0xff] %v1328_v34  ;;  %v878_v37 = vadd.f32 %v2402_v58, %v877_v35  ;;  %v879_v38 = vpop.f32.mrb[29].mxu1  ;;  %v1173_v50 = vpop.f32.mrb[44].mxu0 }
 0x14e   :  { %v880_v40 = vpop.f32.mrb[30].mxu1  ;;  %v1644_v2 = vpop.f32.mrb[45].mxu0 }
 0x14f   :  { %v1142_v42 = vadd.f32 %v1141_v56, %v878_v37  ;;  %v881_v43 = vadd.f32 %v2402_v58, %v880_v40  ;;  %v882_v44 = vpop.f32.mrb[31].mxu1  ;;  %v1176_v54 = vpop.f32.mrb[46].mxu0 }
 0x150   :  { %v1645_v59 = vpop.f32.mrb[47].mxu0 }
 0x151   :  { %v1329_v46 = vmax.f32 %v1142_v42, 0.0  ;;  %v1145_v47 = vadd.f32 %v1144_v62, %v881_v43 }
 0x153   :  { %1386 = vst [vmem:[%s2641_s3 + $0x70] sm:$0xff] %v1329_v46  ;;  %v1330_v48 = vmax.f32 %v1145_v47, 0.0 }
 0x154   :  { %v885_v49 = vpop.f32.mrb[32].mxu1 }
 0x155   :  { %1387 = vst [vmem:[%s2641_s3 + $0x78] sm:$0xff] %v1330_v48  ;;  %v886_v51 = vadd.f32 %v2402_v58, %v885_v49  ;;  %v887_v52 = vpop.f32.mrb[33].mxu1  ;;  %v1181_v0 = vpop.f32.mrb[48].mxu0 }
 0x156   :  { %v888_v53 = vpop.f32.mrb[34].mxu1  ;;  %v1648_v4 = vpop.f32.mrb[49].mxu0 }
 0x157   :  { %v1150_v55 = vadd.f32 %v1149_v8, %v886_v51  ;;  %v889_v56 = vadd.f32 %v2402_v58, %v888_v53  ;;  %v890_v57 = vpop.f32.mrb[35].mxu1  ;;  %v1184_v6 = vpop.f32.mrb[50].mxu0 }
 0x158   :  { %v1649_v10 = vpop.f32.mrb[51].mxu0 }
 0x159   :  { %v1331_v60 = vmax.f32 %v1150_v55, 0.0  ;;  %v1153_v61 = vadd.f32 %v1152_v13, %v889_v56 }
 0x15b   :  { %1388 = vst [vmem:[%s2641_s3 + $0x80] sm:$0xff] %v1331_v60  ;;  %v1332_v62 = vmax.f32 %v1153_v61, 0.0 }
 0x15c   :  { %v893_v63 = vpop.f32.mrb[36].mxu1 }
 0x15d   :  { %1389 = vst [vmem:[%s2641_s3 + $0x88] sm:$0xff] %v1332_v62  ;;  %v894_v1 = vadd.f32 %v2402_v58, %v893_v63  ;;  %v895_v3 = vpop.f32.mrb[37].mxu1  ;;  %v1189_v15 = vpop.f32.mrb[52].mxu0 }
 0x15e   :  { %v896_v5 = vpop.f32.mrb[38].mxu1  ;;  %v1652_v18 = vpop.f32.mrb[53].mxu0 }
 0x15f   :  { %v1158_v7 = vadd.f32 %v1157_v22, %v894_v1  ;;  %v897_v8 = vadd.f32 %v2402_v58, %v896_v5  ;;  %v898_v9 = vpop.f32.mrb[39].mxu1  ;;  %v1192_v20 = vpop.f32.mrb[54].mxu0 }
 0x160   :  { %v1653_v24 = vpop.f32.mrb[55].mxu0 }
 0x161   :  { %v1333_v11 = vmax.f32 %v1158_v7, 0.0  ;;  %v1161_v12 = vadd.f32 %v1160_v27, %v897_v8 }
 0x163   :  { %1390 = vst [vmem:[%s2641_s3 + $0x90] sm:$0xff] %v1333_v11  ;;  %v1334_v13 = vmax.f32 %v1161_v12, 0.0 }
 0x164   :  { %v901_v14 = vpop.f32.mrb[40].mxu1 }
 0x165   :  { %1391 = vst [vmem:[%s2641_s3 + $0x98] sm:$0xff] %v1334_v13  ;;  %v902_v16 = vadd.f32 %v2402_v58, %v901_v14  ;;  %v903_v17 = vpop.f32.mrb[41].mxu1  ;;  %v1197_v29 = vpop.f32.mrb[56].mxu0 }
 0x166   :  { %v904_v19 = vpop.f32.mrb[42].mxu1  ;;  %v1656_v32 = vpop.f32.mrb[57].mxu0 }
 0x167   :  { %v1166_v21 = vadd.f32 %v1165_v36, %v902_v16  ;;  %v905_v22 = vadd.f32 %v2402_v58, %v904_v19  ;;  %v906_v23 = vpop.f32.mrb[43].mxu1  ;;  %v1200_v34 = vpop.f32.mrb[58].mxu0 }
 0x168   :  { %v1657_v38 = vpop.f32.mrb[59].mxu0 }
 0x169   :  { %v1335_v25 = vmax.f32 %v1166_v21, 0.0  ;;  %v1169_v26 = vadd.f32 %v1168_v41, %v905_v22 }
 0x16b   :  { %1392 = vst [vmem:[%s2641_s3 + $0xa0] sm:$0xff] %v1335_v25  ;;  %v1336_v27 = vmax.f32 %v1169_v26, 0.0 }
 0x16c   :  { %v909_v28 = vpop.f32.mrb[44].mxu1 }
 0x16d   :  { %1393 = vst [vmem:[%s2641_s3 + $0xa8] sm:$0xff] %v1336_v27  ;;  %v910_v30 = vadd.f32 %v2402_v58, %v909_v28  ;;  %v911_v31 = vpop.f32.mrb[45].mxu1  ;;  %v1205_v43 = vpop.f32.mrb[60].mxu0 }
 0x16e   :  { %v912_v33 = vpop.f32.mrb[46].mxu1  ;;  %v1660_v46 = vpop.f32.mrb[61].mxu0 }
 0x16f   :  { %v1174_v35 = vadd.f32 %v1173_v50, %v910_v30  ;;  %v913_v36 = vadd.f32 %v2402_v58, %v912_v33  ;;  %v914_v37 = vpop.f32.mrb[47].mxu1  ;;  %v1208_v48 = vpop.f32.mrb[62].mxu0 }
 0x170   :  { %v1661_v52 = vpop.f32.mrb[63].mxu0 }
 0x171   :  { %v1337_v39 = vmax.f32 %v1174_v35, 0.0  ;;  %v1177_v40 = vadd.f32 %v1176_v54, %v913_v36 }
 0x173   :  { %1394 = vst [vmem:[%s2641_s3 + $0xb0] sm:$0xff] %v1337_v39  ;;  %v1338_v41 = vmax.f32 %v1177_v40, 0.0 }
 0x174   :  { %v917_v42 = vpop.f32.mrb[48].mxu1 }
 0x175   :  { %1395 = vst [vmem:[%s2641_s3 + $0xb8] sm:$0xff] %v1338_v41  ;;  %v918_v44 = vadd.f32 %v2402_v58, %v917_v42  ;;  %v919_v45 = vpop.f32.mrb[49].mxu1  ;;  %v1213_v56 = vpop.f32.mrb[64].mxu0 }
 0x176   :  { %v920_v47 = vpop.f32.mrb[50].mxu1  ;;  %v1664_v60 = vpop.f32.mrb[65].mxu0 }
 0x177   :  { %v1182_v49 = vadd.f32 %v1181_v0, %v918_v44  ;;  %v921_v50 = vadd.f32 %v2402_v58, %v920_v47  ;;  %v922_v51 = vpop.f32.mrb[51].mxu1  ;;  %v1216_v62 = vpop.f32.mrb[66].mxu0 }
 0x178   :  { %v1665_v3 = vpop.f32.mrb[67].mxu0 }
 0x179   :  { %v1339_v2 = vmax.f32 %v1182_v49, 0.0  ;;  %v1185_v53 = vadd.f32 %v1184_v6, %v921_v50 }
 0x17b   :  { %1396 = vst [vmem:[%s2641_s3 + $0xc0] sm:$0xff] %v1339_v2  ;;  %v1340_v54 = vmax.f32 %v1185_v53, 0.0 }
 0x17c   :  { %v925_v55 = vpop.f32.mrb[52].mxu1 }
 0x17d   :  { %1397 = vst [vmem:[%s2641_s3 + $0xc8] sm:$0xff] %v1340_v54  ;;  %v926_v57 = vadd.f32 %v2402_v58, %v925_v55  ;;  %v927_v59 = vpop.f32.mrb[53].mxu1  ;;  %v1221_v8 = vpop.f32.mrb[68].mxu0 }
 0x17e   :  { %v928_v61 = vpop.f32.mrb[54].mxu1  ;;  %v1668_v11 = vpop.f32.mrb[69].mxu0 }
 0x17f   :  { %v1190_v63 = vadd.f32 %v1189_v15, %v926_v57  ;;  %v929_v0 = vadd.f32 %v2402_v58, %v928_v61  ;;  %v930_v1 = vpop.f32.mrb[55].mxu1  ;;  %v1224_v13 = vpop.f32.mrb[70].mxu0 }
 0x180   :  { %v1669_v17 = vpop.f32.mrb[71].mxu0 }
 0x181   :  { %v1341_v4 = vmax.f32 %v1190_v63, 0.0  ;;  %v1193_v5 = vadd.f32 %v1192_v20, %v929_v0 }
 0x183   :  { %1398 = vst [vmem:[%s2641_s3 + $0xd0] sm:$0xff] %v1341_v4  ;;  %v1342_v6 = vmax.f32 %v1193_v5, 0.0 }
 0x184   :  { %v933_v7 = vpop.f32.mrb[56].mxu1 }
 0x185   :  { %1399 = vst [vmem:[%s2641_s3 + $0xd8] sm:$0xff] %v1342_v6  ;;  %v934_v9 = vadd.f32 %v2402_v58, %v933_v7  ;;  %v935_v10 = vpop.f32.mrb[57].mxu1  ;;  %v1229_v22 = vpop.f32.mrb[72].mxu0 }
 0x186   :  { %v936_v12 = vpop.f32.mrb[58].mxu1  ;;  %v1672_v25 = vpop.f32.mrb[73].mxu0 }
 0x187   :  { %v1198_v14 = vadd.f32 %v1197_v29, %v934_v9  ;;  %v937_v15 = vadd.f32 %v2402_v58, %v936_v12  ;;  %v938_v16 = vpop.f32.mrb[59].mxu1  ;;  %v1232_v27 = vpop.f32.mrb[74].mxu0 }
 0x188   :  { %v1673_v31 = vpop.f32.mrb[75].mxu0 }
 0x189   :  { %v1343_v18 = vmax.f32 %v1198_v14, 0.0  ;;  %v1201_v19 = vadd.f32 %v1200_v34, %v937_v15 }
 0x18b   :  { %1400 = vst [vmem:[%s2641_s3 + $0xe0] sm:$0xff] %v1343_v18  ;;  %v1344_v20 = vmax.f32 %v1201_v19, 0.0 }
 0x18c   :  { %v941_v21 = vpop.f32.mrb[60].mxu1 }
 0x18d   :  { %1401 = vst [vmem:[%s2641_s3 + $0xe8] sm:$0xff] %v1344_v20  ;;  %v942_v23 = vadd.f32 %v2402_v58, %v941_v21  ;;  %v943_v24 = vpop.f32.mrb[61].mxu1  ;;  %v1237_v36 = vpop.f32.mrb[76].mxu0 }
 0x18e   :  { %v944_v26 = vpop.f32.mrb[62].mxu1  ;;  %v1676_v39 = vpop.f32.mrb[77].mxu0 }
 0x18f   :  { %v1206_v28 = vadd.f32 %v1205_v43, %v942_v23  ;;  %v945_v29 = vadd.f32 %v2402_v58, %v944_v26  ;;  %v946_v30 = vpop.f32.mrb[63].mxu1  ;;  %v1240_v41 = vpop.f32.mrb[78].mxu0 }
 0x190   :  { %v1677_v45 = vpop.f32.mrb[79].mxu0 }
 0x191   :  { %v1345_v32 = vmax.f32 %v1206_v28, 0.0  ;;  %v1209_v33 = vadd.f32 %v1208_v48, %v945_v29 }
 0x193   :  { %1402 = vst [vmem:[%s2641_s3 + $0xf0] sm:$0xff] %v1345_v32  ;;  %v1346_v34 = vmax.f32 %v1209_v33, 0.0 }
 0x194   :  { %v949_v35 = vpop.f32.mrb[64].mxu1 }
 0x195   :  { %1403 = vst [vmem:[%s2641_s3 + $0xf8] sm:$0xff] %v1346_v34  ;;  %v950_v37 = vadd.f32 %v2402_v58, %v949_v35  ;;  %v951_v38 = vpop.f32.mrb[65].mxu1  ;;  %v1245_v50 = vpop.f32.mrb[80].mxu0 }
 0x196   :  { %v952_v40 = vpop.f32.mrb[66].mxu1  ;;  %v1680_v2 = vpop.f32.mrb[81].mxu0 }
 0x197   :  { %v1214_v42 = vadd.f32 %v1213_v56, %v950_v37  ;;  %v953_v43 = vadd.f32 %v2402_v58, %v952_v40  ;;  %v954_v44 = vpop.f32.mrb[67].mxu1  ;;  %v1248_v54 = vpop.f32.mrb[82].mxu0 }
 0x198   :  { %v1681_v59 = vpop.f32.mrb[83].mxu0 }
 0x199   :  { %v1347_v46 = vmax.f32 %v1214_v42, 0.0  ;;  %v1217_v47 = vadd.f32 %v1216_v62, %v953_v43 }
 0x19b   :  { %1404 = vst [vmem:[%s2641_s3 + $0x100] sm:$0xff] %v1347_v46  ;;  %v1348_v48 = vmax.f32 %v1217_v47, 0.0 }
 0x19c   :  { %v957_v49 = vpop.f32.mrb[68].mxu1 }
 0x19d   :  { %1405 = vst [vmem:[%s2641_s3 + $0x108] sm:$0xff] %v1348_v48  ;;  %v958_v51 = vadd.f32 %v2402_v58, %v957_v49  ;;  %v959_v52 = vpop.f32.mrb[69].mxu1  ;;  %v1253_v0 = vpop.f32.mrb[84].mxu0 }
 0x19e   :  { %v960_v53 = vpop.f32.mrb[70].mxu1  ;;  %v1684_v4 = vpop.f32.mrb[85].mxu0 }
 0x19f   :  { %v1222_v55 = vadd.f32 %v1221_v8, %v958_v51  ;;  %v961_v56 = vadd.f32 %v2402_v58, %v960_v53  ;;  %v962_v57 = vpop.f32.mrb[71].mxu1  ;;  %v1256_v6 = vpop.f32.mrb[86].mxu0 }
 0x1a0   :  { %v1685_v10 = vpop.f32.mrb[87].mxu0 }
 0x1a1   :  { %v1349_v60 = vmax.f32 %v1222_v55, 0.0  ;;  %v1225_v61 = vadd.f32 %v1224_v13, %v961_v56 }
 0x1a3   :  { %1406 = vst [vmem:[%s2641_s3 + $0x110] sm:$0xff] %v1349_v60  ;;  %v1350_v62 = vmax.f32 %v1225_v61, 0.0 }
 0x1a4   :  { %v965_v63 = vpop.f32.mrb[72].mxu1 }
 0x1a5   :  { %1407 = vst [vmem:[%s2641_s3 + $0x118] sm:$0xff] %v1350_v62  ;;  %v966_v1 = vadd.f32 %v2402_v58, %v965_v63  ;;  %v967_v3 = vpop.f32.mrb[73].mxu1  ;;  %v1261_v15 = vpop.f32.mrb[88].mxu0 }
 0x1a6   :  { %v968_v5 = vpop.f32.mrb[74].mxu1  ;;  %v1688_v18 = vpop.f32.mrb[89].mxu0 }
 0x1a7   :  { %v1230_v7 = vadd.f32 %v1229_v22, %v966_v1  ;;  %v969_v8 = vadd.f32 %v2402_v58, %v968_v5  ;;  %v970_v9 = vpop.f32.mrb[75].mxu1  ;;  %v1264_v20 = vpop.f32.mrb[90].mxu0 }
 0x1a8   :  { %v1689_v24 = vpop.f32.mrb[91].mxu0 }
 0x1a9   :  { %v1351_v11 = vmax.f32 %v1230_v7, 0.0  ;;  %v1233_v12 = vadd.f32 %v1232_v27, %v969_v8 }
 0x1ab   :  { %1408 = vst [vmem:[%s2641_s3 + $0x120] sm:$0xff] %v1351_v11  ;;  %v1352_v13 = vmax.f32 %v1233_v12, 0.0 }
 0x1ac   :  { %v973_v14 = vpop.f32.mrb[76].mxu1 }
 0x1ad   :  { %1409 = vst [vmem:[%s2641_s3 + $0x128] sm:$0xff] %v1352_v13  ;;  %v974_v16 = vadd.f32 %v2402_v58, %v973_v14  ;;  %v975_v17 = vpop.f32.mrb[77].mxu1  ;;  %v1269_v29 = vpop.f32.mrb[92].mxu0 }
 0x1ae   :  { %v976_v19 = vpop.f32.mrb[78].mxu1  ;;  %v1692_v32 = vpop.f32.mrb[93].mxu0 }
 0x1af   :  { %v1238_v21 = vadd.f32 %v1237_v36, %v974_v16  ;;  %v977_v22 = vadd.f32 %v2402_v58, %v976_v19  ;;  %v978_v23 = vpop.f32.mrb[79].mxu1  ;;  %v1272_v34 = vpop.f32.mrb[94].mxu0 }
 0x1b0   :  { %v1693_v38 = vpop.f32.mrb[95].mxu0 }
 0x1b1   :  { %v1353_v25 = vmax.f32 %v1238_v21, 0.0  ;;  %v1241_v26 = vadd.f32 %v1240_v41, %v977_v22 }
 0x1b3   :  { %1410 = vst [vmem:[%s2641_s3 + $0x130] sm:$0xff] %v1353_v25  ;;  %v1354_v27 = vmax.f32 %v1241_v26, 0.0 }
 0x1b4   :  { %v981_v28 = vpop.f32.mrb[80].mxu1 }
 0x1b5   :  { %1411 = vst [vmem:[%s2641_s3 + $0x138] sm:$0xff] %v1354_v27  ;;  %v982_v30 = vadd.f32 %v2402_v58, %v981_v28  ;;  %v983_v31 = vpop.f32.mrb[81].mxu1  ;;  %v1277_v43 = vpop.f32.mrb[96].mxu0 }
 0x1b6   :  { %v984_v33 = vpop.f32.mrb[82].mxu1  ;;  %v1696_v46 = vpop.f32.mrb[97].mxu0 }
 0x1b7   :  { %v1246_v35 = vadd.f32 %v1245_v50, %v982_v30  ;;  %v985_v36 = vadd.f32 %v2402_v58, %v984_v33  ;;  %v986_v37 = vpop.f32.mrb[83].mxu1  ;;  %v1280_v48 = vpop.f32.mrb[98].mxu0 }
 0x1b8   :  { %v1697_v52 = vpop.f32.mrb[99].mxu0 }
 0x1b9   :  { %v1355_v39 = vmax.f32 %v1246_v35, 0.0  ;;  %v1249_v40 = vadd.f32 %v1248_v54, %v985_v36 }
 0x1bb   :  { %1412 = vst [vmem:[%s2641_s3 + $0x140] sm:$0xff] %v1355_v39  ;;  %v1356_v41 = vmax.f32 %v1249_v40, 0.0 }
 0x1bc   :  { %v989_v42 = vpop.f32.mrb[84].mxu1 }
 0x1bd   :  { %1413 = vst [vmem:[%s2641_s3 + $0x148] sm:$0xff] %v1356_v41  ;;  %v990_v44 = vadd.f32 %v2402_v58, %v989_v42  ;;  %v991_v45 = vpop.f32.mrb[85].mxu1  ;;  %v1285_v56 = vpop.f32.mrb[100].mxu0 }
 0x1be   :  { %v992_v47 = vpop.f32.mrb[86].mxu1  ;;  %v1700_v60 = vpop.f32.mrb[101].mxu0 }
 0x1bf   :  { %v1254_v49 = vadd.f32 %v1253_v0, %v990_v44  ;;  %v993_v50 = vadd.f32 %v2402_v58, %v992_v47  ;;  %v994_v51 = vpop.f32.mrb[87].mxu1  ;;  %v1288_v62 = vpop.f32.mrb[102].mxu0 }
 0x1c0   :  { %v1701_v3 = vpop.f32.mrb[103].mxu0 }
 0x1c1   :  { %v1357_v2 = vmax.f32 %v1254_v49, 0.0  ;;  %v1257_v53 = vadd.f32 %v1256_v6, %v993_v50 }
 0x1c3   :  { %1414 = vst [vmem:[%s2641_s3 + $0x150] sm:$0xff] %v1357_v2  ;;  %v1358_v54 = vmax.f32 %v1257_v53, 0.0 }
 0x1c4   :  { %v997_v55 = vpop.f32.mrb[88].mxu1 }
 0x1c5   :  { %1415 = vst [vmem:[%s2641_s3 + $0x158] sm:$0xff] %v1358_v54  ;;  %v998_v57 = vadd.f32 %v2402_v58, %v997_v55  ;;  %v999_v59 = vpop.f32.mrb[89].mxu1  ;;  %v1293_v8 = vpop.f32.mrb[104].mxu0 }
 0x1c6   :  { %v1000_v61 = vpop.f32.mrb[90].mxu1  ;;  %v1704_v11 = vpop.f32.mrb[105].mxu0 }
 0x1c7   :  { %v1262_v63 = vadd.f32 %v1261_v15, %v998_v57  ;;  %v1001_v0 = vadd.f32 %v2402_v58, %v1000_v61  ;;  %v1002_v1 = vpop.f32.mrb[91].mxu1  ;;  %v1296_v13 = vpop.f32.mrb[106].mxu0 }
 0x1c8   :  { %v1705_v17 = vpop.f32.mrb[107].mxu0 }
 0x1c9   :  { %v1359_v4 = vmax.f32 %v1262_v63, 0.0  ;;  %v1265_v5 = vadd.f32 %v1264_v20, %v1001_v0 }
 0x1cb   :  { %1416 = vst [vmem:[%s2641_s3 + $0x160] sm:$0xff] %v1359_v4  ;;  %v1360_v6 = vmax.f32 %v1265_v5, 0.0 }
 0x1cc   :  { %v1005_v7 = vpop.f32.mrb[92].mxu1 }
 0x1cd   :  { %1417 = vst [vmem:[%s2641_s3 + $0x168] sm:$0xff] %v1360_v6  ;;  %v1006_v9 = vadd.f32 %v2402_v58, %v1005_v7  ;;  %v1007_v10 = vpop.f32.mrb[93].mxu1  ;;  %v1301_v22 = vpop.f32.mrb[108].mxu0 }
 0x1ce   :  { %v1008_v12 = vpop.f32.mrb[94].mxu1  ;;  %v1708_v25 = vpop.f32.mrb[109].mxu0 }
 0x1cf   :  { %v1270_v14 = vadd.f32 %v1269_v29, %v1006_v9  ;;  %v1009_v15 = vadd.f32 %v2402_v58, %v1008_v12  ;;  %v1010_v16 = vpop.f32.mrb[95].mxu1  ;;  %v1304_v27 = vpop.f32.mrb[110].mxu0 }
 0x1d0   :  { %v1709_v31 = vpop.f32.mrb[111].mxu0 }
 0x1d1   :  { %v1361_v18 = vmax.f32 %v1270_v14, 0.0  ;;  %v1273_v19 = vadd.f32 %v1272_v34, %v1009_v15 }
 0x1d3   :  { %1418 = vst [vmem:[%s2641_s3 + $0x170] sm:$0xff] %v1361_v18  ;;  %v1362_v20 = vmax.f32 %v1273_v19, 0.0 }
 0x1d4   :  { %v1013_v21 = vpop.f32.mrb[96].mxu1 }
 0x1d5   :  { %1419 = vst [vmem:[%s2641_s3 + $0x178] sm:$0xff] %v1362_v20  ;;  %v1014_v23 = vadd.f32 %v2402_v58, %v1013_v21  ;;  %v1015_v24 = vpop.f32.mrb[97].mxu1  ;;  %v1309_v36 = vpop.f32.mrb[112].mxu0 }
 0x1d6   :  { %v1016_v26 = vpop.f32.mrb[98].mxu1  ;;  %v1712_v39 = vpop.f32.mrb[113].mxu0 }
 0x1d7   :  { %v1278_v28 = vadd.f32 %v1277_v43, %v1014_v23  ;;  %v1017_v29 = vadd.f32 %v2402_v58, %v1016_v26  ;;  %v1018_v30 = vpop.f32.mrb[99].mxu1  ;;  %v1312_v41 = vpop.f32.mrb[114].mxu0 }
 0x1d8   :  { %v1713_v45 = vpop.f32.mrb[115].mxu0 }
 0x1d9   :  { %v1363_v32 = vmax.f32 %v1278_v28, 0.0  ;;  %v1281_v33 = vadd.f32 %v1280_v48, %v1017_v29 }
 0x1db   :  { %1420 = vst [vmem:[%s2641_s3 + $0x180] sm:$0xff] %v1363_v32  ;;  %v1364_v34 = vmax.f32 %v1281_v33, 0.0 }
 0x1dc   :  { %v1021_v35 = vpop.f32.mrb[100].mxu1 }
 0x1dd   :  { %1421 = vst [vmem:[%s2641_s3 + $0x188] sm:$0xff] %v1364_v34  ;;  %v1022_v37 = vadd.f32 %v2402_v58, %v1021_v35  ;;  %v1023_v38 = vpop.f32.mrb[101].mxu1 }
 0x1de   :  { %v1024_v40 = vpop.f32.mrb[102].mxu1 }
 0x1df   :  { %v1286_v42 = vadd.f32 %v1285_v56, %v1022_v37  ;;  %v1025_v43 = vadd.f32 %v2402_v58, %v1024_v40  ;;  %v1026_v44 = vpop.f32.mrb[103].mxu1 }
 0x1e1   :  { %v1365_v46 = vmax.f32 %v1286_v42, 0.0  ;;  %v1289_v47 = vadd.f32 %v1288_v62, %v1025_v43 }
 0x1e3   :  { %1422 = vst [vmem:[%s2641_s3 + $0x190] sm:$0xff] %v1365_v46  ;;  %v1366_v48 = vmax.f32 %v1289_v47, 0.0 }
 0x1e4   :  { %v1029_v49 = vpop.f32.mrb[104].mxu1 }
 0x1e5   :  { %1423 = vst [vmem:[%s2641_s3 + $0x198] sm:$0xff] %v1366_v48  ;;  %v1030_v50 = vadd.f32 %v2402_v58, %v1029_v49  ;;  %v1031_v51 = vpop.f32.mrb[105].mxu1 }
 0x1e6   :  { %v1032_v52 = vpop.f32.mrb[106].mxu1 }
 0x1e7   :  { %v1294_v2 = vadd.f32 %v1293_v8, %v1030_v50  ;;  %v1033_v53 = vadd.f32 %v2402_v58, %v1032_v52  ;;  %v1034_v54 = vpop.f32.mrb[107].mxu1 }
 0x1e9   :  { %v1367_v55 = vmax.f32 %v1294_v2, 0.0  ;;  %v1297_v56 = vadd.f32 %v1296_v13, %v1033_v53 }
 0x1eb   :  { %1424 = vst [vmem:[%s2641_s3 + $0x1a0] sm:$0xff] %v1367_v55  ;;  %v1368_v57 = vmax.f32 %v1297_v56, 0.0 }
 0x1ec   :  { %v1037_v59 = vpop.f32.mrb[108].mxu1 }
 0x1ed   :  { %1425 = vst [vmem:[%s2641_s3 + $0x1a8] sm:$0xff] %v1368_v57  ;;  %v1038_v60 = vadd.f32 %v2402_v58, %v1037_v59  ;;  %v1039_v61 = vpop.f32.mrb[109].mxu1 }
 0x1ee   :  { %v1040_v62 = vpop.f32.mrb[110].mxu1 }
 0x1ef   :  { %v1302_v63 = vadd.f32 %v1301_v22, %v1038_v60  ;;  %v1041_v0 = vadd.f32 %v2402_v58, %v1040_v62  ;;  %v1042_v1 = vpop.f32.mrb[111].mxu1 }
 0x1f1   :  { %v1369_v3 = vmax.f32 %v1302_v63, 0.0  ;;  %v1305_v4 = vadd.f32 %v1304_v27, %v1041_v0 }
 0x1f3   :  { %1426 = vst [vmem:[%s2641_s3 + $0x1b0] sm:$0xff] %v1369_v3  ;;  %v1370_v5 = vmax.f32 %v1305_v4, 0.0 }
 0x1f4   :  { %v1045_v6 = vpop.f32.mrb[112].mxu1 }
 0x1f5   :  { %1427 = vst [vmem:[%s2641_s3 + $0x1b8] sm:$0xff] %v1370_v5  ;;  %v1046_v7 = vadd.f32 %v2402_v58, %v1045_v6  ;;  %v1047_v8 = vpop.f32.mrb[113].mxu1 }
 0x1f6   :  { %v1048_v9 = vpop.f32.mrb[114].mxu1 }
 0x1f7   :  { %v1310_v10 = vadd.f32 %v1309_v36, %v1046_v7  ;;  %v1049_v11 = vpop.f32.mrb[115].mxu1 }
 0x1f9   :  { %v1371_v12 = vmax.f32 %v1310_v10, 0.0 }
 0x1fb   :  { %1428 = vst [vmem:[%s2641_s3 + $0x1c0] sm:$0xff] %v1371_v12 }

// kernel: alexnet_forward.8
= control target key start
LH: loop header
LB: loop body
LE: loop exit
PB: predicated region body
PF: predicated region fallthrough
CT: control target
= control target key end

     0   :  { %s1141_s30 = smov 0   ;;  %s1143_s10 = smov 0   ;;  %s1230_s0 = inlined_call_operand.vmem [shape: f32[2,15,7,128], index: 0, kind: input, shape index: {}, may-alias: {0,1,2}]   ;;  %s1231_s1 = inlined_call_operand.vmem [shape: f32[2,15,7,128], index: 1, kind: input, shape index: {}, may-alias: {0,1,2}]   ;;  %s1232_s2 = inlined_call_operand.vmem [shape: f32[2,15,7,128], index: 2, kind: input, shape index: {}, may-alias: {0,1,2}]   ;;  %s1233_s3 = inlined_call_operand.vmem [shape: f32[2,15,7,128], index: 3, kind: input, shape index: {}, may-alias: {3,4,5}]   ;;  %s1234_s4 = inlined_call_operand.vmem [shape: f32[2,15,7,128], index: 4, kind: input, shape index: {}, may-alias: {3,4,5}]   ;;  %s1235_s5 = inlined_call_operand.vmem [shape: f32[2,15,7,128], index: 5, kind: input, shape index: {}, may-alias: {3,4,5}]   ;;  %s1236_s6 = inlined_call_operand.vmem [shape: f32[2,15,7,128], index: 6, kind: input, shape index: {}, may-alias: {6,7,8}]   ;;  %s1237_s7 = inlined_call_operand.vmem [shape: f32[2,15,7,128], index: 7, kind: input, shape index: {}, may-alias: {6,7,8}]   ;;  %s1238_s8 = inlined_call_operand.vmem [shape: f32[2,15,7,128], index: 8, kind: input, shape index: {}, may-alias: {6,7,8}]   ;;  %s1239_s9 = inlined_call_operand.vmem [shape: f32[2,7,7,128], index: 9, kind: output, shape index: {}]  }
   0x1   :  { %1242 = sst [smem:[#allocation6_spill]] %s1230_s0  ;;  %s1145_s11 = smov 0  }
   0x2   :  { %s1147_s12 = smov 0   ;;  %s1149_s13 = smov 0  }
   0x3 LB: > { %1243 = sst [smem:[#allocation2_spill]] %s1081_s11  ;;  %s28_s14 = sadd.s32 1, %s1081_s11  ;;  %s1089_s13 = sphi %s1149_s13, %s19_s13   ;;  %s1085_s12 = sphi %s1147_s12, %s1251_s12   ;;  %s1081_s11 = sphi %s1145_s11, %s1250_s11   ;;  %s1077_s10 = sphi %s1143_s10, %s1249_s10   ;;  %s1073_s30 = sphi %s1141_s30, %s1248_s30  }
   0x4   : > { %1244 = sst [smem:[#allocation3_spill]] %s1085_s12  ;;  %s31_s15 = sadd.s32 1, %s1085_s12 }
   0x5   : > { %p29_p0 = scmp.ge.s32.totalorder %s28_s14, 7  ;;  %p987_p1 = scmp.ge.s32.totalorder %s1089_s13, 1 }
   0x6   : > { %p486_p2 = scmp.lt.s32.totalorder %s1089_s13, 15 }
   0x7   : > { %s1253_s14 = smov (%p29_p0, %s28_s14), 0  ;;  %s1255_s15 = smov (!%p29_p0, %s31_s15), %s1085_s12 }
   0x8   : > { %1245 = sst [smem:[#allocation4_spill]] %s1253_s14  ;;  %p487_p3 = pnand %p987_p1, %p486_p2 }
   0x9   : > { %p33_p4 = scmp.ge.s32.totalorder %s1255_s15, 2  ;;  %s988_s16 = sshll.u32 (!%p487_p3), %s1073_s30, 1 }
   0xa   : > { %490 = sbr.rel (%p487_p3) target bundleno = 43 (0x2b), region = 56  ;;  %p608_p5 = scmp.lt.s32.totalorder (!%p487_p3), %s1077_s10, 1 }
   0xb   : > { %s1257_s15 = smov (%p33_p4, %s1255_s15), 0  ;;  %p610_p6 = scmp.lt.s32.totalorder (!%p487_p3), %s988_s16, 14 }
   0xc   : > { %1246 = sst [smem:[#allocation5_spill]] %s1257_s15  ;;  %s618_s17 = sadd.s32 (!%p487_p3), 1, %s988_s16 }
   0xd   : > { %p621_p7 = scmp.lt.s32.totalorder (!%p487_p3), %s618_s17, 14  ;;  %s630_s20 = sadd.s32 (!%p487_p3), 2, %s988_s16 }
   0xe   : > { %p633_p8 = scmp.lt.s32.totalorder (!%p487_p3), %s630_s20, 14  ;;  %s1247_s0 = sld [smem:[#allocation6_spill]] (!%p487_p3) }
   0xf   : > { %p711_p9 = scmp.lt.s32.totalorder (!%p487_p3), %s1073_s30, 6 }
  0x11   : > { %s1259_s10 = smov (!%p608_p5, %s1077_s10), 1  ;;  %s1261_s17 = smov (!%p621_p7, %s618_s17), 14 }
  0x12   : > { %s611_s18 = scalar_select %p610_p6, %s988_s16, 14 }
  0x13   : > { %s1009_s19 = smul.u32 15, %s1259_s10  ;;  %s1263_s20 = smov (!%p633_p8, %s630_s20), 14 }
  0x14   : > { %s1010_s15 = smul.u32 7, %s1259_s10  ;;  %s1265_s30 = smov (!%p711_p9, %s1073_s30), 6 }
  0x15   : > { %s613_s21 = sadd.s32 %s1009_s19, %s611_s18  ;;  %s624_s26 = sadd.s32 %s1009_s19, %s1261_s17 }
  0x16   : > { %s1177_s22 = sshll.u32 %s613_s21, 3  ;;  %s991_s16 = sshll.u32 %s624_s26, 3 }
  0x17   : > { %s615_s25 = scalar_lea.vmem %s1247_s0, %s1177_s22  ;;  %s649_s29 = scalar_lea.vmem %s1233_s3, %s1177_s22 }
  0x18   : > { %s636_s18 = sadd.s32 %s1009_s19, %s1263_s20  ;;  %v717_v0 = vld [vmem:[%s615_s25] sm:$0x7f]  ;;  %s626_s14 = scalar_lea.vmem %s1231_s1, %s991_s16 }
  0x19   : > { %s993_s23 = sshll.u32 %s636_s18, 3  ;;  %v718_v1 = vld [vmem:[%s626_s14] sm:$0x7f]  ;;  %s660_s27 = scalar_lea.vmem %s1234_s4, %s991_s16 }
  0x1a   : > { %s638_s12 = scalar_lea.vmem %s1232_s2, %s993_s23  ;;  %v719_v2 = vmax.f32 %v717_v0, %v718_v1  ;;  %v722_v4 = vld [vmem:[%s649_s29] sm:$0x7f]  ;;  %s672_s25 = scalar_lea.vmem %s1235_s5, %s993_s23 }
  0x1b   : > { %v720_v3 = vld [vmem:[%s638_s12] sm:$0x7f]  ;;  %s683_s28 = scalar_lea.vmem %s1236_s6, %s1177_s22  ;;  %s694_s18 = scalar_lea.vmem %s1237_s7, %s991_s16 }
  0x1c   : > { %v721_v5 = vmax.f32 %v719_v2, %v720_v3  ;;  %v724_v6 = vld [vmem:[%s660_s27] sm:$0x7f]  ;;  %s714_s12 = sadd.s32 %s1010_s15, %s1265_s30  ;;  %s706_s10 = scalar_lea.vmem %s1238_s8, %s993_s23 }
  0x1d   : > { %v726_v8 = vld [vmem:[%s672_s25] sm:$0x7f]  ;;  %s1006_s24 = sshll.u32 %s714_s12, 3 }
  0x1e   : > { %v723_v7 = vmax.f32 %v721_v5, %v722_v4  ;;  %v728_v10 = vld [vmem:[%s683_s28] sm:$0x7f]  ;;  %s716_s27 = scalar_lea.vmem %s1239_s9, %s1006_s24 }
  0x1f   : > { %v730_v12 = vld [vmem:[%s694_s18] sm:$0x7f] }
  0x20   : > { %v725_v9 = vmax.f32 %v723_v7, %v724_v6  ;;  %v732_v14 = vld [vmem:[%s706_s10] sm:$0x7f] }
  0x22   : > { %v727_v11 = vmax.f32 %v725_v9, %v726_v8 }
  0x24   : > { %v729_v13 = vmax.f32 %v727_v11, %v728_v10 }
  0x26   : > { %v731_v15 = vmax.f32 %v729_v13, %v730_v12 }
  0x28   : > { %v733_v16 = vmax.f32 %v731_v15, %v732_v14 }
  0x2a   : > { %734 = vst [vmem:[%s716_s27] sm:$0x7f] %v733_v16 }
  0x2b PF: > { %s19_s13 = sadd.s32 1, %s1089_s13   ;;  %s1248_s30 = sld [smem:[#allocation2_spill]] }
  0x2c   : > { %p16_p10 = scmp.ge.s32.totalorder %s19_s13, 16   ;;  %s1249_s10 = sld [smem:[#allocation3_spill]] }
  0x2d   : > { %s1250_s11 = sld [smem:[#allocation4_spill]]  ;;  %s1251_s12 = sld [smem:[#allocation5_spill]] }
  0x2e   :  { %18 = sbr.rel (!%p16_p10) target bundleno = 3 (0x3), region = 110 }

// kernel: alexnet_forward.10
= control target key start
LH: loop header
LB: loop body
LE: loop exit
PB: predicated region body
PF: predicated region fallthrough
CT: control target
= control target key end

     0   :  { %s1213_s30 = smov 0   ;;  %s1215_s10 = smov 0   ;;  %s1304_s0 = inlined_call_operand.vmem [shape: f32[2,7,3,256], index: 0, kind: input, shape index: {}, may-alias: {0,1,2}]   ;;  %s1305_s1 = inlined_call_operand.vmem [shape: f32[2,7,3,256], index: 1, kind: input, shape index: {}, may-alias: {0,1,2}]   ;;  %s1306_s2 = inlined_call_operand.vmem [shape: f32[2,7,3,256], index: 2, kind: input, shape index: {}, may-alias: {0,1,2}]   ;;  %s1307_s3 = inlined_call_operand.vmem [shape: f32[2,7,3,256], index: 3, kind: input, shape index: {}, may-alias: {3,4,5}]   ;;  %s1308_s4 = inlined_call_operand.vmem [shape: f32[2,7,3,256], index: 4, kind: input, shape index: {}, may-alias: {3,4,5}]   ;;  %s1309_s5 = inlined_call_operand.vmem [shape: f32[2,7,3,256], index: 5, kind: input, shape index: {}, may-alias: {3,4,5}]   ;;  %s1310_s6 = inlined_call_operand.vmem [shape: f32[2,7,3,256], index: 6, kind: input, shape index: {}, may-alias: {6,7,8}]   ;;  %s1311_s7 = inlined_call_operand.vmem [shape: f32[2,7,3,256], index: 7, kind: input, shape index: {}, may-alias: {6,7,8}]   ;;  %s1312_s8 = inlined_call_operand.vmem [shape: f32[2,7,3,256], index: 8, kind: input, shape index: {}, may-alias: {6,7,8}]   ;;  %s1313_s9 = inlined_call_operand.vmem [shape: f32[2,3,3,256], index: 9, kind: output, shape index: {}]  }
   0x1   :  { %1316 = sst [smem:[#allocation6_spill]] %s1304_s0  ;;  %s1217_s11 = smov 0  }
   0x2   :  { %s1219_s12 = smov 0   ;;  %s1221_s13 = smov 0  }
   0x3 LB: > { %1317 = sst [smem:[#allocation2_spill]] %s1153_s11  ;;  %s28_s14 = sadd.s32 1, %s1153_s11  ;;  %s1161_s13 = sphi %s1221_s13, %s19_s13   ;;  %s1157_s12 = sphi %s1219_s12, %s1325_s12   ;;  %s1153_s11 = sphi %s1217_s11, %s1324_s11   ;;  %s1149_s10 = sphi %s1215_s10, %s1323_s10   ;;  %s1145_s30 = sphi %s1213_s30, %s1322_s30  }
   0x4   : > { %1318 = sst [smem:[#allocation3_spill]] %s1157_s12  ;;  %s31_s15 = sadd.s32 1, %s1157_s12 }
   0x5   : > { %p29_p0 = scmp.ge.s32.totalorder %s28_s14, 3  ;;  %p1049_p1 = scmp.ge.s32.totalorder %s1161_s13, 1 }
   0x6   : > { %p495_p2 = scmp.lt.s32.totalorder %s1161_s13, 7 }
   0x7   : > { %s1327_s14 = smov (%p29_p0, %s28_s14), 0  ;;  %s1329_s15 = smov (!%p29_p0, %s31_s15), %s1157_s12 }
   0x8   : > { %1319 = sst [smem:[#allocation4_spill]] %s1327_s14  ;;  %p496_p3 = pnand %p1049_p1, %p495_p2 }
   0x9   : > { %p33_p4 = scmp.ge.s32.totalorder %s1329_s15, 2  ;;  %s1050_s16 = sshll.u32 (!%p496_p3), %s1145_s30, 1 }
   0xa   : > { %499 = sbr.rel (%p496_p3) target bundleno = 44 (0x2c), region = 56  ;;  %p627_p5 = scmp.lt.s32.totalorder (!%p496_p3), %s1149_s10, 1 }
   0xb   : > { %s1331_s15 = smov (%p33_p4, %s1329_s15), 0  ;;  %p629_p6 = scmp.lt.s32.totalorder (!%p496_p3), %s1050_s16, 6 }
   0xc   : > { %1320 = sst [smem:[#allocation5_spill]] %s1331_s15  ;;  %s638_s17 = sadd.s32 (!%p496_p3), 1, %s1050_s16 }
   0xd   : > { %p641_p7 = scmp.lt.s32.totalorder (!%p496_p3), %s638_s17, 6  ;;  %s651_s21 = sadd.s32 (!%p496_p3), 2, %s1050_s16 }
   0xe   : > { %p654_p8 = scmp.lt.s32.totalorder (!%p496_p3), %s651_s21, 6  ;;  %s1321_s0 = sld [smem:[#allocation6_spill]] (!%p496_p3) }
   0xf   : > { %p739_p9 = scmp.lt.s32.totalorder (!%p496_p3), %s1145_s30, 2 }
  0x11   : > { %s1333_s10 = smov (!%p627_p5, %s1149_s10), 1  ;;  %s1335_s17 = smov (!%p641_p7, %s638_s17), 6 }
  0x12   : > { %s630_s18 = scalar_select %p629_p6, %s1050_s16, 6 }
  0x13   : > { %s1081_s19 = smul.u32 14, %s1333_s10  ;;  %s1337_s21 = smov (!%p654_p8, %s651_s21), 6 }
  0x14   : > { %s1051_s20 = sshll.u32 %s630_s18, 1  ;;  %s1054_s27 = sshll.u32 %s1335_s17, 1 }
  0x15   : > { %s633_s22 = sadd.s32 %s1081_s19, %s1051_s20  ;;  %s645_s18 = sadd.s32 %s1081_s19, %s1054_s27 }
  0x16   : > { %s1249_s23 = sshll.u32 %s633_s22, 2  ;;  %s1057_s20 = sshll.u32 %s1337_s21, 1 }
  0x17   : > { %s635_s26 = scalar_lea.vmem %s1321_s0, %s1249_s23  ;;  %s672_s16 = scalar_lea.vmem %s1307_s3, %s1249_s23 }
  0x18   : > { %s1055_s22 = sshll.u32 %s645_s18, 2  ;;  %s658_s15 = sadd.s32 %s1081_s19, %s1057_s20  ;;  %v746_v0 = vld [vmem:[%s635_s26] sm:$0x77] }
  0x19   : > { %s647_s0 = scalar_lea.vmem %s1305_s1, %s1055_s22  ;;  %s1058_s14 = sshll.u32 %s658_s15, 2  ;;  %v751_v4 = vld [vmem:[%s672_s16] sm:$0x77] }
  0x1a   : > { %s660_s11 = scalar_lea.vmem %s1306_s2, %s1058_s14  ;;  %v747_v1 = vld [vmem:[%s647_s0] sm:$0x77]  ;;  %s684_s27 = scalar_lea.vmem %s1308_s4, %s1055_s22 }
  0x1b   : > { %v748_v2 = vmax.f32 %v746_v0, %v747_v1  ;;  %v749_v3 = vld [vmem:[%s660_s11] sm:$0x77]  ;;  %s697_s19 = scalar_lea.vmem %s1309_s5, %s1058_s14  ;;  %s1339_s30 = smov (!%p739_p9, %s1145_s30), 2 }
  0x1c   : > { %s1082_s15 = smul.u32 6, %s1333_s10  ;;  %v753_v6 = vld [vmem:[%s684_s27] sm:$0x77]  ;;  %s709_s0 = scalar_lea.vmem %s1310_s6, %s1249_s23 }
  0x1d   : > { %v750_v5 = vmax.f32 %v748_v2, %v749_v3  ;;  %s1077_s20 = sshll.u32 %s1339_s30, 1  ;;  %v755_v8 = vld [vmem:[%s697_s19] sm:$0x77]  ;;  %s721_s11 = scalar_lea.vmem %s1311_s7, %s1055_s22 }
  0x1e   : > { %s743_s17 = sadd.s32 %s1082_s15, %s1077_s20  ;;  %v757_v10 = vld [vmem:[%s709_s0] sm:$0x77]  ;;  %s734_s29 = scalar_lea.vmem %s1312_s8, %s1058_s14 }
  0x1f   : > { %v752_v7 = vmax.f32 %v750_v5, %v751_v4  ;;  %v759_v12 = vld [vmem:[%s721_s11] sm:$0x77]  ;;  %s1078_s10 = sshll.u32 %s743_s17, 2 }
  0x20   : > { %v761_v14 = vld [vmem:[%s734_s29] sm:$0x77]  ;;  %s745_s27 = scalar_lea.vmem %s1313_s9, %s1078_s10 }
  0x21   : > { %v754_v9 = vmax.f32 %v752_v7, %v753_v6 }
  0x23   : > { %v756_v11 = vmax.f32 %v754_v9, %v755_v8 }
  0x25   : > { %v758_v13 = vmax.f32 %v756_v11, %v757_v10 }
  0x27   : > { %v760_v15 = vmax.f32 %v758_v13, %v759_v12 }
  0x29   : > { %v762_v16 = vmax.f32 %v760_v15, %v761_v14 }
  0x2b   : > { %763 = vst [vmem:[%s745_s27] sm:$0x77] %v762_v16 }
  0x2c PF: > { %s19_s13 = sadd.s32 1, %s1161_s13   ;;  %s1322_s30 = sld [smem:[#allocation2_spill]] }
  0x2d   : > { %p16_p10 = scmp.ge.s32.totalorder %s19_s13, 8   ;;  %s1323_s10 = sld [smem:[#allocation3_spill]] }
  0x2e   : > { %s1324_s11 = sld [smem:[#allocation4_spill]]  ;;  %s1325_s12 = sld [smem:[#allocation5_spill]] }
  0x2f   :  { %18 = sbr.rel (!%p16_p10) target bundleno = 3 (0x3), region = 110 }

// kernel: alexnet_forward.9
= control target key start
LH: loop header
LB: loop body
LE: loop exit
PB: predicated region body
PF: predicated region fallthrough
CT: control target
= control target key end

     0   :  { %s4744_s1 = inlined_call_operand.vmem [shape: bf16[1664,256], index: 1, kind: input, shape index: {}]   ;;  %s4745_s0 = inlined_call_operand.vmem [shape: bf16[104,1664], index: 0, kind: input, shape index: {}]   ;;  %s4746_s2 = inlined_call_operand.vmem [shape: f32[1,256], index: 2, kind: input, shape index: {}]   ;;  %s4747_s3 = inlined_call_operand.vmem [shape: f32[104,256], index: 3, kind: output, shape index: {}]  }
   0x1   :  { %v3091_v0 = vld [vmem:[%s4744_s1 + $0x4] ss:$8 sps:$4 sm:$0xff]   ;;  %v3095_v2 = vld [vmem:[%s4744_s1] ss:$8 sps:$4 sm:$0xff]   ;;  %v3097_v4 = vld [vmem:[%s4744_s1 + $0x14] ss:$8 sps:$4 sm:$0xff]  }
   0x2   :  { %v3093_v1 = vld [vmem:[%s4744_s1 + $0x304] ss:$8 sps:$4 sm:$0xff]   ;;  %1808 = vmatprep.subr.bf16.mxu1 %v3091_v0  ;;  %v3096_v3 = vld [vmem:[%s4744_s1 + $0x300] ss:$8 sps:$4 sm:$0xff]   ;;  %v3099_v5 = vld [vmem:[%s4744_s1 + $0x314] ss:$8 sps:$4 sm:$0xff]  }
   0x3   :  { %2111 = vmatprep.subr.bf16.mxu0 %v3093_v1  ;;  %1809 = vmatpush1.bf16.msra.mxu1 %v3095_v2  ;;  %v3101_v6 = vld [vmem:[%s4744_s1 + $0x10] ss:$8 sps:$4 sm:$0xff]   ;;  %v3103_v8 = vld [vmem:[%s4744_s1 + $0x24] ss:$8 sps:$4 sm:$0xff]   ;;  %v3107_v10 = vld [vmem:[%s4744_s1 + $0x20] ss:$8 sps:$4 sm:$0xff]  }
   0x4   :  { %2112 = vmatpush1.bf16.msra.mxu0 %v3096_v3  ;;  %1810 = vmatprep.subr.bf16.mxu1 %v3097_v4  ;;  %v3102_v7 = vld [vmem:[%s4744_s1 + $0x310] ss:$8 sps:$4 sm:$0xff]   ;;  %v3105_v9 = vld [vmem:[%s4744_s1 + $0x324] ss:$8 sps:$4 sm:$0xff]   ;;  %v3108_v11 = vld [vmem:[%s4744_s1 + $0x320] ss:$8 sps:$4 sm:$0xff]  }
   0x5   :  { %2113 = vmatprep.subr.bf16.mxu0 %v3099_v5  ;;  %v3109_v12 = vld [vmem:[%s4744_s1 + $0x34] ss:$8 sps:$4 sm:$0xff]   ;;  %v3113_v14 = vld [vmem:[%s4744_s1 + $0x30] ss:$8 sps:$4 sm:$0xff]   ;;  %v3115_v16 = vld [vmem:[%s4744_s1 + $0x44] ss:$8 sps:$4 sm:$0xff]  }
   0x6   :  { %v3111_v13 = vld [vmem:[%s4744_s1 + $0x334] ss:$8 sps:$4 sm:$0xff]   ;;  %v3114_v15 = vld [vmem:[%s4744_s1 + $0x330] ss:$8 sps:$4 sm:$0xff]   ;;  %v3117_v17 = vld [vmem:[%s4744_s1 + $0x344] ss:$8 sps:$4 sm:$0xff]  }
   0x7   :  { %1811 = vmatpush1.bf16.msra.mxu1 %v3101_v6  ;;  %v3119_v18 = vld [vmem:[%s4744_s1 + $0x40] ss:$8 sps:$4 sm:$0xff]   ;;  %v3121_v20 = vld [vmem:[%s4744_s1 + $0x54] ss:$8 sps:$4 sm:$0xff]   ;;  %v3125_v22 = vld [vmem:[%s4744_s1 + $0x50] ss:$8 sps:$4 sm:$0xff]  }
   0x8   :  { %2114 = vmatpush1.bf16.msra.mxu0 %v3102_v7  ;;  %1812 = vmatprep.subr.bf16.mxu1 %v3103_v8  ;;  %v3120_v19 = vld [vmem:[%s4744_s1 + $0x340] ss:$8 sps:$4 sm:$0xff]   ;;  %v3123_v21 = vld [vmem:[%s4744_s1 + $0x354] ss:$8 sps:$4 sm:$0xff]   ;;  %v3126_v23 = vld [vmem:[%s4744_s1 + $0x350] ss:$8 sps:$4 sm:$0xff]  }
   0x9   :  { %2115 = vmatprep.subr.bf16.mxu0 %v3105_v9  ;;  %v3127_v24 = vld [vmem:[%s4744_s1 + $0x64] ss:$8 sps:$4 sm:$0xff]   ;;  %v3131_v26 = vld [vmem:[%s4744_s1 + $0x60] ss:$8 sps:$4 sm:$0xff]   ;;  %v3133_v28 = vld [vmem:[%s4744_s1 + $0x74] ss:$8 sps:$4 sm:$0xff]  }
   0xa   :  { %v3129_v25 = vld [vmem:[%s4744_s1 + $0x364] ss:$8 sps:$4 sm:$0xff]   ;;  %v3132_v27 = vld [vmem:[%s4744_s1 + $0x360] ss:$8 sps:$4 sm:$0xff]   ;;  %v3135_v29 = vld [vmem:[%s4744_s1 + $0x374] ss:$8 sps:$4 sm:$0xff]  }
   0xb   :  { %1813 = vmatpush1.bf16.msra.mxu1 %v3107_v10  ;;  %v3137_v30 = vld [vmem:[%s4744_s1 + $0x70] ss:$8 sps:$4 sm:$0xff]   ;;  %v3139_v32 = vld [vmem:[%s4744_s1 + $0x84] ss:$8 sps:$4 sm:$0xff]   ;;  %v3143_v34 = vld [vmem:[%s4744_s1 + $0x80] ss:$8 sps:$4 sm:$0xff]  }
   0xc   :  { %2116 = vmatpush1.bf16.msra.mxu0 %v3108_v11  ;;  %1814 = vmatprep.subr.bf16.mxu1 %v3109_v12  ;;  %v3138_v31 = vld [vmem:[%s4744_s1 + $0x370] ss:$8 sps:$4 sm:$0xff]   ;;  %v3141_v33 = vld [vmem:[%s4744_s1 + $0x384] ss:$8 sps:$4 sm:$0xff]   ;;  %v3144_v35 = vld [vmem:[%s4744_s1 + $0x380] ss:$8 sps:$4 sm:$0xff]  }
   0xd   :  { %2117 = vmatprep.subr.bf16.mxu0 %v3111_v13  ;;  %v3145_v36 = vld [vmem:[%s4744_s1 + $0x94] ss:$8 sps:$4 sm:$0xff]   ;;  %v3149_v38 = vld [vmem:[%s4744_s1 + $0x90] ss:$8 sps:$4 sm:$0xff]   ;;  %v3151_v40 = vld [vmem:[%s4744_s1 + $0xa4] ss:$8 sps:$4 sm:$0xff]  }
   0xe   :  { %v3147_v37 = vld [vmem:[%s4744_s1 + $0x394] ss:$8 sps:$4 sm:$0xff]   ;;  %v3150_v39 = vld [vmem:[%s4744_s1 + $0x390] ss:$8 sps:$4 sm:$0xff]   ;;  %v3153_v41 = vld [vmem:[%s4744_s1 + $0x3a4] ss:$8 sps:$4 sm:$0xff]  }
   0xf   :  { %1815 = vmatpush1.bf16.msra.mxu1 %v3113_v14  ;;  %v3155_v42 = vld [vmem:[%s4744_s1 + $0xa0] ss:$8 sps:$4 sm:$0xff]   ;;  %v3157_v44 = vld [vmem:[%s4744_s1 + $0xb4] ss:$8 sps:$4 sm:$0xff]   ;;  %v3161_v46 = vld [vmem:[%s4744_s1 + $0xb0] ss:$8 sps:$4 sm:$0xff]  }
  0x10   :  { %2118 = vmatpush1.bf16.msra.mxu0 %v3114_v15  ;;  %1816 = vmatprep.subr.bf16.mxu1 %v3115_v16  ;;  %v3156_v43 = vld [vmem:[%s4744_s1 + $0x3a0] ss:$8 sps:$4 sm:$0xff]   ;;  %v3159_v45 = vld [vmem:[%s4744_s1 + $0x3b4] ss:$8 sps:$4 sm:$0xff]   ;;  %v3162_v47 = vld [vmem:[%s4744_s1 + $0x3b0] ss:$8 sps:$4 sm:$0xff]  }
  0x11   :  { %2119 = vmatprep.subr.bf16.mxu0 %v3117_v17  ;;  %v3189_v48 = vld [vmem:[%s4745_s0 + $0x4] ss:$52 sps:$4 sm:$0xff]   ;;  %v3195_v51 = vld [vmem:[%s4745_s0 + $0x1c] ss:$52 sps:$4 sm:$0xff]   ;;  %v3167_v52 = vld [vmem:[%s4744_s1 + $0xc0] ss:$8 sps:$4 sm:$0xff]  }
  0x12   :  { %v3163_v49 = vld [vmem:[%s4744_s1 + $0xc4] ss:$8 sps:$4 sm:$0xff]   ;;  %1840 = vmatprep.mubr.bf16.mxu1 %v3189_v48  ;;  %v3168_v53 = vld [vmem:[%s4744_s1 + $0x3c0] ss:$8 sps:$4 sm:$0xff]   ;;  %v3169_v54 = vld [vmem:[%s4744_s1 + $0xd4] ss:$8 sps:$4 sm:$0xff]   ;;  %2143 = vmatprep.mubr.bf16.mxu0 %v3195_v51 }
  0x13   :  { %1817 = vmatpush1.bf16.msra.mxu1 %v3119_v18  ;;  %v3165_v50 = vld [vmem:[%s4744_s1 + $0x3c4] ss:$8 sps:$4 sm:$0xff]   ;;  %v3171_v55 = vld [vmem:[%s4744_s1 + $0x3d4] ss:$8 sps:$4 sm:$0xff]   ;;  %v3173_v56 = vld [vmem:[%s4744_s1 + $0xd0] ss:$8 sps:$4 sm:$0xff]  }
  0x14   :  { %2120 = vmatpush1.bf16.msra.mxu0 %v3120_v19  ;;  %1818 = vmatprep.subr.bf16.mxu1 %v3121_v20  ;;  %v3174_v57 = vld [vmem:[%s4744_s1 + $0x3d0] ss:$8 sps:$4 sm:$0xff]   ;;  %v3175_v58 = vld [vmem:[%s4744_s1 + $0xe4] ss:$8 sps:$4 sm:$0xff]   ;;  %v3179_v60 = vld [vmem:[%s4744_s1 + $0xe0] ss:$8 sps:$4 sm:$0xff]  }
  0x15   :  { %2121 = vmatprep.subr.bf16.mxu0 %v3123_v21  ;;  %v3177_v59 = vld [vmem:[%s4744_s1 + $0x3e4] ss:$8 sps:$4 sm:$0xff]   ;;  %v3180_v61 = vld [vmem:[%s4744_s1 + $0x3e0] ss:$8 sps:$4 sm:$0xff]   ;;  %v3181_v62 = vld [vmem:[%s4744_s1 + $0xf4] ss:$8 sps:$4 sm:$0xff]  }
  0x16   :  { %v3183_v63 = vld [vmem:[%s4744_s1 + $0x3f4] ss:$8 sps:$4 sm:$0xff]   ;;  %v3185_v0 = vld [vmem:[%s4744_s1 + $0xf0] ss:$8 sps:$4 sm:$0xff]   ;;  %v3192_v2 = vld [vmem:[%s4744_s1 + $0x104] ss:$8 sps:$4 sm:$0xff]  }
  0x17   :  { %1819 = vmatpush1.bf16.msra.mxu1 %v3125_v22  ;;  %v3186_v1 = vld [vmem:[%s4744_s1 + $0x3f0] ss:$8 sps:$4 sm:$0xff]   ;;  %v3187_v3 = vld [vmem:[%s4745_s0] ss:$52 sps:$4 sm:$0xff]   ;;  %v3198_v4 = vld [vmem:[%s4744_s1 + $0x404] ss:$8 sps:$4 sm:$0xff]  }
  0x18   :  { %2122 = vmatpush1.bf16.msra.mxu0 %v3126_v23  ;;  %1820 = vmatprep.subr.bf16.mxu1 %v3127_v24  ;;  %v3190_v5 = vld [vmem:[%s4744_s1 + $0x100] ss:$8 sps:$4 sm:$0xff]   ;;  %v3193_v6 = vld [vmem:[%s4745_s0 + $0x18] ss:$52 sps:$4 sm:$0xff]   ;;  %v3201_v8 = vld [vmem:[%s4744_s1 + $0x114] ss:$8 sps:$4 sm:$0xff]  }
  0x19   :  { %2123 = vmatprep.subr.bf16.mxu0 %v3129_v25  ;;  %v3196_v7 = vld [vmem:[%s4744_s1 + $0x400] ss:$8 sps:$4 sm:$0xff]   ;;  %v3204_v9 = vld [vmem:[%s4744_s1 + $0x414] ss:$8 sps:$4 sm:$0xff]   ;;  %v3217_v10 = vld [vmem:[%s4745_s0 + $0x84] ss:$52 sps:$4 sm:$0xff]  }
  0x1a   :  { %v3219_v11 = vld [vmem:[%s4745_s0 + $0x6c] ss:$52 sps:$4 sm:$0xff]   ;;  %v3199_v12 = vld [vmem:[%s4744_s1 + $0x110] ss:$8 sps:$4 sm:$0xff]   ;;  %v3213_v18 = vld [vmem:[%s4744_s1 + $0x134] ss:$8 sps:$4 sm:$0xff]  }
  0x1b   :  { %1821 = vmatpush1.bf16.msra.mxu1 %v3131_v26  ;;  %v3202_v13 = vld [vmem:[%s4744_s1 + $0x410] ss:$8 sps:$4 sm:$0xff]   ;;  %v3207_v14 = vld [vmem:[%s4744_s1 + $0x124] ss:$8 sps:$4 sm:$0xff]   ;;  %v3205_v16 = vld [vmem:[%s4744_s1 + $0x120] ss:$8 sps:$4 sm:$0xff]  }
  0x1c   :  { %2124 = vmatpush1.bf16.msra.mxu0 %v3132_v27  ;;  %1822 = vmatprep.subr.bf16.mxu1 %v3133_v28  ;;  %v3210_v15 = vld [vmem:[%s4744_s1 + $0x424] ss:$8 sps:$4 sm:$0xff]   ;;  %v3208_v17 = vld [vmem:[%s4744_s1 + $0x420] ss:$8 sps:$4 sm:$0xff]   ;;  %v3216_v21 = vld [vmem:[%s4744_s1 + $0x434] ss:$8 sps:$4 sm:$0xff]  }
  0x1d   :  { %2125 = vmatprep.subr.bf16.mxu0 %v3135_v29  ;;  %v3224_v19 = vld [vmem:[%s4745_s0 + $0x80] ss:$52 sps:$4 sm:$0xff]   ;;  %v3228_v20 = vld [vmem:[%s4745_s0 + $0x68] ss:$52 sps:$4 sm:$0xff]   ;;  %v3211_v24 = vld [vmem:[%s4744_s1 + $0x130] ss:$8 sps:$4 sm:$0xff]  }
  0x1e   :  { %v3235_v22 = vld [vmem:[%s4745_s0 + $0xec] ss:$52 sps:$4 sm:$0xff]   ;;  %v3237_v23 = vld [vmem:[%s4745_s0 + $0xd4] ss:$52 sps:$4 sm:$0xff]   ;;  %v3214_v25 = vld [vmem:[%s4744_s1 + $0x430] ss:$8 sps:$4 sm:$0xff]  }
  0x1f   :  { %1823 = vmatpush1.bf16.msra.mxu1 %v3137_v30  ;;  %v3223_v26 = vld [vmem:[%s4744_s1 + $0x144] ss:$8 sps:$4 sm:$0xff]   ;;  %v3221_v28 = vld [vmem:[%s4744_s1 + $0x140] ss:$8 sps:$4 sm:$0xff]   ;;  %v3231_v30 = vld [vmem:[%s4744_s1 + $0x154] ss:$8 sps:$4 sm:$0xff]  }
  0x20   :  { %2126 = vmatpush1.bf16.msra.mxu0 %v3138_v31  ;;  %1824 = vmatprep.subr.bf16.mxu1 %v3139_v32  ;;  %v3227_v27 = vld [vmem:[%s4744_s1 + $0x444] ss:$8 sps:$4 sm:$0xff]   ;;  %v3225_v29 = vld [vmem:[%s4744_s1 + $0x440] ss:$8 sps:$4 sm:$0xff]   ;;  %v3247_v48 = vld [vmem:[%s4744_s1 + $0x170] ss:$8 sps:$4 sm:$0xff]  }
  0x21   :  { %2127 = vmatprep.subr.bf16.mxu0 %v3141_v33  ;;  %v3242_v31 = vld [vmem:[%s4745_s0 + $0xe8] ss:$52 sps:$4 sm:$0xff]   ;;  %v3246_v32 = vld [vmem:[%s4745_s0 + $0xd0] ss:$52 sps:$4 sm:$0xff]  }
  0x22   :  { %v3234_v33 = vld [vmem:[%s4744_s1 + $0x454] ss:$8 sps:$4 sm:$0xff]   ;;  %v3263_v51 = vld [vmem:[%s4744_s1 + $0x484] ss:$8 sps:$4 sm:$0xff]  }
  0x23   :  { %1825 = vmatpush1.bf16.msra.mxu1 %v3143_v34  ;;  %v3253_v34 = vld [vmem:[%s4745_s0 + $0x154] ss:$52 sps:$4 sm:$0xff]  }
  0x24   :  { %2128 = vmatpush1.bf16.msra.mxu0 %v3144_v35  ;;  %1826 = vmatprep.subr.bf16.mxu1 %v3145_v36  ;;  %v3255_v35 = vld [vmem:[%s4745_s0 + $0x13c] ss:$52 sps:$4 sm:$0xff]  }
  0x25   :  { %2129 = vmatprep.subr.bf16.mxu0 %v3147_v37  ;;  %v3229_v36 = vld [vmem:[%s4744_s1 + $0x150] ss:$8 sps:$4 sm:$0xff]  }
  0x26   :  { %v3232_v37 = vld [vmem:[%s4744_s1 + $0x450] ss:$8 sps:$4 sm:$0xff]  }
  0x27   :  { %1827 = vmatpush1.bf16.msra.mxu1 %v3149_v38  ;;  %v3241_v38 = vld [vmem:[%s4744_s1 + $0x164] ss:$8 sps:$4 sm:$0xff]  }
  0x28   :  { %2130 = vmatpush1.bf16.msra.mxu0 %v3150_v39  ;;  %1828 = vmatprep.subr.bf16.mxu1 %v3151_v40  ;;  %v3245_v39 = vld [vmem:[%s4744_s1 + $0x464] ss:$8 sps:$4 sm:$0xff]   ;;  %v3239_v40 = vld [vmem:[%s4744_s1 + $0x160] ss:$8 sps:$4 sm:$0xff]  }
  0x29   :  { %2131 = vmatprep.subr.bf16.mxu0 %v3153_v41  ;;  %v3243_v41 = vld [vmem:[%s4744_s1 + $0x460] ss:$8 sps:$4 sm:$0xff]  }
  0x2b   :  { %1829 = vmatpush1.bf16.msra.mxu1 %v3155_v42  ;;  %v3249_v42 = vld [vmem:[%s4744_s1 + $0x174] ss:$8 sps:$4 sm:$0xff]  }
  0x2c   :  { %2132 = vmatpush1.bf16.msra.mxu0 %v3156_v43  ;;  %1830 = vmatprep.subr.bf16.mxu1 %v3157_v44  ;;  %v3260_v43 = vld [vmem:[%s4745_s0 + $0x150] ss:$52 sps:$4 sm:$0xff]   ;;  %v3264_v44 = vld [vmem:[%s4745_s0 + $0x138] ss:$52 sps:$4 sm:$0xff]  }
  0x2d   :  { %2133 = vmatprep.subr.bf16.mxu0 %v3159_v45  ;;  %v3252_v45 = vld [vmem:[%s4744_s1 + $0x474] ss:$8 sps:$4 sm:$0xff]  }
  0x2f   :  { %1831 = vmatpush1.bf16.msra.mxu1 %v3161_v46  ;;  %v3271_v46 = vld [vmem:[%s4745_s0 + $0x1bc] ss:$52 sps:$4 sm:$0xff]  }
  0x30   :  { %2134 = vmatpush1.bf16.msra.mxu0 %v3162_v47  ;;  %1832 = vmatprep.subr.bf16.mxu1 %v3163_v49  ;;  %v3273_v47 = vld [vmem:[%s4745_s0 + $0x1a4] ss:$52 sps:$4 sm:$0xff]  }
  0x31   :  { %2135 = vmatprep.subr.bf16.mxu0 %v3165_v50  ;;  %v3250_v49 = vld [vmem:[%s4744_s1 + $0x470] ss:$8 sps:$4 sm:$0xff]   ;;  %v3259_v50 = vld [vmem:[%s4744_s1 + $0x184] ss:$8 sps:$4 sm:$0xff]  }
  0x33   :  { %1833 = vmatpush1.bf16.msra.mxu1 %v3167_v52  ;;  %v3257_v52 = vld [vmem:[%s4744_s1 + $0x180] ss:$8 sps:$4 sm:$0xff]  }
  0x34   :  { %2136 = vmatpush1.bf16.msra.mxu0 %v3168_v53  ;;  %1834 = vmatprep.subr.bf16.mxu1 %v3169_v54  ;;  %v3278_v53 = vld [vmem:[%s4745_s0 + $0x1b8] ss:$52 sps:$4 sm:$0xff]   ;;  %v3282_v54 = vld [vmem:[%s4745_s0 + $0x1a0] ss:$52 sps:$4 sm:$0xff]  }
  0x35   :  { %2137 = vmatprep.subr.bf16.mxu0 %v3171_v55  ;;  %v3261_v55 = vld [vmem:[%s4744_s1 + $0x480] ss:$8 sps:$4 sm:$0xff]  }
  0x37   :  { %1835 = vmatpush1.bf16.msra.mxu1 %v3173_v56  ;;  %v3267_v56 = vld [vmem:[%s4744_s1 + $0x194] ss:$8 sps:$4 sm:$0xff]  }
  0x38   :  { %2138 = vmatpush1.bf16.msra.mxu0 %v3174_v57  ;;  %1836 = vmatprep.subr.bf16.mxu1 %v3175_v58  ;;  %v3270_v57 = vld [vmem:[%s4744_s1 + $0x494] ss:$8 sps:$4 sm:$0xff]   ;;  %v3289_v58 = vld [vmem:[%s4745_s0 + $0x224] ss:$52 sps:$4 sm:$0xff]  }
  0x39   :  { %2139 = vmatprep.subr.bf16.mxu0 %v3177_v59  ;;  %v3265_v59 = vld [vmem:[%s4744_s1 + $0x190] ss:$8 sps:$4 sm:$0xff]  }
  0x3b   :  { %1837 = vmatpush1.bf16.msra.mxu1 %v3179_v60  ;;  %v3291_v60 = vld [vmem:[%s4745_s0 + $0x20c] ss:$52 sps:$4 sm:$0xff]  }
  0x3c   :  { %2140 = vmatpush1.bf16.msra.mxu0 %v3180_v61  ;;  %1838 = vmatprep.subr.bf16.mxu1 %v3181_v62  ;;  %v3268_v61 = vld [vmem:[%s4744_s1 + $0x490] ss:$8 sps:$4 sm:$0xff]   ;;  %v3277_v62 = vld [vmem:[%s4744_s1 + $0x1a4] ss:$8 sps:$4 sm:$0xff]  }
  0x3d   :  { %2141 = vmatprep.subr.bf16.mxu0 %v3183_v63  ;;  %v3281_v63 = vld [vmem:[%s4744_s1 + $0x4a4] ss:$8 sps:$4 sm:$0xff]  }
  0x3f   :  { %1839 = vmatpush1.bf16.msra.mxu1 %v3185_v0  ;;  %v3296_v0 = vld [vmem:[%s4745_s0 + $0x220] ss:$52 sps:$4 sm:$0xff]  }
  0x40   :  { %2142 = vmatpush1.bf16.msra.mxu0 %v3186_v1  ;;  %1909 = vmatprep.subr.bf16.mxu1 %v3192_v2  ;;  %v3300_v1 = vld [vmem:[%s4745_s0 + $0x208] ss:$52 sps:$4 sm:$0xff]  }
  0x41   :  { %2212 = vmatprep.subr.bf16.mxu0 %v3198_v4  ;;  %v102_v2 = vld [vmem:[%s4745_s0 + $0x288] sm:$0xff] }
  0x42   :  { %1841 = vmatmul.mubr.bf16.vlgmr.msra.gmra.mrb[0].mxu1 %v3187_v3  ;;  %v99_v3 = vld [vmem:[%s4745_s0 + $0x270] sm:$0xff]  ;;  %v3275_v4 = vld [vmem:[%s4744_s1 + $0x1a0] ss:$8 sps:$4 sm:$0xff]  }
  0x43   :  { %2144 = vmatmul.mubr.bf16.vlgmr.msra.gmra.mrb[0].mxu0 %v3193_v6  ;;  %1910 = vmatpush1.bf16.msra.mxu1 %v3190_v5  ;;  %v3279_v5 = vld [vmem:[%s4744_s1 + $0x4a0] ss:$8 sps:$4 sm:$0xff]   ;;  %v3285_v6 = vld [vmem:[%s4744_s1 + $0x1b4] ss:$8 sps:$4 sm:$0xff]  }
  0x44   :  { %2213 = vmatpush1.bf16.msra.mxu0 %v3196_v7  ;;  %1911 = vmatprep.subr.bf16.mxu1 %v3201_v8  ;;  %v3288_v7 = vld [vmem:[%s4744_s1 + $0x4b4] ss:$8 sps:$4 sm:$0xff]   ;;  %v2656_v8 = vcombine.high %v102_v2, %v102_v2 }
  0x45   :  { %2214 = vmatprep.subr.bf16.mxu0 %v3204_v9  ;;  %2153 = vmatprep.mubr.bf16.mxu0 %v3217_v10  ;;  %v2650_v9 = vcombine.high %v99_v3, %v99_v3  ;;  %v3283_v10 = vld [vmem:[%s4744_s1 + $0x1b0] ss:$8 sps:$4 sm:$0xff]  }
  0x46   :  { %1850 = vmatprep.mubr.bf16.mxu1 %v3219_v11  ;;  %v3286_v11 = vld [vmem:[%s4744_s1 + $0x4b0] ss:$8 sps:$4 sm:$0xff]  }
  0x47   :  { %1912 = vmatpush1.bf16.msra.mxu1 %v3199_v12  ;;  %v3295_v12 = vld [vmem:[%s4744_s1 + $0x1c4] ss:$8 sps:$4 sm:$0xff]  }
  0x48   :  { %2215 = vmatpush1.bf16.msra.mxu0 %v3202_v13  ;;  %1913 = vmatprep.subr.bf16.mxu1 %v3207_v14  ;;  %v3299_v13 = vld [vmem:[%s4744_s1 + $0x4c4] ss:$8 sps:$4 sm:$0xff]   ;;  %v3293_v14 = vld [vmem:[%s4744_s1 + $0x1c0] ss:$8 sps:$4 sm:$0xff]  }
  0x49   :  { %2216 = vmatprep.subr.bf16.mxu0 %v3210_v15  ;;  %v2655_v15 = vcombine.low %v102_v2, %v102_v2  ;;  %v3368_v2 = vld [vmem:[%s4744_s1 + $0x250] ss:$8 sps:$4 sm:$0xff]  }
  0x4a   :  { %1851 = vmatmul.mubr.bf16.gmra.mrb[4].mxu1 %v3228_v20  ;;  %v3325_v20 = vld [vmem:[%s4745_s0 + $0x24] ss:$52 sps:$4 sm:$0xff]  }
  0x4b   :  { %2154 = vmatmul.mubr.bf16.gmra.mrb[4].mxu0 %v3224_v19  ;;  %1914 = vmatpush1.bf16.msra.mxu1 %v3205_v16  ;;  %v2649_v16 = vcombine.low %v99_v3, %v99_v3  ;;  %v3306_v19 = vld [vmem:[%s4744_s1 + $0x4d4] ss:$8 sps:$4 sm:$0xff]   ;;  %v4159_v3 = vld [vmem:[%s4744_s1 + $0x550] ss:$8 sps:$4 sm:$0xff]  }
  0x4c   :  { %2217 = vmatpush1.bf16.msra.mxu0 %v3208_v17  ;;  %1915 = vmatprep.subr.bf16.mxu1 %v3213_v18  ;;  %v3297_v17 = vld [vmem:[%s4744_s1 + $0x4c0] ss:$8 sps:$4 sm:$0xff]   ;;  %v3303_v18 = vld [vmem:[%s4744_s1 + $0x1d4] ss:$8 sps:$4 sm:$0xff]  }
  0x4d   :  { %2218 = vmatprep.subr.bf16.mxu0 %v3216_v21  ;;  %2163 = vmatprep.mubr.bf16.mxu0 %v3235_v22  ;;  %v3328_v21 = vld [vmem:[%s4745_s0 + $0xc] ss:$52 sps:$4 sm:$0xff]   ;;  %v3301_v22 = vld [vmem:[%s4744_s1 + $0x1d0] ss:$8 sps:$4 sm:$0xff]  }
  0x4e   :  { %1860 = vmatprep.mubr.bf16.mxu1 %v3237_v23  ;;  %v3304_v23 = vld [vmem:[%s4744_s1 + $0x4d0] ss:$8 sps:$4 sm:$0xff]  }
  0x4f   :  { %1916 = vmatpush1.bf16.msra.mxu1 %v3211_v24  ;;  %v3311_v24 = vld [vmem:[%s4744_s1 + $0x1e4] ss:$8 sps:$4 sm:$0xff]  }
  0x50   :  { %2219 = vmatpush1.bf16.msra.mxu0 %v3214_v25  ;;  %1917 = vmatprep.subr.bf16.mxu1 %v3223_v26  ;;  %v3315_v25 = vld [vmem:[%s4744_s1 + $0x4e4] ss:$8 sps:$4 sm:$0xff]   ;;  %v3309_v26 = vld [vmem:[%s4744_s1 + $0x1e0] ss:$8 sps:$4 sm:$0xff]  }
  0x51   :  { %2220 = vmatprep.subr.bf16.mxu0 %v3227_v27  ;;  %v3313_v27 = vld [vmem:[%s4744_s1 + $0x4e0] ss:$8 sps:$4 sm:$0xff]  }
  0x52   :  { %1861 = vmatmul.mubr.bf16.gmra.mrb[8].mxu1 %v3246_v32  ;;  %v3331_v32 = vld [vmem:[%s4744_s1 + $0x204] ss:$8 sps:$4 sm:$0xff]  }
  0x53   :  { %2164 = vmatmul.mubr.bf16.gmra.mrb[8].mxu0 %v3242_v31  ;;  %1918 = vmatpush1.bf16.msra.mxu1 %v3221_v28  ;;  %v3319_v28 = vld [vmem:[%s4744_s1 + $0x1f4] ss:$8 sps:$4 sm:$0xff]   ;;  %v3320_v31 = vld [vmem:[%s4744_s1 + $0x4f0] ss:$8 sps:$4 sm:$0xff]  }
  0x54   :  { %2221 = vmatpush1.bf16.msra.mxu0 %v3225_v29  ;;  %1919 = vmatprep.subr.bf16.mxu1 %v3231_v30  ;;  %v3322_v29 = vld [vmem:[%s4744_s1 + $0x4f4] ss:$8 sps:$4 sm:$0xff]   ;;  %v3317_v30 = vld [vmem:[%s4744_s1 + $0x1f0] ss:$8 sps:$4 sm:$0xff]  }
  0x55   :  { %2222 = vmatprep.subr.bf16.mxu0 %v3234_v33  ;;  %2173 = vmatprep.mubr.bf16.mxu0 %v3253_v34  ;;  %v4025_v33 = vld [vmem:[%s4744_s1 + $0x504] ss:$8 sps:$4 sm:$0xff]   ;;  %v3323_v34 = vld [vmem:[%s4745_s0 + $0x20] ss:$52 sps:$4 sm:$0xff]  }
  0x56   :  { %1870 = vmatprep.mubr.bf16.mxu1 %v3255_v35  ;;  %v3326_v35 = vld [vmem:[%s4745_s0 + $0x8] ss:$52 sps:$4 sm:$0xff]  }
  0x57   :  { %1920 = vmatpush1.bf16.msra.mxu1 %v3229_v36  ;;  %v3329_v36 = vld [vmem:[%s4744_s1 + $0x200] ss:$8 sps:$4 sm:$0xff]  }
  0x58   :  { %2223 = vmatpush1.bf16.msra.mxu0 %v3232_v37  ;;  %1921 = vmatprep.subr.bf16.mxu1 %v3241_v38  ;;  %v4039_v37 = vld [vmem:[%s4744_s1 + $0x500] ss:$8 sps:$4 sm:$0xff]   ;;  %v3337_v38 = vld [vmem:[%s4744_s1 + $0x214] ss:$8 sps:$4 sm:$0xff]  }
  0x59   :  { %2224 = vmatprep.subr.bf16.mxu0 %v3245_v39  ;;  %v4048_v39 = vld [vmem:[%s4744_s1 + $0x514] ss:$8 sps:$4 sm:$0xff]  }
  0x5a   :  { %1871 = vmatmul.mubr.bf16.gmra.mrb[12].mxu1 %v3264_v44  ;;  %v3345_v44 = vld [vmem:[%s4744_s1 + $0x224] ss:$8 sps:$4 sm:$0xff]  }
  0x5b   :  { %2174 = vmatmul.mubr.bf16.gmra.mrb[12].mxu0 %v3260_v43  ;;  %1922 = vmatpush1.bf16.msra.mxu1 %v3239_v40  ;;  %v3341_v40 = vld [vmem:[%s4745_s0 + $0x8c] ss:$52 sps:$4 sm:$0xff]   ;;  %v4063_v43 = vld [vmem:[%s4744_s1 + $0x510] ss:$8 sps:$4 sm:$0xff]  }
  0x5c   :  { %2225 = vmatpush1.bf16.msra.mxu0 %v3243_v41  ;;  %1923 = vmatprep.subr.bf16.mxu1 %v3249_v42  ;;  %v3356_v41 = vld [vmem:[%s4745_s0 + $0x74] ss:$52 sps:$4 sm:$0xff]   ;;  %v3335_v42 = vld [vmem:[%s4744_s1 + $0x210] ss:$8 sps:$4 sm:$0xff]  }
  0x5d   :  { %2226 = vmatprep.subr.bf16.mxu0 %v3252_v45  ;;  %2183 = vmatprep.mubr.bf16.mxu0 %v3271_v46  ;;  %v4072_v45 = vld [vmem:[%s4744_s1 + $0x524] ss:$8 sps:$4 sm:$0xff]   ;;  %v3343_v46 = vld [vmem:[%s4744_s1 + $0x220] ss:$8 sps:$4 sm:$0xff]  }
  0x5e   :  { %1880 = vmatprep.mubr.bf16.mxu1 %v3273_v47  ;;  %v3346_v47 = vld [vmem:[%s4745_s0 + $0x88] ss:$52 sps:$4 sm:$0xff]  }
  0x5f   :  { %1924 = vmatpush1.bf16.msra.mxu1 %v3247_v48  ;;  %v3360_v48 = vld [vmem:[%s4745_s0 + $0x70] ss:$52 sps:$4 sm:$0xff]  }
  0x60   :  { %2227 = vmatpush1.bf16.msra.mxu0 %v3250_v49  ;;  %1925 = vmatprep.subr.bf16.mxu1 %v3259_v50  ;;  %v4087_v49 = vld [vmem:[%s4744_s1 + $0x520] ss:$8 sps:$4 sm:$0xff]   ;;  %v3352_v50 = vld [vmem:[%s4744_s1 + $0x234] ss:$8 sps:$4 sm:$0xff]  }
  0x61   :  { %2228 = vmatprep.subr.bf16.mxu0 %v3263_v51  ;;  %v4096_v51 = vld [vmem:[%s4744_s1 + $0x534] ss:$8 sps:$4 sm:$0xff]  }
  0x62   :  { %1881 = vmatmul.mubr.bf16.gmra.mrb[16].mxu1 %v3282_v54  ;;  %v3350_v54 = vld [vmem:[%s4744_s1 + $0x230] ss:$8 sps:$4 sm:$0xff]  }
  0x63   :  { %2184 = vmatmul.mubr.bf16.gmra.mrb[16].mxu0 %v3278_v53  ;;  %1926 = vmatpush1.bf16.msra.mxu1 %v3257_v52  ;;  %v3358_v52 = vld [vmem:[%s4745_s0 + $0xf4] ss:$52 sps:$4 sm:$0xff]   ;;  %v3374_v53 = vld [vmem:[%s4745_s0 + $0xdc] ss:$52 sps:$4 sm:$0xff]  }
  0x64   :  { %2229 = vmatpush1.bf16.msra.mxu0 %v3261_v55  ;;  %1927 = vmatprep.subr.bf16.mxu1 %v3267_v56  ;;  %v4111_v55 = vld [vmem:[%s4744_s1 + $0x530] ss:$8 sps:$4 sm:$0xff]   ;;  %v3363_v56 = vld [vmem:[%s4744_s1 + $0x244] ss:$8 sps:$4 sm:$0xff]  }
  0x65   :  { %2230 = vmatprep.subr.bf16.mxu0 %v3270_v57  ;;  %2193 = vmatprep.mubr.bf16.mxu0 %v3289_v58  ;;  %v4120_v57 = vld [vmem:[%s4744_s1 + $0x544] ss:$8 sps:$4 sm:$0xff]   ;;  %v3361_v58 = vld [vmem:[%s4744_s1 + $0x240] ss:$8 sps:$4 sm:$0xff]  }
  0x66   :  { %1890 = vmatprep.mubr.bf16.mxu1 %v3291_v60  ;;  %v3378_v60 = vld [vmem:[%s4745_s0 + $0xd8] ss:$52 sps:$4 sm:$0xff]  }
  0x67   :  { %1928 = vmatpush1.bf16.msra.mxu1 %v3265_v59  ;;  %v3364_v59 = vld [vmem:[%s4745_s0 + $0xf0] ss:$52 sps:$4 sm:$0xff]  }
  0x68   :  { %2231 = vmatpush1.bf16.msra.mxu0 %v3268_v61  ;;  %1929 = vmatprep.subr.bf16.mxu1 %v3277_v62  ;;  %v4135_v61 = vld [vmem:[%s4744_s1 + $0x540] ss:$8 sps:$4 sm:$0xff]   ;;  %v3370_v62 = vld [vmem:[%s4744_s1 + $0x254] ss:$8 sps:$4 sm:$0xff]  }
  0x69   :  { %2232 = vmatprep.subr.bf16.mxu0 %v3281_v63  ;;  %v4144_v63 = vld [vmem:[%s4744_s1 + $0x554] ss:$8 sps:$4 sm:$0xff]  }
  0x6a   :  { %1891 = vmatmul.mubr.bf16.gmra.mrb[20].mxu1 %v3300_v1  ;;  %v3392_v1 = vld [vmem:[%s4745_s0 + $0x144] ss:$52 sps:$4 sm:$0xff]  }
  0x6b   :  { %2194 = vmatmul.mubr.bf16.gmra.mrb[20].mxu0 %v3296_v0  ;;  %1930 = vmatpush1.bf16.msra.mxu1 %v3275_v4  ;;  %v3376_v0 = vld [vmem:[%s4745_s0 + $0x15c] ss:$52 sps:$4 sm:$0xff]   ;;  %v3381_v4 = vld [vmem:[%s4744_s1 + $0x264] ss:$8 sps:$4 sm:$0xff]  }
  0x6c   :  { %2233 = vmatpush1.bf16.msra.mxu0 %v3279_v5  ;;  %1931 = vmatprep.subr.bf16.mxu1 %v3285_v6  ;;  %v4168_v5 = vld [vmem:[%s4744_s1 + $0x564] ss:$8 sps:$4 sm:$0xff]   ;;  %v3379_v6 = vld [vmem:[%s4744_s1 + $0x260] ss:$8 sps:$4 sm:$0xff]  }
  0x6d   :  { %2234 = vmatprep.subr.bf16.mxu0 %v3288_v7  ;;  %2203 = vmatprep.mubr.bf16.mxu0 %v2656_v8  ;;  %v3382_v7 = vld [vmem:[%s4745_s0 + $0x158] ss:$52 sps:$4 sm:$0xff]   ;;  %v4179_v8 = vld [vmem:[%s4744_s1 + $0x560] ss:$8 sps:$4 sm:$0xff]  }
  0x6e   :  { %1900 = vmatprep.mubr.bf16.mxu1 %v2650_v9  ;;  %v3396_v9 = vld [vmem:[%s4745_s0 + $0x140] ss:$52 sps:$4 sm:$0xff]  }
  0x6f   :  { %1932 = vmatpush1.bf16.msra.mxu1 %v3283_v10  ;;  %v3388_v10 = vld [vmem:[%s4744_s1 + $0x274] ss:$8 sps:$4 sm:$0xff]  }
  0x70   :  { %2235 = vmatpush1.bf16.msra.mxu0 %v3286_v11  ;;  %1933 = vmatprep.subr.bf16.mxu1 %v3295_v12  ;;  %v4191_v11 = vld [vmem:[%s4744_s1 + $0x574] ss:$8 sps:$4 sm:$0xff]   ;;  %v3394_v12 = vld [vmem:[%s4745_s0 + $0x1c4] ss:$52 sps:$4 sm:$0xff]  }
  0x71   :  { %2236 = vmatprep.subr.bf16.mxu0 %v3299_v13  ;;  %v3410_v13 = vld [vmem:[%s4745_s0 + $0x1ac] ss:$52 sps:$4 sm:$0xff]  }
  0x72   :  { %1901 = vmatmul.mubr.bf16.gmra.mrb[24].mxu1 %v2649_v16  ;;  %v3399_v16 = vld [vmem:[%s4744_s1 + $0x284] ss:$8 sps:$4 sm:$0xff]  }
  0x73   :  { %2204 = vmatmul.mubr.bf16.gmra.mrb[24].mxu0 %v2655_v15  ;;  %1934 = vmatpush1.bf16.msra.mxu1 %v3293_v14  ;;  %v3386_v14 = vld [vmem:[%s4744_s1 + $0x270] ss:$8 sps:$4 sm:$0xff]  }
  0x74   :  { %2237 = vmatpush1.bf16.msra.mxu0 %v3297_v17  ;;  %1935 = vmatprep.subr.bf16.mxu1 %v3303_v18  ;;  %v4206_v15 = vld [vmem:[%s4744_s1 + $0x570] ss:$8 sps:$4 sm:$0xff]   ;;  %v4216_v17 = vld [vmem:[%s4744_s1 + $0x584] ss:$8 sps:$4 sm:$0xff]   ;;  %v3397_v18 = vld [vmem:[%s4744_s1 + $0x280] ss:$8 sps:$4 sm:$0xff]  }
  0x75   :  { %2238 = vmatprep.subr.bf16.mxu0 %v3306_v19  ;;  %2244 = vmatprep.mubr.bf16.mxu0 %v3325_v20  ;;  %v3400_v19 = vld [vmem:[%s4745_s0 + $0x1c0] ss:$52 sps:$4 sm:$0xff]  }
  0x76   :  { %1941 = vmatprep.mubr.bf16.mxu1 %v3328_v21  ;;  %v4227_v20 = vld [vmem:[%s4744_s1 + $0x580] ss:$8 sps:$4 sm:$0xff]  }
  0x77   :  { %1936 = vmatpush1.bf16.msra.mxu1 %v3301_v22  ;;  %v3414_v21 = vld [vmem:[%s4745_s0 + $0x1a8] ss:$52 sps:$4 sm:$0xff]  }
  0x78   :  { %2239 = vmatpush1.bf16.msra.mxu0 %v3304_v23  ;;  %1937 = vmatprep.subr.bf16.mxu1 %v3311_v24  ;;  %v3406_v22 = vld [vmem:[%s4744_s1 + $0x294] ss:$8 sps:$4 sm:$0xff]   ;;  %v3412_v24 = vld [vmem:[%s4745_s0 + $0x22c] ss:$52 sps:$4 sm:$0xff]  }
  0x79   :  { %2240 = vmatprep.subr.bf16.mxu0 %v3315_v25  ;;  %v4240_v23 = vld [vmem:[%s4744_s1 + $0x594] ss:$8 sps:$4 sm:$0xff]  }
  0x7a   :  { %v3428_v25 = vld [vmem:[%s4745_s0 + $0x214] ss:$52 sps:$4 sm:$0xff]  }
  0x7b   :  { %1938 = vmatpush1.bf16.msra.mxu1 %v3309_v26  ;;  %v3404_v26 = vld [vmem:[%s4744_s1 + $0x290] ss:$8 sps:$4 sm:$0xff]  }
  0x7c   :  { %2241 = vmatpush1.bf16.msra.mxu0 %v3313_v27  ;;  %1939 = vmatprep.subr.bf16.mxu1 %v3319_v28  ;;  %v4254_v27 = vld [vmem:[%s4744_s1 + $0x590] ss:$8 sps:$4 sm:$0xff]   ;;  %v3417_v28 = vld [vmem:[%s4744_s1 + $0x2a4] ss:$8 sps:$4 sm:$0xff]  }
  0x7d   :  { %2242 = vmatprep.subr.bf16.mxu0 %v3322_v29  ;;  %v3418_v29 = vld [vmem:[%s4745_s0 + $0x228] ss:$52 sps:$4 sm:$0xff]  }
  0x7f   :  { %1940 = vmatpush1.bf16.msra.mxu1 %v3317_v30  ;;  %v4267_v30 = vld [vmem:[%s4744_s1 + $0x5a4] ss:$8 sps:$4 sm:$0xff]  }
  0x80   :  { %2243 = vmatpush1.bf16.msra.mxu0 %v3320_v31  ;;  %2010 = vmatprep.subr.bf16.mxu1 %v3331_v32  ;;  %v3415_v31 = vld [vmem:[%s4744_s1 + $0x2a0] ss:$8 sps:$4 sm:$0xff]   ;;  %v103_v32 = vld [vmem:[%s4745_s0 + $0x290] sm:$0xff] }
  0x81   :  { %2313 = vmatprep.subr.bf16.mxu0 %v4025_v33 }
  0x82   :  { %1942 = vmatmul.mubr.bf16.vlgmr.msra.gmra.mrb[0].mxu1 %v3326_v35  ;;  %v100_v35 = vld [vmem:[%s4745_s0 + $0x278] sm:$0xff] }
  0x83   :  { %2245 = vmatmul.mubr.bf16.vlgmr.msra.gmra.mrb[0].mxu0 %v3323_v34  ;;  %2011 = vmatpush1.bf16.msra.mxu1 %v3329_v36  ;;  %v3431_v34 = vld [vmem:[%s4745_s0 + $0x210] ss:$52 sps:$4 sm:$0xff]   ;;  %v4285_v36 = vld [vmem:[%s4744_s1 + $0x5a0] ss:$8 sps:$4 sm:$0xff]  }
  0x84   :  { %2314 = vmatpush1.bf16.msra.mxu0 %v4039_v37  ;;  %2012 = vmatprep.subr.bf16.mxu1 %v3337_v38  ;;  %v3424_v38 = vld [vmem:[%s4744_s1 + $0x2b4] ss:$8 sps:$4 sm:$0xff]  }
  0x85   :  { %2315 = vmatprep.subr.bf16.mxu0 %v4048_v39  ;;  %2254 = vmatprep.mubr.bf16.mxu0 %v3341_v40  ;;  %v4294_v40 = vld [vmem:[%s4744_s1 + $0x5b4] ss:$8 sps:$4 sm:$0xff]  }
  0x86   :  { %1951 = vmatprep.mubr.bf16.mxu1 %v3356_v41  ;;  %v2658_v41 = vcombine.high %v103_v32, %v103_v32 }
  0x87   :  { %2013 = vmatpush1.bf16.msra.mxu1 %v3335_v42  ;;  %v2652_v42 = vcombine.high %v100_v35, %v100_v35 }
  0x88   :  { %2316 = vmatpush1.bf16.msra.mxu0 %v4063_v43  ;;  %2014 = vmatprep.subr.bf16.mxu1 %v3345_v44  ;;  %v3422_v44 = vld [vmem:[%s4744_s1 + $0x2b0] ss:$8 sps:$4 sm:$0xff]  }
  0x89   :  { %2317 = vmatprep.subr.bf16.mxu0 %v4072_v45 }
  0x8a   :  { %1952 = vmatmul.mubr.bf16.gmra.mrb[4].mxu1 %v3360_v48  ;;  %v4312_v48 = vld [vmem:[%s4744_s1 + $0x5c4] ss:$8 sps:$4 sm:$0xff]  }
  0x8b   :  { %2255 = vmatmul.mubr.bf16.gmra.mrb[4].mxu0 %v3346_v47  ;;  %2015 = vmatpush1.bf16.msra.mxu1 %v3343_v46  ;;  %v4302_v46 = vld [vmem:[%s4744_s1 + $0x5b0] ss:$8 sps:$4 sm:$0xff]   ;;  %v3434_v47 = vld [vmem:[%s4744_s1 + $0x2c4] ss:$8 sps:$4 sm:$0xff]  }
  0x8c   :  { %2318 = vmatpush1.bf16.msra.mxu0 %v4087_v49  ;;  %2016 = vmatprep.subr.bf16.mxu1 %v3352_v50  ;;  %v3432_v50 = vld [vmem:[%s4744_s1 + $0x2c0] ss:$8 sps:$4 sm:$0xff]  }
  0x8d   :  { %2319 = vmatprep.subr.bf16.mxu0 %v4096_v51  ;;  %2264 = vmatprep.mubr.bf16.mxu0 %v3358_v52  ;;  %v2657_v52 = vcombine.low %v103_v32, %v103_v32  ;;  %v3494_v32 = vld [vmem:[%s4744_s1 + $0x654] ss:$8 sps:$4 sm:$0xff]  }
  0x8e   :  { %1961 = vmatprep.mubr.bf16.mxu1 %v3374_v53  ;;  %v4320_v53 = vld [vmem:[%s4744_s1 + $0x5c0] ss:$8 sps:$4 sm:$0xff]  }
  0x8f   :  { %2017 = vmatpush1.bf16.msra.mxu1 %v3350_v54  ;;  %v3441_v54 = vld [vmem:[%s4744_s1 + $0x2d4] ss:$8 sps:$4 sm:$0xff]  }
  0x90   :  { %2320 = vmatpush1.bf16.msra.mxu0 %v4111_v55  ;;  %2018 = vmatprep.subr.bf16.mxu1 %v3363_v56  ;;  %v2651_v56 = vcombine.low %v100_v35, %v100_v35  ;;  %v3503_v35 = vld [vmem:[%s4744_s1 + $0x664] ss:$8 sps:$4 sm:$0xff]  }
  0x91   :  { %2321 = vmatprep.subr.bf16.mxu0 %v4120_v57 }
  0x92   :  { %1962 = vmatmul.mubr.bf16.gmra.mrb[8].mxu1 %v3378_v60  ;;  %v3464_v60 = vld [vmem:[%s4745_s0 + $0x2c] ss:$52 sps:$4 sm:$0xff]  }
  0x93   :  { %2265 = vmatmul.mubr.bf16.gmra.mrb[8].mxu0 %v3364_v59  ;;  %2019 = vmatpush1.bf16.msra.mxu1 %v3361_v58  ;;  %v4329_v58 = vld [vmem:[%s4744_s1 + $0x5d4] ss:$8 sps:$4 sm:$0xff]  }
  0x94   :  { %2322 = vmatpush1.bf16.msra.mxu0 %v4135_v61  ;;  %2020 = vmatprep.subr.bf16.mxu1 %v3370_v62  ;;  %v3461_v59 = vld [vmem:[%s4745_s0 + $0x14] ss:$52 sps:$4 sm:$0xff]   ;;  %v3439_v62 = vld [vmem:[%s4744_s1 + $0x2d0] ss:$8 sps:$4 sm:$0xff]  }
  0x95   :  { %2323 = vmatprep.subr.bf16.mxu0 %v4144_v63  ;;  %2274 = vmatprep.mubr.bf16.mxu0 %v3376_v0  ;;  %v4344_v0 = vld [vmem:[%s4744_s1 + $0x5d0] ss:$8 sps:$4 sm:$0xff]  }
  0x96   :  { %1971 = vmatprep.mubr.bf16.mxu1 %v3392_v1  ;;  %v3449_v1 = vld [vmem:[%s4744_s1 + $0x2e4] ss:$8 sps:$4 sm:$0xff]  }
  0x97   :  { %2021 = vmatpush1.bf16.msra.mxu1 %v3368_v2  ;;  %v4354_v2 = vld [vmem:[%s4744_s1 + $0x5e4] ss:$8 sps:$4 sm:$0xff]  }
  0x98   :  { %2324 = vmatpush1.bf16.msra.mxu0 %v4159_v3  ;;  %2022 = vmatprep.subr.bf16.mxu1 %v3381_v4  ;;  %v3447_v4 = vld [vmem:[%s4744_s1 + $0x2e0] ss:$8 sps:$4 sm:$0xff]  }
  0x99   :  { %2325 = vmatprep.subr.bf16.mxu0 %v4168_v5 }
  0x9a   :  { %1972 = vmatmul.mubr.bf16.gmra.mrb[12].mxu1 %v3396_v9  ;;  %v4372_v9 = vld [vmem:[%s4744_s1 + $0x5f4] ss:$8 sps:$4 sm:$0xff]  }
  0x9b   :  { %2275 = vmatmul.mubr.bf16.gmra.mrb[12].mxu0 %v3382_v7  ;;  %2023 = vmatpush1.bf16.msra.mxu1 %v3379_v6  ;;  %v4362_v6 = vld [vmem:[%s4744_s1 + $0x5e0] ss:$8 sps:$4 sm:$0xff]   ;;  %v3455_v7 = vld [vmem:[%s4744_s1 + $0x2f4] ss:$8 sps:$4 sm:$0xff]  }
  0x9c   :  { %2326 = vmatpush1.bf16.msra.mxu0 %v4179_v8  ;;  %2024 = vmatprep.subr.bf16.mxu1 %v3388_v10  ;;  %v3453_v10 = vld [vmem:[%s4744_s1 + $0x2f0] ss:$8 sps:$4 sm:$0xff]  }
  0x9d   :  { %2327 = vmatprep.subr.bf16.mxu0 %v4191_v11  ;;  %2284 = vmatprep.mubr.bf16.mxu0 %v3394_v12  ;;  %v4381_v12 = vld [vmem:[%s4744_s1 + $0x5f0] ss:$8 sps:$4 sm:$0xff]  }
  0x9e   :  { %1981 = vmatprep.mubr.bf16.mxu1 %v3410_v13  ;;  %v3467_v13 = vld [vmem:[%s4744_s1 + $0x604] ss:$8 sps:$4 sm:$0xff]  }
  0x9f   :  { %2025 = vmatpush1.bf16.msra.mxu1 %v3386_v14  ;;  %v3459_v14 = vld [vmem:[%s4745_s0 + $0x10] ss:$52 sps:$4 sm:$0xff]  }
  0xa0   :  { %2328 = vmatpush1.bf16.msra.mxu0 %v4206_v15  ;;  %2026 = vmatprep.subr.bf16.mxu1 %v3399_v16  ;;  %v3462_v16 = vld [vmem:[%s4745_s0 + $0x28] ss:$52 sps:$4 sm:$0xff]  }
  0xa1   :  { %2329 = vmatprep.subr.bf16.mxu0 %v4216_v17 }
  0xa2   :  { %1982 = vmatmul.mubr.bf16.gmra.mrb[16].mxu1 %v3414_v21  ;;  %v3471_v21 = vld [vmem:[%s4745_s0 + $0x7c] ss:$52 sps:$4 sm:$0xff]  }
  0xa3   :  { %2285 = vmatmul.mubr.bf16.gmra.mrb[16].mxu0 %v3400_v19  ;;  %2027 = vmatpush1.bf16.msra.mxu1 %v3397_v18  ;;  %v3465_v18 = vld [vmem:[%s4744_s1 + $0x600] ss:$8 sps:$4 sm:$0xff]   ;;  %v3470_v19 = vld [vmem:[%s4744_s1 + $0x614] ss:$8 sps:$4 sm:$0xff]  }
  0xa4   :  { %2330 = vmatpush1.bf16.msra.mxu0 %v4227_v20  ;;  %2028 = vmatprep.subr.bf16.mxu1 %v3406_v22  ;;  %v3473_v22 = vld [vmem:[%s4745_s0 + $0x94] ss:$52 sps:$4 sm:$0xff]  }
  0xa5   :  { %2331 = vmatprep.subr.bf16.mxu0 %v4240_v23  ;;  %2294 = vmatprep.mubr.bf16.mxu0 %v3412_v24  ;;  %v3479_v24 = vld [vmem:[%s4744_s1 + $0x624] ss:$8 sps:$4 sm:$0xff]  }
  0xa6   :  { %1991 = vmatprep.mubr.bf16.mxu1 %v3428_v25  ;;  %v3475_v25 = vld [vmem:[%s4745_s0 + $0x78] ss:$52 sps:$4 sm:$0xff]  }
  0xa7   :  { %2029 = vmatpush1.bf16.msra.mxu1 %v3404_v26  ;;  %v3482_v26 = vld [vmem:[%s4744_s1 + $0x634] ss:$8 sps:$4 sm:$0xff]  }
  0xa8   :  { %2332 = vmatpush1.bf16.msra.mxu0 %v4254_v27  ;;  %2030 = vmatprep.subr.bf16.mxu1 %v3417_v28  ;;  %v3483_v28 = vld [vmem:[%s4745_s0 + $0xe4] ss:$52 sps:$4 sm:$0xff]  }
  0xa9   :  { %2333 = vmatprep.subr.bf16.mxu0 %v4267_v30 }
  0xaa   :  { %1992 = vmatmul.mubr.bf16.gmra.mrb[20].mxu1 %v3431_v34  ;;  %v3495_v34 = vld [vmem:[%s4745_s0 + $0x14c] ss:$52 sps:$4 sm:$0xff]  }
  0xab   :  { %2295 = vmatmul.mubr.bf16.gmra.mrb[20].mxu0 %v3418_v29  ;;  %2031 = vmatpush1.bf16.msra.mxu1 %v3415_v31  ;;  %v3491_v29 = vld [vmem:[%s4744_s1 + $0x644] ss:$8 sps:$4 sm:$0xff]   ;;  %v3487_v31 = vld [vmem:[%s4745_s0 + $0xe0] ss:$52 sps:$4 sm:$0xff]  }
  0xac   :  { %2334 = vmatpush1.bf16.msra.mxu0 %v4285_v36  ;;  %2032 = vmatprep.subr.bf16.mxu1 %v3424_v38  ;;  %v3499_v38 = vld [vmem:[%s4745_s0 + $0x148] ss:$52 sps:$4 sm:$0xff]  }
  0xad   :  { %2335 = vmatprep.subr.bf16.mxu0 %v4294_v40  ;;  %2304 = vmatprep.mubr.bf16.mxu0 %v2658_v41  ;;  %v3506_v41 = vld [vmem:[%s4744_s1 + $0x674] ss:$8 sps:$4 sm:$0xff]  }
  0xae   :  { %2001 = vmatprep.mubr.bf16.mxu1 %v2652_v42  ;;  %v3507_v42 = vld [vmem:[%s4745_s0 + $0x1b4] ss:$52 sps:$4 sm:$0xff]  }
  0xaf   :  { %2033 = vmatpush1.bf16.msra.mxu1 %v3422_v44  ;;  %v3509_v44 = vld [vmem:[%s4745_s0 + $0x1b0] ss:$52 sps:$4 sm:$0xff]  }
  0xb0   :  { %2336 = vmatpush1.bf16.msra.mxu0 %v4302_v46  ;;  %2034 = vmatprep.subr.bf16.mxu1 %v3434_v47  ;;  %v3510_v47 = vld [vmem:[%s4745_s0 + $0x30] ss:$52 sps:$4 sm:$0xff]  }
  0xb1   :  { %2337 = vmatprep.subr.bf16.mxu0 %v4312_v48 }
  0xb2   :  { %2002 = vmatmul.mubr.bf16.gmra.mrb[24].mxu1 %v2651_v56 }
  0xb3   :  { %2305 = vmatmul.mubr.bf16.gmra.mrb[24].mxu0 %v2657_v52  ;;  %2035 = vmatpush1.bf16.msra.mxu1 %v3432_v50  ;;  %v3525_v52 = vld [vmem:[%s4745_s0 + $0x230] ss:$52 sps:$4 sm:$0xff]  }
  0xb4   :  { %2338 = vmatpush1.bf16.msra.mxu0 %v4320_v53  ;;  %2036 = vmatprep.subr.bf16.mxu1 %v3441_v54 }
  0xb5   :  { %2339 = vmatprep.subr.bf16.mxu0 %v4329_v58  ;;  %2042 = vmatprep.mubr.bf16.mxu1 %v3461_v59 }
  0xb6   :  { %2345 = vmatprep.mubr.bf16.mxu0 %v3464_v60 }
  0xb7   :  { %2037 = vmatpush1.bf16.msra.mxu1 %v3439_v62 }
  0xb8   :  { %2340 = vmatpush1.bf16.msra.mxu0 %v4344_v0  ;;  %2038 = vmatprep.subr.bf16.mxu1 %v3449_v1 }
  0xb9   :  { %2341 = vmatprep.subr.bf16.mxu0 %v4354_v2 }
  0xbb   :  { %2039 = vmatpush1.bf16.msra.mxu1 %v3447_v4 }
  0xbc   :  { %2342 = vmatpush1.bf16.msra.mxu0 %v4362_v6  ;;  %2040 = vmatprep.subr.bf16.mxu1 %v3455_v7 }
  0xbd   :  { %2343 = vmatprep.subr.bf16.mxu0 %v4372_v9 }
  0xbf   :  { %2041 = vmatpush1.bf16.msra.mxu1 %v3453_v10 }
  0xc0   :  { %2344 = vmatpush1.bf16.msra.mxu0 %v4381_v12  ;;  %2870 = vmatprep.subr.bf16.mxu1 %v4025_v33  ;;  %v3468_v33 = vld [vmem:[%s4744_s1 + $0x610] ss:$8 sps:$4 sm:$0xff]  }
  0xc1   :  { %2414 = vmatprep.subr.bf16.mxu0 %v3467_v13 }
  0xc2   :  { %2043 = vmatmul.mubr.bf16.vlgmr.msra.gmra.mrb[0].mxu1 %v3459_v14 }
  0xc3   :  { %2346 = vmatmul.mubr.bf16.vlgmr.msra.gmra.mrb[0].mxu0 %v3462_v16  ;;  %2886 = vmatpush1.bf16.msra.mxu1 %v4039_v37  ;;  %v3476_v37 = vld [vmem:[%s4745_s0 + $0x90] ss:$52 sps:$4 sm:$0xff]  }
  0xc4   :  { %2415 = vmatpush1.bf16.msra.mxu0 %v3465_v18  ;;  %2871 = vmatprep.subr.bf16.mxu1 %v4048_v39  ;;  %v3477_v39 = vld [vmem:[%s4744_s1 + $0x620] ss:$8 sps:$4 sm:$0xff]  }
  0xc5   :  { %2416 = vmatprep.subr.bf16.mxu0 %v3470_v19  ;;  %2052 = vmatprep.mubr.bf16.mxu1 %v3471_v21 }
  0xc6   :  { %2355 = vmatprep.mubr.bf16.mxu0 %v3473_v22 }
  0xc7   :  { %2887 = vmatpush1.bf16.msra.mxu1 %v4063_v43  ;;  %v3485_v43 = vld [vmem:[%s4745_s0 + $0xfc] ss:$52 sps:$4 sm:$0xff]  }
  0xc8   :  { %2417 = vmatpush1.bf16.msra.mxu0 %v3468_v33  ;;  %2872 = vmatprep.subr.bf16.mxu1 %v4072_v45  ;;  %v3480_v45 = vld [vmem:[%s4744_s1 + $0x630] ss:$8 sps:$4 sm:$0xff]  }
  0xc9   :  { %2418 = vmatprep.subr.bf16.mxu0 %v3479_v24  ;;  %v316_v24 = vlaneseq }
  0xca   :  { %2053 = vmatmul.mubr.bf16.gmra.mrb[4].mxu1 %v3475_v25 }
  0xcb   :  { %2356 = vmatmul.mubr.bf16.gmra.mrb[4].mxu0 %v3476_v37  ;;  %2888 = vmatpush1.bf16.msra.mxu1 %v4087_v49  ;;  %v3488_v49 = vld [vmem:[%s4745_s0 + $0xf8] ss:$52 sps:$4 sm:$0xff]  }
  0xcc   :  { %2419 = vmatpush1.bf16.msra.mxu0 %v3477_v39  ;;  %2873 = vmatprep.subr.bf16.mxu1 %v4096_v51  ;;  %v3489_v51 = vld [vmem:[%s4744_s1 + $0x640] ss:$8 sps:$4 sm:$0xff]  }
  0xcd   :  { %2420 = vmatprep.subr.bf16.mxu0 %v3482_v26  ;;  %2062 = vmatprep.mubr.bf16.mxu1 %v3483_v28  ;;  %v317_v26 = vshrl.u32 %v316_v24, 7 }
  0xce   :  { %2365 = vmatprep.mubr.bf16.mxu0 %v3485_v43 }
  0xcf   :  { %2889 = vmatpush1.bf16.msra.mxu1 %v4111_v55  ;;  %v3497_v55 = vld [vmem:[%s4745_s0 + $0x164] ss:$52 sps:$4 sm:$0xff]   ;;  %v318_v43 = vsub.s32 0, %v317_v26 }
  0xd0   :  { %2421 = vmatpush1.bf16.msra.mxu0 %v3480_v45  ;;  %2874 = vmatprep.subr.bf16.mxu1 %v4120_v57  ;;  %v3492_v57 = vld [vmem:[%s4744_s1 + $0x650] ss:$8 sps:$4 sm:$0xff]   ;;  %v314_v45 = vld [vmem:[%s4746_s2] sm:$0x3] }
  0xd1   :  { %2422 = vmatprep.subr.bf16.mxu0 %v3491_v29  ;;  %v322_v29 = vsub.s32 1, %v317_v26 }
  0xd2   :  { %2063 = vmatmul.mubr.bf16.gmra.mrb[8].mxu1 %v3487_v31 }
  0xd3   :  { %2366 = vmatmul.mubr.bf16.gmra.mrb[8].mxu0 %v3488_v49  ;;  %2890 = vmatpush1.bf16.msra.mxu1 %v4135_v61  ;;  %v3500_v61 = vld [vmem:[%s4745_s0 + $0x160] ss:$52 sps:$4 sm:$0xff]  }
  0xd4   :  { %2423 = vmatpush1.bf16.msra.mxu0 %v3489_v51  ;;  %2875 = vmatprep.subr.bf16.mxu1 %v4144_v63  ;;  %v3501_v63 = vld [vmem:[%s4744_s1 + $0x660] ss:$8 sps:$4 sm:$0xff]  }
  0xd5   :  { %2424 = vmatprep.subr.bf16.mxu0 %v3494_v32  ;;  %2072 = vmatprep.mubr.bf16.mxu1 %v3495_v34  ;;  %v4589_v32 = vrot.slane %v314_v45, %v318_v43 }
  0xd6   :  { %2375 = vmatprep.mubr.bf16.mxu0 %v3497_v55  ;;  %v4593_v55 = vrot.slane %v314_v45, %v322_v29 }
  0xd7   :  { %2891 = vmatpush1.bf16.msra.mxu1 %v4159_v3  ;;  %v3504_v3 = vld [vmem:[%s4744_s1 + $0x670] ss:$8 sps:$4 sm:$0xff]  }
  0xd8   :  { %2425 = vmatpush1.bf16.msra.mxu0 %v3492_v57  ;;  %2876 = vmatprep.subr.bf16.mxu1 %v4168_v5  ;;  %v3530_v5 = vmov 0  }
  0xd9   :  { %2426 = vmatprep.subr.bf16.mxu0 %v3503_v35 }
  0xda   :  { %2073 = vmatmul.mubr.bf16.gmra.mrb[12].mxu1 %v3499_v38 }
  0xdb   :  { %2376 = vmatmul.mubr.bf16.gmra.mrb[12].mxu0 %v3500_v61  ;;  %2892 = vmatpush1.bf16.msra.mxu1 %v4179_v8  ;;  %v3511_v8 = vld [vmem:[%s4745_s0 + $0x21c] ss:$52 sps:$4 sm:$0xff]  }
  0xdc   :  { %2427 = vmatpush1.bf16.msra.mxu0 %v3501_v63  ;;  %2877 = vmatprep.subr.bf16.mxu1 %v4191_v11  ;;  %v101_v11 = vld [vmem:[%s4745_s0 + $0x280] sm:$0xff] }
  0xdd   :  { %2428 = vmatprep.subr.bf16.mxu0 %v3506_v41  ;;  %2082 = vmatprep.mubr.bf16.mxu1 %v3507_v42  ;;  %v2654_v50 = vcombine.high %v101_v11, %v101_v11 }
  0xde   :  { %2446 = vmatprep.mubr.bf16.mxu0 %v3530_v5 }
  0xdf   :  { %2893 = vmatpush1.bf16.msra.mxu1 %v4206_v15  ;;  %v3513_v15 = vld [vmem:[%s4745_s0 + $0x218] ss:$52 sps:$4 sm:$0xff]  }
  0xe0   :  { %2429 = vmatpush1.bf16.msra.mxu0 %v3504_v3  ;;  %2878 = vmatprep.subr.bf16.mxu1 %v4216_v17  ;;  %v3514_v17 = vld [vmem:[%s4745_s0 + $0x98] ss:$52 sps:$4 sm:$0xff]  }
  0xe2   :  { %2083 = vmatmul.mubr.bf16.gmra.mrb[16].mxu1 %v3509_v44 }
  0xe3   :  { %2447 = vmatmul.mubr.bf16.vlgmr.msra.gmra.mrb[0].mxu0 %v3510_v47  ;;  %2894 = vmatpush1.bf16.msra.mxu1 %v4227_v20  ;;  %v2653_v20 = vcombine.low %v101_v11, %v101_v11 }
  0xe4   :  { %2092 = vmatprep.mubr.bf16.mxu1 %v3511_v8  ;;  %2879 = vmatprep.subr.bf16.mxu1 %v4240_v23  ;;  %v3517_v23 = vld [vmem:[%s4745_s0 + $0x100] ss:$52 sps:$4 sm:$0xff]  }
  0xe5   :  { %2456 = vmatprep.mubr.bf16.mxu0 %v3530_v5 }
  0xe7   :  { %2895 = vmatpush1.bf16.msra.mxu1 %v4254_v27  ;;  %v3521_v27 = vld [vmem:[%s4745_s0 + $0x1cc] ss:$52 sps:$4 sm:$0xff]  }
  0xe8   :  { %2880 = vmatprep.subr.bf16.mxu1 %v4267_v30  ;;  %v3518_v30 = vld [vmem:[%s4745_s0 + $0x168] ss:$52 sps:$4 sm:$0xff]  }
  0xea   :  { %2093 = vmatmul.mubr.bf16.gmra.mrb[20].mxu1 %v3513_v15 }
  0xeb   :  { %2457 = vmatmul.mubr.bf16.gmra.mrb[4].mxu0 %v3514_v17  ;;  %2896 = vmatpush1.bf16.msra.mxu1 %v4285_v36  ;;  %v3519_v36 = vld [vmem:[%s4745_s0 + $0x1c8] ss:$52 sps:$4 sm:$0xff]  }
  0xec   :  { %2102 = vmatprep.mubr.bf16.mxu1 %v2654_v50  ;;  %2881 = vmatprep.subr.bf16.mxu1 %v4294_v40  ;;  %v3522_v40 = vld [vmem:[%s4745_s0 + $0x1d0] ss:$52 sps:$4 sm:$0xff]  }
  0xed   :  { %2466 = vmatprep.mubr.bf16.mxu0 %v3530_v5 }
  0xef   :  { %2897 = vmatpush1.bf16.msra.mxu1 %v4302_v46  ;;  %v3523_v46 = vld [vmem:[%s4745_s0 + $0x234] ss:$52 sps:$4 sm:$0xff]  }
  0xf0   :  { %2882 = vmatprep.subr.bf16.mxu1 %v4312_v48  ;;  %v104_v48 = vld [vmem:[%s4745_s0 + $0x298] sm:$0xff] }
  0xf1   :  { %v2660_v54 = vcombine.high %v104_v48, %v104_v48  ;;  %v2659_v56 = vcombine.low %v104_v48, %v104_v48 }
  0xf2   :  { %2103 = vmatmul.mubr.bf16.gmra.mrb[24].mxu1 %v2653_v20 }
  0xf3   :  { %2467 = vmatmul.mubr.bf16.gmra.mrb[8].mxu0 %v3517_v23  ;;  %2898 = vmatpush1.bf16.msra.mxu1 %v4320_v53  ;;  %v3526_v53 = vld [vmem:[%s4745_s0 + $0x238] ss:$52 sps:$4 sm:$0xff]  }
  0xf4   :  { %2476 = vmatprep.mubr.bf16.mxu0 %v3530_v5  ;;  %2883 = vmatprep.subr.bf16.mxu1 %v4329_v58  ;;  %v3529_v58 = vld [vmem:[%s4745_s0 + $0x2a0] ss:$0 sps:$4 sm:$0xff]  }
  0xf5   :  { %2385 = vmatprep.mubr.bf16.mxu1 %v3521_v27 }
  0xf7   :  { %2899 = vmatpush1.bf16.msra.mxu1 %v4344_v0 }
  0xf8   :  { %2884 = vmatprep.subr.bf16.mxu1 %v4354_v2 }
  0xfb   :  { %2477 = vmatmul.mubr.bf16.gmra.mrb[12].mxu0 %v3518_v30  ;;  %2900 = vmatpush1.bf16.msra.mxu1 %v4362_v6 }
  0xfc   :  { %2486 = vmatprep.mubr.bf16.mxu0 %v3530_v5  ;;  %2885 = vmatprep.subr.bf16.mxu1 %v4372_v9 }
  0xff   :  { %2901 = vmatpush1.bf16.msra.mxu1 %v4381_v12 }
 0x102   :  { %2386 = vmatmul.mubr.bf16.vlgmr.msra.gmra.mrb[28].mxu1 %v3519_v36 }
 0x103   :  { %2487 = vmatmul.mubr.bf16.gmra.mrb[28].mxu0 %v3522_v40  ;;  %2395 = vmatprep.mubr.bf16.mxu1 %v3523_v46 }
 0x104   :  { %2496 = vmatprep.mubr.bf16.mxu0 %v3530_v5 }
 0x10a   :  { %2396 = vmatmul.mubr.bf16.gmra.mrb[32].mxu1 %v3525_v52 }
 0x10b   :  { %2497 = vmatmul.mubr.bf16.gmra.mrb[32].mxu0 %v3526_v53  ;;  %2405 = vmatprep.mubr.bf16.mxu1 %v2660_v54 }
 0x10c   :  { %2506 = vmatprep.mubr.bf16.mxu0 %v3530_v5 }
 0x112   :  { %2406 = vmatmul.mubr.bf16.gmra.mrb[36].mxu1 %v2659_v56 }
 0x113   :  { %2507 = vmatmul.mubr.bf16.gmra.mrb[36].mxu0 %v3529_v58 }
 0x176   :  { %v2286_v59 = vpop.f32.mrb[16].mxu0 }
 0x177   :  { %v2288_v60 = vpop.f32.mrb[17].mxu0 }
 0x178   :  { %v2290_v62 = vpop.f32.mrb[18].mxu0 }
 0x179   :  { %v4558_v0 = vpop.f32.mrb[19].mxu0 }
 0x17e   :  { %v4560_v1 = vpop.f32.mrb[20].mxu0 }
 0x17f   :  { %v4562_v2 = vpop.f32.mrb[21].mxu0 }
 0x180   :  { %v4564_v4 = vpop.f32.mrb[22].mxu0 }
 0x181   :  { %v4566_v6 = vpop.f32.mrb[23].mxu0 }
 0x186   :  { %v4568_v7 = vpop.f32.mrb[24].mxu0 }
 0x187   :  { %v4570_v9 = vpop.f32.mrb[25].mxu0 }
 0x188   :  { %v2310_v10 = vpop.f32.mrb[26].mxu0 }
 0x189   :  { %v2311_v12 = vpop.f32.mrb[27].mxu0 }
 0x195   :  { %v2044_v13 = vpop.f32.mrb[0].mxu1 }
 0x196   :  { %v2046_v14 = vpop.f32.mrb[1].mxu1  ;;  %v2902_v57 = vadd.f32 %v2044_v13, %v4589_v32 }
 0x197   :  { %v2048_v16 = vpop.f32.mrb[2].mxu1  ;;  %v2904_v35 = vadd.f32 %v2046_v14, %v4593_v55 }
 0x198   :  { %v2050_v18 = vpop.f32.mrb[3].mxu1  ;;  %v2906_v63 = vadd.f32 %v2048_v16, %v4589_v32 }
 0x199   :  { %v2908_v44 = vadd.f32 %v2050_v18, %v4593_v55 }
 0x19d   :  { %v2054_v19 = vpop.f32.mrb[4].mxu1 }
 0x19e   :  { %v2056_v21 = vpop.f32.mrb[5].mxu1  ;;  %v2910_v58 = vadd.f32 %v2054_v19, %v4589_v32 }
 0x19f   :  { %v2058_v22 = vpop.f32.mrb[6].mxu1 }
 0x1a0   :  { %v2060_v33 = vpop.f32.mrb[7].mxu1  ;;  %v2914_v10 = vadd.f32 %v2058_v22, %v4589_v32 }
 0x1a1   :  { %v2916_v16 = vadd.f32 %v2060_v33, %v4593_v55 }
 0x1a5   :  { %v4572_v25 = vpop.f32.mrb[8].mxu1 }
 0x1a6   :  { %v4574_v37 = vpop.f32.mrb[9].mxu1 }
 0x1a7   :  { %v4576_v39 = vpop.f32.mrb[10].mxu1 }
 0x1a8   :  { %v4578_v28 = vpop.f32.mrb[11].mxu1 }
 0x1ad   :  { %v4583_v31 = vpop.f32.mrb[12].mxu1 }
 0x1ae   :  { %v4585_v49 = vpop.f32.mrb[13].mxu1 }
 0x1af   :  { %v4587_v51 = vpop.f32.mrb[14].mxu1 }
 0x1b0   :  { %v4591_v34 = vpop.f32.mrb[15].mxu1 }
 0x1b5   :  { %v2084_v38 = vpop.f32.mrb[16].mxu1 }
 0x1b6   :  { %v2448_v61 = vpop.f32.mrb[0].mxu0  ;;  %v2934_v41 = vadd.f32 %v2084_v38, %v4589_v32  ;;  %v2086_v3 = vpop.f32.mrb[17].mxu1 }
 0x1b7   :  { %v2903_v42 = vadd.f32 %v2902_v57, %v2448_v61  ;;  %v2450_v5 = vpop.f32.mrb[1].mxu0  ;;  %v2938_v47 = vadd.f32 %v2086_v3, %v4593_v55  ;;  %v2088_v11 = vpop.f32.mrb[18].mxu1  ;;  %v2920_v3 = vadd.f32 %v4574_v37, %v4593_v55 }
 0x1b8   :  { %v2905_v8 = vadd.f32 %v2904_v35, %v2450_v5  ;;  %v2452_v15 = vpop.f32.mrb[2].mxu0  ;;  %v2942_v50 = vadd.f32 %v2088_v11, %v4589_v32  ;;  %v2090_v23 = vpop.f32.mrb[19].mxu1  ;;  %v4602_v30 = vadd.f32 %v2934_v41, %v2286_v59  ;;  %v2912_v59 = vadd.f32 %v2056_v21, %v4593_v55 }
 0x1b9   :  { %v2515_v17 = vmax.f32 %v2903_v42, 0.0  ;;  %v2907_v20 = vadd.f32 %v2906_v63, %v2452_v15  ;;  %v2454_v27 = vpop.f32.mrb[3].mxu0  ;;  %v2946_v40 = vadd.f32 %v2090_v23, %v4593_v55  ;;  %v4605_v48 = vadd.f32 %v2938_v47, %v2288_v60 }
 0x1ba   :  { %v2516_v36 = vmax.f32 %v2905_v8, 0.0  ;;  %v2909_v46 = vadd.f32 %v2908_v44, %v2454_v27  ;;  %v4610_v53 = vadd.f32 %v2942_v50, %v2290_v62  ;;  %v2924_v11 = vadd.f32 %v4578_v28, %v4593_v55 }
 0x1bb   :  { %2541 = vst [vmem:[%s4747_s3] sm:$0xff] %v2515_v17  ;;  %v2517_v52 = vmax.f32 %v2907_v20, 0.0  ;;  %v4616_v56 = vadd.f32 %v2946_v40, %v4558_v0 }
 0x1bc   :  { %2542 = vst [vmem:[%s4747_s3 + $0x8] sm:$0xff] %v2516_v36  ;;  %v2518_v54 = vmax.f32 %v2909_v46, 0.0 }
 0x1bd   :  { %2543 = vst [vmem:[%s4747_s3 + $0x10] sm:$0xff] %v2517_v52  ;;  %v2094_v60 = vpop.f32.mrb[20].mxu1 }
 0x1be   :  { %2544 = vst [vmem:[%s4747_s3 + $0x18] sm:$0xff] %v2518_v54  ;;  %v2458_v62 = vpop.f32.mrb[4].mxu0  ;;  %v2950_v12 = vadd.f32 %v2094_v60, %v4589_v32  ;;  %v2096_v13 = vpop.f32.mrb[21].mxu1 }
 0x1bf   :  { %v2911_v0 = vadd.f32 %v2910_v58, %v2458_v62  ;;  %v2460_v14 = vpop.f32.mrb[5].mxu0  ;;  %v2954_v18 = vadd.f32 %v2096_v13, %v4593_v55  ;;  %v2098_v24 = vpop.f32.mrb[22].mxu1  ;;  %v2926_v58 = vadd.f32 %v4583_v31, %v4589_v32  ;;  %v2932_v31 = vadd.f32 %v4591_v34, %v4593_v55 }
 0x1c0   :  { %v2913_v19 = vadd.f32 %v2912_v59, %v2460_v14  ;;  %v2462_v21 = vpop.f32.mrb[6].mxu0  ;;  %v2958_v43 = vadd.f32 %v2098_v24, %v4589_v32  ;;  %v2100_v29 = vpop.f32.mrb[23].mxu1  ;;  %v4632_v22 = vadd.f32 %v2950_v12, %v4560_v1  ;;  %v2930_v59 = vadd.f32 %v4587_v51, %v4589_v32 }
 0x1c1   :  { %v2519_v26 = vmax.f32 %v2911_v0, 0.0  ;;  %v2915_v45 = vadd.f32 %v2914_v10, %v2462_v21  ;;  %v2464_v57 = vpop.f32.mrb[7].mxu0  ;;  %v2962_v38 = vadd.f32 %v2100_v29, %v4593_v55  ;;  %v4636_v33 = vadd.f32 %v2954_v18, %v4562_v2 }
 0x1c2   :  { %v2520_v35 = vmax.f32 %v2913_v19, 0.0  ;;  %v2917_v61 = vadd.f32 %v2916_v16, %v2464_v57  ;;  %v4642_v41 = vadd.f32 %v2958_v43, %v4564_v4  ;;  %v2918_v2 = vadd.f32 %v4572_v25, %v4589_v32 }
 0x1c3   :  { %2545 = vst [vmem:[%s4747_s3 + $0x20] sm:$0xff] %v2519_v26  ;;  %v2521_v63 = vmax.f32 %v2915_v45, 0.0  ;;  %v4648_v42 = vadd.f32 %v2962_v38, %v4566_v6  ;;  %v2922_v6 = vadd.f32 %v4576_v39, %v4589_v32 }
 0x1c4   :  { %2546 = vst [vmem:[%s4747_s3 + $0x28] sm:$0xff] %v2520_v35  ;;  %v2522_v1 = vmax.f32 %v2917_v61, 0.0 }
 0x1c5   :  { %2547 = vst [vmem:[%s4747_s3 + $0x30] sm:$0xff] %v2521_v63  ;;  %v2104_v4 = vpop.f32.mrb[24].mxu1 }
 0x1c6   :  { %2548 = vst [vmem:[%s4747_s3 + $0x38] sm:$0xff] %v2522_v1  ;;  %v2468_v5 = vpop.f32.mrb[8].mxu0  ;;  %v2966_v44 = vadd.f32 %v2104_v4, %v4589_v32  ;;  %v2106_v25 = vpop.f32.mrb[25].mxu1 }
 0x1c7   :  { %v2919_v47 = vadd.f32 %v2918_v2, %v2468_v5  ;;  %v2470_v8 = vpop.f32.mrb[9].mxu0  ;;  %v2970_v15 = vadd.f32 %v2106_v25, %v4593_v55  ;;  %v2108_v17 = vpop.f32.mrb[26].mxu1 }
 0x1c8   :  { %v2921_v37 = vadd.f32 %v2920_v3, %v2470_v8  ;;  %v2472_v50 = vpop.f32.mrb[10].mxu0  ;;  %v2109_v27 = vpop.f32.mrb[27].mxu1  ;;  %v4667_v40 = vadd.f32 %v2966_v44, %v4568_v7  ;;  %v2928_v7 = vadd.f32 %v4585_v49, %v4593_v55 }
 0x1c9   :  { %v2523_v20 = vmax.f32 %v2919_v47, 0.0  ;;  %v2923_v23 = vadd.f32 %v2922_v6, %v2472_v50  ;;  %v2474_v36 = vpop.f32.mrb[11].mxu0  ;;  %v4670_v52 = vadd.f32 %v2970_v15, %v4570_v9 }
 0x1ca   :  { %v2524_v39 = vmax.f32 %v2921_v37, 0.0  ;;  %v2925_v46 = vadd.f32 %v2924_v11, %v2474_v36 }
 0x1cb   :  { %2549 = vst [vmem:[%s4747_s3 + $0x40] sm:$0xff] %v2523_v20  ;;  %v2525_v28 = vmax.f32 %v2923_v23, 0.0 }
 0x1cc   :  { %2550 = vst [vmem:[%s4747_s3 + $0x48] sm:$0xff] %v2524_v39  ;;  %v2526_v54 = vmax.f32 %v2925_v46, 0.0 }
 0x1cd   :  { %2551 = vst [vmem:[%s4747_s3 + $0x50] sm:$0xff] %v2525_v28 }
 0x1ce   :  { %2552 = vst [vmem:[%s4747_s3 + $0x58] sm:$0xff] %v2526_v54  ;;  %v2478_v9 = vpop.f32.mrb[12].mxu0 }
 0x1cf   :  { %v2927_v60 = vadd.f32 %v2926_v58, %v2478_v9  ;;  %v2480_v62 = vpop.f32.mrb[13].mxu0 }
 0x1d0   :  { %v2929_v10 = vadd.f32 %v2928_v7, %v2480_v62  ;;  %v2482_v12 = vpop.f32.mrb[14].mxu0 }
 0x1d1   :  { %v2527_v0 = vmax.f32 %v2927_v60, 0.0  ;;  %v2931_v13 = vadd.f32 %v2930_v59, %v2482_v12  ;;  %v2484_v14 = vpop.f32.mrb[15].mxu0 }
 0x1d2   :  { %v2528_v16 = vmax.f32 %v2929_v10, 0.0  ;;  %v2933_v49 = vadd.f32 %v2932_v31, %v2484_v14 }
 0x1d3   :  { %2553 = vst [vmem:[%s4747_s3 + $0x60] sm:$0xff] %v2527_v0  ;;  %v2529_v18 = vmax.f32 %v2931_v13, 0.0 }
 0x1d4   :  { %2554 = vst [vmem:[%s4747_s3 + $0x68] sm:$0xff] %v2528_v16  ;;  %v2530_v51 = vmax.f32 %v2933_v49, 0.0 }
 0x1d5   :  { %2555 = vst [vmem:[%s4747_s3 + $0x70] sm:$0xff] %v2529_v18  ;;  %v2387_v32 = vpop.f32.mrb[28].mxu1 }
 0x1d6   :  { %2556 = vst [vmem:[%s4747_s3 + $0x78] sm:$0xff] %v2530_v51  ;;  %v2488_v34 = vpop.f32.mrb[28].mxu0  ;;  %v2936_v55 = vadd.f32 %v4602_v30, %v2387_v32  ;;  %v2389_v19 = vpop.f32.mrb[29].mxu1 }
 0x1d7   :  { %v2490_v24 = vpop.f32.mrb[29].mxu0  ;;  %v2940_v21 = vadd.f32 %v4605_v48, %v2389_v19  ;;  %v2391_v26 = vpop.f32.mrb[30].mxu1 }
 0x1d8   :  { %v2492_v43 = vpop.f32.mrb[30].mxu0  ;;  %v2937_v45 = vadd.f32 %v2936_v55, %v2488_v34  ;;  %v2944_v29 = vadd.f32 %v4610_v53, %v2391_v26  ;;  %v2393_v57 = vpop.f32.mrb[31].mxu1 }
 0x1d9   :  { %v2494_v35 = vpop.f32.mrb[31].mxu0  ;;  %v2941_v38 = vadd.f32 %v2940_v21, %v2490_v24  ;;  %v2948_v61 = vadd.f32 %v4616_v56, %v2393_v57 }
 0x1da   :  { %v2531_v63 = vmax.f32 %v2937_v45, 0.0  ;;  %v2945_v1 = vadd.f32 %v2944_v29, %v2492_v43 }
 0x1db   :  { %v2532_v2 = vmax.f32 %v2941_v38, 0.0  ;;  %v2949_v3 = vadd.f32 %v2948_v61, %v2494_v35 }
 0x1dc   :  { %2557 = vst [vmem:[%s4747_s3 + $0x80] sm:$0xff] %v2531_v63  ;;  %v2533_v30 = vmax.f32 %v2945_v1, 0.0 }
 0x1dd   :  { %2558 = vst [vmem:[%s4747_s3 + $0x88] sm:$0xff] %v2532_v2  ;;  %v2534_v48 = vmax.f32 %v2949_v3, 0.0  ;;  %v2397_v53 = vpop.f32.mrb[32].mxu1 }
 0x1de   :  { %v2498_v4 = vpop.f32.mrb[32].mxu0  ;;  %2559 = vst [vmem:[%s4747_s3 + $0x90] sm:$0xff] %v2533_v30  ;;  %v2952_v56 = vadd.f32 %v4632_v22, %v2397_v53  ;;  %v2399_v5 = vpop.f32.mrb[33].mxu1 }
 0x1df   :  { %v2500_v6 = vpop.f32.mrb[33].mxu0  ;;  %2560 = vst [vmem:[%s4747_s3 + $0x98] sm:$0xff] %v2534_v48  ;;  %v2956_v44 = vadd.f32 %v4636_v33, %v2399_v5  ;;  %v2401_v47 = vpop.f32.mrb[34].mxu1 }
 0x1e0   :  { %v2502_v25 = vpop.f32.mrb[34].mxu0  ;;  %v2953_v8 = vadd.f32 %v2952_v56, %v2498_v4  ;;  %v2960_v11 = vadd.f32 %v4642_v41, %v2401_v47  ;;  %v2403_v15 = vpop.f32.mrb[35].mxu1 }
 0x1e1   :  { %v2504_v37 = vpop.f32.mrb[35].mxu0  ;;  %v2957_v17 = vadd.f32 %v2956_v44, %v2500_v6  ;;  %v2964_v50 = vadd.f32 %v4648_v42, %v2403_v15 }
 0x1e2   :  { %v2535_v20 = vmax.f32 %v2953_v8, 0.0  ;;  %v2961_v22 = vadd.f32 %v2960_v11, %v2502_v25 }
 0x1e3   :  { %v2536_v23 = vmax.f32 %v2957_v17, 0.0  ;;  %v2965_v27 = vadd.f32 %v2964_v50, %v2504_v37 }
 0x1e4   :  { %2561 = vst [vmem:[%s4747_s3 + $0xa0] sm:$0xff] %v2535_v20  ;;  %v2537_v36 = vmax.f32 %v2961_v22, 0.0 }
 0x1e5   :  { %2562 = vst [vmem:[%s4747_s3 + $0xa8] sm:$0xff] %v2536_v23  ;;  %v2538_v33 = vmax.f32 %v2965_v27, 0.0  ;;  %v2407_v41 = vpop.f32.mrb[36].mxu1 }
 0x1e6   :  { %v2508_v39 = vpop.f32.mrb[36].mxu0  ;;  %2563 = vst [vmem:[%s4747_s3 + $0xb0] sm:$0xff] %v2537_v36  ;;  %v2968_v42 = vadd.f32 %v4667_v40, %v2407_v41  ;;  %v2409_v46 = vpop.f32.mrb[37].mxu1 }
 0x1e7   :  { %v2510_v28 = vpop.f32.mrb[37].mxu0  ;;  %2564 = vst [vmem:[%s4747_s3 + $0xb8] sm:$0xff] %v2538_v33  ;;  %v2972_v54 = vadd.f32 %v4670_v52, %v2409_v46  ;;  %v2411_v58 = vpop.f32.mrb[38].mxu1 }
 0x1e8   :  { %v2512_v7 = vpop.f32.mrb[38].mxu0  ;;  %v2969_v9 = vadd.f32 %v2968_v42, %v2508_v39  ;;  %v2412_v59 = vpop.f32.mrb[39].mxu1 }
 0x1e9   :  { %v2513_v60 = vpop.f32.mrb[39].mxu0  ;;  %v2973_v62 = vadd.f32 %v2972_v54, %v2510_v28 }
 0x1ea   :  { %v2539_v31 = vmax.f32 %v2969_v9, 0.0 }
 0x1eb   :  { %v2540_v10 = vmax.f32 %v2973_v62, 0.0 }
 0x1ec   :  { %2565 = vst [vmem:[%s4747_s3 + $0xc0] sm:$0xff] %v2539_v31 }
 0x1ed   :  { %2566 = vst [vmem:[%s4747_s3 + $0xc8] sm:$0xff] %v2540_v10 }

// kernel: alexnet_forward.11
= control target key start
LH: loop header
LB: loop body
LE: loop exit
PB: predicated region body
PF: predicated region fallthrough
CT: control target
= control target key end

     0   :  { %s3294_s12 = smov 0   ;;  %s3296_s13 = smov 0   ;;  %s4004_s0 = inlined_call_operand.vmem [shape: bf16[24,1792], index: 0, kind: input, shape index: {}]   ;;  %s4005_s1 = inlined_call_operand.vmem [shape: bf16[1792,384], index: 1, kind: input, shape index: {}]   ;;  %s4006_s2 = inlined_call_operand.vmem [shape: f32[1,384], index: 2, kind: input, shape index: {}]   ;;  %s4007_s3 = inlined_call_operand.vmem [shape: f32[24,384], index: 3, kind: output, shape index: {}]  }
   0x1   :  { %s3298_s14 = smov 0   ;;  %s3300_s15 = smov 0  }
   0x2   :  { %s3302_s16 = smov 0  }
   0x3 LB: > { %s22_s17 = sadd.s32 1, %s3268_s15  ;;  %s2681_s18 = sadd.s32 4294967295, %s3272_s16   ;;  %s3272_s16 = sphi %s3302_s16, %s13_s16   ;;  %s3268_s15 = sphi %s3300_s15, %s4012_s15   ;;  %s3264_s14 = sphi %s3298_s14, %s4011_s14   ;;  %s3260_s13 = sphi %s3296_s13, %s4010_s13   ;;  %s3256_s12 = sphi %s3294_s12, %s4009_s12  }
   0x4   : > { %p23_p0 = scmp.ge.s32.totalorder %s22_s17, 3  ;;  %p65_p1 = scmp.ne.s32.totalorder %s3260_s13, %s3256_s12 }
   0x5   : > { %p66_p2 = scmp.eq.s32.totalorder %s3272_s16, 0  ;;  %p123_p4 = scmp.eq.s32.totalorder %s2681_s18, 2 }
   0x6   : > { %s4014_s17 = smov (%p23_p0, %s22_s17), 0  ;;  %s58_s20 = sadd.s32 1, %s3260_s13 }
   0x7   : > { %p67_p3 = por %p66_p2, %p65_p1  ;;  %s55_s19 = ssub.s32 %s3268_s15, %s4014_s17 }
   0x8   : > { %p56_p5 = scmp.eq.s32.totalorder %s55_s19, 0  ;;  %p3329_p6 = por %p123_p4, %p65_p1 }
   0x9   : > { %p2685_p7 = scmp.ge.s32.totalorder %s3272_s16, 3 }
   0xa   : > { %s3334_s22 = scalar_select %p56_p5, %s3260_s13, %s58_s20  }
   0xb   : > { %155 = sbr.rel (%p2685_p7) target bundleno = 171 (0xab), region = 20 }
  0x12   : > { %158 = sbr.rel (!%p67_p3) target bundleno = 171 (0xab), region = 24  ;;  %s160_s23 = sand.u32 (%p67_p3), 1, %s3260_s13  }
  0x13   : > { %s2686_s24 = sshll.u32 (%p67_p3), %s3268_s15, 2  ;;  %s3044_s25 = smul.u32 (%p67_p3), 896, %s160_s23 }
  0x14   : > { %s3342_s28 = scalar_lea.vmem (%p67_p3), %s4005_s1, %s2686_s24 }
  0x15   : > { %v180_v0 = vld [vmem:[%s3342_s28] sm:$0xf] (%p67_p3)  ;;  %v182_v1 = vld [vmem:[%s3342_s28 + $0xc] sm:$0xf] (%p67_p3)  ;;  %v184_v2 = vld [vmem:[%s3342_s28 + $0x18] sm:$0xf] (%p67_p3) }
  0x16   : > { %v186_v3 = vld [vmem:[%s3342_s28 + $0x24] sm:$0xf] (%p67_p3)  ;;  %v188_v4 = vld [vmem:[%s3342_s28 + $0x30] sm:$0xf] (%p67_p3)  ;;  %s3349_s29 = scalar_lea.vmem (%p67_p3), [#allocation2], %s3044_s25 }
  0x17   : > { %181 = vst [vmem:[%s3349_s29] sm:$0xf] (%p67_p3), %v180_v0  ;;  %183 = vst [vmem:[%s3349_s29 + $0x4] sm:$0xf] (%p67_p3), %v182_v1  ;;  %v190_v5 = vld [vmem:[%s3342_s28 + $0x3c] sm:$0xf] (%p67_p3) }
  0x18   : > { %185 = vst [vmem:[%s3349_s29 + $0x8] sm:$0xf] (%p67_p3), %v184_v2  ;;  %187 = vst [vmem:[%s3349_s29 + $0xc] sm:$0xf] (%p67_p3), %v186_v3  ;;  %v192_v6 = vld [vmem:[%s3342_s28 + $0x48] sm:$0xf] (%p67_p3) }
  0x19   : > { %189 = vst [vmem:[%s3349_s29 + $0x10] sm:$0xf] %v188_v4  ;;  %v194_v7 = vld [vmem:[%s3342_s28 + $0x54] sm:$0xf]  ;;  %191 = vst [vmem:[%s3349_s29 + $0x14] sm:$0xf] %v190_v5 }
  0x1a   : > { %193 = vst [vmem:[%s3349_s29 + $0x18] sm:$0xf] %v192_v6  ;;  %195 = vst [vmem:[%s3349_s29 + $0x1c] sm:$0xf] %v194_v7  ;;  %v196_v8 = vld [vmem:[%s3342_s28 + $0x60] sm:$0xf] }
  0x1b   : > { %v198_v9 = vld [vmem:[%s3342_s28 + $0x6c] sm:$0xf]  ;;  %v200_v10 = vld [vmem:[%s3342_s28 + $0x78] sm:$0xf]  ;;  %197 = vst [vmem:[%s3349_s29 + $0x20] sm:$0xf] %v196_v8 }
  0x1c   : > { %199 = vst [vmem:[%s3349_s29 + $0x24] sm:$0xf] %v198_v9  ;;  %201 = vst [vmem:[%s3349_s29 + $0x28] sm:$0xf] %v200_v10  ;;  %v202_v11 = vld [vmem:[%s3342_s28 + $0x84] sm:$0xf] }
  0x1d   : > { %v204_v12 = vld [vmem:[%s3342_s28 + $0x90] sm:$0xf]  ;;  %v206_v13 = vld [vmem:[%s3342_s28 + $0x9c] sm:$0xf]  ;;  %203 = vst [vmem:[%s3349_s29 + $0x2c] sm:$0xf] %v202_v11 }
  0x1e   : > { %205 = vst [vmem:[%s3349_s29 + $0x30] sm:$0xf] %v204_v12  ;;  %207 = vst [vmem:[%s3349_s29 + $0x34] sm:$0xf] %v206_v13  ;;  %v208_v14 = vld [vmem:[%s3342_s28 + $0xa8] sm:$0xf] }
  0x1f   : > { %v210_v15 = vld [vmem:[%s3342_s28 + $0xb4] sm:$0xf]  ;;  %v212_v16 = vld [vmem:[%s3342_s28 + $0xc0] sm:$0xf]  ;;  %209 = vst [vmem:[%s3349_s29 + $0x38] sm:$0xf] %v208_v14 }
  0x20   : > { %211 = vst [vmem:[%s3349_s29 + $0x3c] sm:$0xf] %v210_v15  ;;  %213 = vst [vmem:[%s3349_s29 + $0x40] sm:$0xf] %v212_v16  ;;  %v214_v17 = vld [vmem:[%s3342_s28 + $0xcc] sm:$0xf] }
  0x21   : > { %v216_v18 = vld [vmem:[%s3342_s28 + $0xd8] sm:$0xf]  ;;  %v218_v19 = vld [vmem:[%s3342_s28 + $0xe4] sm:$0xf]  ;;  %215 = vst [vmem:[%s3349_s29 + $0x44] sm:$0xf] %v214_v17 }
  0x22   : > { %217 = vst [vmem:[%s3349_s29 + $0x48] sm:$0xf] %v216_v18  ;;  %219 = vst [vmem:[%s3349_s29 + $0x4c] sm:$0xf] %v218_v19  ;;  %v220_v20 = vld [vmem:[%s3342_s28 + $0xf0] sm:$0xf] }
  0x23   : > { %v222_v21 = vld [vmem:[%s3342_s28 + $0xfc] sm:$0xf]  ;;  %v224_v22 = vld [vmem:[%s3342_s28 + $0x108] sm:$0xf]  ;;  %221 = vst [vmem:[%s3349_s29 + $0x50] sm:$0xf] %v220_v20 }
  0x24   : > { %223 = vst [vmem:[%s3349_s29 + $0x54] sm:$0xf] %v222_v21  ;;  %225 = vst [vmem:[%s3349_s29 + $0x58] sm:$0xf] %v224_v22  ;;  %v226_v23 = vld [vmem:[%s3342_s28 + $0x114] sm:$0xf] }
  0x25   : > { %v228_v24 = vld [vmem:[%s3342_s28 + $0x120] sm:$0xf]  ;;  %v230_v25 = vld [vmem:[%s3342_s28 + $0x12c] sm:$0xf]  ;;  %227 = vst [vmem:[%s3349_s29 + $0x5c] sm:$0xf] %v226_v23 }
  0x26   : > { %229 = vst [vmem:[%s3349_s29 + $0x60] sm:$0xf] %v228_v24  ;;  %231 = vst [vmem:[%s3349_s29 + $0x64] sm:$0xf] %v230_v25  ;;  %v232_v26 = vld [vmem:[%s3342_s28 + $0x138] sm:$0xf] }
  0x27   : > { %v234_v27 = vld [vmem:[%s3342_s28 + $0x144] sm:$0xf]  ;;  %v236_v28 = vld [vmem:[%s3342_s28 + $0x150] sm:$0xf]  ;;  %233 = vst [vmem:[%s3349_s29 + $0x68] sm:$0xf] %v232_v26 }
  0x28   : > { %235 = vst [vmem:[%s3349_s29 + $0x6c] sm:$0xf] %v234_v27  ;;  %237 = vst [vmem:[%s3349_s29 + $0x70] sm:$0xf] %v236_v28  ;;  %v238_v29 = vld [vmem:[%s3342_s28 + $0x15c] sm:$0xf] }
  0x29   : > { %v240_v30 = vld [vmem:[%s3342_s28 + $0x168] sm:$0xf]  ;;  %v242_v31 = vld [vmem:[%s3342_s28 + $0x174] sm:$0xf]  ;;  %239 = vst [vmem:[%s3349_s29 + $0x74] sm:$0xf] %v238_v29 }
  0x2a   : > { %241 = vst [vmem:[%s3349_s29 + $0x78] sm:$0xf] %v240_v30  ;;  %243 = vst [vmem:[%s3349_s29 + $0x7c] sm:$0xf] %v242_v31  ;;  %v244_v32 = vld [vmem:[%s3342_s28 + $0x180] sm:$0xf] }
  0x2b   : > { %v246_v33 = vld [vmem:[%s3342_s28 + $0x18c] sm:$0xf]  ;;  %v248_v34 = vld [vmem:[%s3342_s28 + $0x198] sm:$0xf]  ;;  %245 = vst [vmem:[%s3349_s29 + $0x80] sm:$0xf] %v244_v32 }
  0x2c   : > { %247 = vst [vmem:[%s3349_s29 + $0x84] sm:$0xf] %v246_v33  ;;  %249 = vst [vmem:[%s3349_s29 + $0x88] sm:$0xf] %v248_v34  ;;  %v250_v35 = vld [vmem:[%s3342_s28 + $0x1a4] sm:$0xf] }
  0x2d   : > { %v252_v36 = vld [vmem:[%s3342_s28 + $0x1b0] sm:$0xf]  ;;  %v254_v37 = vld [vmem:[%s3342_s28 + $0x1bc] sm:$0xf]  ;;  %251 = vst [vmem:[%s3349_s29 + $0x8c] sm:$0xf] %v250_v35 }
  0x2e   : > { %253 = vst [vmem:[%s3349_s29 + $0x90] sm:$0xf] %v252_v36  ;;  %255 = vst [vmem:[%s3349_s29 + $0x94] sm:$0xf] %v254_v37  ;;  %v256_v38 = vld [vmem:[%s3342_s28 + $0x1c8] sm:$0xf] }
  0x2f   : > { %v258_v39 = vld [vmem:[%s3342_s28 + $0x1d4] sm:$0xf]  ;;  %v260_v40 = vld [vmem:[%s3342_s28 + $0x1e0] sm:$0xf]  ;;  %257 = vst [vmem:[%s3349_s29 + $0x98] sm:$0xf] %v256_v38 }
  0x30   : > { %259 = vst [vmem:[%s3349_s29 + $0x9c] sm:$0xf] %v258_v39  ;;  %261 = vst [vmem:[%s3349_s29 + $0xa0] sm:$0xf] %v260_v40  ;;  %v262_v41 = vld [vmem:[%s3342_s28 + $0x1ec] sm:$0xf] }
  0x31   : > { %v264_v42 = vld [vmem:[%s3342_s28 + $0x1f8] sm:$0xf]  ;;  %v266_v43 = vld [vmem:[%s3342_s28 + $0x204] sm:$0xf]  ;;  %263 = vst [vmem:[%s3349_s29 + $0xa4] sm:$0xf] %v262_v41 }
  0x32   : > { %265 = vst [vmem:[%s3349_s29 + $0xa8] sm:$0xf] %v264_v42  ;;  %267 = vst [vmem:[%s3349_s29 + $0xac] sm:$0xf] %v266_v43  ;;  %v268_v44 = vld [vmem:[%s3342_s28 + $0x210] sm:$0xf] }
  0x33   : > { %v270_v45 = vld [vmem:[%s3342_s28 + $0x21c] sm:$0xf]  ;;  %v272_v46 = vld [vmem:[%s3342_s28 + $0x228] sm:$0xf]  ;;  %269 = vst [vmem:[%s3349_s29 + $0xb0] sm:$0xf] %v268_v44 }
  0x34   : > { %271 = vst [vmem:[%s3349_s29 + $0xb4] sm:$0xf] %v270_v45  ;;  %273 = vst [vmem:[%s3349_s29 + $0xb8] sm:$0xf] %v272_v46  ;;  %v274_v47 = vld [vmem:[%s3342_s28 + $0x234] sm:$0xf] }
  0x35   : > { %v276_v48 = vld [vmem:[%s3342_s28 + $0x240] sm:$0xf]  ;;  %v278_v49 = vld [vmem:[%s3342_s28 + $0x24c] sm:$0xf]  ;;  %275 = vst [vmem:[%s3349_s29 + $0xbc] sm:$0xf] %v274_v47 }
  0x36   : > { %277 = vst [vmem:[%s3349_s29 + $0xc0] sm:$0xf] %v276_v48  ;;  %279 = vst [vmem:[%s3349_s29 + $0xc4] sm:$0xf] %v278_v49  ;;  %v280_v50 = vld [vmem:[%s3342_s28 + $0x258] sm:$0xf] }
  0x37   : > { %v282_v51 = vld [vmem:[%s3342_s28 + $0x264] sm:$0xf]  ;;  %v284_v52 = vld [vmem:[%s3342_s28 + $0x270] sm:$0xf]  ;;  %281 = vst [vmem:[%s3349_s29 + $0xc8] sm:$0xf] %v280_v50 }
  0x38   : > { %283 = vst [vmem:[%s3349_s29 + $0xcc] sm:$0xf] %v282_v51  ;;  %285 = vst [vmem:[%s3349_s29 + $0xd0] sm:$0xf] %v284_v52  ;;  %v286_v53 = vld [vmem:[%s3342_s28 + $0x27c] sm:$0xf] }
  0x39   : > { %v288_v54 = vld [vmem:[%s3342_s28 + $0x288] sm:$0xf]  ;;  %v290_v55 = vld [vmem:[%s3342_s28 + $0x294] sm:$0xf]  ;;  %287 = vst [vmem:[%s3349_s29 + $0xd4] sm:$0xf] %v286_v53 }
  0x3a   : > { %289 = vst [vmem:[%s3349_s29 + $0xd8] sm:$0xf] %v288_v54  ;;  %291 = vst [vmem:[%s3349_s29 + $0xdc] sm:$0xf] %v290_v55  ;;  %v292_v56 = vld [vmem:[%s3342_s28 + $0x2a0] sm:$0xf] }
  0x3b   : > { %v294_v57 = vld [vmem:[%s3342_s28 + $0x2ac] sm:$0xf]  ;;  %v296_v58 = vld [vmem:[%s3342_s28 + $0x2b8] sm:$0xf]  ;;  %293 = vst [vmem:[%s3349_s29 + $0xe0] sm:$0xf] %v292_v56 }
  0x3c   : > { %295 = vst [vmem:[%s3349_s29 + $0xe4] sm:$0xf] %v294_v57  ;;  %297 = vst [vmem:[%s3349_s29 + $0xe8] sm:$0xf] %v296_v58  ;;  %v298_v59 = vld [vmem:[%s3342_s28 + $0x2c4] sm:$0xf] }
  0x3d   : > { %v300_v60 = vld [vmem:[%s3342_s28 + $0x2d0] sm:$0xf]  ;;  %v302_v61 = vld [vmem:[%s3342_s28 + $0x2dc] sm:$0xf]  ;;  %299 = vst [vmem:[%s3349_s29 + $0xec] sm:$0xf] %v298_v59 }
  0x3e   : > { %301 = vst [vmem:[%s3349_s29 + $0xf0] sm:$0xf] %v300_v60  ;;  %303 = vst [vmem:[%s3349_s29 + $0xf4] sm:$0xf] %v302_v61  ;;  %v304_v62 = vld [vmem:[%s3342_s28 + $0x2e8] sm:$0xf] }
  0x3f   : > { %v306_v63 = vld [vmem:[%s3342_s28 + $0x2f4] sm:$0xf]  ;;  %v308_v0 = vld [vmem:[%s3342_s28 + $0x300] sm:$0xf]  ;;  %305 = vst [vmem:[%s3349_s29 + $0xf8] sm:$0xf] %v304_v62 }
  0x40   : > { %307 = vst [vmem:[%s3349_s29 + $0xfc] sm:$0xf] %v306_v63  ;;  %309 = vst [vmem:[%s3349_s29 + $0x100] sm:$0xf] %v308_v0  ;;  %v310_v1 = vld [vmem:[%s3342_s28 + $0x30c] sm:$0xf] }
  0x41   : > { %v312_v2 = vld [vmem:[%s3342_s28 + $0x318] sm:$0xf]  ;;  %v314_v3 = vld [vmem:[%s3342_s28 + $0x324] sm:$0xf]  ;;  %311 = vst [vmem:[%s3349_s29 + $0x104] sm:$0xf] %v310_v1 }
  0x42   : > { %313 = vst [vmem:[%s3349_s29 + $0x108] sm:$0xf] %v312_v2  ;;  %315 = vst [vmem:[%s3349_s29 + $0x10c] sm:$0xf] %v314_v3  ;;  %v316_v4 = vld [vmem:[%s3342_s28 + $0x330] sm:$0xf] }
  0x43   : > { %v318_v5 = vld [vmem:[%s3342_s28 + $0x33c] sm:$0xf]  ;;  %v320_v6 = vld [vmem:[%s3342_s28 + $0x348] sm:$0xf]  ;;  %317 = vst [vmem:[%s3349_s29 + $0x110] sm:$0xf] %v316_v4 }
  0x44   : > { %319 = vst [vmem:[%s3349_s29 + $0x114] sm:$0xf] %v318_v5  ;;  %321 = vst [vmem:[%s3349_s29 + $0x118] sm:$0xf] %v320_v6  ;;  %v322_v7 = vld [vmem:[%s3342_s28 + $0x354] sm:$0xf] }
  0x45   : > { %v324_v8 = vld [vmem:[%s3342_s28 + $0x360] sm:$0xf]  ;;  %v326_v9 = vld [vmem:[%s3342_s28 + $0x36c] sm:$0xf]  ;;  %323 = vst [vmem:[%s3349_s29 + $0x11c] sm:$0xf] %v322_v7 }
  0x46   : > { %325 = vst [vmem:[%s3349_s29 + $0x120] sm:$0xf] %v324_v8  ;;  %327 = vst [vmem:[%s3349_s29 + $0x124] sm:$0xf] %v326_v9  ;;  %v328_v10 = vld [vmem:[%s3342_s28 + $0x378] sm:$0xf] }
  0x47   : > { %v330_v11 = vld [vmem:[%s3342_s28 + $0x384] sm:$0xf]  ;;  %v332_v12 = vld [vmem:[%s3342_s28 + $0x390] sm:$0xf]  ;;  %329 = vst [vmem:[%s3349_s29 + $0x128] sm:$0xf] %v328_v10 }
  0x48   : > { %331 = vst [vmem:[%s3349_s29 + $0x12c] sm:$0xf] %v330_v11  ;;  %333 = vst [vmem:[%s3349_s29 + $0x130] sm:$0xf] %v332_v12  ;;  %v334_v13 = vld [vmem:[%s3342_s28 + $0x39c] sm:$0xf] }
  0x49   : > { %v336_v14 = vld [vmem:[%s3342_s28 + $0x3a8] sm:$0xf]  ;;  %v338_v15 = vld [vmem:[%s3342_s28 + $0x3b4] sm:$0xf]  ;;  %335 = vst [vmem:[%s3349_s29 + $0x134] sm:$0xf] %v334_v13 }
  0x4a   : > { %337 = vst [vmem:[%s3349_s29 + $0x138] sm:$0xf] %v336_v14  ;;  %339 = vst [vmem:[%s3349_s29 + $0x13c] sm:$0xf] %v338_v15  ;;  %v340_v16 = vld [vmem:[%s3342_s28 + $0x3c0] sm:$0xf] }
  0x4b   : > { %v342_v17 = vld [vmem:[%s3342_s28 + $0x3cc] sm:$0xf]  ;;  %v344_v18 = vld [vmem:[%s3342_s28 + $0x3d8] sm:$0xf]  ;;  %341 = vst [vmem:[%s3349_s29 + $0x140] sm:$0xf] %v340_v16 }
  0x4c   : > { %343 = vst [vmem:[%s3349_s29 + $0x144] sm:$0xf] %v342_v17  ;;  %345 = vst [vmem:[%s3349_s29 + $0x148] sm:$0xf] %v344_v18  ;;  %v346_v19 = vld [vmem:[%s3342_s28 + $0x3e4] sm:$0xf] }
  0x4d   : > { %v348_v20 = vld [vmem:[%s3342_s28 + $0x3f0] sm:$0xf]  ;;  %v350_v21 = vld [vmem:[%s3342_s28 + $0x3fc] sm:$0xf]  ;;  %347 = vst [vmem:[%s3349_s29 + $0x14c] sm:$0xf] %v346_v19 }
  0x4e   : > { %349 = vst [vmem:[%s3349_s29 + $0x150] sm:$0xf] %v348_v20  ;;  %351 = vst [vmem:[%s3349_s29 + $0x154] sm:$0xf] %v350_v21  ;;  %v352_v22 = vld [vmem:[%s3342_s28 + $0x408] sm:$0xf] }
  0x4f   : > { %v354_v23 = vld [vmem:[%s3342_s28 + $0x414] sm:$0xf]  ;;  %v356_v24 = vld [vmem:[%s3342_s28 + $0x420] sm:$0xf]  ;;  %353 = vst [vmem:[%s3349_s29 + $0x158] sm:$0xf] %v352_v22 }
  0x50   : > { %355 = vst [vmem:[%s3349_s29 + $0x15c] sm:$0xf] %v354_v23  ;;  %357 = vst [vmem:[%s3349_s29 + $0x160] sm:$0xf] %v356_v24  ;;  %v358_v25 = vld [vmem:[%s3342_s28 + $0x42c] sm:$0xf] }
  0x51   : > { %v360_v26 = vld [vmem:[%s3342_s28 + $0x438] sm:$0xf]  ;;  %v362_v27 = vld [vmem:[%s3342_s28 + $0x444] sm:$0xf]  ;;  %359 = vst [vmem:[%s3349_s29 + $0x164] sm:$0xf] %v358_v25 }
  0x52   : > { %361 = vst [vmem:[%s3349_s29 + $0x168] sm:$0xf] %v360_v26  ;;  %363 = vst [vmem:[%s3349_s29 + $0x16c] sm:$0xf] %v362_v27  ;;  %v364_v28 = vld [vmem:[%s3342_s28 + $0x450] sm:$0xf] }
  0x53   : > { %v366_v29 = vld [vmem:[%s3342_s28 + $0x45c] sm:$0xf]  ;;  %v368_v30 = vld [vmem:[%s3342_s28 + $0x468] sm:$0xf]  ;;  %365 = vst [vmem:[%s3349_s29 + $0x170] sm:$0xf] %v364_v28 }
  0x54   : > { %367 = vst [vmem:[%s3349_s29 + $0x174] sm:$0xf] %v366_v29  ;;  %369 = vst [vmem:[%s3349_s29 + $0x178] sm:$0xf] %v368_v30  ;;  %v370_v31 = vld [vmem:[%s3342_s28 + $0x474] sm:$0xf] }
  0x55   : > { %v372_v32 = vld [vmem:[%s3342_s28 + $0x480] sm:$0xf]  ;;  %v374_v33 = vld [vmem:[%s3342_s28 + $0x48c] sm:$0xf]  ;;  %371 = vst [vmem:[%s3349_s29 + $0x17c] sm:$0xf] %v370_v31 }
  0x56   : > { %373 = vst [vmem:[%s3349_s29 + $0x180] sm:$0xf] %v372_v32  ;;  %375 = vst [vmem:[%s3349_s29 + $0x184] sm:$0xf] %v374_v33  ;;  %v376_v34 = vld [vmem:[%s3342_s28 + $0x498] sm:$0xf] }
  0x57   : > { %v378_v35 = vld [vmem:[%s3342_s28 + $0x4a4] sm:$0xf]  ;;  %v380_v36 = vld [vmem:[%s3342_s28 + $0x4b0] sm:$0xf]  ;;  %377 = vst [vmem:[%s3349_s29 + $0x188] sm:$0xf] %v376_v34 }
  0x58   : > { %379 = vst [vmem:[%s3349_s29 + $0x18c] sm:$0xf] %v378_v35  ;;  %381 = vst [vmem:[%s3349_s29 + $0x190] sm:$0xf] %v380_v36  ;;  %v382_v37 = vld [vmem:[%s3342_s28 + $0x4bc] sm:$0xf] }
  0x59   : > { %v384_v38 = vld [vmem:[%s3342_s28 + $0x4c8] sm:$0xf]  ;;  %v386_v39 = vld [vmem:[%s3342_s28 + $0x4d4] sm:$0xf]  ;;  %383 = vst [vmem:[%s3349_s29 + $0x194] sm:$0xf] %v382_v37 }
  0x5a   : > { %385 = vst [vmem:[%s3349_s29 + $0x198] sm:$0xf] %v384_v38  ;;  %387 = vst [vmem:[%s3349_s29 + $0x19c] sm:$0xf] %v386_v39  ;;  %v388_v40 = vld [vmem:[%s3342_s28 + $0x4e0] sm:$0xf] }
  0x5b   : > { %v390_v41 = vld [vmem:[%s3342_s28 + $0x4ec] sm:$0xf]  ;;  %v392_v42 = vld [vmem:[%s3342_s28 + $0x4f8] sm:$0xf]  ;;  %389 = vst [vmem:[%s3349_s29 + $0x1a0] sm:$0xf] %v388_v40 }
  0x5c   : > { %391 = vst [vmem:[%s3349_s29 + $0x1a4] sm:$0xf] %v390_v41  ;;  %393 = vst [vmem:[%s3349_s29 + $0x1a8] sm:$0xf] %v392_v42  ;;  %v394_v43 = vld [vmem:[%s3342_s28 + $0x504] sm:$0xf] }
  0x5d   : > { %v396_v44 = vld [vmem:[%s3342_s28 + $0x510] sm:$0xf]  ;;  %v398_v45 = vld [vmem:[%s3342_s28 + $0x51c] sm:$0xf]  ;;  %395 = vst [vmem:[%s3349_s29 + $0x1ac] sm:$0xf] %v394_v43 }
  0x5e   : > { %397 = vst [vmem:[%s3349_s29 + $0x1b0] sm:$0xf] %v396_v44  ;;  %399 = vst [vmem:[%s3349_s29 + $0x1b4] sm:$0xf] %v398_v45  ;;  %v400_v46 = vld [vmem:[%s3342_s28 + $0x528] sm:$0xf] }
  0x5f   : > { %v402_v47 = vld [vmem:[%s3342_s28 + $0x534] sm:$0xf]  ;;  %v404_v48 = vld [vmem:[%s3342_s28 + $0x540] sm:$0xf]  ;;  %401 = vst [vmem:[%s3349_s29 + $0x1b8] sm:$0xf] %v400_v46 }
  0x60   : > { %403 = vst [vmem:[%s3349_s29 + $0x1bc] sm:$0xf] %v402_v47  ;;  %405 = vst [vmem:[%s3349_s29 + $0x1c0] sm:$0xf] %v404_v48  ;;  %v406_v49 = vld [vmem:[%s3342_s28 + $0x54c] sm:$0xf] }
  0x61   : > { %v408_v50 = vld [vmem:[%s3342_s28 + $0x558] sm:$0xf]  ;;  %v410_v51 = vld [vmem:[%s3342_s28 + $0x564] sm:$0xf]  ;;  %407 = vst [vmem:[%s3349_s29 + $0x1c4] sm:$0xf] %v406_v49 }
  0x62   : > { %409 = vst [vmem:[%s3349_s29 + $0x1c8] sm:$0xf] %v408_v50  ;;  %411 = vst [vmem:[%s3349_s29 + $0x1cc] sm:$0xf] %v410_v51  ;;  %v412_v52 = vld [vmem:[%s3342_s28 + $0x570] sm:$0xf] }
  0x63   : > { %v414_v53 = vld [vmem:[%s3342_s28 + $0x57c] sm:$0xf]  ;;  %v416_v54 = vld [vmem:[%s3342_s28 + $0x588] sm:$0xf]  ;;  %413 = vst [vmem:[%s3349_s29 + $0x1d0] sm:$0xf] %v412_v52 }
  0x64   : > { %415 = vst [vmem:[%s3349_s29 + $0x1d4] sm:$0xf] %v414_v53  ;;  %417 = vst [vmem:[%s3349_s29 + $0x1d8] sm:$0xf] %v416_v54  ;;  %v418_v55 = vld [vmem:[%s3342_s28 + $0x594] sm:$0xf] }
  0x65   : > { %v420_v56 = vld [vmem:[%s3342_s28 + $0x5a0] sm:$0xf]  ;;  %v422_v57 = vld [vmem:[%s3342_s28 + $0x5ac] sm:$0xf]  ;;  %419 = vst [vmem:[%s3349_s29 + $0x1dc] sm:$0xf] %v418_v55 }
  0x66   : > { %421 = vst [vmem:[%s3349_s29 + $0x1e0] sm:$0xf] %v420_v56  ;;  %423 = vst [vmem:[%s3349_s29 + $0x1e4] sm:$0xf] %v422_v57  ;;  %v424_v58 = vld [vmem:[%s3342_s28 + $0x5b8] sm:$0xf] }
  0x67   : > { %v426_v59 = vld [vmem:[%s3342_s28 + $0x5c4] sm:$0xf]  ;;  %v428_v60 = vld [vmem:[%s3342_s28 + $0x5d0] sm:$0xf]  ;;  %425 = vst [vmem:[%s3349_s29 + $0x1e8] sm:$0xf] %v424_v58 }
  0x68   : > { %427 = vst [vmem:[%s3349_s29 + $0x1ec] sm:$0xf] %v426_v59  ;;  %429 = vst [vmem:[%s3349_s29 + $0x1f0] sm:$0xf] %v428_v60  ;;  %v430_v61 = vld [vmem:[%s3342_s28 + $0x5dc] sm:$0xf] }
  0x69   : > { %v432_v62 = vld [vmem:[%s3342_s28 + $0x5e8] sm:$0xf]  ;;  %v434_v63 = vld [vmem:[%s3342_s28 + $0x5f4] sm:$0xf]  ;;  %431 = vst [vmem:[%s3349_s29 + $0x1f4] sm:$0xf] %v430_v61 }
  0x6a   : > { %433 = vst [vmem:[%s3349_s29 + $0x1f8] sm:$0xf] %v432_v62  ;;  %435 = vst [vmem:[%s3349_s29 + $0x1fc] sm:$0xf] %v434_v63  ;;  %v436_v0 = vld [vmem:[%s3342_s28 + $0x600] sm:$0xf] }
  0x6b   : > { %v438_v1 = vld [vmem:[%s3342_s28 + $0x60c] sm:$0xf]  ;;  %v440_v2 = vld [vmem:[%s3342_s28 + $0x618] sm:$0xf]  ;;  %437 = vst [vmem:[%s3349_s29 + $0x200] sm:$0xf] %v436_v0 }
  0x6c   : > { %439 = vst [vmem:[%s3349_s29 + $0x204] sm:$0xf] %v438_v1  ;;  %441 = vst [vmem:[%s3349_s29 + $0x208] sm:$0xf] %v440_v2  ;;  %v442_v3 = vld [vmem:[%s3342_s28 + $0x624] sm:$0xf] }
  0x6d   : > { %v444_v4 = vld [vmem:[%s3342_s28 + $0x630] sm:$0xf]  ;;  %v446_v5 = vld [vmem:[%s3342_s28 + $0x63c] sm:$0xf]  ;;  %443 = vst [vmem:[%s3349_s29 + $0x20c] sm:$0xf] %v442_v3 }
  0x6e   : > { %445 = vst [vmem:[%s3349_s29 + $0x210] sm:$0xf] %v444_v4  ;;  %447 = vst [vmem:[%s3349_s29 + $0x214] sm:$0xf] %v446_v5  ;;  %v448_v6 = vld [vmem:[%s3342_s28 + $0x648] sm:$0xf] }
  0x6f   : > { %v450_v7 = vld [vmem:[%s3342_s28 + $0x654] sm:$0xf]  ;;  %v452_v8 = vld [vmem:[%s3342_s28 + $0x660] sm:$0xf]  ;;  %449 = vst [vmem:[%s3349_s29 + $0x218] sm:$0xf] %v448_v6 }
  0x70   : > { %451 = vst [vmem:[%s3349_s29 + $0x21c] sm:$0xf] %v450_v7  ;;  %453 = vst [vmem:[%s3349_s29 + $0x220] sm:$0xf] %v452_v8  ;;  %v454_v9 = vld [vmem:[%s3342_s28 + $0x66c] sm:$0xf] }
  0x71   : > { %v456_v10 = vld [vmem:[%s3342_s28 + $0x678] sm:$0xf]  ;;  %v458_v11 = vld [vmem:[%s3342_s28 + $0x684] sm:$0xf]  ;;  %455 = vst [vmem:[%s3349_s29 + $0x224] sm:$0xf] %v454_v9 }
  0x72   : > { %457 = vst [vmem:[%s3349_s29 + $0x228] sm:$0xf] %v456_v10  ;;  %459 = vst [vmem:[%s3349_s29 + $0x22c] sm:$0xf] %v458_v11  ;;  %v460_v12 = vld [vmem:[%s3342_s28 + $0x690] sm:$0xf] }
  0x73   : > { %v462_v13 = vld [vmem:[%s3342_s28 + $0x69c] sm:$0xf]  ;;  %v464_v14 = vld [vmem:[%s3342_s28 + $0x6a8] sm:$0xf]  ;;  %461 = vst [vmem:[%s3349_s29 + $0x230] sm:$0xf] %v460_v12 }
  0x74   : > { %463 = vst [vmem:[%s3349_s29 + $0x234] sm:$0xf] %v462_v13  ;;  %465 = vst [vmem:[%s3349_s29 + $0x238] sm:$0xf] %v464_v14  ;;  %v466_v15 = vld [vmem:[%s3342_s28 + $0x6b4] sm:$0xf] }
  0x75   : > { %v468_v16 = vld [vmem:[%s3342_s28 + $0x6c0] sm:$0xf]  ;;  %v470_v17 = vld [vmem:[%s3342_s28 + $0x6cc] sm:$0xf]  ;;  %467 = vst [vmem:[%s3349_s29 + $0x23c] sm:$0xf] %v466_v15 }
  0x76   : > { %469 = vst [vmem:[%s3349_s29 + $0x240] sm:$0xf] %v468_v16  ;;  %471 = vst [vmem:[%s3349_s29 + $0x244] sm:$0xf] %v470_v17  ;;  %v472_v18 = vld [vmem:[%s3342_s28 + $0x6d8] sm:$0xf] }
  0x77   : > { %v474_v19 = vld [vmem:[%s3342_s28 + $0x6e4] sm:$0xf]  ;;  %v476_v20 = vld [vmem:[%s3342_s28 + $0x6f0] sm:$0xf]  ;;  %473 = vst [vmem:[%s3349_s29 + $0x248] sm:$0xf] %v472_v18 }
  0x78   : > { %475 = vst [vmem:[%s3349_s29 + $0x24c] sm:$0xf] %v474_v19  ;;  %477 = vst [vmem:[%s3349_s29 + $0x250] sm:$0xf] %v476_v20  ;;  %v478_v21 = vld [vmem:[%s3342_s28 + $0x6fc] sm:$0xf] }
  0x79   : > { %v480_v22 = vld [vmem:[%s3342_s28 + $0x708] sm:$0xf]  ;;  %v482_v23 = vld [vmem:[%s3342_s28 + $0x714] sm:$0xf]  ;;  %479 = vst [vmem:[%s3349_s29 + $0x254] sm:$0xf] %v478_v21 }
  0x7a   : > { %481 = vst [vmem:[%s3349_s29 + $0x258] sm:$0xf] %v480_v22  ;;  %483 = vst [vmem:[%s3349_s29 + $0x25c] sm:$0xf] %v482_v23  ;;  %v484_v24 = vld [vmem:[%s3342_s28 + $0x720] sm:$0xf] }
  0x7b   : > { %v486_v25 = vld [vmem:[%s3342_s28 + $0x72c] sm:$0xf]  ;;  %v488_v26 = vld [vmem:[%s3342_s28 + $0x738] sm:$0xf]  ;;  %485 = vst [vmem:[%s3349_s29 + $0x260] sm:$0xf] %v484_v24 }
  0x7c   : > { %487 = vst [vmem:[%s3349_s29 + $0x264] sm:$0xf] %v486_v25  ;;  %489 = vst [vmem:[%s3349_s29 + $0x268] sm:$0xf] %v488_v26  ;;  %v490_v27 = vld [vmem:[%s3342_s28 + $0x744] sm:$0xf] }
  0x7d   : > { %v492_v28 = vld [vmem:[%s3342_s28 + $0x750] sm:$0xf]  ;;  %v494_v29 = vld [vmem:[%s3342_s28 + $0x75c] sm:$0xf]  ;;  %491 = vst [vmem:[%s3349_s29 + $0x26c] sm:$0xf] %v490_v27 }
  0x7e   : > { %493 = vst [vmem:[%s3349_s29 + $0x270] sm:$0xf] %v492_v28  ;;  %495 = vst [vmem:[%s3349_s29 + $0x274] sm:$0xf] %v494_v29  ;;  %v496_v30 = vld [vmem:[%s3342_s28 + $0x768] sm:$0xf] }
  0x7f   : > { %v498_v31 = vld [vmem:[%s3342_s28 + $0x774] sm:$0xf]  ;;  %v500_v32 = vld [vmem:[%s3342_s28 + $0x780] sm:$0xf]  ;;  %497 = vst [vmem:[%s3349_s29 + $0x278] sm:$0xf] %v496_v30 }
  0x80   : > { %499 = vst [vmem:[%s3349_s29 + $0x27c] sm:$0xf] %v498_v31  ;;  %501 = vst [vmem:[%s3349_s29 + $0x280] sm:$0xf] %v500_v32  ;;  %v502_v33 = vld [vmem:[%s3342_s28 + $0x78c] sm:$0xf] }
  0x81   : > { %v504_v34 = vld [vmem:[%s3342_s28 + $0x798] sm:$0xf]  ;;  %v506_v35 = vld [vmem:[%s3342_s28 + $0x7a4] sm:$0xf]  ;;  %503 = vst [vmem:[%s3349_s29 + $0x284] sm:$0xf] %v502_v33 }
  0x82   : > { %505 = vst [vmem:[%s3349_s29 + $0x288] sm:$0xf] %v504_v34  ;;  %507 = vst [vmem:[%s3349_s29 + $0x28c] sm:$0xf] %v506_v35  ;;  %v508_v36 = vld [vmem:[%s3342_s28 + $0x7b0] sm:$0xf] }
  0x83   : > { %v510_v37 = vld [vmem:[%s3342_s28 + $0x7bc] sm:$0xf]  ;;  %v512_v38 = vld [vmem:[%s3342_s28 + $0x7c8] sm:$0xf]  ;;  %509 = vst [vmem:[%s3349_s29 + $0x290] sm:$0xf] %v508_v36 }
  0x84   : > { %511 = vst [vmem:[%s3349_s29 + $0x294] sm:$0xf] %v510_v37  ;;  %513 = vst [vmem:[%s3349_s29 + $0x298] sm:$0xf] %v512_v38  ;;  %v514_v39 = vld [vmem:[%s3342_s28 + $0x7d4] sm:$0xf] }
  0x85   : > { %v516_v40 = vld [vmem:[%s3342_s28 + $0x7e0] sm:$0xf]  ;;  %v518_v41 = vld [vmem:[%s3342_s28 + $0x7ec] sm:$0xf]  ;;  %515 = vst [vmem:[%s3349_s29 + $0x29c] sm:$0xf] %v514_v39 }
  0x86   : > { %517 = vst [vmem:[%s3349_s29 + $0x2a0] sm:$0xf] %v516_v40  ;;  %519 = vst [vmem:[%s3349_s29 + $0x2a4] sm:$0xf] %v518_v41  ;;  %v520_v42 = vld [vmem:[%s3342_s28 + $0x7f8] sm:$0xf] }
  0x87   : > { %v522_v43 = vld [vmem:[%s3342_s28 + $0x804] sm:$0xf]  ;;  %v524_v44 = vld [vmem:[%s3342_s28 + $0x810] sm:$0xf]  ;;  %521 = vst [vmem:[%s3349_s29 + $0x2a8] sm:$0xf] %v520_v42 }
  0x88   : > { %523 = vst [vmem:[%s3349_s29 + $0x2ac] sm:$0xf] %v522_v43  ;;  %525 = vst [vmem:[%s3349_s29 + $0x2b0] sm:$0xf] %v524_v44  ;;  %v526_v45 = vld [vmem:[%s3342_s28 + $0x81c] sm:$0xf] }
  0x89   : > { %v528_v46 = vld [vmem:[%s3342_s28 + $0x828] sm:$0xf]  ;;  %v530_v47 = vld [vmem:[%s3342_s28 + $0x834] sm:$0xf]  ;;  %527 = vst [vmem:[%s3349_s29 + $0x2b4] sm:$0xf] %v526_v45 }
  0x8a   : > { %529 = vst [vmem:[%s3349_s29 + $0x2b8] sm:$0xf] %v528_v46  ;;  %531 = vst [vmem:[%s3349_s29 + $0x2bc] sm:$0xf] %v530_v47  ;;  %v532_v48 = vld [vmem:[%s3342_s28 + $0x840] sm:$0xf] }
  0x8b   : > { %v534_v49 = vld [vmem:[%s3342_s28 + $0x84c] sm:$0xf]  ;;  %v536_v50 = vld [vmem:[%s3342_s28 + $0x858] sm:$0xf]  ;;  %533 = vst [vmem:[%s3349_s29 + $0x2c0] sm:$0xf] %v532_v48 }
  0x8c   : > { %535 = vst [vmem:[%s3349_s29 + $0x2c4] sm:$0xf] %v534_v49  ;;  %537 = vst [vmem:[%s3349_s29 + $0x2c8] sm:$0xf] %v536_v50  ;;  %v538_v51 = vld [vmem:[%s3342_s28 + $0x864] sm:$0xf] }
  0x8d   : > { %v540_v52 = vld [vmem:[%s3342_s28 + $0x870] sm:$0xf]  ;;  %v542_v53 = vld [vmem:[%s3342_s28 + $0x87c] sm:$0xf]  ;;  %539 = vst [vmem:[%s3349_s29 + $0x2cc] sm:$0xf] %v538_v51 }
  0x8e   : > { %541 = vst [vmem:[%s3349_s29 + $0x2d0] sm:$0xf] %v540_v52  ;;  %543 = vst [vmem:[%s3349_s29 + $0x2d4] sm:$0xf] %v542_v53  ;;  %v544_v54 = vld [vmem:[%s3342_s28 + $0x888] sm:$0xf] }
  0x8f   : > { %v546_v55 = vld [vmem:[%s3342_s28 + $0x894] sm:$0xf]  ;;  %v548_v56 = vld [vmem:[%s3342_s28 + $0x8a0] sm:$0xf]  ;;  %545 = vst [vmem:[%s3349_s29 + $0x2d8] sm:$0xf] %v544_v54 }
  0x90   : > { %547 = vst [vmem:[%s3349_s29 + $0x2dc] sm:$0xf] %v546_v55  ;;  %549 = vst [vmem:[%s3349_s29 + $0x2e0] sm:$0xf] %v548_v56  ;;  %v550_v57 = vld [vmem:[%s3342_s28 + $0x8ac] sm:$0xf] }
  0x91   : > { %v552_v58 = vld [vmem:[%s3342_s28 + $0x8b8] sm:$0xf]  ;;  %v554_v59 = vld [vmem:[%s3342_s28 + $0x8c4] sm:$0xf]  ;;  %551 = vst [vmem:[%s3349_s29 + $0x2e4] sm:$0xf] %v550_v57 }
  0x92   : > { %553 = vst [vmem:[%s3349_s29 + $0x2e8] sm:$0xf] %v552_v58  ;;  %555 = vst [vmem:[%s3349_s29 + $0x2ec] sm:$0xf] %v554_v59  ;;  %v556_v60 = vld [vmem:[%s3342_s28 + $0x8d0] sm:$0xf] }
  0x93   : > { %v558_v61 = vld [vmem:[%s3342_s28 + $0x8dc] sm:$0xf]  ;;  %v560_v62 = vld [vmem:[%s3342_s28 + $0x8e8] sm:$0xf]  ;;  %557 = vst [vmem:[%s3349_s29 + $0x2f0] sm:$0xf] %v556_v60 }
  0x94   : > { %559 = vst [vmem:[%s3349_s29 + $0x2f4] sm:$0xf] %v558_v61  ;;  %561 = vst [vmem:[%s3349_s29 + $0x2f8] sm:$0xf] %v560_v62  ;;  %v562_v63 = vld [vmem:[%s3342_s28 + $0x8f4] sm:$0xf] }
  0x95   : > { %v564_v0 = vld [vmem:[%s3342_s28 + $0x900] sm:$0xf]  ;;  %v566_v1 = vld [vmem:[%s3342_s28 + $0x90c] sm:$0xf]  ;;  %563 = vst [vmem:[%s3349_s29 + $0x2fc] sm:$0xf] %v562_v63 }
  0x96   : > { %565 = vst [vmem:[%s3349_s29 + $0x300] sm:$0xf] %v564_v0  ;;  %567 = vst [vmem:[%s3349_s29 + $0x304] sm:$0xf] %v566_v1  ;;  %v568_v2 = vld [vmem:[%s3342_s28 + $0x918] sm:$0xf] }
  0x97   : > { %v570_v3 = vld [vmem:[%s3342_s28 + $0x924] sm:$0xf]  ;;  %v572_v4 = vld [vmem:[%s3342_s28 + $0x930] sm:$0xf]  ;;  %569 = vst [vmem:[%s3349_s29 + $0x308] sm:$0xf] %v568_v2 }
  0x98   : > { %571 = vst [vmem:[%s3349_s29 + $0x30c] sm:$0xf] %v570_v3  ;;  %573 = vst [vmem:[%s3349_s29 + $0x310] sm:$0xf] %v572_v4  ;;  %v574_v5 = vld [vmem:[%s3342_s28 + $0x93c] sm:$0xf] }
  0x99   : > { %v576_v6 = vld [vmem:[%s3342_s28 + $0x948] sm:$0xf]  ;;  %v578_v7 = vld [vmem:[%s3342_s28 + $0x954] sm:$0xf]  ;;  %575 = vst [vmem:[%s3349_s29 + $0x314] sm:$0xf] %v574_v5 }
  0x9a   : > { %577 = vst [vmem:[%s3349_s29 + $0x318] sm:$0xf] %v576_v6  ;;  %579 = vst [vmem:[%s3349_s29 + $0x31c] sm:$0xf] %v578_v7  ;;  %v580_v8 = vld [vmem:[%s3342_s28 + $0x960] sm:$0xf] }
  0x9b   : > { %v582_v9 = vld [vmem:[%s3342_s28 + $0x96c] sm:$0xf]  ;;  %v584_v10 = vld [vmem:[%s3342_s28 + $0x978] sm:$0xf]  ;;  %581 = vst [vmem:[%s3349_s29 + $0x320] sm:$0xf] %v580_v8 }
  0x9c   : > { %583 = vst [vmem:[%s3349_s29 + $0x324] sm:$0xf] %v582_v9  ;;  %585 = vst [vmem:[%s3349_s29 + $0x328] sm:$0xf] %v584_v10  ;;  %v586_v11 = vld [vmem:[%s3342_s28 + $0x984] sm:$0xf] }
  0x9d   : > { %v588_v12 = vld [vmem:[%s3342_s28 + $0x990] sm:$0xf]  ;;  %v590_v13 = vld [vmem:[%s3342_s28 + $0x99c] sm:$0xf]  ;;  %587 = vst [vmem:[%s3349_s29 + $0x32c] sm:$0xf] %v586_v11 }
  0x9e   : > { %589 = vst [vmem:[%s3349_s29 + $0x330] sm:$0xf] %v588_v12  ;;  %591 = vst [vmem:[%s3349_s29 + $0x334] sm:$0xf] %v590_v13  ;;  %v592_v14 = vld [vmem:[%s3342_s28 + $0x9a8] sm:$0xf] }
  0x9f   : > { %v594_v15 = vld [vmem:[%s3342_s28 + $0x9b4] sm:$0xf]  ;;  %v596_v16 = vld [vmem:[%s3342_s28 + $0x9c0] sm:$0xf]  ;;  %593 = vst [vmem:[%s3349_s29 + $0x338] sm:$0xf] %v592_v14 }
  0xa0   : > { %595 = vst [vmem:[%s3349_s29 + $0x33c] sm:$0xf] %v594_v15  ;;  %597 = vst [vmem:[%s3349_s29 + $0x340] sm:$0xf] %v596_v16  ;;  %v598_v17 = vld [vmem:[%s3342_s28 + $0x9cc] sm:$0xf] }
  0xa1   : > { %v600_v18 = vld [vmem:[%s3342_s28 + $0x9d8] sm:$0xf]  ;;  %v602_v19 = vld [vmem:[%s3342_s28 + $0x9e4] sm:$0xf]  ;;  %599 = vst [vmem:[%s3349_s29 + $0x344] sm:$0xf] %v598_v17 }
  0xa2   : > { %601 = vst [vmem:[%s3349_s29 + $0x348] sm:$0xf] %v600_v18  ;;  %603 = vst [vmem:[%s3349_s29 + $0x34c] sm:$0xf] %v602_v19  ;;  %v604_v20 = vld [vmem:[%s3342_s28 + $0x9f0] sm:$0xf] }
  0xa3   : > { %v606_v21 = vld [vmem:[%s3342_s28 + $0x9fc] sm:$0xf]  ;;  %v608_v22 = vld [vmem:[%s3342_s28 + $0xa08] sm:$0xf]  ;;  %605 = vst [vmem:[%s3349_s29 + $0x350] sm:$0xf] %v604_v20 }
  0xa4   : > { %607 = vst [vmem:[%s3349_s29 + $0x354] sm:$0xf] %v606_v21  ;;  %609 = vst [vmem:[%s3349_s29 + $0x358] sm:$0xf] %v608_v22  ;;  %v610_v23 = vld [vmem:[%s3342_s28 + $0xa14] sm:$0xf] }
  0xa5   : > { %v612_v24 = vld [vmem:[%s3342_s28 + $0xa20] sm:$0xf]  ;;  %v614_v25 = vld [vmem:[%s3342_s28 + $0xa2c] sm:$0xf]  ;;  %611 = vst [vmem:[%s3349_s29 + $0x35c] sm:$0xf] %v610_v23 }
  0xa6   : > { %613 = vst [vmem:[%s3349_s29 + $0x360] sm:$0xf] %v612_v24  ;;  %615 = vst [vmem:[%s3349_s29 + $0x364] sm:$0xf] %v614_v25  ;;  %v616_v26 = vld [vmem:[%s3342_s28 + $0xa38] sm:$0xf] }
  0xa7   : > { %v618_v27 = vld [vmem:[%s3342_s28 + $0xa44] sm:$0xf]  ;;  %v620_v28 = vld [vmem:[%s3342_s28 + $0xa50] sm:$0xf]  ;;  %617 = vst [vmem:[%s3349_s29 + $0x368] sm:$0xf] %v616_v26 }
  0xa8   : > { %619 = vst [vmem:[%s3349_s29 + $0x36c] sm:$0xf] %v618_v27  ;;  %621 = vst [vmem:[%s3349_s29 + $0x370] sm:$0xf] %v620_v28  ;;  %v622_v29 = vld [vmem:[%s3342_s28 + $0xa5c] sm:$0xf] }
  0xa9   : > { %v624_v30 = vld [vmem:[%s3342_s28 + $0xa68] sm:$0xf]  ;;  %v626_v31 = vld [vmem:[%s3342_s28 + $0xa74] sm:$0xf]  ;;  %623 = vst [vmem:[%s3349_s29 + $0x374] sm:$0xf] %v622_v29 }
  0xaa   : > { %625 = vst [vmem:[%s3349_s29 + $0x378] sm:$0xf] %v624_v30  ;;  %627 = vst [vmem:[%s3349_s29 + $0x37c] sm:$0xf] %v626_v31 }
  0xab PF: > { %p2687_p8 = scmp.ge.s32.totalorder %s3272_s16, 1  ;;  %p1103_p9 = scmp.lt.s32.totalorder %s3272_s16, 4 }
  0xad   : > { %p1104_p10 = pnand %p2687_p8, %p1103_p9 }
  0xae   : > { %s1110_s30 = sand.u32 (!%p1104_p10), 1, %s3256_s12   ;;  %v3121_v32 = vld [vmem:[%s4004_s0 + $0x4] ss:$56 sps:$4 sm:$0xff] (!%p1104_p10)   ;;  %v1167_v63 = vld [vmem:[%s4004_s0 + $0x70] sm:$0xff] (!%p1104_p10)  ;;  %v3119_v1 = vld [vmem:[%s4004_s0] ss:$56 sps:$4 sm:$0xff] (!%p1104_p10)  }
  0xaf   : > { %1107 = sbr.rel (%p1104_p10) target bundleno = 539 (0x21b), region = 69  ;;  %v3124_v33 = vld [vmem:[%s4004_s0 + $0xc] ss:$56 sps:$4 sm:$0xff] (!%p1104_p10)   ;;  %2228 = vmatprep.mubr.bf16.mxu0 (!%p1104_p10), %v3121_v32  ;;  %v1168_v2 = vld [vmem:[%s4004_s0 + $0x78] sm:$0xff] (!%p1104_p10)  ;;  %v3122_v4 = vld [vmem:[%s4004_s0 + $0x8] ss:$56 sps:$4 sm:$0xff] (!%p1104_p10)   ;;  %v2704_v8 = vcombine.high (!%p1104_p10), %v1167_v63, %v1167_v63  ;;  %v2703_v16 = vcombine.low (!%p1104_p10), %v1167_v63, %v1167_v63 }
  0xb0   : > { %s3045_s4 = smul.u32 (!%p1104_p10), 896, %s1110_s30  ;;  %2276 = vmatprep.mubr.bf16.mxu1 (!%p1104_p10), %v3124_v33  ;;  %v2706_v10 = vcombine.high (!%p1104_p10), %v1168_v2, %v1168_v2  ;;  %v2705_v18 = vcombine.low (!%p1104_p10), %v1168_v2, %v1168_v2  ;;  %p1148_p11 = scmp.lt.s32.totalorder (!%p1104_p10), %s3264_s14, 2 }
  0xb2   : > { %s3805_s9 = scalar_lea.vmem (!%p1104_p10), [#allocation2], %s3045_s4 }
  0xb3   : > { %v3087_v34 = vld [vmem:[%s3805_s9 + $0x40] sm:$0xff] (!%p1104_p10)   ;;  %v3091_v38 = vld [vmem:[%s3805_s9 + $0x48] sm:$0xff] (!%p1104_p10)   ;;  %v3095_v42 = vld [vmem:[%s3805_s9 + $0x50] sm:$0xff] (!%p1104_p10)  }
  0xb4   : > { %v3088_v35 = vld [vmem:[%s3805_s9 + $0xc0] sm:$0xff] (!%p1104_p10)   ;;  %2832 = vmatprep.subr.bf16.mxu0 (!%p1104_p10), %v3087_v34  ;;  %v3092_v39 = vld [vmem:[%s3805_s9 + $0xc8] sm:$0xff] (!%p1104_p10)   ;;  %v3096_v43 = vld [vmem:[%s3805_s9 + $0xd0] sm:$0xff] (!%p1104_p10)  }
  0xb5   : > { %v3089_v36 = vld [vmem:[%s3805_s9] sm:$0xff] (!%p1104_p10)   ;;  %2860 = vmatprep.subr.bf16.mxu1 (!%p1104_p10), %v3088_v35  ;;  %v3093_v40 = vld [vmem:[%s3805_s9 + $0x8] sm:$0xff] (!%p1104_p10)   ;;  %v3097_v44 = vld [vmem:[%s3805_s9 + $0x10] sm:$0xff] (!%p1104_p10)  }
  0xb6   : > { %v3090_v37 = vld [vmem:[%s3805_s9 + $0x80] sm:$0xff]   ;;  %2833 = vmatpush3.bf16.msra.mxu0 %v3089_v36  ;;  %v3094_v41 = vld [vmem:[%s3805_s9 + $0x88] sm:$0xff]   ;;  %v3098_v45 = vld [vmem:[%s3805_s9 + $0x90] sm:$0xff]   ;;  %s1149_s20 = scalar_select %p1148_p11, %s3264_s14, 2 }
  0xb7   : > { %2861 = vmatpush3.bf16.msra.mxu1 %v3090_v37  ;;  %2834 = vmatprep.subr.bf16.mxu0 %v3091_v38  ;;  %v3099_v46 = vld [vmem:[%s3805_s9 + $0x58] sm:$0xff]   ;;  %v3103_v50 = vld [vmem:[%s3805_s9 + $0x60] sm:$0xff]   ;;  %v3107_v54 = vld [vmem:[%s3805_s9 + $0x68] sm:$0xff]   ;;  %s2829_s12 = sshll.u32 (%p3329_p6), %s3264_s14, 3 }
  0xb8   : > { %2862 = vmatprep.subr.bf16.mxu1 %v3092_v39  ;;  %v3100_v47 = vld [vmem:[%s3805_s9 + $0xd8] sm:$0xff]   ;;  %v3104_v51 = vld [vmem:[%s3805_s9 + $0xe0] sm:$0xff]   ;;  %v3108_v55 = vld [vmem:[%s3805_s9 + $0xe8] sm:$0xff]   ;;  %s1150_s25 = scalar_lea.vmem %s4006_s2, %s1149_s20  ;;  %s2549_s28 = scalar_lea.vmem (%p3329_p6), %s4007_s3, %s2829_s12 }
  0xb9   : > { %v3101_v48 = vld [vmem:[%s3805_s9 + $0x18] sm:$0xff]   ;;  %v3105_v52 = vld [vmem:[%s3805_s9 + $0x20] sm:$0xff]   ;;  %v3109_v56 = vld [vmem:[%s3805_s9 + $0x28] sm:$0xff]  }
  0xba   : > { %2835 = vmatpush3.bf16.msra.mxu0 %v3093_v40  ;;  %v3102_v49 = vld [vmem:[%s3805_s9 + $0x98] sm:$0xff]   ;;  %v3106_v53 = vld [vmem:[%s3805_s9 + $0xa0] sm:$0xff]   ;;  %v3110_v57 = vld [vmem:[%s3805_s9 + $0xa8] sm:$0xff]  }
  0xbb   : > { %2863 = vmatpush3.bf16.msra.mxu1 %v3094_v41  ;;  %2836 = vmatprep.subr.bf16.mxu0 %v3095_v42  ;;  %v3111_v58 = vld [vmem:[%s3805_s9 + $0x70] sm:$0xff]   ;;  %v3115_v62 = vld [vmem:[%s3805_s9 + $0x78] sm:$0xff]   ;;  %v3125_v6 = vld [vmem:[%s3805_s9 + $0x140] sm:$0xff]  }
  0xbc   : > { %2864 = vmatprep.subr.bf16.mxu1 %v3096_v43  ;;  %v3112_v59 = vld [vmem:[%s3805_s9 + $0xf0] sm:$0xff]   ;;  %v3116_v0 = vld [vmem:[%s3805_s9 + $0xf8] sm:$0xff]   ;;  %v3126_v7 = vld [vmem:[%s3805_s9 + $0x1c0] sm:$0xff]  }
  0xbd   : > { %v3113_v60 = vld [vmem:[%s3805_s9 + $0x30] sm:$0xff]   ;;  %v3117_v3 = vld [vmem:[%s3805_s9 + $0x38] sm:$0xff]   ;;  %v3127_v9 = vld [vmem:[%s3805_s9 + $0x100] sm:$0xff]  }
  0xbe   : > { %2837 = vmatpush3.bf16.msra.mxu0 %v3097_v44  ;;  %v3114_v61 = vld [vmem:[%s3805_s9 + $0xb0] sm:$0xff]   ;;  %v3118_v5 = vld [vmem:[%s3805_s9 + $0xb8] sm:$0xff]   ;;  %v3128_v11 = vld [vmem:[%s3805_s9 + $0x180] sm:$0xff]  }
  0xbf   : > { %2865 = vmatpush3.bf16.msra.mxu1 %v3098_v45  ;;  %2838 = vmatprep.subr.bf16.mxu0 %v3099_v46  ;;  %v3129_v12 = vld [vmem:[%s3805_s9 + $0x148] sm:$0xff]   ;;  %v3133_v17 = vld [vmem:[%s3805_s9 + $0x150] sm:$0xff]   ;;  %v3137_v22 = vld [vmem:[%s3805_s9 + $0x158] sm:$0xff]  }
  0xc0   : > { %2866 = vmatprep.subr.bf16.mxu1 %v3100_v47  ;;  %v3130_v13 = vld [vmem:[%s3805_s9 + $0x1c8] sm:$0xff]   ;;  %v3134_v19 = vld [vmem:[%s3805_s9 + $0x1d0] sm:$0xff]   ;;  %v3138_v23 = vld [vmem:[%s3805_s9 + $0x1d8] sm:$0xff]  }
  0xc1   : > { %v3131_v14 = vld [vmem:[%s3805_s9 + $0x108] sm:$0xff]   ;;  %v3135_v20 = vld [vmem:[%s3805_s9 + $0x110] sm:$0xff]   ;;  %v3139_v24 = vld [vmem:[%s3805_s9 + $0x118] sm:$0xff]  }
  0xc2   : > { %2839 = vmatpush3.bf16.msra.mxu0 %v3101_v48  ;;  %v3132_v15 = vld [vmem:[%s3805_s9 + $0x188] sm:$0xff]   ;;  %v3136_v21 = vld [vmem:[%s3805_s9 + $0x190] sm:$0xff]   ;;  %v3140_v25 = vld [vmem:[%s3805_s9 + $0x198] sm:$0xff]  }
  0xc3   : > { %2867 = vmatpush3.bf16.msra.mxu1 %v3102_v49  ;;  %2840 = vmatprep.subr.bf16.mxu0 %v3103_v50  ;;  %v3141_v26 = vld [vmem:[%s3805_s9 + $0x160] sm:$0xff]   ;;  %v3145_v30 = vld [vmem:[%s3805_s9 + $0x168] sm:$0xff]   ;;  %v3153_v34 = vld [vmem:[%s3805_s9 + $0x170] sm:$0xff]  }
  0xc4   : > { %2868 = vmatprep.subr.bf16.mxu1 %v3104_v51  ;;  %v3142_v27 = vld [vmem:[%s3805_s9 + $0x1e0] sm:$0xff]   ;;  %v3146_v31 = vld [vmem:[%s3805_s9 + $0x1e8] sm:$0xff]   ;;  %v3154_v35 = vld [vmem:[%s3805_s9 + $0x1f0] sm:$0xff]  }
  0xc5   : > { %v3143_v28 = vld [vmem:[%s3805_s9 + $0x120] sm:$0xff]   ;;  %v3148_v32 = vld [vmem:[%s3805_s9 + $0x128] sm:$0xff]   ;;  %v3155_v36 = vld [vmem:[%s3805_s9 + $0x130] sm:$0xff]  }
  0xc6   : > { %2841 = vmatpush3.bf16.msra.mxu0 %v3105_v52  ;;  %v3144_v29 = vld [vmem:[%s3805_s9 + $0x1a0] sm:$0xff]   ;;  %v3149_v33 = vld [vmem:[%s3805_s9 + $0x1a8] sm:$0xff]   ;;  %v3156_v37 = vld [vmem:[%s3805_s9 + $0x1b0] sm:$0xff]  }
  0xc7   : > { %2869 = vmatpush3.bf16.msra.mxu1 %v3106_v53  ;;  %2842 = vmatprep.subr.bf16.mxu0 %v3107_v54  ;;  %v3157_v38 = vld [vmem:[%s3805_s9 + $0x178] sm:$0xff]   ;;  %v3161_v42 = vld [vmem:[%s4004_s0 + $0x10] ss:$56 sps:$4 sm:$0xff]   ;;  %v3163_v43 = vld [vmem:[%s4004_s0 + $0x14] ss:$56 sps:$4 sm:$0xff]  }
  0xc8   : > { %2870 = vmatprep.subr.bf16.mxu1 %v3108_v55  ;;  %v3158_v39 = vld [vmem:[%s3805_s9 + $0x1f8] sm:$0xff]   ;;  %v3167_v46 = vld [vmem:[%s3805_s9 + $0x240] sm:$0xff]   ;;  %v3171_v50 = vld [vmem:[%s3805_s9 + $0x248] sm:$0xff]  }
  0xc9   : > { %v3159_v40 = vld [vmem:[%s3805_s9 + $0x138] sm:$0xff]   ;;  %v3168_v47 = vld [vmem:[%s3805_s9 + $0x2c0] sm:$0xff]   ;;  %v3172_v51 = vld [vmem:[%s3805_s9 + $0x2c8] sm:$0xff]  }
  0xca   : > { %2843 = vmatpush3.bf16.msra.mxu0 %v3109_v56  ;;  %v3160_v41 = vld [vmem:[%s3805_s9 + $0x1b8] sm:$0xff]   ;;  %v3169_v48 = vld [vmem:[%s3805_s9 + $0x200] sm:$0xff]   ;;  %v3173_v52 = vld [vmem:[%s3805_s9 + $0x208] sm:$0xff]  }
  0xcb   : > { %2871 = vmatpush3.bf16.msra.mxu1 %v3110_v57  ;;  %2844 = vmatprep.subr.bf16.mxu0 %v3111_v58  ;;  %v3164_v44 = vld [vmem:[%s4004_s0 + $0x18] ss:$56 sps:$4 sm:$0xff]   ;;  %v3166_v45 = vld [vmem:[%s4004_s0 + $0x1c] ss:$56 sps:$4 sm:$0xff]   ;;  %v3170_v49 = vld [vmem:[%s3805_s9 + $0x280] sm:$0xff]  }
  0xcc   : > { %2872 = vmatprep.subr.bf16.mxu1 %v3112_v59  ;;  %v3174_v53 = vld [vmem:[%s3805_s9 + $0x288] sm:$0xff]   ;;  %v1169_v54 = vld [vmem:[%s4004_s0 + $0x80] sm:$0xff]  ;;  %v3177_v57 = vld [vmem:[%s3805_s9 + $0x250] sm:$0xff]  }
  0xcd   : > { %v2708_v55 = vcombine.high %v1169_v54, %v1169_v54  ;;  %v2707_v56 = vcombine.low %v1169_v54, %v1169_v54  ;;  %v3178_v58 = vld [vmem:[%s3805_s9 + $0x2d0] sm:$0xff]   ;;  %v1170_v59 = vld [vmem:[%s4004_s0 + $0x88] sm:$0xff]  ;;  %v3185_v2 = vld [vmem:[%s3805_s9 + $0x218] sm:$0xff]  }
  0xce   : > { %2845 = vmatpush3.bf16.msra.mxu0 %v3113_v60  ;;  %v2710_v60 = vcombine.high %v1170_v59, %v1170_v59  ;;  %v3181_v63 = vld [vmem:[%s3805_s9 + $0x290] sm:$0xff]  }
  0xcf   : > { %2873 = vmatpush3.bf16.msra.mxu1 %v3114_v61  ;;  %2846 = vmatprep.subr.bf16.mxu0 %v3115_v62  ;;  %v3180_v61 = vld [vmem:[%s3805_s9 + $0x210] sm:$0xff]   ;;  %v2709_v62 = vcombine.low %v1170_v59, %v1170_v59 }
  0xd0   : > { %2874 = vmatprep.subr.bf16.mxu1 %v3116_v0  ;;  %v3183_v0 = vld [vmem:[%s3805_s9 + $0x258] sm:$0xff]  }
  0xd2   : > { %2847 = vmatpush3.bf16.msra.mxu0 %v3117_v3  ;;  %v3186_v3 = vld [vmem:[%s3805_s9 + $0x298] sm:$0xff]  }
  0xd3   : > { %2875 = vmatpush3.bf16.msra.mxu1 %v3118_v5  ;;  %2888 = vmatprep.subr.bf16.mxu0 %v3125_v6  ;;  %v3188_v5 = vld [vmem:[%s3805_s9 + $0x2e0] sm:$0xff]  }
  0xd4   : > { %2916 = vmatprep.subr.bf16.mxu1 %v3126_v7  ;;  %v3189_v6 = vld [vmem:[%s3805_s9 + $0x220] sm:$0xff]  }
  0xd5   : > { %2229 = vmatmul.mubr.bf16.vlgmr.msra.gmra.mrb[0].mxu0 %v3119_v1  ;;  %v3184_v1 = vld [vmem:[%s3805_s9 + $0x2d8] sm:$0xff]   ;;  %v3190_v7 = vld [vmem:[%s3805_s9 + $0x2a0] sm:$0xff]  }
  0xd6   : > { %2277 = vmatmul.mubr.bf16.vlgmr.msra.gmra.mrb[0].mxu1 %v3122_v4  ;;  %2889 = vmatpush3.bf16.msra.mxu0 %v3127_v9  ;;  %v3187_v4 = vld [vmem:[%s3805_s9 + $0x260] sm:$0xff]   ;;  %v3192_v9 = vld [vmem:[%s3805_s9 + $0x2e8] sm:$0xff]  }
  0xd7   : > { %2917 = vmatpush3.bf16.msra.mxu1 %v3128_v11  ;;  %2236 = vmatprep.mubr.bf16.mxu0 %v2704_v8  ;;  %v3191_v8 = vld [vmem:[%s3805_s9 + $0x268] sm:$0xff]  }
  0xd8   : > { %2890 = vmatprep.subr.bf16.mxu0 %v3129_v12  ;;  %2284 = vmatprep.mubr.bf16.mxu1 %v2706_v10  ;;  %v3193_v10 = vld [vmem:[%s3805_s9 + $0x228] sm:$0xff]   ;;  %v3195_v12 = vld [vmem:[%s3805_s9 + $0x270] sm:$0xff]  }
  0xd9   : > { %2918 = vmatprep.subr.bf16.mxu1 %v3130_v13  ;;  %v3194_v11 = vld [vmem:[%s3805_s9 + $0x2a8] sm:$0xff]   ;;  %v3196_v13 = vld [vmem:[%s3805_s9 + $0x2f0] sm:$0xff]  }
  0xda   : > { %2891 = vmatpush3.bf16.msra.mxu0 %v3131_v14  ;;  %v3197_v14 = vld [vmem:[%s3805_s9 + $0x230] sm:$0xff]  }
  0xdb   : > { %2919 = vmatpush3.bf16.msra.mxu1 %v3132_v15  ;;  %2892 = vmatprep.subr.bf16.mxu0 %v3133_v17  ;;  %v3198_v15 = vld [vmem:[%s3805_s9 + $0x2b0] sm:$0xff]   ;;  %v3200_v17 = vld [vmem:[%s3805_s9 + $0x2f8] sm:$0xff]  }
  0xdc   : > { %2920 = vmatprep.subr.bf16.mxu1 %v3134_v19  ;;  %v3202_v19 = vld [vmem:[%s3805_s9 + $0x2b8] sm:$0xff]  }
  0xdd   : > { %2237 = vmatmul.mubr.bf16.gmra.mrb[4].mxu0 %v2703_v16  ;;  %v3199_v16 = vld [vmem:[%s3805_s9 + $0x278] sm:$0xff]  }
  0xde   : > { %2893 = vmatpush3.bf16.msra.mxu0 %v3135_v20  ;;  %2285 = vmatmul.mubr.bf16.gmra.mrb[4].mxu1 %v2705_v18  ;;  %v3201_v18 = vld [vmem:[%s3805_s9 + $0x238] sm:$0xff]  }
  0xdf   : > { %2921 = vmatpush3.bf16.msra.mxu1 %v3136_v21  ;;  %2894 = vmatprep.subr.bf16.mxu0 %v3137_v22  ;;  %v3203_v20 = vld [vmem:[%s4004_s0 + $0x20] ss:$56 sps:$4 sm:$0xff]   ;;  %v3205_v21 = vld [vmem:[%s4004_s0 + $0x24] ss:$56 sps:$4 sm:$0xff]  }
  0xe0   : > { %2922 = vmatprep.subr.bf16.mxu1 %v3138_v23  ;;  %2324 = vmatprep.mubr.bf16.mxu0 %v3163_v43  ;;  %v3206_v22 = vld [vmem:[%s4004_s0 + $0x28] ss:$56 sps:$4 sm:$0xff]   ;;  %v3208_v23 = vld [vmem:[%s4004_s0 + $0x2c] ss:$56 sps:$4 sm:$0xff]  }
  0xe1   : > { %2372 = vmatprep.mubr.bf16.mxu1 %v3166_v45  ;;  %v3225_v45 = vld [vmem:[%s3805_s9 + $0x370] sm:$0xff]  }
  0xe2   : > { %2895 = vmatpush3.bf16.msra.mxu0 %v3139_v24  ;;  %v3209_v24 = vld [vmem:[%s3805_s9 + $0x340] sm:$0xff]  }
  0xe3   : > { %2923 = vmatpush3.bf16.msra.mxu1 %v3140_v25  ;;  %2896 = vmatprep.subr.bf16.mxu0 %v3141_v26  ;;  %v3210_v25 = vld [vmem:[%s3805_s9 + $0x300] sm:$0xff]   ;;  %v3211_v26 = vld [vmem:[%s3805_s9 + $0x348] sm:$0xff]  }
  0xe4   : > { %2924 = vmatprep.subr.bf16.mxu1 %v3142_v27  ;;  %v3212_v27 = vld [vmem:[%s3805_s9 + $0x308] sm:$0xff]  }
  0xe6   : > { %2897 = vmatpush3.bf16.msra.mxu0 %v3143_v28  ;;  %v1171_v28 = vld [vmem:[%s4004_s0 + $0x90] sm:$0xff] }
  0xe7   : > { %2925 = vmatpush3.bf16.msra.mxu1 %v3144_v29  ;;  %2898 = vmatprep.subr.bf16.mxu0 %v3145_v30  ;;  %v2712_v29 = vcombine.high %v1171_v28, %v1171_v28  ;;  %v2711_v30 = vcombine.low %v1171_v28, %v1171_v28 }
  0xe8   : > { %2926 = vmatprep.subr.bf16.mxu1 %v3146_v31  ;;  %v1172_v31 = vld [vmem:[%s4004_s0 + $0x98] sm:$0xff] }
  0xea   : > { %2899 = vmatpush3.bf16.msra.mxu0 %v3148_v32  ;;  %v3215_v32 = vld [vmem:[%s3805_s9 + $0x350] sm:$0xff]  }
  0xeb   : > { %2927 = vmatpush3.bf16.msra.mxu1 %v3149_v33  ;;  %2900 = vmatprep.subr.bf16.mxu0 %v3153_v34  ;;  %v2714_v33 = vcombine.high %v1172_v31, %v1172_v31  ;;  %v2713_v34 = vcombine.low %v1172_v31, %v1172_v31 }
  0xec   : > { %2928 = vmatprep.subr.bf16.mxu1 %v3154_v35  ;;  %v3217_v35 = vld [vmem:[%s3805_s9 + $0x310] sm:$0xff]  }
  0xee   : > { %2901 = vmatpush3.bf16.msra.mxu0 %v3155_v36  ;;  %v3219_v36 = vld [vmem:[%s3805_s9 + $0x358] sm:$0xff]  }
  0xef   : > { %2929 = vmatpush3.bf16.msra.mxu1 %v3156_v37  ;;  %2902 = vmatprep.subr.bf16.mxu0 %v3157_v38  ;;  %v3220_v37 = vld [vmem:[%s3805_s9 + $0x318] sm:$0xff]   ;;  %v3221_v38 = vld [vmem:[%s3805_s9 + $0x360] sm:$0xff]  }
  0xf0   : > { %2930 = vmatprep.subr.bf16.mxu1 %v3158_v39  ;;  %v3222_v39 = vld [vmem:[%s3805_s9 + $0x320] sm:$0xff]  }
  0xf2   : > { %2903 = vmatpush3.bf16.msra.mxu0 %v3159_v40  ;;  %v3223_v40 = vld [vmem:[%s3805_s9 + $0x368] sm:$0xff]  }
  0xf3   : > { %2931 = vmatpush3.bf16.msra.mxu1 %v3160_v41  ;;  %2944 = vmatprep.subr.bf16.mxu0 %v3167_v46  ;;  %v3231_v41 = vld [vmem:[%s4004_s0 + $0x34] ss:$56 sps:$4 sm:$0xff]  }
  0xf4   : > { %2972 = vmatprep.subr.bf16.mxu1 %v3168_v47  ;;  %v3226_v46 = vld [vmem:[%s3805_s9 + $0x330] sm:$0xff]   ;;  %v3227_v47 = vld [vmem:[%s3805_s9 + $0x378] sm:$0xff]  }
  0xf5   : > { %2325 = vmatmul.mubr.bf16.vlgmr.msra.gmra.mrb[8].mxu0 %v3161_v42  ;;  %v1173_v42 = vld [vmem:[%s4004_s0 + $0xa0] sm:$0xff] }
  0xf6   : > { %2373 = vmatmul.mubr.bf16.vlgmr.msra.gmra.mrb[8].mxu1 %v3164_v44  ;;  %2945 = vmatpush3.bf16.msra.mxu0 %v3169_v48  ;;  %v2716_v43 = vcombine.high %v1173_v42, %v1173_v42  ;;  %v3224_v44 = vld [vmem:[%s3805_s9 + $0x328] sm:$0xff]   ;;  %v3228_v48 = vld [vmem:[%s3805_s9 + $0x338] sm:$0xff]   ;;  %s3046_s9 = smul.u32 24, %s1110_s30 }
  0xf7   : > { %2973 = vmatpush3.bf16.msra.mxu1 %v3170_v49  ;;  %2946 = vmatprep.subr.bf16.mxu0 %v3171_v50  ;;  %v3229_v49 = vld [vmem:[%s4004_s0 + $0x30] ss:$56 sps:$4 sm:$0xff]   ;;  %v2715_v50 = vcombine.low %v1173_v42, %v1173_v42 }
  0xf8   : > { %2974 = vmatprep.subr.bf16.mxu1 %v3172_v51  ;;  %2332 = vmatprep.mubr.bf16.mxu0 %v2708_v55  ;;  %s1140_s26 = scalar_lea.vmem [#allocation3], %s3046_s9 }
  0xf9   : > { %2380 = vmatprep.mubr.bf16.mxu1 %v2710_v60 }
  0xfa   : > { %2947 = vmatpush3.bf16.msra.mxu0 %v3173_v52 }
  0xfb   : > { %2975 = vmatpush3.bf16.msra.mxu1 %v3174_v53  ;;  %2948 = vmatprep.subr.bf16.mxu0 %v3177_v57  ;;  %v2688_v53 = vld [vmem:[%s1150_s25] ss:$0 sm:$0xff] }
  0xfc   : > { %2976 = vmatprep.subr.bf16.mxu1 %v3178_v58 }
  0xfd   : > { %2333 = vmatmul.mubr.bf16.gmra.mrb[12].mxu0 %v2707_v56 }
  0xfe   : > { %2949 = vmatpush3.bf16.msra.mxu0 %v3180_v61  ;;  %2381 = vmatmul.mubr.bf16.gmra.mrb[12].mxu1 %v2709_v62 }
  0xff   : > { %2977 = vmatpush3.bf16.msra.mxu1 %v3181_v63  ;;  %2950 = vmatprep.subr.bf16.mxu0 %v3183_v0 }
 0x100   : > { %2978 = vmatprep.subr.bf16.mxu1 %v3184_v1  ;;  %2420 = vmatprep.mubr.bf16.mxu0 %v3205_v21 }
 0x101   : > { %2468 = vmatprep.mubr.bf16.mxu1 %v3208_v23 }
 0x102   : > { %2951 = vmatpush3.bf16.msra.mxu0 %v3185_v2 }
 0x103   : > { %2979 = vmatpush3.bf16.msra.mxu1 %v3186_v3  ;;  %2952 = vmatprep.subr.bf16.mxu0 %v3187_v4 }
 0x104   : > { %2980 = vmatprep.subr.bf16.mxu1 %v3188_v5 }
 0x106   : > { %2953 = vmatpush3.bf16.msra.mxu0 %v3189_v6 }
 0x107   : > { %2981 = vmatpush3.bf16.msra.mxu1 %v3190_v7  ;;  %2954 = vmatprep.subr.bf16.mxu0 %v3191_v8 }
 0x108   : > { %2982 = vmatprep.subr.bf16.mxu1 %v3192_v9 }
 0x10a   : > { %2955 = vmatpush3.bf16.msra.mxu0 %v3193_v10 }
 0x10b   : > { %2983 = vmatpush3.bf16.msra.mxu1 %v3194_v11  ;;  %2956 = vmatprep.subr.bf16.mxu0 %v3195_v12 }
 0x10c   : > { %2984 = vmatprep.subr.bf16.mxu1 %v3196_v13 }
 0x10e   : > { %2957 = vmatpush3.bf16.msra.mxu0 %v3197_v14 }
 0x10f   : > { %2985 = vmatpush3.bf16.msra.mxu1 %v3198_v15  ;;  %2958 = vmatprep.subr.bf16.mxu0 %v3199_v16 }
 0x110   : > { %2986 = vmatprep.subr.bf16.mxu1 %v3200_v17 }
 0x112   : > { %2959 = vmatpush3.bf16.msra.mxu0 %v3201_v18 }
 0x113   : > { %2987 = vmatpush3.bf16.msra.mxu1 %v3202_v19  ;;  %3000 = vmatprep.subr.bf16.mxu0 %v3209_v24 }
 0x114   : > { %3028 = vmatprep.subr.bf16.mxu1 %v3209_v24 }
 0x115   : > { %2421 = vmatmul.mubr.bf16.vlgmr.msra.gmra.mrb[16].mxu0 %v3203_v20 }
 0x116   : > { %2469 = vmatmul.mubr.bf16.vlgmr.msra.gmra.mrb[16].mxu1 %v3206_v22  ;;  %3001 = vmatpush3.bf16.msra.mxu0 %v3210_v25 }
 0x117   : > { %3036 = vmatpush3.bf16.msra.mxu1 %v3210_v25  ;;  %3002 = vmatprep.subr.bf16.mxu0 %v3211_v26 }
 0x118   : > { %3029 = vmatprep.subr.bf16.mxu1 %v3211_v26  ;;  %2428 = vmatprep.mubr.bf16.mxu0 %v2712_v29 }
 0x119   : > { %2476 = vmatprep.mubr.bf16.mxu1 %v2714_v33 }
 0x11a   : > { %3003 = vmatpush3.bf16.msra.mxu0 %v3212_v27 }
 0x11b   : > { %3037 = vmatpush3.bf16.msra.mxu1 %v3212_v27  ;;  %3004 = vmatprep.subr.bf16.mxu0 %v3215_v32 }
 0x11c   : > { %3030 = vmatprep.subr.bf16.mxu1 %v3215_v32 }
 0x11d   : > { %2429 = vmatmul.mubr.bf16.gmra.mrb[20].mxu0 %v2711_v30 }
 0x11e   : > { %2477 = vmatmul.mubr.bf16.gmra.mrb[20].mxu1 %v2713_v34  ;;  %3005 = vmatpush3.bf16.msra.mxu0 %v3217_v35 }
 0x11f   : > { %3038 = vmatpush3.bf16.msra.mxu1 %v3217_v35  ;;  %3006 = vmatprep.subr.bf16.mxu0 %v3219_v36 }
 0x120   : > { %3031 = vmatprep.subr.bf16.mxu1 %v3219_v36  ;;  %2516 = vmatprep.mubr.bf16.mxu0 %v3231_v41 }
 0x121   : > { %2524 = vmatprep.mubr.bf16.mxu1 %v2716_v43 }
 0x122   : > { %3007 = vmatpush3.bf16.msra.mxu0 %v3220_v37 }
 0x123   : > { %3039 = vmatpush3.bf16.msra.mxu1 %v3220_v37  ;;  %3008 = vmatprep.subr.bf16.mxu0 %v3221_v38 }
 0x124   : > { %3032 = vmatprep.subr.bf16.mxu1 %v3221_v38 }
 0x126   : > { %3009 = vmatpush3.bf16.msra.mxu0 %v3222_v39 }
 0x127   : > { %3040 = vmatpush3.bf16.msra.mxu1 %v3222_v39  ;;  %3010 = vmatprep.subr.bf16.mxu0 %v3223_v40 }
 0x128   : > { %3033 = vmatprep.subr.bf16.mxu1 %v3223_v40 }
 0x12a   : > { %3011 = vmatpush3.bf16.msra.mxu0 %v3224_v44 }
 0x12b   : > { %3041 = vmatpush3.bf16.msra.mxu1 %v3224_v44  ;;  %3012 = vmatprep.subr.bf16.mxu0 %v3225_v45 }
 0x12c   : > { %3034 = vmatprep.subr.bf16.mxu1 %v3225_v45 }
 0x12e   : > { %3013 = vmatpush3.bf16.msra.mxu0 %v3226_v46 }
 0x12f   : > { %3042 = vmatpush3.bf16.msra.mxu1 %v3226_v46  ;;  %3014 = vmatprep.subr.bf16.mxu0 %v3227_v47 }
 0x130   : > { %3035 = vmatprep.subr.bf16.mxu1 %v3227_v47 }
 0x132   : > { %3015 = vmatpush3.bf16.msra.mxu0 %v3228_v48 }
 0x133   : > { %3043 = vmatpush3.bf16.msra.mxu1 %v3228_v48 }
 0x135   : > { %2517 = vmatmul.mubr.bf16.vlgmr.msra.gmra.mrb[24].mxu0 %v3229_v49 }
 0x136   : > { %2525 = vmatmul.mubr.bf16.vlgmr.msra.gmra.mrb[24].mxu1 %v2715_v50 }
 0x1a8   : > { %v2848_v51 = vpop.f32.mrb[0].mxu0 }
 0x1a9   : > { %v2876_v52 = vpop.f32.mrb[0].mxu1  ;;  %v2849_v54 = vpop.f32.mrb[1].mxu0 }
 0x1aa   : > { %v2850_v55 = vadd.f32 %v2849_v54, %v2848_v51  ;;  %v2877_v56 = vpop.f32.mrb[1].mxu1  ;;  %v2851_v57 = vpop.f32.mrb[2].mxu0 }
 0x1ab   : > { %v2878_v58 = vadd.f32 %v2877_v56, %v2876_v52  ;;  %v2879_v59 = vpop.f32.mrb[2].mxu1  ;;  %v2852_v60 = vpop.f32.mrb[3].mxu0 }
 0x1ac   : > { %v2231_v61 = vadd.f32 %v2850_v55, %v2688_v53  ;;  %v2853_v62 = vadd.f32 %v2852_v60, %v2851_v57  ;;  %v2880_v63 = vpop.f32.mrb[3].mxu1 }
 0x1ad   : > { %v2881_v0 = vadd.f32 %v2880_v63, %v2879_v59 }
 0x1ae   : > { %v2279_v1 = vadd.f32 %v2878_v58, %v2231_v61  ;;  %v2234_v2 = vadd.f32 %v2853_v62, %v2688_v53 }
 0x1b0   : > { %v2282_v3 = vadd.f32 %v2881_v0, %v2234_v2  ;;  %v2854_v4 = vpop.f32.mrb[4].mxu0 }
 0x1b1   : > { %v2855_v5 = vpop.f32.mrb[5].mxu0  ;;  %v2882_v6 = vpop.f32.mrb[4].mxu1 }
 0x1b2   : > { %v2856_v7 = vadd.f32 %v2855_v5, %v2854_v4  ;;  %v2857_v8 = vpop.f32.mrb[6].mxu0  ;;  %v2883_v9 = vpop.f32.mrb[5].mxu1 }
 0x1b3   : > { %v2858_v10 = vpop.f32.mrb[7].mxu0  ;;  %v2884_v11 = vadd.f32 %v2883_v9, %v2882_v6  ;;  %v2885_v12 = vpop.f32.mrb[6].mxu1 }
 0x1b4   : > { %v2239_v13 = vadd.f32 %v2856_v7, %v2688_v53  ;;  %v2886_v14 = vpop.f32.mrb[7].mxu1 }
 0x1b6   : > { %v2287_v15 = vadd.f32 %v2884_v11, %v2239_v13 }
 0x1c8   : > { %v2904_v16 = vpop.f32.mrb[8].mxu0 }
 0x1c9   : > { %v2932_v17 = vpop.f32.mrb[8].mxu1  ;;  %v2905_v18 = vpop.f32.mrb[9].mxu0 }
 0x1ca   : > { %v2906_v19 = vadd.f32 %v2905_v18, %v2904_v16  ;;  %v2933_v20 = vpop.f32.mrb[9].mxu1  ;;  %v2907_v21 = vpop.f32.mrb[10].mxu0 }
 0x1cb   : > { %v2934_v22 = vadd.f32 %v2933_v20, %v2932_v17  ;;  %v2935_v23 = vpop.f32.mrb[10].mxu1  ;;  %v2908_v24 = vpop.f32.mrb[11].mxu0 }
 0x1cc   : > { %v2327_v25 = vadd.f32 %v2906_v19, %v2279_v1  ;;  %v2909_v26 = vadd.f32 %v2908_v24, %v2907_v21  ;;  %v2936_v27 = vpop.f32.mrb[11].mxu1 }
 0x1cd   : > { %v2937_v28 = vadd.f32 %v2936_v27, %v2935_v23 }
 0x1ce   : > { %v2375_v29 = vadd.f32 %v2934_v22, %v2327_v25  ;;  %v2330_v30 = vadd.f32 %v2909_v26, %v2282_v3 }
 0x1d0   : > { %v2378_v31 = vadd.f32 %v2937_v28, %v2330_v30  ;;  %v2910_v32 = vpop.f32.mrb[12].mxu0 }
 0x1d1   : > { %v2911_v33 = vpop.f32.mrb[13].mxu0  ;;  %v2938_v36 = vpop.f32.mrb[12].mxu1 }
 0x1d2   : > { %v2912_v34 = vadd.f32 %v2911_v33, %v2910_v32  ;;  %v2913_v35 = vpop.f32.mrb[14].mxu0  ;;  %v2939_v39 = vpop.f32.mrb[13].mxu1 }
 0x1d3   : > { %v2914_v37 = vpop.f32.mrb[15].mxu0  ;;  %v2940_v40 = vadd.f32 %v2939_v39, %v2938_v36  ;;  %v2941_v41 = vpop.f32.mrb[14].mxu1 }
 0x1d4   : > { %v2335_v38 = vadd.f32 %v2912_v34, %v2287_v15  ;;  %v2942_v42 = vpop.f32.mrb[15].mxu1 }
 0x1d6   : > { %v2383_v43 = vadd.f32 %v2940_v40, %v2335_v38 }
 0x1e8   : > { %v2960_v44 = vpop.f32.mrb[16].mxu0 }
 0x1e9   : > { %v2961_v45 = vpop.f32.mrb[17].mxu0  ;;  %v2988_v46 = vpop.f32.mrb[16].mxu1 }
 0x1ea   : > { %v2962_v47 = vadd.f32 %v2961_v45, %v2960_v44  ;;  %v2963_v48 = vpop.f32.mrb[18].mxu0  ;;  %v2989_v49 = vpop.f32.mrb[17].mxu1 }
 0x1eb   : > { %v2964_v50 = vpop.f32.mrb[19].mxu0  ;;  %v2990_v52 = vadd.f32 %v2989_v49, %v2988_v46  ;;  %v2991_v53 = vpop.f32.mrb[18].mxu1 }
 0x1ec   : > { %v2423_v51 = vadd.f32 %v2962_v47, %v2375_v29  ;;  %v2965_v54 = vadd.f32 %v2964_v50, %v2963_v48  ;;  %v2992_v55 = vpop.f32.mrb[19].mxu1 }
 0x1ed   : > { %v2993_v58 = vadd.f32 %v2992_v55, %v2991_v53 }
 0x1ee   : > { %v2471_v56 = vadd.f32 %v2990_v52, %v2423_v51  ;;  %v2426_v57 = vadd.f32 %v2965_v54, %v2378_v31 }
 0x1f0   : > { %v2474_v59 = vadd.f32 %v2993_v58, %v2426_v57  ;;  %v2966_v60 = vpop.f32.mrb[20].mxu0 }
 0x1f1   : > { %v2967_v61 = vpop.f32.mrb[21].mxu0  ;;  %v2994_v63 = vpop.f32.mrb[20].mxu1 }
 0x1f2   : > { %v2968_v62 = vadd.f32 %v2967_v61, %v2966_v60  ;;  %v2969_v0 = vpop.f32.mrb[22].mxu0  ;;  %v2995_v1 = vpop.f32.mrb[21].mxu1 }
 0x1f3   : > { %v2970_v2 = vpop.f32.mrb[23].mxu0  ;;  %v2996_v4 = vadd.f32 %v2995_v1, %v2994_v63  ;;  %v2997_v5 = vpop.f32.mrb[22].mxu1 }
 0x1f4   : > { %v2431_v3 = vadd.f32 %v2968_v62, %v2383_v43  ;;  %v2998_v6 = vpop.f32.mrb[23].mxu1 }
 0x1f6   : > { %v2479_v7 = vadd.f32 %v2996_v4, %v2431_v3 }
 0x208   : > { %v3016_v8 = vpop.f32.mrb[24].mxu0 }
 0x209   : > { %v3022_v9 = vpop.f32.mrb[24].mxu1  ;;  %v3017_v10 = vpop.f32.mrb[25].mxu0 }
 0x20a   : > { %v3018_v11 = vadd.f32 %v3017_v10, %v3016_v8  ;;  %v3023_v12 = vpop.f32.mrb[25].mxu1  ;;  %v3019_v13 = vpop.f32.mrb[26].mxu0 }
 0x20b   : > { %v3024_v14 = vadd.f32 %v3023_v12, %v3022_v9  ;;  %v3025_v15 = vpop.f32.mrb[26].mxu1  ;;  %v3020_v16 = vpop.f32.mrb[27].mxu0 }
 0x20c   : > { %v2519_v17 = vadd.f32 %v3018_v11, %v2471_v56  ;;  %v3021_v18 = vadd.f32 %v3020_v16, %v3019_v13  ;;  %v3026_v19 = vpop.f32.mrb[27].mxu1  ;;  %2544 = sbr.rel (!%p3329_p6) target bundleno = 539 (0x21b), region = 77 }
 0x20d   : > { %v2527_v20 = vadd.f32 %v3024_v14, %v2479_v7 }
 0x20e   : > { %v2532_v21 = vmax.f32 %v2519_v17, 0.0  ;;  %v2522_v22 = vadd.f32 %v3021_v18, %v2474_v59 }
 0x20f   : > { %v2534_v23 = vmax.f32 %v2527_v20, 0.0 }
 0x210   : > { %2535 = vst [vmem:[%s1140_s26] sm:$0xff] %v2532_v21  ;;  %v2533_v24 = vmax.f32 %v2522_v22, 0.0 }
 0x211   : > { %2537 = vst [vmem:[%s1140_s26 + $0x10] sm:$0xff] %v2534_v23 }
 0x212   : > { %2536 = vst [vmem:[%s1140_s26 + $0x8] sm:$0xff] %v2533_v24 }
 0x217   : > { %v2581_v25 = vld [vmem:[%s1140_s26] sm:$0xff] }
 0x218   : > { %v2585_v27 = vld [vmem:[%s1140_s26 + $0x10] sm:$0xff]  ;;  %2582 = vst [vmem:[%s2549_s28] sm:$0xff] %v2581_v25 }
 0x219   : > { %v2583_v26 = vld [vmem:[%s1140_s26 + $0x8] sm:$0xff]  ;;  %2586 = vst [vmem:[%s2549_s28 + $0x30] sm:$0xff] %v2585_v27 }
 0x21a   : > { %2584 = vst [vmem:[%s2549_s28 + $0x18] sm:$0xff] %v2583_v26 }
 0x21b PF: > { %s13_s16 = sadd.s32 1, %s3272_s16   ;;  %s4009_s12 = smov %s3260_s13 }
 0x21c   : > { %p10_p12 = scmp.ge.s32.totalorder %s13_s16, 5   ;;  %s4010_s13 = smov %s3334_s22 }
 0x21d   : > { %s4011_s14 = smov %s3268_s15  ;;  %s4012_s15 = smov %s4014_s17 }
 0x21e   :  { %12 = sbr.rel (!%p10_p12) target bundleno = 3 (0x3), region = 152 }

// kernel: alexnet_forward.13
= control target key start
LH: loop header
LB: loop body
LE: loop exit
PB: predicated region body
PF: predicated region fallthrough
CT: control target
= control target key end

     0   :  { %s4300_s1 = inlined_call_operand.vmem [shape: bf16[2304,256], index: 1, kind: input, shape index: {}]   ;;  %s4301_s0 = inlined_call_operand.vmem [shape: bf16[24,2304], index: 0, kind: input, shape index: {}]   ;;  %s4302_s2 = inlined_call_operand.vmem [shape: f32[1,256], index: 2, kind: input, shape index: {}]   ;;  %s4303_s3 = inlined_call_operand.vmem [shape: f32[24,256], index: 3, kind: output, shape index: {}]  }
   0x1   :  { %v2831_v0 = vld [vmem:[%s4300_s1 + $0x4] ss:$8 sps:$4 sm:$0xff]   ;;  %v2835_v2 = vld [vmem:[%s4300_s1] ss:$8 sps:$4 sm:$0xff]   ;;  %v2837_v4 = vld [vmem:[%s4300_s1 + $0x14] ss:$8 sps:$4 sm:$0xff]  }
   0x2   :  { %v2833_v1 = vld [vmem:[%s4300_s1 + $0x404] ss:$8 sps:$4 sm:$0xff]   ;;  %1934 = vmatprep.subr.bf16.mxu1 %v2831_v0  ;;  %v2836_v3 = vld [vmem:[%s4300_s1 + $0x400] ss:$8 sps:$4 sm:$0xff]   ;;  %v2839_v5 = vld [vmem:[%s4300_s1 + $0x414] ss:$8 sps:$4 sm:$0xff]  }
   0x3   :  { %2138 = vmatprep.subr.bf16.mxu0 %v2833_v1  ;;  %1935 = vmatpush1.bf16.msra.mxu1 %v2835_v2  ;;  %v2841_v6 = vld [vmem:[%s4300_s1 + $0x10] ss:$8 sps:$4 sm:$0xff]   ;;  %v2843_v8 = vld [vmem:[%s4300_s1 + $0x24] ss:$8 sps:$4 sm:$0xff]   ;;  %v2847_v10 = vld [vmem:[%s4300_s1 + $0x20] ss:$8 sps:$4 sm:$0xff]  }
   0x4   :  { %2139 = vmatpush1.bf16.msra.mxu0 %v2836_v3  ;;  %1936 = vmatprep.subr.bf16.mxu1 %v2837_v4  ;;  %v2842_v7 = vld [vmem:[%s4300_s1 + $0x410] ss:$8 sps:$4 sm:$0xff]   ;;  %v2845_v9 = vld [vmem:[%s4300_s1 + $0x424] ss:$8 sps:$4 sm:$0xff]   ;;  %v2848_v11 = vld [vmem:[%s4300_s1 + $0x420] ss:$8 sps:$4 sm:$0xff]  }
   0x5   :  { %2140 = vmatprep.subr.bf16.mxu0 %v2839_v5  ;;  %v2849_v12 = vld [vmem:[%s4300_s1 + $0x34] ss:$8 sps:$4 sm:$0xff]   ;;  %v2853_v14 = vld [vmem:[%s4300_s1 + $0x30] ss:$8 sps:$4 sm:$0xff]   ;;  %v2855_v16 = vld [vmem:[%s4300_s1 + $0x44] ss:$8 sps:$4 sm:$0xff]  }
   0x6   :  { %v2851_v13 = vld [vmem:[%s4300_s1 + $0x434] ss:$8 sps:$4 sm:$0xff]   ;;  %v2854_v15 = vld [vmem:[%s4300_s1 + $0x430] ss:$8 sps:$4 sm:$0xff]   ;;  %v2857_v17 = vld [vmem:[%s4300_s1 + $0x444] ss:$8 sps:$4 sm:$0xff]  }
   0x7   :  { %1937 = vmatpush1.bf16.msra.mxu1 %v2841_v6  ;;  %v2859_v18 = vld [vmem:[%s4300_s1 + $0x40] ss:$8 sps:$4 sm:$0xff]   ;;  %v2861_v20 = vld [vmem:[%s4300_s1 + $0x54] ss:$8 sps:$4 sm:$0xff]   ;;  %v2865_v22 = vld [vmem:[%s4300_s1 + $0x50] ss:$8 sps:$4 sm:$0xff]  }
   0x8   :  { %2141 = vmatpush1.bf16.msra.mxu0 %v2842_v7  ;;  %1938 = vmatprep.subr.bf16.mxu1 %v2843_v8  ;;  %v2860_v19 = vld [vmem:[%s4300_s1 + $0x440] ss:$8 sps:$4 sm:$0xff]   ;;  %v2863_v21 = vld [vmem:[%s4300_s1 + $0x454] ss:$8 sps:$4 sm:$0xff]   ;;  %v2866_v23 = vld [vmem:[%s4300_s1 + $0x450] ss:$8 sps:$4 sm:$0xff]  }
   0x9   :  { %2142 = vmatprep.subr.bf16.mxu0 %v2845_v9  ;;  %v2867_v24 = vld [vmem:[%s4300_s1 + $0x64] ss:$8 sps:$4 sm:$0xff]   ;;  %v2871_v26 = vld [vmem:[%s4300_s1 + $0x60] ss:$8 sps:$4 sm:$0xff]   ;;  %v2873_v28 = vld [vmem:[%s4300_s1 + $0x74] ss:$8 sps:$4 sm:$0xff]  }
   0xa   :  { %v2869_v25 = vld [vmem:[%s4300_s1 + $0x464] ss:$8 sps:$4 sm:$0xff]   ;;  %v2872_v27 = vld [vmem:[%s4300_s1 + $0x460] ss:$8 sps:$4 sm:$0xff]   ;;  %v2875_v29 = vld [vmem:[%s4300_s1 + $0x474] ss:$8 sps:$4 sm:$0xff]  }
   0xb   :  { %1939 = vmatpush1.bf16.msra.mxu1 %v2847_v10  ;;  %v2877_v30 = vld [vmem:[%s4300_s1 + $0x70] ss:$8 sps:$4 sm:$0xff]   ;;  %v2879_v32 = vld [vmem:[%s4300_s1 + $0x84] ss:$8 sps:$4 sm:$0xff]   ;;  %v2883_v34 = vld [vmem:[%s4300_s1 + $0x80] ss:$8 sps:$4 sm:$0xff]  }
   0xc   :  { %2143 = vmatpush1.bf16.msra.mxu0 %v2848_v11  ;;  %1940 = vmatprep.subr.bf16.mxu1 %v2849_v12  ;;  %v2878_v31 = vld [vmem:[%s4300_s1 + $0x470] ss:$8 sps:$4 sm:$0xff]   ;;  %v2881_v33 = vld [vmem:[%s4300_s1 + $0x484] ss:$8 sps:$4 sm:$0xff]   ;;  %v2884_v35 = vld [vmem:[%s4300_s1 + $0x480] ss:$8 sps:$4 sm:$0xff]  }
   0xd   :  { %2144 = vmatprep.subr.bf16.mxu0 %v2851_v13  ;;  %v2885_v36 = vld [vmem:[%s4300_s1 + $0x94] ss:$8 sps:$4 sm:$0xff]   ;;  %v2889_v38 = vld [vmem:[%s4300_s1 + $0x90] ss:$8 sps:$4 sm:$0xff]   ;;  %v2891_v40 = vld [vmem:[%s4300_s1 + $0xa4] ss:$8 sps:$4 sm:$0xff]  }
   0xe   :  { %v2887_v37 = vld [vmem:[%s4300_s1 + $0x494] ss:$8 sps:$4 sm:$0xff]   ;;  %v2890_v39 = vld [vmem:[%s4300_s1 + $0x490] ss:$8 sps:$4 sm:$0xff]   ;;  %v2893_v41 = vld [vmem:[%s4300_s1 + $0x4a4] ss:$8 sps:$4 sm:$0xff]  }
   0xf   :  { %1941 = vmatpush1.bf16.msra.mxu1 %v2853_v14  ;;  %v2895_v42 = vld [vmem:[%s4300_s1 + $0xa0] ss:$8 sps:$4 sm:$0xff]   ;;  %v2897_v44 = vld [vmem:[%s4300_s1 + $0xb4] ss:$8 sps:$4 sm:$0xff]   ;;  %v2901_v46 = vld [vmem:[%s4300_s1 + $0xb0] ss:$8 sps:$4 sm:$0xff]  }
  0x10   :  { %2145 = vmatpush1.bf16.msra.mxu0 %v2854_v15  ;;  %1942 = vmatprep.subr.bf16.mxu1 %v2855_v16  ;;  %v2896_v43 = vld [vmem:[%s4300_s1 + $0x4a0] ss:$8 sps:$4 sm:$0xff]   ;;  %v2899_v45 = vld [vmem:[%s4300_s1 + $0x4b4] ss:$8 sps:$4 sm:$0xff]   ;;  %v2902_v47 = vld [vmem:[%s4300_s1 + $0x4b0] ss:$8 sps:$4 sm:$0xff]  }
  0x11   :  { %2146 = vmatprep.subr.bf16.mxu0 %v2857_v17  ;;  %v2929_v48 = vld [vmem:[%s4301_s0 + $0x4] ss:$72 sps:$4 sm:$0xff]   ;;  %v2907_v52 = vld [vmem:[%s4300_s1 + $0xc0] ss:$8 sps:$4 sm:$0xff]   ;;  %v2909_v54 = vld [vmem:[%s4300_s1 + $0xd4] ss:$8 sps:$4 sm:$0xff]  }
  0x12   :  { %v2903_v49 = vld [vmem:[%s4300_s1 + $0xc4] ss:$8 sps:$4 sm:$0xff]   ;;  %1966 = vmatprep.mubr.bf16.mxu1 %v2929_v48  ;;  %v2908_v53 = vld [vmem:[%s4300_s1 + $0x4c0] ss:$8 sps:$4 sm:$0xff]   ;;  %v2911_v55 = vld [vmem:[%s4300_s1 + $0x4d4] ss:$8 sps:$4 sm:$0xff]  }
  0x13   :  { %1943 = vmatpush1.bf16.msra.mxu1 %v2859_v18  ;;  %v2905_v50 = vld [vmem:[%s4300_s1 + $0x4c4] ss:$8 sps:$4 sm:$0xff]   ;;  %v2913_v56 = vld [vmem:[%s4300_s1 + $0xd0] ss:$8 sps:$4 sm:$0xff]   ;;  %v2919_v60 = vld [vmem:[%s4300_s1 + $0xe0] ss:$8 sps:$4 sm:$0xff]  }
  0x14   :  { %2147 = vmatpush1.bf16.msra.mxu0 %v2860_v19  ;;  %1944 = vmatprep.subr.bf16.mxu1 %v2861_v20  ;;  %v2935_v51 = vld [vmem:[%s4301_s0 + $0x24] ss:$72 sps:$4 sm:$0xff]   ;;  %v2914_v57 = vld [vmem:[%s4300_s1 + $0x4d0] ss:$8 sps:$4 sm:$0xff]   ;;  %v2920_v61 = vld [vmem:[%s4300_s1 + $0x4e0] ss:$8 sps:$4 sm:$0xff]  }
  0x15   :  { %2148 = vmatprep.subr.bf16.mxu0 %v2863_v21  ;;  %2170 = vmatprep.mubr.bf16.mxu0 %v2935_v51  ;;  %v2915_v58 = vld [vmem:[%s4300_s1 + $0xe4] ss:$8 sps:$4 sm:$0xff]   ;;  %v2921_v62 = vld [vmem:[%s4300_s1 + $0xf4] ss:$8 sps:$4 sm:$0xff]   ;;  %v2925_v0 = vld [vmem:[%s4300_s1 + $0xf0] ss:$8 sps:$4 sm:$0xff]  }
  0x16   :  { %v2917_v59 = vld [vmem:[%s4300_s1 + $0x4e4] ss:$8 sps:$4 sm:$0xff]   ;;  %v2923_v63 = vld [vmem:[%s4300_s1 + $0x4f4] ss:$8 sps:$4 sm:$0xff]   ;;  %v2926_v1 = vld [vmem:[%s4300_s1 + $0x4f0] ss:$8 sps:$4 sm:$0xff]  }
  0x17   :  { %1945 = vmatpush1.bf16.msra.mxu1 %v2865_v22  ;;  %v2932_v2 = vld [vmem:[%s4300_s1 + $0x104] ss:$8 sps:$4 sm:$0xff]   ;;  %v2927_v4 = vld [vmem:[%s4301_s0] ss:$72 sps:$4 sm:$0xff]   ;;  %v2941_v8 = vld [vmem:[%s4300_s1 + $0x114] ss:$8 sps:$4 sm:$0xff]  }
  0x18   :  { %2149 = vmatpush1.bf16.msra.mxu0 %v2866_v23  ;;  %1946 = vmatprep.subr.bf16.mxu1 %v2867_v24  ;;  %v2938_v3 = vld [vmem:[%s4300_s1 + $0x504] ss:$8 sps:$4 sm:$0xff]   ;;  %v2930_v5 = vld [vmem:[%s4300_s1 + $0x100] ss:$8 sps:$4 sm:$0xff]   ;;  %v2944_v9 = vld [vmem:[%s4300_s1 + $0x514] ss:$8 sps:$4 sm:$0xff]  }
  0x19   :  { %2150 = vmatprep.subr.bf16.mxu0 %v2869_v25  ;;  %v2933_v6 = vld [vmem:[%s4301_s0 + $0x20] ss:$72 sps:$4 sm:$0xff]   ;;  %v2939_v10 = vld [vmem:[%s4300_s1 + $0x110] ss:$8 sps:$4 sm:$0xff]   ;;  %v2947_v12 = vld [vmem:[%s4300_s1 + $0x124] ss:$8 sps:$4 sm:$0xff]  }
  0x1a   :  { %v2936_v7 = vld [vmem:[%s4300_s1 + $0x500] ss:$8 sps:$4 sm:$0xff]   ;;  %v2942_v11 = vld [vmem:[%s4300_s1 + $0x510] ss:$8 sps:$4 sm:$0xff]   ;;  %v2950_v13 = vld [vmem:[%s4300_s1 + $0x524] ss:$8 sps:$4 sm:$0xff]  }
  0x1b   :  { %1947 = vmatpush1.bf16.msra.mxu1 %v2871_v26  ;;  %v2945_v14 = vld [vmem:[%s4300_s1 + $0x120] ss:$8 sps:$4 sm:$0xff]   ;;  %v2953_v16 = vld [vmem:[%s4300_s1 + $0x134] ss:$8 sps:$4 sm:$0xff]   ;;  %v2951_v18 = vld [vmem:[%s4300_s1 + $0x130] ss:$8 sps:$4 sm:$0xff]  }
  0x1c   :  { %2151 = vmatpush1.bf16.msra.mxu0 %v2872_v27  ;;  %1948 = vmatprep.subr.bf16.mxu1 %v2873_v28  ;;  %v2948_v15 = vld [vmem:[%s4300_s1 + $0x520] ss:$8 sps:$4 sm:$0xff]   ;;  %v2956_v17 = vld [vmem:[%s4300_s1 + $0x534] ss:$8 sps:$4 sm:$0xff]   ;;  %v2954_v19 = vld [vmem:[%s4300_s1 + $0x530] ss:$8 sps:$4 sm:$0xff]  }
  0x1d   :  { %2152 = vmatprep.subr.bf16.mxu0 %v2875_v29  ;;  %v2959_v20 = vld [vmem:[%s4300_s1 + $0x144] ss:$8 sps:$4 sm:$0xff]   ;;  %v2957_v22 = vld [vmem:[%s4300_s1 + $0x140] ss:$8 sps:$4 sm:$0xff]   ;;  %v2965_v24 = vld [vmem:[%s4300_s1 + $0x154] ss:$8 sps:$4 sm:$0xff]  }
  0x1e   :  { %v2962_v21 = vld [vmem:[%s4300_s1 + $0x544] ss:$8 sps:$4 sm:$0xff]   ;;  %v2960_v23 = vld [vmem:[%s4300_s1 + $0x540] ss:$8 sps:$4 sm:$0xff]   ;;  %v2968_v25 = vld [vmem:[%s4300_s1 + $0x554] ss:$8 sps:$4 sm:$0xff]  }
  0x1f   :  { %1949 = vmatpush1.bf16.msra.mxu1 %v2877_v30  ;;  %v32_v26 = vld [vmem:[%s4301_s0 + $0x90] sm:$0xff] }
  0x20   :  { %2153 = vmatpush1.bf16.msra.mxu0 %v2878_v31  ;;  %1950 = vmatprep.subr.bf16.mxu1 %v2879_v32  ;;  %v2963_v27 = vld [vmem:[%s4300_s1 + $0x150] ss:$8 sps:$4 sm:$0xff]   ;;  %v2428_v28 = vcombine.high %v32_v26, %v32_v26  ;;  %v2427_v29 = vcombine.low %v32_v26, %v32_v26  ;;  %v2971_v32 = vld [vmem:[%s4300_s1 + $0x164] ss:$8 sps:$4 sm:$0xff]   ;;  %v2989_v48 = vld [vmem:[%s4300_s1 + $0x194] ss:$8 sps:$4 sm:$0xff]  }
  0x21   :  { %2154 = vmatprep.subr.bf16.mxu0 %v2881_v33  ;;  %v2966_v30 = vld [vmem:[%s4300_s1 + $0x550] ss:$8 sps:$4 sm:$0xff]   ;;  %v2974_v33 = vld [vmem:[%s4300_s1 + $0x564] ss:$8 sps:$4 sm:$0xff]  }
  0x22   :  { %v36_v31 = vld [vmem:[%s4301_s0 + $0xb0] sm:$0xff]  ;;  %v3053_v26 = vld [vmem:[%s4300_s1 + $0x224] ss:$8 sps:$4 sm:$0xff]  }
  0x23   :  { %1951 = vmatpush1.bf16.msra.mxu1 %v2883_v34  ;;  %v2436_v34 = vcombine.high %v36_v31, %v36_v31  ;;  %v2990_v51 = vld [vmem:[%s4300_s1 + $0x590] ss:$8 sps:$4 sm:$0xff]  }
  0x24   :  { %2155 = vmatpush1.bf16.msra.mxu0 %v2884_v35  ;;  %1952 = vmatprep.subr.bf16.mxu1 %v2885_v36  ;;  %v2435_v35 = vcombine.low %v36_v31, %v36_v31  ;;  %v2969_v36 = vld [vmem:[%s4300_s1 + $0x160] ss:$8 sps:$4 sm:$0xff]  }
  0x25   :  { %2156 = vmatprep.subr.bf16.mxu0 %v2887_v37  ;;  %v2972_v37 = vld [vmem:[%s4300_s1 + $0x560] ss:$8 sps:$4 sm:$0xff]  }
  0x27   :  { %1953 = vmatpush1.bf16.msra.mxu1 %v2889_v38  ;;  %v2977_v38 = vld [vmem:[%s4300_s1 + $0x174] ss:$8 sps:$4 sm:$0xff]  }
  0x28   :  { %2157 = vmatpush1.bf16.msra.mxu0 %v2890_v39  ;;  %1954 = vmatprep.subr.bf16.mxu1 %v2891_v40  ;;  %v2980_v39 = vld [vmem:[%s4300_s1 + $0x574] ss:$8 sps:$4 sm:$0xff]  }
  0x29   :  { %2158 = vmatprep.subr.bf16.mxu0 %v2893_v41  ;;  %v3035_v40 = vld [vmem:[%s4301_s0 + $0xc] ss:$72 sps:$4 sm:$0xff]   ;;  %v2975_v41 = vld [vmem:[%s4300_s1 + $0x170] ss:$8 sps:$4 sm:$0xff]  }
  0x2b   :  { %1955 = vmatpush1.bf16.msra.mxu1 %v2895_v42  ;;  %v2978_v42 = vld [vmem:[%s4300_s1 + $0x570] ss:$8 sps:$4 sm:$0xff]  }
  0x2c   :  { %2159 = vmatpush1.bf16.msra.mxu0 %v2896_v43  ;;  %1956 = vmatprep.subr.bf16.mxu1 %v2897_v44  ;;  %v3041_v43 = vld [vmem:[%s4301_s0 + $0x2c] ss:$72 sps:$4 sm:$0xff]  }
  0x2d   :  { %2160 = vmatprep.subr.bf16.mxu0 %v2899_v45  ;;  %v2983_v44 = vld [vmem:[%s4300_s1 + $0x184] ss:$8 sps:$4 sm:$0xff]  }
  0x2e   :  { %v2986_v45 = vld [vmem:[%s4300_s1 + $0x584] ss:$8 sps:$4 sm:$0xff]  }
  0x2f   :  { %1957 = vmatpush1.bf16.msra.mxu1 %v2901_v46  ;;  %v2981_v46 = vld [vmem:[%s4300_s1 + $0x180] ss:$8 sps:$4 sm:$0xff]  }
  0x30   :  { %2161 = vmatpush1.bf16.msra.mxu0 %v2902_v47  ;;  %1958 = vmatprep.subr.bf16.mxu1 %v2903_v49  ;;  %v2984_v47 = vld [vmem:[%s4300_s1 + $0x580] ss:$8 sps:$4 sm:$0xff]   ;;  %v2992_v49 = vld [vmem:[%s4300_s1 + $0x594] ss:$8 sps:$4 sm:$0xff]  }
  0x31   :  { %2162 = vmatprep.subr.bf16.mxu0 %v2905_v50  ;;  %v2987_v50 = vld [vmem:[%s4300_s1 + $0x190] ss:$8 sps:$4 sm:$0xff]  }
  0x33   :  { %1959 = vmatpush1.bf16.msra.mxu1 %v2907_v52  ;;  %v2995_v52 = vld [vmem:[%s4300_s1 + $0x1a4] ss:$8 sps:$4 sm:$0xff]  }
  0x34   :  { %2163 = vmatpush1.bf16.msra.mxu0 %v2908_v53  ;;  %1960 = vmatprep.subr.bf16.mxu1 %v2909_v54  ;;  %v2998_v53 = vld [vmem:[%s4300_s1 + $0x5a4] ss:$8 sps:$4 sm:$0xff]   ;;  %v2993_v54 = vld [vmem:[%s4300_s1 + $0x1a0] ss:$8 sps:$4 sm:$0xff]  }
  0x35   :  { %2164 = vmatprep.subr.bf16.mxu0 %v2911_v55  ;;  %v2996_v55 = vld [vmem:[%s4300_s1 + $0x5a0] ss:$8 sps:$4 sm:$0xff]  }
  0x37   :  { %1961 = vmatpush1.bf16.msra.mxu1 %v2913_v56  ;;  %v3001_v56 = vld [vmem:[%s4300_s1 + $0x1b4] ss:$8 sps:$4 sm:$0xff]  }
  0x38   :  { %2165 = vmatpush1.bf16.msra.mxu0 %v2914_v57  ;;  %1962 = vmatprep.subr.bf16.mxu1 %v2915_v58  ;;  %v3004_v57 = vld [vmem:[%s4300_s1 + $0x5b4] ss:$8 sps:$4 sm:$0xff]   ;;  %v2999_v58 = vld [vmem:[%s4300_s1 + $0x1b0] ss:$8 sps:$4 sm:$0xff]  }
  0x39   :  { %2166 = vmatprep.subr.bf16.mxu0 %v2917_v59  ;;  %v3002_v59 = vld [vmem:[%s4300_s1 + $0x5b0] ss:$8 sps:$4 sm:$0xff]  }
  0x3b   :  { %1963 = vmatpush1.bf16.msra.mxu1 %v2919_v60  ;;  %v3007_v60 = vld [vmem:[%s4300_s1 + $0x1c4] ss:$8 sps:$4 sm:$0xff]  }
  0x3c   :  { %2167 = vmatpush1.bf16.msra.mxu0 %v2920_v61  ;;  %1964 = vmatprep.subr.bf16.mxu1 %v2921_v62  ;;  %v3010_v61 = vld [vmem:[%s4300_s1 + $0x5c4] ss:$8 sps:$4 sm:$0xff]   ;;  %v3005_v62 = vld [vmem:[%s4300_s1 + $0x1c0] ss:$8 sps:$4 sm:$0xff]  }
  0x3d   :  { %2168 = vmatprep.subr.bf16.mxu0 %v2923_v63  ;;  %v3008_v63 = vld [vmem:[%s4300_s1 + $0x5c0] ss:$8 sps:$4 sm:$0xff]  }
  0x3f   :  { %1965 = vmatpush1.bf16.msra.mxu1 %v2925_v0  ;;  %v3013_v0 = vld [vmem:[%s4300_s1 + $0x1d4] ss:$8 sps:$4 sm:$0xff]  }
  0x40   :  { %2169 = vmatpush1.bf16.msra.mxu0 %v2926_v1  ;;  %1985 = vmatprep.subr.bf16.mxu1 %v2932_v2  ;;  %v3016_v1 = vld [vmem:[%s4300_s1 + $0x5d4] ss:$8 sps:$4 sm:$0xff]   ;;  %v3011_v2 = vld [vmem:[%s4300_s1 + $0x1d0] ss:$8 sps:$4 sm:$0xff]  }
  0x41   :  { %2189 = vmatprep.subr.bf16.mxu0 %v2938_v3  ;;  %v3014_v3 = vld [vmem:[%s4300_s1 + $0x5d0] ss:$8 sps:$4 sm:$0xff]  }
  0x42   :  { %1967 = vmatmul.mubr.bf16.vlgmr.msra.gmra.mrb[0].mxu1 %v2927_v4  ;;  %v3020_v4 = vld [vmem:[%s4300_s1 + $0x1e4] ss:$8 sps:$4 sm:$0xff]  }
  0x43   :  { %2171 = vmatmul.mubr.bf16.vlgmr.msra.gmra.mrb[0].mxu0 %v2933_v6  ;;  %1986 = vmatpush1.bf16.msra.mxu1 %v2930_v5  ;;  %v3024_v5 = vld [vmem:[%s4300_s1 + $0x5e4] ss:$8 sps:$4 sm:$0xff]   ;;  %v3018_v6 = vld [vmem:[%s4300_s1 + $0x1e0] ss:$8 sps:$4 sm:$0xff]  }
  0x44   :  { %2190 = vmatpush1.bf16.msra.mxu0 %v2936_v7  ;;  %1987 = vmatprep.subr.bf16.mxu1 %v2941_v8  ;;  %v3022_v7 = vld [vmem:[%s4300_s1 + $0x5e0] ss:$8 sps:$4 sm:$0xff]   ;;  %v3029_v8 = vld [vmem:[%s4300_s1 + $0x1f4] ss:$8 sps:$4 sm:$0xff]  }
  0x45   :  { %2191 = vmatprep.subr.bf16.mxu0 %v2944_v9  ;;  %1976 = vmatprep.mubr.bf16.mxu1 %v2428_v28  ;;  %v3032_v9 = vld [vmem:[%s4300_s1 + $0x5f4] ss:$8 sps:$4 sm:$0xff]   ;;  %v3051_v28 = vld [vmem:[%s4300_s1 + $0x220] ss:$8 sps:$4 sm:$0xff]  }
  0x46   :  { %2180 = vmatprep.mubr.bf16.mxu0 %v2436_v34  ;;  %v3141_v34 = vld [vmem:[%s4301_s0 + $0x14] ss:$72 sps:$4 sm:$0xff]  }
  0x47   :  { %1988 = vmatpush1.bf16.msra.mxu1 %v2939_v10  ;;  %v3027_v10 = vld [vmem:[%s4300_s1 + $0x1f0] ss:$8 sps:$4 sm:$0xff]  }
  0x48   :  { %2192 = vmatpush1.bf16.msra.mxu0 %v2942_v11  ;;  %1989 = vmatprep.subr.bf16.mxu1 %v2947_v12  ;;  %v3030_v11 = vld [vmem:[%s4300_s1 + $0x5f0] ss:$8 sps:$4 sm:$0xff]  }
  0x49   :  { %2193 = vmatprep.subr.bf16.mxu0 %v2950_v13  ;;  %v3033_v12 = vld [vmem:[%s4301_s0 + $0x8] ss:$72 sps:$4 sm:$0xff]   ;;  %v3038_v13 = vld [vmem:[%s4300_s1 + $0x204] ss:$8 sps:$4 sm:$0xff]  }
  0x4a   :  { %1977 = vmatmul.mubr.bf16.gmra.mrb[4].mxu1 %v2427_v29  ;;  %v3054_v29 = vld [vmem:[%s4300_s1 + $0x620] ss:$8 sps:$4 sm:$0xff]  }
  0x4b   :  { %1990 = vmatpush1.bf16.msra.mxu1 %v2945_v14  ;;  %2181 = vmatmul.mubr.bf16.gmra.mrb[4].mxu0 %v2435_v35  ;;  %v3044_v14 = vld [vmem:[%s4300_s1 + $0x604] ss:$8 sps:$4 sm:$0xff]   ;;  %v3147_v35 = vld [vmem:[%s4301_s0 + $0x34] ss:$72 sps:$4 sm:$0xff]  }
  0x4c   :  { %2194 = vmatpush1.bf16.msra.mxu0 %v2948_v15  ;;  %1991 = vmatprep.subr.bf16.mxu1 %v2953_v16  ;;  %v3036_v15 = vld [vmem:[%s4300_s1 + $0x200] ss:$8 sps:$4 sm:$0xff]  }
  0x4d   :  { %2195 = vmatprep.subr.bf16.mxu0 %v2956_v17  ;;  %2017 = vmatprep.mubr.bf16.mxu1 %v3035_v40  ;;  %v3039_v16 = vld [vmem:[%s4301_s0 + $0x28] ss:$72 sps:$4 sm:$0xff]  }
  0x4e   :  { %2221 = vmatprep.mubr.bf16.mxu0 %v3041_v43  ;;  %v3042_v17 = vld [vmem:[%s4300_s1 + $0x600] ss:$8 sps:$4 sm:$0xff]   ;;  %v3074_v43 = vld [vmem:[%s4300_s1 + $0x654] ss:$8 sps:$4 sm:$0xff]  }
  0x4f   :  { %1992 = vmatpush1.bf16.msra.mxu1 %v2951_v18  ;;  %v3047_v18 = vld [vmem:[%s4300_s1 + $0x214] ss:$8 sps:$4 sm:$0xff]   ;;  %v3063_v40 = vld [vmem:[%s4300_s1 + $0x240] ss:$8 sps:$4 sm:$0xff]  }
  0x50   :  { %2196 = vmatpush1.bf16.msra.mxu0 %v2954_v19  ;;  %1993 = vmatprep.subr.bf16.mxu1 %v2959_v20  ;;  %v33_v19 = vld [vmem:[%s4301_s0 + $0x98] sm:$0xff] }
  0x51   :  { %2197 = vmatprep.subr.bf16.mxu0 %v2962_v21  ;;  %v3050_v20 = vld [vmem:[%s4300_s1 + $0x614] ss:$8 sps:$4 sm:$0xff]   ;;  %v2430_v21 = vcombine.high %v33_v19, %v33_v19 }
  0x53   :  { %1994 = vmatpush1.bf16.msra.mxu1 %v2957_v22  ;;  %v37_v22 = vld [vmem:[%s4301_s0 + $0xb8] sm:$0xff] }
  0x54   :  { %2198 = vmatpush1.bf16.msra.mxu0 %v2960_v23  ;;  %1995 = vmatprep.subr.bf16.mxu1 %v2965_v24  ;;  %v3045_v23 = vld [vmem:[%s4300_s1 + $0x210] ss:$8 sps:$4 sm:$0xff]   ;;  %v2437_v31 = vcombine.low %v37_v22, %v37_v22 }
  0x55   :  { %2199 = vmatprep.subr.bf16.mxu0 %v2968_v25  ;;  %v3048_v24 = vld [vmem:[%s4300_s1 + $0x610] ss:$8 sps:$4 sm:$0xff]   ;;  %v2438_v25 = vcombine.high %v37_v22, %v37_v22  ;;  %v3144_v22 = vld [vmem:[%s4300_s1 + $0x304] ss:$8 sps:$4 sm:$0xff]  }
  0x57   :  { %1996 = vmatpush1.bf16.msra.mxu1 %v2963_v27  ;;  %v3056_v27 = vld [vmem:[%s4300_s1 + $0x624] ss:$8 sps:$4 sm:$0xff]  }
  0x58   :  { %2200 = vmatpush1.bf16.msra.mxu0 %v2966_v30  ;;  %1997 = vmatprep.subr.bf16.mxu1 %v2971_v32  ;;  %v2429_v30 = vcombine.low %v33_v19, %v33_v19  ;;  %v3059_v32 = vld [vmem:[%s4300_s1 + $0x234] ss:$8 sps:$4 sm:$0xff]  }
  0x59   :  { %2201 = vmatprep.subr.bf16.mxu0 %v2974_v33  ;;  %v3062_v33 = vld [vmem:[%s4300_s1 + $0x634] ss:$8 sps:$4 sm:$0xff]  }
  0x5a   :  { %v3138_v19 = vld [vmem:[%s4300_s1 + $0x6f4] ss:$8 sps:$4 sm:$0xff]  }
  0x5b   :  { %1998 = vmatpush1.bf16.msra.mxu1 %v2969_v36  ;;  %v3057_v36 = vld [vmem:[%s4300_s1 + $0x230] ss:$8 sps:$4 sm:$0xff]  }
  0x5c   :  { %2202 = vmatpush1.bf16.msra.mxu0 %v2972_v37  ;;  %1999 = vmatprep.subr.bf16.mxu1 %v2977_v38  ;;  %v3060_v37 = vld [vmem:[%s4300_s1 + $0x630] ss:$8 sps:$4 sm:$0xff]   ;;  %v3065_v38 = vld [vmem:[%s4300_s1 + $0x244] ss:$8 sps:$4 sm:$0xff]  }
  0x5d   :  { %2203 = vmatprep.subr.bf16.mxu0 %v2980_v39  ;;  %v3068_v39 = vld [vmem:[%s4300_s1 + $0x644] ss:$8 sps:$4 sm:$0xff]  }
  0x5f   :  { %2000 = vmatpush1.bf16.msra.mxu1 %v2975_v41  ;;  %v3066_v41 = vld [vmem:[%s4300_s1 + $0x640] ss:$8 sps:$4 sm:$0xff]  }
  0x60   :  { %2204 = vmatpush1.bf16.msra.mxu0 %v2978_v42  ;;  %2001 = vmatprep.subr.bf16.mxu1 %v2983_v44  ;;  %v3071_v42 = vld [vmem:[%s4300_s1 + $0x254] ss:$8 sps:$4 sm:$0xff]   ;;  %v3069_v44 = vld [vmem:[%s4300_s1 + $0x250] ss:$8 sps:$4 sm:$0xff]  }
  0x61   :  { %2205 = vmatprep.subr.bf16.mxu0 %v2986_v45  ;;  %v3072_v45 = vld [vmem:[%s4300_s1 + $0x650] ss:$8 sps:$4 sm:$0xff]  }
  0x63   :  { %2002 = vmatpush1.bf16.msra.mxu1 %v2981_v46  ;;  %v3077_v46 = vld [vmem:[%s4300_s1 + $0x264] ss:$8 sps:$4 sm:$0xff]  }
  0x64   :  { %2206 = vmatpush1.bf16.msra.mxu0 %v2984_v47  ;;  %2003 = vmatprep.subr.bf16.mxu1 %v2989_v48  ;;  %v3080_v47 = vld [vmem:[%s4300_s1 + $0x664] ss:$8 sps:$4 sm:$0xff]   ;;  %v3075_v48 = vld [vmem:[%s4300_s1 + $0x260] ss:$8 sps:$4 sm:$0xff]  }
  0x65   :  { %2207 = vmatprep.subr.bf16.mxu0 %v2992_v49  ;;  %v3078_v49 = vld [vmem:[%s4300_s1 + $0x660] ss:$8 sps:$4 sm:$0xff]  }
  0x67   :  { %2004 = vmatpush1.bf16.msra.mxu1 %v2987_v50  ;;  %v3083_v50 = vld [vmem:[%s4300_s1 + $0x274] ss:$8 sps:$4 sm:$0xff]  }
  0x68   :  { %2208 = vmatpush1.bf16.msra.mxu0 %v2990_v51  ;;  %2005 = vmatprep.subr.bf16.mxu1 %v2995_v52  ;;  %v3086_v51 = vld [vmem:[%s4300_s1 + $0x674] ss:$8 sps:$4 sm:$0xff]   ;;  %v3081_v52 = vld [vmem:[%s4300_s1 + $0x270] ss:$8 sps:$4 sm:$0xff]  }
  0x69   :  { %2209 = vmatprep.subr.bf16.mxu0 %v2998_v53  ;;  %v3084_v53 = vld [vmem:[%s4300_s1 + $0x670] ss:$8 sps:$4 sm:$0xff]  }
  0x6b   :  { %2006 = vmatpush1.bf16.msra.mxu1 %v2993_v54  ;;  %v3089_v54 = vld [vmem:[%s4300_s1 + $0x284] ss:$8 sps:$4 sm:$0xff]  }
  0x6c   :  { %2210 = vmatpush1.bf16.msra.mxu0 %v2996_v55  ;;  %2007 = vmatprep.subr.bf16.mxu1 %v3001_v56  ;;  %v3092_v55 = vld [vmem:[%s4300_s1 + $0x684] ss:$8 sps:$4 sm:$0xff]   ;;  %v3087_v56 = vld [vmem:[%s4300_s1 + $0x280] ss:$8 sps:$4 sm:$0xff]  }
  0x6d   :  { %2211 = vmatprep.subr.bf16.mxu0 %v3004_v57  ;;  %v3090_v57 = vld [vmem:[%s4300_s1 + $0x680] ss:$8 sps:$4 sm:$0xff]  }
  0x6f   :  { %2008 = vmatpush1.bf16.msra.mxu1 %v2999_v58  ;;  %v3095_v58 = vld [vmem:[%s4300_s1 + $0x294] ss:$8 sps:$4 sm:$0xff]  }
  0x70   :  { %2212 = vmatpush1.bf16.msra.mxu0 %v3002_v59  ;;  %2009 = vmatprep.subr.bf16.mxu1 %v3007_v60  ;;  %v3098_v59 = vld [vmem:[%s4300_s1 + $0x694] ss:$8 sps:$4 sm:$0xff]   ;;  %v3093_v60 = vld [vmem:[%s4300_s1 + $0x290] ss:$8 sps:$4 sm:$0xff]  }
  0x71   :  { %2213 = vmatprep.subr.bf16.mxu0 %v3010_v61  ;;  %v3096_v61 = vld [vmem:[%s4300_s1 + $0x690] ss:$8 sps:$4 sm:$0xff]  }
  0x73   :  { %2010 = vmatpush1.bf16.msra.mxu1 %v3005_v62  ;;  %v3101_v62 = vld [vmem:[%s4300_s1 + $0x2a4] ss:$8 sps:$4 sm:$0xff]  }
  0x74   :  { %2214 = vmatpush1.bf16.msra.mxu0 %v3008_v63  ;;  %2011 = vmatprep.subr.bf16.mxu1 %v3013_v0  ;;  %v3104_v63 = vld [vmem:[%s4300_s1 + $0x6a4] ss:$8 sps:$4 sm:$0xff]   ;;  %v3099_v0 = vld [vmem:[%s4300_s1 + $0x2a0] ss:$8 sps:$4 sm:$0xff]  }
  0x75   :  { %2215 = vmatprep.subr.bf16.mxu0 %v3016_v1  ;;  %v3102_v1 = vld [vmem:[%s4300_s1 + $0x6a0] ss:$8 sps:$4 sm:$0xff]  }
  0x77   :  { %2012 = vmatpush1.bf16.msra.mxu1 %v3011_v2  ;;  %v3107_v2 = vld [vmem:[%s4300_s1 + $0x2b4] ss:$8 sps:$4 sm:$0xff]  }
  0x78   :  { %2216 = vmatpush1.bf16.msra.mxu0 %v3014_v3  ;;  %2013 = vmatprep.subr.bf16.mxu1 %v3020_v4  ;;  %v3110_v3 = vld [vmem:[%s4300_s1 + $0x6b4] ss:$8 sps:$4 sm:$0xff]   ;;  %v3105_v4 = vld [vmem:[%s4300_s1 + $0x2b0] ss:$8 sps:$4 sm:$0xff]  }
  0x79   :  { %2217 = vmatprep.subr.bf16.mxu0 %v3024_v5  ;;  %v3108_v5 = vld [vmem:[%s4300_s1 + $0x6b0] ss:$8 sps:$4 sm:$0xff]  }
  0x7b   :  { %2014 = vmatpush1.bf16.msra.mxu1 %v3018_v6  ;;  %v3113_v6 = vld [vmem:[%s4300_s1 + $0x2c4] ss:$8 sps:$4 sm:$0xff]  }
  0x7c   :  { %2218 = vmatpush1.bf16.msra.mxu0 %v3022_v7  ;;  %2015 = vmatprep.subr.bf16.mxu1 %v3029_v8  ;;  %v3116_v7 = vld [vmem:[%s4300_s1 + $0x6c4] ss:$8 sps:$4 sm:$0xff]   ;;  %v3111_v8 = vld [vmem:[%s4300_s1 + $0x2c0] ss:$8 sps:$4 sm:$0xff]  }
  0x7d   :  { %2219 = vmatprep.subr.bf16.mxu0 %v3032_v9  ;;  %v3114_v9 = vld [vmem:[%s4300_s1 + $0x6c0] ss:$8 sps:$4 sm:$0xff]  }
  0x7f   :  { %2016 = vmatpush1.bf16.msra.mxu1 %v3027_v10  ;;  %v3119_v10 = vld [vmem:[%s4300_s1 + $0x2d4] ss:$8 sps:$4 sm:$0xff]  }
  0x80   :  { %2220 = vmatpush1.bf16.msra.mxu0 %v3030_v11  ;;  %2036 = vmatprep.subr.bf16.mxu1 %v3038_v13  ;;  %v3122_v11 = vld [vmem:[%s4300_s1 + $0x6d4] ss:$8 sps:$4 sm:$0xff]   ;;  %v3120_v13 = vld [vmem:[%s4300_s1 + $0x6d0] ss:$8 sps:$4 sm:$0xff]  }
  0x81   :  { %2240 = vmatprep.subr.bf16.mxu0 %v3044_v14  ;;  %v3126_v14 = vld [vmem:[%s4300_s1 + $0x2e4] ss:$8 sps:$4 sm:$0xff]  }
  0x82   :  { %2018 = vmatmul.mubr.bf16.vlgmr.msra.gmra.mrb[0].mxu1 %v3033_v12  ;;  %v3117_v12 = vld [vmem:[%s4300_s1 + $0x2d0] ss:$8 sps:$4 sm:$0xff]  }
  0x83   :  { %2222 = vmatmul.mubr.bf16.vlgmr.msra.gmra.mrb[0].mxu0 %v3039_v16  ;;  %2037 = vmatpush1.bf16.msra.mxu1 %v3036_v15  ;;  %v3130_v15 = vld [vmem:[%s4300_s1 + $0x6e4] ss:$8 sps:$4 sm:$0xff]   ;;  %v3124_v16 = vld [vmem:[%s4300_s1 + $0x2e0] ss:$8 sps:$4 sm:$0xff]  }
  0x84   :  { %2241 = vmatpush1.bf16.msra.mxu0 %v3042_v17  ;;  %2038 = vmatprep.subr.bf16.mxu1 %v3047_v18  ;;  %v3128_v17 = vld [vmem:[%s4300_s1 + $0x6e0] ss:$8 sps:$4 sm:$0xff]   ;;  %v3135_v18 = vld [vmem:[%s4300_s1 + $0x2f4] ss:$8 sps:$4 sm:$0xff]  }
  0x85   :  { %2242 = vmatprep.subr.bf16.mxu0 %v3050_v20  ;;  %2027 = vmatprep.mubr.bf16.mxu1 %v2430_v21  ;;  %v3133_v20 = vld [vmem:[%s4300_s1 + $0x2f0] ss:$8 sps:$4 sm:$0xff]  }
  0x86   :  { %2231 = vmatprep.mubr.bf16.mxu0 %v2438_v25  ;;  %v3136_v21 = vld [vmem:[%s4300_s1 + $0x6f0] ss:$8 sps:$4 sm:$0xff]   ;;  %v3142_v25 = vld [vmem:[%s4300_s1 + $0x300] ss:$8 sps:$4 sm:$0xff]  }
  0x87   :  { %2039 = vmatpush1.bf16.msra.mxu1 %v3045_v23  ;;  %v3139_v23 = vld [vmem:[%s4301_s0 + $0x10] ss:$72 sps:$4 sm:$0xff]  }
  0x88   :  { %2243 = vmatpush1.bf16.msra.mxu0 %v3048_v24  ;;  %2040 = vmatprep.subr.bf16.mxu1 %v3053_v26  ;;  %v3150_v24 = vld [vmem:[%s4300_s1 + $0x704] ss:$8 sps:$4 sm:$0xff]   ;;  %v3145_v26 = vld [vmem:[%s4301_s0 + $0x30] ss:$72 sps:$4 sm:$0xff]  }
  0x89   :  { %2244 = vmatprep.subr.bf16.mxu0 %v3056_v27  ;;  %v3148_v27 = vld [vmem:[%s4300_s1 + $0x700] ss:$8 sps:$4 sm:$0xff]  }
  0x8a   :  { %2028 = vmatmul.mubr.bf16.gmra.mrb[4].mxu1 %v2429_v30  ;;  %v3153_v30 = vld [vmem:[%s4300_s1 + $0x314] ss:$8 sps:$4 sm:$0xff]  }
  0x8b   :  { %2232 = vmatmul.mubr.bf16.gmra.mrb[4].mxu0 %v2437_v31  ;;  %2041 = vmatpush1.bf16.msra.mxu1 %v3051_v28  ;;  %v34_v28 = vld [vmem:[%s4301_s0 + $0xa0] sm:$0xff]  ;;  %v3156_v31 = vld [vmem:[%s4300_s1 + $0x714] ss:$8 sps:$4 sm:$0xff]  }
  0x8c   :  { %2245 = vmatpush1.bf16.msra.mxu0 %v3054_v29  ;;  %2042 = vmatprep.subr.bf16.mxu1 %v3059_v32  ;;  %v38_v29 = vld [vmem:[%s4301_s0 + $0xc0] sm:$0xff]  ;;  %v2432_v32 = vcombine.high %v34_v28, %v34_v28 }
  0x8d   :  { %2246 = vmatprep.subr.bf16.mxu0 %v3062_v33  ;;  %2068 = vmatprep.mubr.bf16.mxu1 %v3141_v34  ;;  %v2440_v33 = vcombine.high %v38_v29, %v38_v29  ;;  %v3151_v34 = vld [vmem:[%s4300_s1 + $0x310] ss:$8 sps:$4 sm:$0xff]  }
  0x8e   :  { %2272 = vmatprep.mubr.bf16.mxu0 %v3147_v35  ;;  %v3154_v35 = vld [vmem:[%s4300_s1 + $0x710] ss:$8 sps:$4 sm:$0xff]  }
  0x8f   :  { %2043 = vmatpush1.bf16.msra.mxu1 %v3057_v36  ;;  %v3159_v36 = vld [vmem:[%s4300_s1 + $0x324] ss:$8 sps:$4 sm:$0xff]  }
  0x90   :  { %2247 = vmatpush1.bf16.msra.mxu0 %v3060_v37  ;;  %2044 = vmatprep.subr.bf16.mxu1 %v3065_v38  ;;  %v3162_v37 = vld [vmem:[%s4300_s1 + $0x724] ss:$8 sps:$4 sm:$0xff]   ;;  %v3157_v38 = vld [vmem:[%s4300_s1 + $0x320] ss:$8 sps:$4 sm:$0xff]  }
  0x91   :  { %2248 = vmatprep.subr.bf16.mxu0 %v3068_v39  ;;  %v3160_v39 = vld [vmem:[%s4300_s1 + $0x720] ss:$8 sps:$4 sm:$0xff]  }
  0x93   :  { %2045 = vmatpush1.bf16.msra.mxu1 %v3063_v40  ;;  %v2431_v40 = vcombine.low %v34_v28, %v34_v28  ;;  %v3241_v28 = vld [vmem:[%s4300_s1 + $0x3f4] ss:$8 sps:$4 sm:$0xff]  }
  0x94   :  { %2249 = vmatpush1.bf16.msra.mxu0 %v3066_v41  ;;  %2046 = vmatprep.subr.bf16.mxu1 %v3071_v42  ;;  %v2439_v41 = vcombine.low %v38_v29, %v38_v29  ;;  %v3165_v42 = vld [vmem:[%s4300_s1 + $0x334] ss:$8 sps:$4 sm:$0xff]  }
  0x95   :  { %2250 = vmatprep.subr.bf16.mxu0 %v3074_v43  ;;  %v3168_v43 = vld [vmem:[%s4300_s1 + $0x734] ss:$8 sps:$4 sm:$0xff]  }
  0x96   :  { %v3244_v29 = vld [vmem:[%s4300_s1 + $0x7f4] ss:$8 sps:$4 sm:$0xff]  }
  0x97   :  { %2047 = vmatpush1.bf16.msra.mxu1 %v3069_v44  ;;  %v3247_v44 = vld [vmem:[%s4301_s0 + $0x1c] ss:$72 sps:$4 sm:$0xff]  }
  0x98   :  { %2251 = vmatpush1.bf16.msra.mxu0 %v3072_v45  ;;  %2048 = vmatprep.subr.bf16.mxu1 %v3077_v46  ;;  %v3250_v45 = vld [vmem:[%s4301_s0 + $0x3c] ss:$72 sps:$4 sm:$0xff]   ;;  %v3163_v46 = vld [vmem:[%s4300_s1 + $0x330] ss:$8 sps:$4 sm:$0xff]  }
  0x99   :  { %2252 = vmatprep.subr.bf16.mxu0 %v3080_v47  ;;  %v3166_v47 = vld [vmem:[%s4300_s1 + $0x730] ss:$8 sps:$4 sm:$0xff]  }
  0x9b   :  { %2049 = vmatpush1.bf16.msra.mxu1 %v3075_v48  ;;  %v3171_v48 = vld [vmem:[%s4300_s1 + $0x344] ss:$8 sps:$4 sm:$0xff]  }
  0x9c   :  { %2253 = vmatpush1.bf16.msra.mxu0 %v3078_v49  ;;  %2050 = vmatprep.subr.bf16.mxu1 %v3083_v50  ;;  %v3174_v49 = vld [vmem:[%s4300_s1 + $0x744] ss:$8 sps:$4 sm:$0xff]   ;;  %v3169_v50 = vld [vmem:[%s4300_s1 + $0x340] ss:$8 sps:$4 sm:$0xff]  }
  0x9d   :  { %2254 = vmatprep.subr.bf16.mxu0 %v3086_v51  ;;  %v3172_v51 = vld [vmem:[%s4300_s1 + $0x740] ss:$8 sps:$4 sm:$0xff]  }
  0x9f   :  { %2051 = vmatpush1.bf16.msra.mxu1 %v3081_v52  ;;  %v3177_v52 = vld [vmem:[%s4300_s1 + $0x354] ss:$8 sps:$4 sm:$0xff]  }
  0xa0   :  { %2255 = vmatpush1.bf16.msra.mxu0 %v3084_v53  ;;  %2052 = vmatprep.subr.bf16.mxu1 %v3089_v54  ;;  %v3180_v53 = vld [vmem:[%s4300_s1 + $0x754] ss:$8 sps:$4 sm:$0xff]   ;;  %v3175_v54 = vld [vmem:[%s4300_s1 + $0x350] ss:$8 sps:$4 sm:$0xff]  }
  0xa1   :  { %2256 = vmatprep.subr.bf16.mxu0 %v3092_v55  ;;  %v3178_v55 = vld [vmem:[%s4300_s1 + $0x750] ss:$8 sps:$4 sm:$0xff]  }
  0xa3   :  { %2053 = vmatpush1.bf16.msra.mxu1 %v3087_v56  ;;  %v3183_v56 = vld [vmem:[%s4300_s1 + $0x364] ss:$8 sps:$4 sm:$0xff]  }
  0xa4   :  { %2257 = vmatpush1.bf16.msra.mxu0 %v3090_v57  ;;  %2054 = vmatprep.subr.bf16.mxu1 %v3095_v58  ;;  %v3186_v57 = vld [vmem:[%s4300_s1 + $0x764] ss:$8 sps:$4 sm:$0xff]   ;;  %v3181_v58 = vld [vmem:[%s4300_s1 + $0x360] ss:$8 sps:$4 sm:$0xff]  }
  0xa5   :  { %2258 = vmatprep.subr.bf16.mxu0 %v3098_v59  ;;  %v3184_v59 = vld [vmem:[%s4300_s1 + $0x760] ss:$8 sps:$4 sm:$0xff]  }
  0xa7   :  { %2055 = vmatpush1.bf16.msra.mxu1 %v3093_v60  ;;  %v3189_v60 = vld [vmem:[%s4300_s1 + $0x374] ss:$8 sps:$4 sm:$0xff]  }
  0xa8   :  { %2259 = vmatpush1.bf16.msra.mxu0 %v3096_v61  ;;  %2056 = vmatprep.subr.bf16.mxu1 %v3101_v62  ;;  %v3192_v61 = vld [vmem:[%s4300_s1 + $0x774] ss:$8 sps:$4 sm:$0xff]   ;;  %v3187_v62 = vld [vmem:[%s4300_s1 + $0x370] ss:$8 sps:$4 sm:$0xff]  }
  0xa9   :  { %2260 = vmatprep.subr.bf16.mxu0 %v3104_v63  ;;  %v3190_v63 = vld [vmem:[%s4300_s1 + $0x770] ss:$8 sps:$4 sm:$0xff]  }
  0xab   :  { %2057 = vmatpush1.bf16.msra.mxu1 %v3099_v0  ;;  %v3195_v0 = vld [vmem:[%s4300_s1 + $0x384] ss:$8 sps:$4 sm:$0xff]  }
  0xac   :  { %2261 = vmatpush1.bf16.msra.mxu0 %v3102_v1  ;;  %2058 = vmatprep.subr.bf16.mxu1 %v3107_v2  ;;  %v3198_v1 = vld [vmem:[%s4300_s1 + $0x784] ss:$8 sps:$4 sm:$0xff]   ;;  %v3193_v2 = vld [vmem:[%s4300_s1 + $0x380] ss:$8 sps:$4 sm:$0xff]  }
  0xad   :  { %2262 = vmatprep.subr.bf16.mxu0 %v3110_v3  ;;  %v3196_v3 = vld [vmem:[%s4300_s1 + $0x780] ss:$8 sps:$4 sm:$0xff]  }
  0xaf   :  { %2059 = vmatpush1.bf16.msra.mxu1 %v3105_v4  ;;  %v3201_v4 = vld [vmem:[%s4300_s1 + $0x394] ss:$8 sps:$4 sm:$0xff]  }
  0xb0   :  { %2263 = vmatpush1.bf16.msra.mxu0 %v3108_v5  ;;  %2060 = vmatprep.subr.bf16.mxu1 %v3113_v6  ;;  %v3204_v5 = vld [vmem:[%s4300_s1 + $0x794] ss:$8 sps:$4 sm:$0xff]   ;;  %v3199_v6 = vld [vmem:[%s4300_s1 + $0x390] ss:$8 sps:$4 sm:$0xff]  }
  0xb1   :  { %2264 = vmatprep.subr.bf16.mxu0 %v3116_v7  ;;  %v3202_v7 = vld [vmem:[%s4300_s1 + $0x790] ss:$8 sps:$4 sm:$0xff]  }
  0xb3   :  { %2061 = vmatpush1.bf16.msra.mxu1 %v3111_v8  ;;  %v3207_v8 = vld [vmem:[%s4300_s1 + $0x3a4] ss:$8 sps:$4 sm:$0xff]  }
  0xb4   :  { %2265 = vmatpush1.bf16.msra.mxu0 %v3114_v9  ;;  %2062 = vmatprep.subr.bf16.mxu1 %v3119_v10  ;;  %v3210_v9 = vld [vmem:[%s4300_s1 + $0x7a4] ss:$8 sps:$4 sm:$0xff]   ;;  %v3205_v10 = vld [vmem:[%s4300_s1 + $0x3a0] ss:$8 sps:$4 sm:$0xff]  }
  0xb5   :  { %2266 = vmatprep.subr.bf16.mxu0 %v3122_v11  ;;  %v3208_v11 = vld [vmem:[%s4300_s1 + $0x7a0] ss:$8 sps:$4 sm:$0xff]  }
  0xb7   :  { %2063 = vmatpush1.bf16.msra.mxu1 %v3117_v12  ;;  %v3213_v12 = vld [vmem:[%s4300_s1 + $0x3b4] ss:$8 sps:$4 sm:$0xff]  }
  0xb8   :  { %2267 = vmatpush1.bf16.msra.mxu0 %v3120_v13  ;;  %2064 = vmatprep.subr.bf16.mxu1 %v3126_v14  ;;  %v3216_v13 = vld [vmem:[%s4300_s1 + $0x7b4] ss:$8 sps:$4 sm:$0xff]   ;;  %v3211_v14 = vld [vmem:[%s4300_s1 + $0x3b0] ss:$8 sps:$4 sm:$0xff]  }
  0xb9   :  { %2268 = vmatprep.subr.bf16.mxu0 %v3130_v15  ;;  %v3214_v15 = vld [vmem:[%s4300_s1 + $0x7b0] ss:$8 sps:$4 sm:$0xff]  }
  0xbb   :  { %2065 = vmatpush1.bf16.msra.mxu1 %v3124_v16  ;;  %v3219_v16 = vld [vmem:[%s4300_s1 + $0x3c4] ss:$8 sps:$4 sm:$0xff]  }
  0xbc   :  { %2269 = vmatpush1.bf16.msra.mxu0 %v3128_v17  ;;  %2066 = vmatprep.subr.bf16.mxu1 %v3135_v18  ;;  %v3222_v17 = vld [vmem:[%s4300_s1 + $0x7c4] ss:$8 sps:$4 sm:$0xff]   ;;  %v3217_v18 = vld [vmem:[%s4300_s1 + $0x3c0] ss:$8 sps:$4 sm:$0xff]  }
  0xbd   :  { %2270 = vmatprep.subr.bf16.mxu0 %v3138_v19  ;;  %v3220_v19 = vld [vmem:[%s4300_s1 + $0x7c0] ss:$8 sps:$4 sm:$0xff]  }
  0xbf   :  { %2067 = vmatpush1.bf16.msra.mxu1 %v3133_v20  ;;  %v3225_v20 = vld [vmem:[%s4300_s1 + $0x3d4] ss:$8 sps:$4 sm:$0xff]  }
  0xc0   :  { %2271 = vmatpush1.bf16.msra.mxu0 %v3136_v21  ;;  %2087 = vmatprep.subr.bf16.mxu1 %v3144_v22  ;;  %v3228_v21 = vld [vmem:[%s4300_s1 + $0x7d4] ss:$8 sps:$4 sm:$0xff]   ;;  %v3223_v22 = vld [vmem:[%s4300_s1 + $0x3d0] ss:$8 sps:$4 sm:$0xff]  }
  0xc1   :  { %2291 = vmatprep.subr.bf16.mxu0 %v3150_v24  ;;  %v3234_v24 = vld [vmem:[%s4300_s1 + $0x3e4] ss:$8 sps:$4 sm:$0xff]  }
  0xc2   :  { %2069 = vmatmul.mubr.bf16.vlgmr.msra.gmra.mrb[0].mxu1 %v3139_v23  ;;  %v3226_v23 = vld [vmem:[%s4300_s1 + $0x7d0] ss:$8 sps:$4 sm:$0xff]  }
  0xc3   :  { %2273 = vmatmul.mubr.bf16.vlgmr.msra.gmra.mrb[0].mxu0 %v3145_v26  ;;  %2088 = vmatpush1.bf16.msra.mxu1 %v3142_v25  ;;  %v3238_v25 = vld [vmem:[%s4300_s1 + $0x7e4] ss:$8 sps:$4 sm:$0xff]   ;;  %v3232_v26 = vld [vmem:[%s4300_s1 + $0x3e0] ss:$8 sps:$4 sm:$0xff]  }
  0xc4   :  { %2292 = vmatpush1.bf16.msra.mxu0 %v3148_v27  ;;  %2089 = vmatprep.subr.bf16.mxu1 %v3153_v30  ;;  %v3236_v27 = vld [vmem:[%s4300_s1 + $0x7e0] ss:$8 sps:$4 sm:$0xff]   ;;  %v3239_v30 = vld [vmem:[%s4300_s1 + $0x3f0] ss:$8 sps:$4 sm:$0xff]  }
  0xc5   :  { %2293 = vmatprep.subr.bf16.mxu0 %v3156_v31  ;;  %2078 = vmatprep.mubr.bf16.mxu1 %v2432_v32  ;;  %v3242_v31 = vld [vmem:[%s4300_s1 + $0x7f0] ss:$8 sps:$4 sm:$0xff]   ;;  %v3253_v32 = vld [vmem:[%s4300_s1 + $0x804] ss:$8 sps:$4 sm:$0xff]  }
  0xc6   :  { %2282 = vmatprep.mubr.bf16.mxu0 %v2440_v33  ;;  %v3245_v33 = vld [vmem:[%s4301_s0 + $0x18] ss:$72 sps:$4 sm:$0xff]  }
  0xc7   :  { %2090 = vmatpush1.bf16.msra.mxu1 %v3151_v34  ;;  %v3248_v34 = vld [vmem:[%s4301_s0 + $0x38] ss:$72 sps:$4 sm:$0xff]  }
  0xc8   :  { %2294 = vmatpush1.bf16.msra.mxu0 %v3154_v35  ;;  %2091 = vmatprep.subr.bf16.mxu1 %v3159_v36  ;;  %v35_v35 = vld [vmem:[%s4301_s0 + $0xa8] sm:$0xff] }
  0xc9   :  { %2295 = vmatprep.subr.bf16.mxu0 %v3162_v37  ;;  %v39_v36 = vld [vmem:[%s4301_s0 + $0xc8] sm:$0xff] }
  0xca   :  { %2079 = vmatmul.mubr.bf16.gmra.mrb[4].mxu1 %v2431_v40  ;;  %v3251_v37 = vld [vmem:[%s4300_s1 + $0x800] ss:$8 sps:$4 sm:$0xff]   ;;  %v2442_v40 = vcombine.high %v39_v36, %v39_v36 }
  0xcb   :  { %2283 = vmatmul.mubr.bf16.gmra.mrb[4].mxu0 %v2439_v41  ;;  %2092 = vmatpush1.bf16.msra.mxu1 %v3157_v38  ;;  %v3256_v38 = vld [vmem:[%s4300_s1 + $0x814] ss:$8 sps:$4 sm:$0xff]   ;;  %v3254_v41 = vld [vmem:[%s4300_s1 + $0x810] ss:$8 sps:$4 sm:$0xff]  }
  0xcc   :  { %2296 = vmatpush1.bf16.msra.mxu0 %v3160_v39  ;;  %2093 = vmatprep.subr.bf16.mxu1 %v3165_v42  ;;  %v2434_v39 = vcombine.high %v35_v35, %v35_v35  ;;  %v3263_v42 = vld [vmem:[%s4300_s1 + $0x824] ss:$8 sps:$4 sm:$0xff]  }
  0xcd   :  { %2297 = vmatprep.subr.bf16.mxu0 %v3168_v43  ;;  %2119 = vmatprep.mubr.bf16.mxu1 %v3247_v44  ;;  %v2433_v43 = vcombine.low %v35_v35, %v35_v35  ;;  %v2441_v44 = vcombine.low %v39_v36, %v39_v36 }
  0xce   :  { %2323 = vmatprep.mubr.bf16.mxu0 %v3250_v45  ;;  %v4186_v45 = vld [vmem:[%s4301_s0 + $0xd0] sm:$0xff] }
  0xcf   :  { %2094 = vmatpush1.bf16.msra.mxu1 %v3163_v46  ;;  %v3261_v46 = vld [vmem:[%s4300_s1 + $0x820] ss:$8 sps:$4 sm:$0xff]  }
  0xd0   :  { %2298 = vmatpush1.bf16.msra.mxu0 %v3166_v47  ;;  %2095 = vmatprep.subr.bf16.mxu1 %v3171_v48  ;;  %v3266_v47 = vld [vmem:[%s4300_s1 + $0x834] ss:$8 sps:$4 sm:$0xff]   ;;  %v3305_v48 = vld [vmem:[%s4301_s0 + $0x44] ss:$72 sps:$4 sm:$0xff]  }
  0xd1   :  { %2299 = vmatprep.subr.bf16.mxu0 %v3174_v49  ;;  %v2444_v49 = vcombine.high %v4186_v45, %v4186_v45 }
  0xd3   :  { %2096 = vmatpush1.bf16.msra.mxu1 %v3169_v50  ;;  %v3264_v50 = vld [vmem:[%s4300_s1 + $0x830] ss:$8 sps:$4 sm:$0xff]  }
  0xd4   :  { %2300 = vmatpush1.bf16.msra.mxu0 %v3172_v51  ;;  %2097 = vmatprep.subr.bf16.mxu1 %v3177_v52  ;;  %v3269_v51 = vld [vmem:[%s4300_s1 + $0x844] ss:$8 sps:$4 sm:$0xff]   ;;  %v3267_v52 = vld [vmem:[%s4300_s1 + $0x840] ss:$8 sps:$4 sm:$0xff]  }
  0xd5   :  { %2301 = vmatprep.subr.bf16.mxu0 %v3180_v53  ;;  %v3272_v53 = vld [vmem:[%s4300_s1 + $0x854] ss:$8 sps:$4 sm:$0xff]  }
  0xd7   :  { %2098 = vmatpush1.bf16.msra.mxu1 %v3175_v54  ;;  %v3270_v54 = vld [vmem:[%s4300_s1 + $0x850] ss:$8 sps:$4 sm:$0xff]  }
  0xd8   :  { %2302 = vmatpush1.bf16.msra.mxu0 %v3178_v55  ;;  %2099 = vmatprep.subr.bf16.mxu1 %v3183_v56  ;;  %v3275_v55 = vld [vmem:[%s4300_s1 + $0x864] ss:$8 sps:$4 sm:$0xff]   ;;  %v3273_v56 = vld [vmem:[%s4300_s1 + $0x860] ss:$8 sps:$4 sm:$0xff]  }
  0xd9   :  { %2303 = vmatprep.subr.bf16.mxu0 %v3186_v57  ;;  %v3278_v57 = vld [vmem:[%s4300_s1 + $0x874] ss:$8 sps:$4 sm:$0xff]  }
  0xdb   :  { %2100 = vmatpush1.bf16.msra.mxu1 %v3181_v58  ;;  %v3276_v58 = vld [vmem:[%s4300_s1 + $0x870] ss:$8 sps:$4 sm:$0xff]  }
  0xdc   :  { %2304 = vmatpush1.bf16.msra.mxu0 %v3184_v59  ;;  %2101 = vmatprep.subr.bf16.mxu1 %v3189_v60  ;;  %v3281_v59 = vld [vmem:[%s4300_s1 + $0x884] ss:$8 sps:$4 sm:$0xff]   ;;  %v3279_v60 = vld [vmem:[%s4300_s1 + $0x880] ss:$8 sps:$4 sm:$0xff]  }
  0xdd   :  { %2305 = vmatprep.subr.bf16.mxu0 %v3192_v61  ;;  %v3284_v61 = vld [vmem:[%s4300_s1 + $0x894] ss:$8 sps:$4 sm:$0xff]  }
  0xdf   :  { %2102 = vmatpush1.bf16.msra.mxu1 %v3187_v62  ;;  %v3282_v62 = vld [vmem:[%s4300_s1 + $0x890] ss:$8 sps:$4 sm:$0xff]  }
  0xe0   :  { %2306 = vmatpush1.bf16.msra.mxu0 %v3190_v63  ;;  %2103 = vmatprep.subr.bf16.mxu1 %v3195_v0  ;;  %v3287_v63 = vld [vmem:[%s4300_s1 + $0x8a4] ss:$8 sps:$4 sm:$0xff]   ;;  %v3285_v0 = vld [vmem:[%s4300_s1 + $0x8a0] ss:$8 sps:$4 sm:$0xff]  }
  0xe1   :  { %2307 = vmatprep.subr.bf16.mxu0 %v3198_v1  ;;  %v3290_v1 = vld [vmem:[%s4300_s1 + $0x8b4] ss:$8 sps:$4 sm:$0xff]  }
  0xe3   :  { %2104 = vmatpush1.bf16.msra.mxu1 %v3193_v2  ;;  %v3288_v2 = vld [vmem:[%s4300_s1 + $0x8b0] ss:$8 sps:$4 sm:$0xff]  }
  0xe4   :  { %2308 = vmatpush1.bf16.msra.mxu0 %v3196_v3  ;;  %2105 = vmatprep.subr.bf16.mxu1 %v3201_v4  ;;  %v3293_v3 = vld [vmem:[%s4300_s1 + $0x8c4] ss:$8 sps:$4 sm:$0xff]   ;;  %v3291_v4 = vld [vmem:[%s4300_s1 + $0x8c0] ss:$8 sps:$4 sm:$0xff]  }
  0xe5   :  { %2309 = vmatprep.subr.bf16.mxu0 %v3204_v5  ;;  %v3296_v5 = vld [vmem:[%s4300_s1 + $0x8d4] ss:$8 sps:$4 sm:$0xff]  }
  0xe7   :  { %2106 = vmatpush1.bf16.msra.mxu1 %v3199_v6  ;;  %v3294_v6 = vld [vmem:[%s4300_s1 + $0x8d0] ss:$8 sps:$4 sm:$0xff]  }
  0xe8   :  { %2310 = vmatpush1.bf16.msra.mxu0 %v3202_v7  ;;  %2107 = vmatprep.subr.bf16.mxu1 %v3207_v8  ;;  %v3299_v7 = vld [vmem:[%s4300_s1 + $0x8e4] ss:$8 sps:$4 sm:$0xff]   ;;  %v3297_v8 = vld [vmem:[%s4300_s1 + $0x8e0] ss:$8 sps:$4 sm:$0xff]  }
  0xe9   :  { %2311 = vmatprep.subr.bf16.mxu0 %v3210_v9  ;;  %v3302_v9 = vld [vmem:[%s4300_s1 + $0x8f4] ss:$8 sps:$4 sm:$0xff]  }
  0xeb   :  { %2108 = vmatpush1.bf16.msra.mxu1 %v3205_v10  ;;  %v3300_v10 = vld [vmem:[%s4300_s1 + $0x8f0] ss:$8 sps:$4 sm:$0xff]  }
  0xec   :  { %2312 = vmatpush1.bf16.msra.mxu0 %v3208_v11  ;;  %2109 = vmatprep.subr.bf16.mxu1 %v3213_v12  ;;  %v3303_v11 = vld [vmem:[%s4301_s0 + $0x40] ss:$72 sps:$4 sm:$0xff]   ;;  %v2443_v12 = vcombine.low %v4186_v45, %v4186_v45 }
  0xed   :  { %2313 = vmatprep.subr.bf16.mxu0 %v3216_v13  ;;  %v331_v13 = vlaneseq }
  0xef   :  { %2110 = vmatpush1.bf16.msra.mxu1 %v3211_v14  ;;  %v332_v14 = vshrl.u32 %v331_v13, 7 }
  0xf0   :  { %2314 = vmatpush1.bf16.msra.mxu0 %v3214_v15  ;;  %2111 = vmatprep.subr.bf16.mxu1 %v3219_v16 }
  0xf1   :  { %2315 = vmatprep.subr.bf16.mxu0 %v3222_v17 }
  0xf3   :  { %2112 = vmatpush1.bf16.msra.mxu1 %v3217_v18  ;;  %v333_v18 = vsub.s32 0, %v332_v14 }
  0xf4   :  { %2316 = vmatpush1.bf16.msra.mxu0 %v3220_v19  ;;  %2113 = vmatprep.subr.bf16.mxu1 %v3225_v20  ;;  %v329_v20 = vld [vmem:[%s4302_s2] sm:$0x3] }
  0xf5   :  { %2317 = vmatprep.subr.bf16.mxu0 %v3228_v21  ;;  %v337_v21 = vsub.s32 1, %v332_v14 }
  0xf7   :  { %2114 = vmatpush1.bf16.msra.mxu1 %v3223_v22  ;;  %v334_v22 = vrot.slane %v329_v20, %v333_v18 }
  0xf8   :  { %2318 = vmatpush1.bf16.msra.mxu0 %v3226_v23  ;;  %2115 = vmatprep.subr.bf16.mxu1 %v3234_v24  ;;  %v338_v23 = vrot.slane %v329_v20, %v337_v21 }
  0xf9   :  { %2319 = vmatprep.subr.bf16.mxu0 %v3238_v25 }
  0xfb   :  { %2116 = vmatpush1.bf16.msra.mxu1 %v3232_v26 }
  0xfc   :  { %2320 = vmatpush1.bf16.msra.mxu0 %v3236_v27  ;;  %2117 = vmatprep.subr.bf16.mxu1 %v3241_v28 }
  0xfd   :  { %2321 = vmatprep.subr.bf16.mxu0 %v3244_v29 }
  0xff   :  { %2118 = vmatpush1.bf16.msra.mxu1 %v3239_v30 }
 0x100   :  { %2322 = vmatpush1.bf16.msra.mxu0 %v3242_v31  ;;  %2733 = vmatprep.subr.bf16.mxu1 %v3253_v32 }
 0x101   :  { %2342 = vmatprep.subr.bf16.mxu0 %v3253_v32 }
 0x102   :  { %2120 = vmatmul.mubr.bf16.vlgmr.msra.gmra.mrb[0].mxu1 %v3245_v33 }
 0x103   :  { %2324 = vmatmul.mubr.bf16.vlgmr.msra.gmra.mrb[0].mxu0 %v3248_v34  ;;  %2749 = vmatpush1.bf16.msra.mxu1 %v3251_v37 }
 0x104   :  { %2343 = vmatpush1.bf16.msra.mxu0 %v3251_v37  ;;  %2734 = vmatprep.subr.bf16.mxu1 %v3256_v38 }
 0x105   :  { %2344 = vmatprep.subr.bf16.mxu0 %v3256_v38  ;;  %2129 = vmatprep.mubr.bf16.mxu1 %v2434_v39 }
 0x106   :  { %2333 = vmatprep.mubr.bf16.mxu0 %v2442_v40 }
 0x107   :  { %2750 = vmatpush1.bf16.msra.mxu1 %v3254_v41 }
 0x108   :  { %2345 = vmatpush1.bf16.msra.mxu0 %v3254_v41  ;;  %2735 = vmatprep.subr.bf16.mxu1 %v3263_v42 }
 0x109   :  { %2346 = vmatprep.subr.bf16.mxu0 %v3263_v42 }
 0x10a   :  { %2130 = vmatmul.mubr.bf16.gmra.mrb[4].mxu1 %v2433_v43 }
 0x10b   :  { %2334 = vmatmul.mubr.bf16.gmra.mrb[4].mxu0 %v2441_v44  ;;  %2751 = vmatpush1.bf16.msra.mxu1 %v3261_v46 }
 0x10c   :  { %2347 = vmatpush1.bf16.msra.mxu0 %v3261_v46  ;;  %2736 = vmatprep.subr.bf16.mxu1 %v3266_v47 }
 0x10d   :  { %2348 = vmatprep.subr.bf16.mxu0 %v3266_v47  ;;  %2374 = vmatprep.mubr.bf16.mxu0 %v3305_v48 }
 0x10e   :  { %2384 = vmatprep.mubr.bf16.mxu1 %v2444_v49 }
 0x10f   :  { %2752 = vmatpush1.bf16.msra.mxu1 %v3264_v50 }
 0x110   :  { %2349 = vmatpush1.bf16.msra.mxu0 %v3264_v50  ;;  %2737 = vmatprep.subr.bf16.mxu1 %v3269_v51 }
 0x111   :  { %2350 = vmatprep.subr.bf16.mxu0 %v3269_v51 }
 0x113   :  { %2753 = vmatpush1.bf16.msra.mxu1 %v3267_v52 }
 0x114   :  { %2351 = vmatpush1.bf16.msra.mxu0 %v3267_v52  ;;  %2738 = vmatprep.subr.bf16.mxu1 %v3272_v53 }
 0x115   :  { %2352 = vmatprep.subr.bf16.mxu0 %v3272_v53 }
 0x117   :  { %2754 = vmatpush1.bf16.msra.mxu1 %v3270_v54 }
 0x118   :  { %2353 = vmatpush1.bf16.msra.mxu0 %v3270_v54  ;;  %2739 = vmatprep.subr.bf16.mxu1 %v3275_v55 }
 0x119   :  { %2354 = vmatprep.subr.bf16.mxu0 %v3275_v55 }
 0x11b   :  { %2755 = vmatpush1.bf16.msra.mxu1 %v3273_v56 }
 0x11c   :  { %2355 = vmatpush1.bf16.msra.mxu0 %v3273_v56  ;;  %2740 = vmatprep.subr.bf16.mxu1 %v3278_v57 }
 0x11d   :  { %2356 = vmatprep.subr.bf16.mxu0 %v3278_v57 }
 0x11f   :  { %2756 = vmatpush1.bf16.msra.mxu1 %v3276_v58 }
 0x120   :  { %2357 = vmatpush1.bf16.msra.mxu0 %v3276_v58  ;;  %2741 = vmatprep.subr.bf16.mxu1 %v3281_v59 }
 0x121   :  { %2358 = vmatprep.subr.bf16.mxu0 %v3281_v59 }
 0x123   :  { %2757 = vmatpush1.bf16.msra.mxu1 %v3279_v60 }
 0x124   :  { %2359 = vmatpush1.bf16.msra.mxu0 %v3279_v60  ;;  %2742 = vmatprep.subr.bf16.mxu1 %v3284_v61 }
 0x125   :  { %2360 = vmatprep.subr.bf16.mxu0 %v3284_v61 }
 0x127   :  { %2758 = vmatpush1.bf16.msra.mxu1 %v3282_v62 }
 0x128   :  { %2361 = vmatpush1.bf16.msra.mxu0 %v3282_v62  ;;  %2743 = vmatprep.subr.bf16.mxu1 %v3287_v63 }
 0x129   :  { %2362 = vmatprep.subr.bf16.mxu0 %v3287_v63 }
 0x12b   :  { %2759 = vmatpush1.bf16.msra.mxu1 %v3285_v0 }
 0x12c   :  { %2363 = vmatpush1.bf16.msra.mxu0 %v3285_v0  ;;  %2744 = vmatprep.subr.bf16.mxu1 %v3290_v1 }
 0x12d   :  { %2364 = vmatprep.subr.bf16.mxu0 %v3290_v1 }
 0x12f   :  { %2760 = vmatpush1.bf16.msra.mxu1 %v3288_v2 }
 0x130   :  { %2365 = vmatpush1.bf16.msra.mxu0 %v3288_v2  ;;  %2745 = vmatprep.subr.bf16.mxu1 %v3293_v3 }
 0x131   :  { %2366 = vmatprep.subr.bf16.mxu0 %v3293_v3 }
 0x133   :  { %2761 = vmatpush1.bf16.msra.mxu1 %v3291_v4 }
 0x134   :  { %2367 = vmatpush1.bf16.msra.mxu0 %v3291_v4  ;;  %2746 = vmatprep.subr.bf16.mxu1 %v3296_v5 }
 0x135   :  { %2368 = vmatprep.subr.bf16.mxu0 %v3296_v5 }
 0x137   :  { %2762 = vmatpush1.bf16.msra.mxu1 %v3294_v6 }
 0x138   :  { %2369 = vmatpush1.bf16.msra.mxu0 %v3294_v6  ;;  %2747 = vmatprep.subr.bf16.mxu1 %v3299_v7 }
 0x139   :  { %2370 = vmatprep.subr.bf16.mxu0 %v3299_v7 }
 0x13b   :  { %2763 = vmatpush1.bf16.msra.mxu1 %v3297_v8 }
 0x13c   :  { %2371 = vmatpush1.bf16.msra.mxu0 %v3297_v8  ;;  %2748 = vmatprep.subr.bf16.mxu1 %v3302_v9 }
 0x13d   :  { %2372 = vmatprep.subr.bf16.mxu0 %v3302_v9 }
 0x13f   :  { %2764 = vmatpush1.bf16.msra.mxu1 %v3300_v10 }
 0x140   :  { %2373 = vmatpush1.bf16.msra.mxu0 %v3300_v10 }
 0x142   :  { %2385 = vmatmul.mubr.bf16.vlgmr.msra.gmra.mrb[8].mxu1 %v2443_v12 }
 0x143   :  { %2375 = vmatmul.mubr.bf16.vlgmr.msra.gmra.mrb[0].mxu0 %v3303_v11 }
 0x1d5   :  { %v2121_v15 = vpop.f32.mrb[0].mxu1 }
 0x1d6   :  { %v2123_v16 = vpop.f32.mrb[1].mxu1  ;;  %v2765_v36 = vadd.f32 %v2121_v15, %v334_v22 }
 0x1d7   :  { %v2125_v17 = vpop.f32.mrb[2].mxu1  ;;  %v2767_v37 = vadd.f32 %v2123_v16, %v338_v23 }
 0x1d8   :  { %v2127_v19 = vpop.f32.mrb[3].mxu1  ;;  %v2769_v40 = vadd.f32 %v2125_v17, %v334_v22 }
 0x1d9   :  { %v2771_v45 = vadd.f32 %v2127_v19, %v338_v23 }
 0x1dd   :  { %v2131_v24 = vpop.f32.mrb[4].mxu1 }
 0x1de   :  { %v2335_v25 = vpop.f32.mrb[4].mxu0  ;;  %v2773_v26 = vadd.f32 %v2131_v24, %v334_v22  ;;  %v2133_v27 = vpop.f32.mrb[5].mxu1 }
 0x1df   :  { %v2337_v28 = vpop.f32.mrb[5].mxu0  ;;  %v2776_v29 = vadd.f32 %v2133_v27, %v338_v23  ;;  %v2135_v30 = vpop.f32.mrb[6].mxu1 }
 0x1e0   :  { %v2339_v31 = vpop.f32.mrb[6].mxu0  ;;  %v2774_v32 = vadd.f32 %v2773_v26, %v2335_v25  ;;  %v2136_v33 = vpop.f32.mrb[7].mxu1 }
 0x1e1   :  { %v2340_v34 = vpop.f32.mrb[7].mxu0  ;;  %v2777_v35 = vadd.f32 %v2776_v29, %v2337_v28 }
 0x215   :  { %v2386_v39 = vpop.f32.mrb[8].mxu1 }
 0x216   :  { %v2376_v38 = vpop.f32.mrb[0].mxu0  ;;  %v2775_v42 = vadd.f32 %v2774_v32, %v2386_v39  ;;  %v2388_v44 = vpop.f32.mrb[9].mxu1 }
 0x217   :  { %v2766_v41 = vadd.f32 %v2765_v36, %v2376_v38  ;;  %v2378_v43 = vpop.f32.mrb[1].mxu0  ;;  %v2778_v47 = vadd.f32 %v2777_v35, %v2388_v44  ;;  %v2390_v49 = vpop.f32.mrb[10].mxu1 }
 0x218   :  { %v2768_v46 = vadd.f32 %v2767_v37, %v2378_v43  ;;  %v2380_v48 = vpop.f32.mrb[2].mxu0  ;;  %v2397_v51 = vmax.f32 %v2775_v42, 0.0  ;;  %v2391_v54 = vpop.f32.mrb[11].mxu1 }
 0x219   :  { %v2393_v50 = vmax.f32 %v2766_v41, 0.0  ;;  %v2770_v52 = vadd.f32 %v2769_v40, %v2380_v48  ;;  %v2382_v53 = vpop.f32.mrb[3].mxu0  ;;  %v2398_v56 = vmax.f32 %v2778_v47, 0.0 }
 0x21a   :  { %v2394_v55 = vmax.f32 %v2768_v46, 0.0  ;;  %v2772_v57 = vadd.f32 %v2771_v45, %v2382_v53  ;;  %2403 = vst [vmem:[%s4303_s3 + $0x20] sm:$0xff] %v2397_v51 }
 0x21b   :  { %2399 = vst [vmem:[%s4303_s3] sm:$0xff] %v2393_v50  ;;  %v2395_v58 = vmax.f32 %v2770_v52, 0.0  ;;  %2404 = vst [vmem:[%s4303_s3 + $0x28] sm:$0xff] %v2398_v56 }
 0x21c   :  { %2400 = vst [vmem:[%s4303_s3 + $0x8] sm:$0xff] %v2394_v55  ;;  %v2396_v59 = vmax.f32 %v2772_v57, 0.0 }
 0x21d   :  { %2401 = vst [vmem:[%s4303_s3 + $0x10] sm:$0xff] %v2395_v58 }
 0x21e   :  { %2402 = vst [vmem:[%s4303_s3 + $0x18] sm:$0xff] %v2396_v59 }

// kernel: alexnet_forward.12
= control target key start
LH: loop header
LB: loop body
LE: loop exit
PB: predicated region body
PF: predicated region fallthrough
CT: control target
= control target key end

     0   :  { %s6393_s1 = inlined_call_operand.vmem [shape: bf16[3456,256], index: 1, kind: input, shape index: {}]   ;;  %s6394_s0 = inlined_call_operand.vmem [shape: bf16[24,3456], index: 0, kind: input, shape index: {}]   ;;  %s6395_s2 = inlined_call_operand.vmem [shape: f32[1,256], index: 2, kind: input, shape index: {}]   ;;  %s6396_s3 = inlined_call_operand.vmem [shape: f32[24,256], index: 3, kind: output, shape index: {}]  }
   0x1   :  { %v4217_v0 = vld [vmem:[%s6393_s1 + $0x4] ss:$8 sps:$4 sm:$0xff]   ;;  %v4221_v2 = vld [vmem:[%s6393_s1] ss:$8 sps:$4 sm:$0xff]   ;;  %v4223_v4 = vld [vmem:[%s6393_s1 + $0x14] ss:$8 sps:$4 sm:$0xff]  }
   0x2   :  { %v4219_v1 = vld [vmem:[%s6393_s1 + $0x704] ss:$8 sps:$4 sm:$0xff]   ;;  %2892 = vmatprep.subr.bf16.mxu1 %v4217_v0  ;;  %v4222_v3 = vld [vmem:[%s6393_s1 + $0x700] ss:$8 sps:$4 sm:$0xff]   ;;  %v4225_v5 = vld [vmem:[%s6393_s1 + $0x714] ss:$8 sps:$4 sm:$0xff]  }
   0x3   :  { %3249 = vmatprep.subr.bf16.mxu0 %v4219_v1  ;;  %2893 = vmatpush1.bf16.msra.mxu1 %v4221_v2  ;;  %v4227_v6 = vld [vmem:[%s6393_s1 + $0x10] ss:$8 sps:$4 sm:$0xff]   ;;  %v4229_v8 = vld [vmem:[%s6393_s1 + $0x24] ss:$8 sps:$4 sm:$0xff]   ;;  %v4233_v10 = vld [vmem:[%s6393_s1 + $0x20] ss:$8 sps:$4 sm:$0xff]  }
   0x4   :  { %3250 = vmatpush1.bf16.msra.mxu0 %v4222_v3  ;;  %2894 = vmatprep.subr.bf16.mxu1 %v4223_v4  ;;  %v4228_v7 = vld [vmem:[%s6393_s1 + $0x710] ss:$8 sps:$4 sm:$0xff]   ;;  %v4231_v9 = vld [vmem:[%s6393_s1 + $0x724] ss:$8 sps:$4 sm:$0xff]   ;;  %v4234_v11 = vld [vmem:[%s6393_s1 + $0x720] ss:$8 sps:$4 sm:$0xff]  }
   0x5   :  { %3251 = vmatprep.subr.bf16.mxu0 %v4225_v5  ;;  %v4235_v12 = vld [vmem:[%s6393_s1 + $0x34] ss:$8 sps:$4 sm:$0xff]   ;;  %v4239_v14 = vld [vmem:[%s6393_s1 + $0x30] ss:$8 sps:$4 sm:$0xff]   ;;  %v4241_v16 = vld [vmem:[%s6393_s1 + $0x44] ss:$8 sps:$4 sm:$0xff]  }
   0x6   :  { %v4237_v13 = vld [vmem:[%s6393_s1 + $0x734] ss:$8 sps:$4 sm:$0xff]   ;;  %v4240_v15 = vld [vmem:[%s6393_s1 + $0x730] ss:$8 sps:$4 sm:$0xff]   ;;  %v4243_v17 = vld [vmem:[%s6393_s1 + $0x744] ss:$8 sps:$4 sm:$0xff]  }
   0x7   :  { %2895 = vmatpush1.bf16.msra.mxu1 %v4227_v6  ;;  %v4245_v18 = vld [vmem:[%s6393_s1 + $0x40] ss:$8 sps:$4 sm:$0xff]   ;;  %v4247_v20 = vld [vmem:[%s6393_s1 + $0x54] ss:$8 sps:$4 sm:$0xff]   ;;  %v4251_v22 = vld [vmem:[%s6393_s1 + $0x50] ss:$8 sps:$4 sm:$0xff]  }
   0x8   :  { %3252 = vmatpush1.bf16.msra.mxu0 %v4228_v7  ;;  %2896 = vmatprep.subr.bf16.mxu1 %v4229_v8  ;;  %v4246_v19 = vld [vmem:[%s6393_s1 + $0x740] ss:$8 sps:$4 sm:$0xff]   ;;  %v4249_v21 = vld [vmem:[%s6393_s1 + $0x754] ss:$8 sps:$4 sm:$0xff]   ;;  %v4252_v23 = vld [vmem:[%s6393_s1 + $0x750] ss:$8 sps:$4 sm:$0xff]  }
   0x9   :  { %3253 = vmatprep.subr.bf16.mxu0 %v4231_v9  ;;  %v4253_v24 = vld [vmem:[%s6393_s1 + $0x64] ss:$8 sps:$4 sm:$0xff]   ;;  %v4257_v26 = vld [vmem:[%s6393_s1 + $0x60] ss:$8 sps:$4 sm:$0xff]   ;;  %v4259_v28 = vld [vmem:[%s6393_s1 + $0x74] ss:$8 sps:$4 sm:$0xff]  }
   0xa   :  { %v4255_v25 = vld [vmem:[%s6393_s1 + $0x764] ss:$8 sps:$4 sm:$0xff]   ;;  %v4258_v27 = vld [vmem:[%s6393_s1 + $0x760] ss:$8 sps:$4 sm:$0xff]   ;;  %v4261_v29 = vld [vmem:[%s6393_s1 + $0x774] ss:$8 sps:$4 sm:$0xff]  }
   0xb   :  { %2897 = vmatpush1.bf16.msra.mxu1 %v4233_v10  ;;  %v4263_v30 = vld [vmem:[%s6393_s1 + $0x70] ss:$8 sps:$4 sm:$0xff]   ;;  %v4265_v32 = vld [vmem:[%s6393_s1 + $0x84] ss:$8 sps:$4 sm:$0xff]   ;;  %v4269_v34 = vld [vmem:[%s6393_s1 + $0x80] ss:$8 sps:$4 sm:$0xff]  }
   0xc   :  { %3254 = vmatpush1.bf16.msra.mxu0 %v4234_v11  ;;  %2898 = vmatprep.subr.bf16.mxu1 %v4235_v12  ;;  %v4264_v31 = vld [vmem:[%s6393_s1 + $0x770] ss:$8 sps:$4 sm:$0xff]   ;;  %v4267_v33 = vld [vmem:[%s6393_s1 + $0x784] ss:$8 sps:$4 sm:$0xff]   ;;  %v4270_v35 = vld [vmem:[%s6393_s1 + $0x780] ss:$8 sps:$4 sm:$0xff]  }
   0xd   :  { %3255 = vmatprep.subr.bf16.mxu0 %v4237_v13  ;;  %v4271_v36 = vld [vmem:[%s6393_s1 + $0x94] ss:$8 sps:$4 sm:$0xff]   ;;  %v4275_v38 = vld [vmem:[%s6393_s1 + $0x90] ss:$8 sps:$4 sm:$0xff]   ;;  %v4277_v40 = vld [vmem:[%s6393_s1 + $0xa4] ss:$8 sps:$4 sm:$0xff]  }
   0xe   :  { %v4273_v37 = vld [vmem:[%s6393_s1 + $0x794] ss:$8 sps:$4 sm:$0xff]   ;;  %v4276_v39 = vld [vmem:[%s6393_s1 + $0x790] ss:$8 sps:$4 sm:$0xff]   ;;  %v4279_v41 = vld [vmem:[%s6393_s1 + $0x7a4] ss:$8 sps:$4 sm:$0xff]  }
   0xf   :  { %2899 = vmatpush1.bf16.msra.mxu1 %v4239_v14  ;;  %v4281_v42 = vld [vmem:[%s6393_s1 + $0xa0] ss:$8 sps:$4 sm:$0xff]   ;;  %v4283_v44 = vld [vmem:[%s6393_s1 + $0xb4] ss:$8 sps:$4 sm:$0xff]   ;;  %v4287_v46 = vld [vmem:[%s6393_s1 + $0xb0] ss:$8 sps:$4 sm:$0xff]  }
  0x10   :  { %3256 = vmatpush1.bf16.msra.mxu0 %v4240_v15  ;;  %2900 = vmatprep.subr.bf16.mxu1 %v4241_v16  ;;  %v4282_v43 = vld [vmem:[%s6393_s1 + $0x7a0] ss:$8 sps:$4 sm:$0xff]   ;;  %v4285_v45 = vld [vmem:[%s6393_s1 + $0x7b4] ss:$8 sps:$4 sm:$0xff]   ;;  %v4288_v47 = vld [vmem:[%s6393_s1 + $0x7b0] ss:$8 sps:$4 sm:$0xff]  }
  0x11   :  { %3257 = vmatprep.subr.bf16.mxu0 %v4243_v17  ;;  %v4315_v48 = vld [vmem:[%s6394_s0 + $0x4] ss:$108 sps:$4 sm:$0xff]   ;;  %v4321_v51 = vld [vmem:[%s6394_s0 + $0x3c] ss:$108 sps:$4 sm:$0xff]   ;;  %v4313_v4 = vld [vmem:[%s6394_s0] ss:$108 sps:$4 sm:$0xff]  }
  0x12   :  { %v4289_v49 = vld [vmem:[%s6393_s1 + $0xc4] ss:$8 sps:$4 sm:$0xff]   ;;  %2924 = vmatprep.mubr.bf16.mxu1 %v4315_v48  ;;  %v4293_v52 = vld [vmem:[%s6393_s1 + $0xc0] ss:$8 sps:$4 sm:$0xff]   ;;  %v4295_v54 = vld [vmem:[%s6393_s1 + $0xd4] ss:$8 sps:$4 sm:$0xff]   ;;  %3281 = vmatprep.mubr.bf16.mxu0 %v4321_v51 }
  0x13   :  { %2901 = vmatpush1.bf16.msra.mxu1 %v4245_v18  ;;  %v4291_v50 = vld [vmem:[%s6393_s1 + $0x7c4] ss:$8 sps:$4 sm:$0xff]   ;;  %v4294_v53 = vld [vmem:[%s6393_s1 + $0x7c0] ss:$8 sps:$4 sm:$0xff]   ;;  %v4297_v55 = vld [vmem:[%s6393_s1 + $0x7d4] ss:$8 sps:$4 sm:$0xff]  }
  0x14   :  { %3258 = vmatpush1.bf16.msra.mxu0 %v4246_v19  ;;  %2902 = vmatprep.subr.bf16.mxu1 %v4247_v20  ;;  %v4299_v56 = vld [vmem:[%s6393_s1 + $0xd0] ss:$8 sps:$4 sm:$0xff]   ;;  %v4301_v58 = vld [vmem:[%s6393_s1 + $0xe4] ss:$8 sps:$4 sm:$0xff]   ;;  %v4305_v60 = vld [vmem:[%s6393_s1 + $0xe0] ss:$8 sps:$4 sm:$0xff]  }
  0x15   :  { %3259 = vmatprep.subr.bf16.mxu0 %v4249_v21  ;;  %v4300_v57 = vld [vmem:[%s6393_s1 + $0x7d0] ss:$8 sps:$4 sm:$0xff]   ;;  %v4303_v59 = vld [vmem:[%s6393_s1 + $0x7e4] ss:$8 sps:$4 sm:$0xff]   ;;  %v4306_v61 = vld [vmem:[%s6393_s1 + $0x7e0] ss:$8 sps:$4 sm:$0xff]  }
  0x16   :  { %v4307_v62 = vld [vmem:[%s6393_s1 + $0xf4] ss:$8 sps:$4 sm:$0xff]   ;;  %v4311_v0 = vld [vmem:[%s6393_s1 + $0xf0] ss:$8 sps:$4 sm:$0xff]   ;;  %v4318_v2 = vld [vmem:[%s6393_s1 + $0x104] ss:$8 sps:$4 sm:$0xff]  }
  0x17   :  { %2903 = vmatpush1.bf16.msra.mxu1 %v4251_v22  ;;  %v4309_v63 = vld [vmem:[%s6393_s1 + $0x7f4] ss:$8 sps:$4 sm:$0xff]   ;;  %v4312_v1 = vld [vmem:[%s6393_s1 + $0x7f0] ss:$8 sps:$4 sm:$0xff]   ;;  %v4324_v3 = vld [vmem:[%s6393_s1 + $0x804] ss:$8 sps:$4 sm:$0xff]  }
  0x18   :  { %3260 = vmatpush1.bf16.msra.mxu0 %v4252_v23  ;;  %2904 = vmatprep.subr.bf16.mxu1 %v4253_v24  ;;  %v4316_v5 = vld [vmem:[%s6393_s1 + $0x100] ss:$8 sps:$4 sm:$0xff]   ;;  %v4319_v6 = vld [vmem:[%s6394_s0 + $0x38] ss:$108 sps:$4 sm:$0xff]   ;;  %v4327_v8 = vld [vmem:[%s6393_s1 + $0x114] ss:$8 sps:$4 sm:$0xff]  }
  0x19   :  { %3261 = vmatprep.subr.bf16.mxu0 %v4255_v25  ;;  %v4322_v7 = vld [vmem:[%s6393_s1 + $0x800] ss:$8 sps:$4 sm:$0xff]   ;;  %v4330_v9 = vld [vmem:[%s6393_s1 + $0x814] ss:$8 sps:$4 sm:$0xff]   ;;  %v4325_v10 = vld [vmem:[%s6393_s1 + $0x110] ss:$8 sps:$4 sm:$0xff]  }
  0x1a   :  { %v4328_v11 = vld [vmem:[%s6393_s1 + $0x810] ss:$8 sps:$4 sm:$0xff]   ;;  %v4333_v12 = vld [vmem:[%s6393_s1 + $0x124] ss:$8 sps:$4 sm:$0xff]   ;;  %v4331_v14 = vld [vmem:[%s6393_s1 + $0x120] ss:$8 sps:$4 sm:$0xff]  }
  0x1b   :  { %2905 = vmatpush1.bf16.msra.mxu1 %v4257_v26  ;;  %v4336_v13 = vld [vmem:[%s6393_s1 + $0x824] ss:$8 sps:$4 sm:$0xff]   ;;  %v4334_v15 = vld [vmem:[%s6393_s1 + $0x820] ss:$8 sps:$4 sm:$0xff]   ;;  %v4339_v16 = vld [vmem:[%s6393_s1 + $0x134] ss:$8 sps:$4 sm:$0xff]  }
  0x1c   :  { %3262 = vmatpush1.bf16.msra.mxu0 %v4258_v27  ;;  %2906 = vmatprep.subr.bf16.mxu1 %v4259_v28  ;;  %v4342_v17 = vld [vmem:[%s6393_s1 + $0x834] ss:$8 sps:$4 sm:$0xff]   ;;  %v4337_v18 = vld [vmem:[%s6393_s1 + $0x130] ss:$8 sps:$4 sm:$0xff]   ;;  %v4345_v20 = vld [vmem:[%s6393_s1 + $0x144] ss:$8 sps:$4 sm:$0xff]  }
  0x1d   :  { %3263 = vmatprep.subr.bf16.mxu0 %v4261_v29  ;;  %v4340_v19 = vld [vmem:[%s6393_s1 + $0x830] ss:$8 sps:$4 sm:$0xff]   ;;  %v4348_v21 = vld [vmem:[%s6393_s1 + $0x844] ss:$8 sps:$4 sm:$0xff]   ;;  %v4343_v22 = vld [vmem:[%s6393_s1 + $0x140] ss:$8 sps:$4 sm:$0xff]  }
  0x1e   :  { %v4346_v23 = vld [vmem:[%s6393_s1 + $0x840] ss:$8 sps:$4 sm:$0xff]   ;;  %v4351_v24 = vld [vmem:[%s6393_s1 + $0x154] ss:$8 sps:$4 sm:$0xff]   ;;  %v4349_v27 = vld [vmem:[%s6393_s1 + $0x150] ss:$8 sps:$4 sm:$0xff]  }
  0x1f   :  { %2907 = vmatpush1.bf16.msra.mxu1 %v4263_v30  ;;  %v4354_v25 = vld [vmem:[%s6393_s1 + $0x854] ss:$8 sps:$4 sm:$0xff]   ;;  %v4352_v30 = vld [vmem:[%s6393_s1 + $0x850] ss:$8 sps:$4 sm:$0xff]  }
  0x20   :  { %3264 = vmatpush1.bf16.msra.mxu0 %v4264_v31  ;;  %2908 = vmatprep.subr.bf16.mxu1 %v4265_v32  ;;  %v43_v26 = vld [vmem:[%s6394_s0 + $0xd8] sm:$0xff]  ;;  %v50_v31 = vld [vmem:[%s6394_s0 + $0x110] sm:$0xff]  ;;  %v4357_v32 = vld [vmem:[%s6393_s1 + $0x164] ss:$8 sps:$4 sm:$0xff]  }
  0x21   :  { %3265 = vmatprep.subr.bf16.mxu0 %v4267_v33  ;;  %v3650_v28 = vcombine.high %v43_v26, %v43_v26  ;;  %v3649_v29 = vcombine.low %v43_v26, %v43_v26  ;;  %v4360_v33 = vld [vmem:[%s6393_s1 + $0x864] ss:$8 sps:$4 sm:$0xff]   ;;  %v4375_v48 = vld [vmem:[%s6393_s1 + $0x194] ss:$8 sps:$4 sm:$0xff]   ;;  %v4376_v51 = vld [vmem:[%s6393_s1 + $0x890] ss:$8 sps:$4 sm:$0xff]  }
  0x22   :  { %v4439_v26 = vld [vmem:[%s6393_s1 + $0x224] ss:$8 sps:$4 sm:$0xff]  }
  0x23   :  { %2909 = vmatpush1.bf16.msra.mxu1 %v4269_v34  ;;  %v3664_v34 = vcombine.high %v50_v31, %v50_v31 }
  0x24   :  { %3266 = vmatpush1.bf16.msra.mxu0 %v4270_v35  ;;  %2910 = vmatprep.subr.bf16.mxu1 %v4271_v36  ;;  %v3663_v35 = vcombine.low %v50_v31, %v50_v31  ;;  %v4355_v36 = vld [vmem:[%s6393_s1 + $0x160] ss:$8 sps:$4 sm:$0xff]  }
  0x25   :  { %3267 = vmatprep.subr.bf16.mxu0 %v4273_v37  ;;  %v4358_v37 = vld [vmem:[%s6393_s1 + $0x860] ss:$8 sps:$4 sm:$0xff]  }
  0x27   :  { %2911 = vmatpush1.bf16.msra.mxu1 %v4275_v38  ;;  %v4363_v38 = vld [vmem:[%s6393_s1 + $0x174] ss:$8 sps:$4 sm:$0xff]  }
  0x28   :  { %3268 = vmatpush1.bf16.msra.mxu0 %v4276_v39  ;;  %2912 = vmatprep.subr.bf16.mxu1 %v4277_v40  ;;  %v4366_v39 = vld [vmem:[%s6393_s1 + $0x874] ss:$8 sps:$4 sm:$0xff]   ;;  %v4421_v40 = vld [vmem:[%s6394_s0 + $0xc] ss:$108 sps:$4 sm:$0xff]  }
  0x29   :  { %3269 = vmatprep.subr.bf16.mxu0 %v4279_v41  ;;  %v4361_v41 = vld [vmem:[%s6393_s1 + $0x170] ss:$8 sps:$4 sm:$0xff]  }
  0x2b   :  { %2913 = vmatpush1.bf16.msra.mxu1 %v4281_v42  ;;  %v4364_v42 = vld [vmem:[%s6393_s1 + $0x870] ss:$8 sps:$4 sm:$0xff]  }
  0x2c   :  { %3270 = vmatpush1.bf16.msra.mxu0 %v4282_v43  ;;  %2914 = vmatprep.subr.bf16.mxu1 %v4283_v44  ;;  %v4427_v43 = vld [vmem:[%s6394_s0 + $0x44] ss:$108 sps:$4 sm:$0xff]  }
  0x2d   :  { %3271 = vmatprep.subr.bf16.mxu0 %v4285_v45  ;;  %v4369_v44 = vld [vmem:[%s6393_s1 + $0x184] ss:$8 sps:$4 sm:$0xff]  }
  0x2e   :  { %v4372_v45 = vld [vmem:[%s6393_s1 + $0x884] ss:$8 sps:$4 sm:$0xff]  }
  0x2f   :  { %2915 = vmatpush1.bf16.msra.mxu1 %v4287_v46  ;;  %v4367_v46 = vld [vmem:[%s6393_s1 + $0x180] ss:$8 sps:$4 sm:$0xff]  }
  0x30   :  { %3272 = vmatpush1.bf16.msra.mxu0 %v4288_v47  ;;  %2916 = vmatprep.subr.bf16.mxu1 %v4289_v49  ;;  %v4370_v47 = vld [vmem:[%s6393_s1 + $0x880] ss:$8 sps:$4 sm:$0xff]   ;;  %v4378_v49 = vld [vmem:[%s6393_s1 + $0x894] ss:$8 sps:$4 sm:$0xff]  }
  0x31   :  { %3273 = vmatprep.subr.bf16.mxu0 %v4291_v50  ;;  %v4373_v50 = vld [vmem:[%s6393_s1 + $0x190] ss:$8 sps:$4 sm:$0xff]  }
  0x33   :  { %2917 = vmatpush1.bf16.msra.mxu1 %v4293_v52  ;;  %v4381_v52 = vld [vmem:[%s6393_s1 + $0x1a4] ss:$8 sps:$4 sm:$0xff]  }
  0x34   :  { %3274 = vmatpush1.bf16.msra.mxu0 %v4294_v53  ;;  %2918 = vmatprep.subr.bf16.mxu1 %v4295_v54  ;;  %v4384_v53 = vld [vmem:[%s6393_s1 + $0x8a4] ss:$8 sps:$4 sm:$0xff]   ;;  %v4379_v54 = vld [vmem:[%s6393_s1 + $0x1a0] ss:$8 sps:$4 sm:$0xff]  }
  0x35   :  { %3275 = vmatprep.subr.bf16.mxu0 %v4297_v55  ;;  %v4382_v55 = vld [vmem:[%s6393_s1 + $0x8a0] ss:$8 sps:$4 sm:$0xff]  }
  0x37   :  { %2919 = vmatpush1.bf16.msra.mxu1 %v4299_v56  ;;  %v4387_v56 = vld [vmem:[%s6393_s1 + $0x1b4] ss:$8 sps:$4 sm:$0xff]  }
  0x38   :  { %3276 = vmatpush1.bf16.msra.mxu0 %v4300_v57  ;;  %2920 = vmatprep.subr.bf16.mxu1 %v4301_v58  ;;  %v4390_v57 = vld [vmem:[%s6393_s1 + $0x8b4] ss:$8 sps:$4 sm:$0xff]   ;;  %v4385_v58 = vld [vmem:[%s6393_s1 + $0x1b0] ss:$8 sps:$4 sm:$0xff]  }
  0x39   :  { %3277 = vmatprep.subr.bf16.mxu0 %v4303_v59  ;;  %v4388_v59 = vld [vmem:[%s6393_s1 + $0x8b0] ss:$8 sps:$4 sm:$0xff]  }
  0x3b   :  { %2921 = vmatpush1.bf16.msra.mxu1 %v4305_v60  ;;  %v4393_v60 = vld [vmem:[%s6393_s1 + $0x1c4] ss:$8 sps:$4 sm:$0xff]  }
  0x3c   :  { %3278 = vmatpush1.bf16.msra.mxu0 %v4306_v61  ;;  %2922 = vmatprep.subr.bf16.mxu1 %v4307_v62  ;;  %v4396_v61 = vld [vmem:[%s6393_s1 + $0x8c4] ss:$8 sps:$4 sm:$0xff]   ;;  %v4391_v62 = vld [vmem:[%s6393_s1 + $0x1c0] ss:$8 sps:$4 sm:$0xff]  }
  0x3d   :  { %3279 = vmatprep.subr.bf16.mxu0 %v4309_v63  ;;  %v4394_v63 = vld [vmem:[%s6393_s1 + $0x8c0] ss:$8 sps:$4 sm:$0xff]  }
  0x3f   :  { %2923 = vmatpush1.bf16.msra.mxu1 %v4311_v0  ;;  %v4399_v0 = vld [vmem:[%s6393_s1 + $0x1d4] ss:$8 sps:$4 sm:$0xff]  }
  0x40   :  { %3280 = vmatpush1.bf16.msra.mxu0 %v4312_v1  ;;  %2943 = vmatprep.subr.bf16.mxu1 %v4318_v2  ;;  %v4402_v1 = vld [vmem:[%s6393_s1 + $0x8d4] ss:$8 sps:$4 sm:$0xff]   ;;  %v4397_v2 = vld [vmem:[%s6393_s1 + $0x1d0] ss:$8 sps:$4 sm:$0xff]  }
  0x41   :  { %3300 = vmatprep.subr.bf16.mxu0 %v4324_v3  ;;  %v4400_v3 = vld [vmem:[%s6393_s1 + $0x8d0] ss:$8 sps:$4 sm:$0xff]  }
  0x42   :  { %2925 = vmatmul.mubr.bf16.vlgmr.msra.gmra.mrb[0].mxu1 %v4313_v4  ;;  %v4406_v4 = vld [vmem:[%s6393_s1 + $0x1e4] ss:$8 sps:$4 sm:$0xff]  }
  0x43   :  { %3282 = vmatmul.mubr.bf16.vlgmr.msra.gmra.mrb[0].mxu0 %v4319_v6  ;;  %2944 = vmatpush1.bf16.msra.mxu1 %v4316_v5  ;;  %v4410_v5 = vld [vmem:[%s6393_s1 + $0x8e4] ss:$8 sps:$4 sm:$0xff]   ;;  %v4404_v6 = vld [vmem:[%s6393_s1 + $0x1e0] ss:$8 sps:$4 sm:$0xff]  }
  0x44   :  { %3301 = vmatpush1.bf16.msra.mxu0 %v4322_v7  ;;  %2945 = vmatprep.subr.bf16.mxu1 %v4327_v8  ;;  %v4408_v7 = vld [vmem:[%s6393_s1 + $0x8e0] ss:$8 sps:$4 sm:$0xff]   ;;  %v4415_v8 = vld [vmem:[%s6393_s1 + $0x1f4] ss:$8 sps:$4 sm:$0xff]  }
  0x45   :  { %3302 = vmatprep.subr.bf16.mxu0 %v4330_v9  ;;  %2934 = vmatprep.mubr.bf16.mxu1 %v3650_v28  ;;  %v4418_v9 = vld [vmem:[%s6393_s1 + $0x8f4] ss:$8 sps:$4 sm:$0xff]   ;;  %v4437_v28 = vld [vmem:[%s6393_s1 + $0x220] ss:$8 sps:$4 sm:$0xff]  }
  0x46   :  { %3291 = vmatprep.mubr.bf16.mxu0 %v3664_v34  ;;  %v4527_v34 = vld [vmem:[%s6394_s0 + $0x14] ss:$108 sps:$4 sm:$0xff]  }
  0x47   :  { %2946 = vmatpush1.bf16.msra.mxu1 %v4325_v10  ;;  %v4413_v10 = vld [vmem:[%s6393_s1 + $0x1f0] ss:$8 sps:$4 sm:$0xff]  }
  0x48   :  { %3303 = vmatpush1.bf16.msra.mxu0 %v4328_v11  ;;  %2947 = vmatprep.subr.bf16.mxu1 %v4333_v12  ;;  %v4416_v11 = vld [vmem:[%s6393_s1 + $0x8f0] ss:$8 sps:$4 sm:$0xff]   ;;  %v4419_v12 = vld [vmem:[%s6394_s0 + $0x8] ss:$108 sps:$4 sm:$0xff]  }
  0x49   :  { %3304 = vmatprep.subr.bf16.mxu0 %v4336_v13  ;;  %v4424_v13 = vld [vmem:[%s6393_s1 + $0x204] ss:$8 sps:$4 sm:$0xff]  }
  0x4a   :  { %2935 = vmatmul.mubr.bf16.gmra.mrb[4].mxu1 %v3649_v29  ;;  %v4440_v29 = vld [vmem:[%s6393_s1 + $0x920] ss:$8 sps:$4 sm:$0xff]  }
  0x4b   :  { %2948 = vmatpush1.bf16.msra.mxu1 %v4331_v14  ;;  %3292 = vmatmul.mubr.bf16.gmra.mrb[4].mxu0 %v3663_v35  ;;  %v4430_v14 = vld [vmem:[%s6393_s1 + $0x904] ss:$8 sps:$4 sm:$0xff]  }
  0x4c   :  { %3305 = vmatpush1.bf16.msra.mxu0 %v4334_v15  ;;  %2949 = vmatprep.subr.bf16.mxu1 %v4339_v16  ;;  %v4422_v15 = vld [vmem:[%s6393_s1 + $0x200] ss:$8 sps:$4 sm:$0xff]   ;;  %v4533_v35 = vld [vmem:[%s6394_s0 + $0x4c] ss:$108 sps:$4 sm:$0xff]  }
  0x4d   :  { %3306 = vmatprep.subr.bf16.mxu0 %v4342_v17  ;;  %2975 = vmatprep.mubr.bf16.mxu1 %v4421_v40  ;;  %v4425_v16 = vld [vmem:[%s6394_s0 + $0x40] ss:$108 sps:$4 sm:$0xff]  }
  0x4e   :  { %3332 = vmatprep.mubr.bf16.mxu0 %v4427_v43  ;;  %v4428_v17 = vld [vmem:[%s6393_s1 + $0x900] ss:$8 sps:$4 sm:$0xff]   ;;  %v4460_v43 = vld [vmem:[%s6393_s1 + $0x954] ss:$8 sps:$4 sm:$0xff]  }
  0x4f   :  { %2950 = vmatpush1.bf16.msra.mxu1 %v4337_v18  ;;  %v4433_v18 = vld [vmem:[%s6393_s1 + $0x214] ss:$8 sps:$4 sm:$0xff]   ;;  %v4449_v40 = vld [vmem:[%s6393_s1 + $0x240] ss:$8 sps:$4 sm:$0xff]  }
  0x50   :  { %3307 = vmatpush1.bf16.msra.mxu0 %v4340_v19  ;;  %2951 = vmatprep.subr.bf16.mxu1 %v4345_v20  ;;  %v44_v19 = vld [vmem:[%s6394_s0 + $0xe0] sm:$0xff]  ;;  %v4436_v20 = vld [vmem:[%s6393_s1 + $0x914] ss:$8 sps:$4 sm:$0xff]  }
  0x51   :  { %3308 = vmatprep.subr.bf16.mxu0 %v4348_v21  ;;  %v3652_v21 = vcombine.high %v44_v19, %v44_v19 }
  0x53   :  { %2952 = vmatpush1.bf16.msra.mxu1 %v4343_v22  ;;  %v51_v22 = vld [vmem:[%s6394_s0 + $0x118] sm:$0xff] }
  0x54   :  { %3309 = vmatpush1.bf16.msra.mxu0 %v4346_v23  ;;  %2953 = vmatprep.subr.bf16.mxu1 %v4351_v24  ;;  %v4431_v23 = vld [vmem:[%s6393_s1 + $0x210] ss:$8 sps:$4 sm:$0xff]   ;;  %v3665_v31 = vcombine.low %v51_v22, %v51_v22 }
  0x55   :  { %3310 = vmatprep.subr.bf16.mxu0 %v4354_v25  ;;  %v4434_v24 = vld [vmem:[%s6393_s1 + $0x910] ss:$8 sps:$4 sm:$0xff]   ;;  %v3666_v25 = vcombine.high %v51_v22, %v51_v22  ;;  %v4530_v22 = vld [vmem:[%s6393_s1 + $0x304] ss:$8 sps:$4 sm:$0xff]  }
  0x57   :  { %2954 = vmatpush1.bf16.msra.mxu1 %v4349_v27  ;;  %v4442_v27 = vld [vmem:[%s6393_s1 + $0x924] ss:$8 sps:$4 sm:$0xff]  }
  0x58   :  { %3311 = vmatpush1.bf16.msra.mxu0 %v4352_v30  ;;  %2955 = vmatprep.subr.bf16.mxu1 %v4357_v32  ;;  %v3651_v30 = vcombine.low %v44_v19, %v44_v19  ;;  %v4445_v32 = vld [vmem:[%s6393_s1 + $0x234] ss:$8 sps:$4 sm:$0xff]  }
  0x59   :  { %3312 = vmatprep.subr.bf16.mxu0 %v4360_v33  ;;  %v4448_v33 = vld [vmem:[%s6393_s1 + $0x934] ss:$8 sps:$4 sm:$0xff]  }
  0x5a   :  { %v4524_v19 = vld [vmem:[%s6393_s1 + $0x9f4] ss:$8 sps:$4 sm:$0xff]  }
  0x5b   :  { %2956 = vmatpush1.bf16.msra.mxu1 %v4355_v36  ;;  %v4443_v36 = vld [vmem:[%s6393_s1 + $0x230] ss:$8 sps:$4 sm:$0xff]  }
  0x5c   :  { %3313 = vmatpush1.bf16.msra.mxu0 %v4358_v37  ;;  %2957 = vmatprep.subr.bf16.mxu1 %v4363_v38  ;;  %v4446_v37 = vld [vmem:[%s6393_s1 + $0x930] ss:$8 sps:$4 sm:$0xff]   ;;  %v4451_v38 = vld [vmem:[%s6393_s1 + $0x244] ss:$8 sps:$4 sm:$0xff]  }
  0x5d   :  { %3314 = vmatprep.subr.bf16.mxu0 %v4366_v39  ;;  %v4454_v39 = vld [vmem:[%s6393_s1 + $0x944] ss:$8 sps:$4 sm:$0xff]  }
  0x5f   :  { %2958 = vmatpush1.bf16.msra.mxu1 %v4361_v41  ;;  %v4452_v41 = vld [vmem:[%s6393_s1 + $0x940] ss:$8 sps:$4 sm:$0xff]  }
  0x60   :  { %3315 = vmatpush1.bf16.msra.mxu0 %v4364_v42  ;;  %2959 = vmatprep.subr.bf16.mxu1 %v4369_v44  ;;  %v4457_v42 = vld [vmem:[%s6393_s1 + $0x254] ss:$8 sps:$4 sm:$0xff]   ;;  %v4455_v44 = vld [vmem:[%s6393_s1 + $0x250] ss:$8 sps:$4 sm:$0xff]  }
  0x61   :  { %3316 = vmatprep.subr.bf16.mxu0 %v4372_v45  ;;  %v4458_v45 = vld [vmem:[%s6393_s1 + $0x950] ss:$8 sps:$4 sm:$0xff]  }
  0x63   :  { %2960 = vmatpush1.bf16.msra.mxu1 %v4367_v46  ;;  %v4463_v46 = vld [vmem:[%s6393_s1 + $0x264] ss:$8 sps:$4 sm:$0xff]  }
  0x64   :  { %3317 = vmatpush1.bf16.msra.mxu0 %v4370_v47  ;;  %2961 = vmatprep.subr.bf16.mxu1 %v4375_v48  ;;  %v4466_v47 = vld [vmem:[%s6393_s1 + $0x964] ss:$8 sps:$4 sm:$0xff]   ;;  %v4461_v48 = vld [vmem:[%s6393_s1 + $0x260] ss:$8 sps:$4 sm:$0xff]  }
  0x65   :  { %3318 = vmatprep.subr.bf16.mxu0 %v4378_v49  ;;  %v4464_v49 = vld [vmem:[%s6393_s1 + $0x960] ss:$8 sps:$4 sm:$0xff]  }
  0x67   :  { %2962 = vmatpush1.bf16.msra.mxu1 %v4373_v50  ;;  %v4469_v50 = vld [vmem:[%s6393_s1 + $0x274] ss:$8 sps:$4 sm:$0xff]  }
  0x68   :  { %3319 = vmatpush1.bf16.msra.mxu0 %v4376_v51  ;;  %2963 = vmatprep.subr.bf16.mxu1 %v4381_v52  ;;  %v4472_v51 = vld [vmem:[%s6393_s1 + $0x974] ss:$8 sps:$4 sm:$0xff]   ;;  %v4467_v52 = vld [vmem:[%s6393_s1 + $0x270] ss:$8 sps:$4 sm:$0xff]  }
  0x69   :  { %3320 = vmatprep.subr.bf16.mxu0 %v4384_v53  ;;  %v4470_v53 = vld [vmem:[%s6393_s1 + $0x970] ss:$8 sps:$4 sm:$0xff]  }
  0x6b   :  { %2964 = vmatpush1.bf16.msra.mxu1 %v4379_v54  ;;  %v4475_v54 = vld [vmem:[%s6393_s1 + $0x284] ss:$8 sps:$4 sm:$0xff]  }
  0x6c   :  { %3321 = vmatpush1.bf16.msra.mxu0 %v4382_v55  ;;  %2965 = vmatprep.subr.bf16.mxu1 %v4387_v56  ;;  %v4478_v55 = vld [vmem:[%s6393_s1 + $0x984] ss:$8 sps:$4 sm:$0xff]   ;;  %v4473_v56 = vld [vmem:[%s6393_s1 + $0x280] ss:$8 sps:$4 sm:$0xff]  }
  0x6d   :  { %3322 = vmatprep.subr.bf16.mxu0 %v4390_v57  ;;  %v4476_v57 = vld [vmem:[%s6393_s1 + $0x980] ss:$8 sps:$4 sm:$0xff]  }
  0x6f   :  { %2966 = vmatpush1.bf16.msra.mxu1 %v4385_v58  ;;  %v4481_v58 = vld [vmem:[%s6393_s1 + $0x294] ss:$8 sps:$4 sm:$0xff]  }
  0x70   :  { %3323 = vmatpush1.bf16.msra.mxu0 %v4388_v59  ;;  %2967 = vmatprep.subr.bf16.mxu1 %v4393_v60  ;;  %v4484_v59 = vld [vmem:[%s6393_s1 + $0x994] ss:$8 sps:$4 sm:$0xff]   ;;  %v4479_v60 = vld [vmem:[%s6393_s1 + $0x290] ss:$8 sps:$4 sm:$0xff]  }
  0x71   :  { %3324 = vmatprep.subr.bf16.mxu0 %v4396_v61  ;;  %v4482_v61 = vld [vmem:[%s6393_s1 + $0x990] ss:$8 sps:$4 sm:$0xff]  }
  0x73   :  { %2968 = vmatpush1.bf16.msra.mxu1 %v4391_v62  ;;  %v4487_v62 = vld [vmem:[%s6393_s1 + $0x2a4] ss:$8 sps:$4 sm:$0xff]  }
  0x74   :  { %3325 = vmatpush1.bf16.msra.mxu0 %v4394_v63  ;;  %2969 = vmatprep.subr.bf16.mxu1 %v4399_v0  ;;  %v4490_v63 = vld [vmem:[%s6393_s1 + $0x9a4] ss:$8 sps:$4 sm:$0xff]   ;;  %v4485_v0 = vld [vmem:[%s6393_s1 + $0x2a0] ss:$8 sps:$4 sm:$0xff]  }
  0x75   :  { %3326 = vmatprep.subr.bf16.mxu0 %v4402_v1  ;;  %v4488_v1 = vld [vmem:[%s6393_s1 + $0x9a0] ss:$8 sps:$4 sm:$0xff]  }
  0x77   :  { %2970 = vmatpush1.bf16.msra.mxu1 %v4397_v2  ;;  %v4493_v2 = vld [vmem:[%s6393_s1 + $0x2b4] ss:$8 sps:$4 sm:$0xff]  }
  0x78   :  { %3327 = vmatpush1.bf16.msra.mxu0 %v4400_v3  ;;  %2971 = vmatprep.subr.bf16.mxu1 %v4406_v4  ;;  %v4496_v3 = vld [vmem:[%s6393_s1 + $0x9b4] ss:$8 sps:$4 sm:$0xff]   ;;  %v4491_v4 = vld [vmem:[%s6393_s1 + $0x2b0] ss:$8 sps:$4 sm:$0xff]  }
  0x79   :  { %3328 = vmatprep.subr.bf16.mxu0 %v4410_v5  ;;  %v4494_v5 = vld [vmem:[%s6393_s1 + $0x9b0] ss:$8 sps:$4 sm:$0xff]  }
  0x7b   :  { %2972 = vmatpush1.bf16.msra.mxu1 %v4404_v6  ;;  %v4499_v6 = vld [vmem:[%s6393_s1 + $0x2c4] ss:$8 sps:$4 sm:$0xff]  }
  0x7c   :  { %3329 = vmatpush1.bf16.msra.mxu0 %v4408_v7  ;;  %2973 = vmatprep.subr.bf16.mxu1 %v4415_v8  ;;  %v4502_v7 = vld [vmem:[%s6393_s1 + $0x9c4] ss:$8 sps:$4 sm:$0xff]   ;;  %v4497_v8 = vld [vmem:[%s6393_s1 + $0x2c0] ss:$8 sps:$4 sm:$0xff]  }
  0x7d   :  { %3330 = vmatprep.subr.bf16.mxu0 %v4418_v9  ;;  %v4500_v9 = vld [vmem:[%s6393_s1 + $0x9c0] ss:$8 sps:$4 sm:$0xff]  }
  0x7f   :  { %2974 = vmatpush1.bf16.msra.mxu1 %v4413_v10  ;;  %v4505_v10 = vld [vmem:[%s6393_s1 + $0x2d4] ss:$8 sps:$4 sm:$0xff]  }
  0x80   :  { %3331 = vmatpush1.bf16.msra.mxu0 %v4416_v11  ;;  %2994 = vmatprep.subr.bf16.mxu1 %v4424_v13  ;;  %v4508_v11 = vld [vmem:[%s6393_s1 + $0x9d4] ss:$8 sps:$4 sm:$0xff]   ;;  %v4506_v13 = vld [vmem:[%s6393_s1 + $0x9d0] ss:$8 sps:$4 sm:$0xff]  }
  0x81   :  { %3351 = vmatprep.subr.bf16.mxu0 %v4430_v14  ;;  %v4512_v14 = vld [vmem:[%s6393_s1 + $0x2e4] ss:$8 sps:$4 sm:$0xff]  }
  0x82   :  { %2976 = vmatmul.mubr.bf16.vlgmr.msra.gmra.mrb[0].mxu1 %v4419_v12  ;;  %v4503_v12 = vld [vmem:[%s6393_s1 + $0x2d0] ss:$8 sps:$4 sm:$0xff]  }
  0x83   :  { %3333 = vmatmul.mubr.bf16.vlgmr.msra.gmra.mrb[0].mxu0 %v4425_v16  ;;  %2995 = vmatpush1.bf16.msra.mxu1 %v4422_v15  ;;  %v4516_v15 = vld [vmem:[%s6393_s1 + $0x9e4] ss:$8 sps:$4 sm:$0xff]   ;;  %v4510_v16 = vld [vmem:[%s6393_s1 + $0x2e0] ss:$8 sps:$4 sm:$0xff]  }
  0x84   :  { %3352 = vmatpush1.bf16.msra.mxu0 %v4428_v17  ;;  %2996 = vmatprep.subr.bf16.mxu1 %v4433_v18  ;;  %v4514_v17 = vld [vmem:[%s6393_s1 + $0x9e0] ss:$8 sps:$4 sm:$0xff]   ;;  %v4521_v18 = vld [vmem:[%s6393_s1 + $0x2f4] ss:$8 sps:$4 sm:$0xff]  }
  0x85   :  { %3353 = vmatprep.subr.bf16.mxu0 %v4436_v20  ;;  %2985 = vmatprep.mubr.bf16.mxu1 %v3652_v21  ;;  %v4519_v20 = vld [vmem:[%s6393_s1 + $0x2f0] ss:$8 sps:$4 sm:$0xff]  }
  0x86   :  { %3342 = vmatprep.mubr.bf16.mxu0 %v3666_v25  ;;  %v4522_v21 = vld [vmem:[%s6393_s1 + $0x9f0] ss:$8 sps:$4 sm:$0xff]   ;;  %v4536_v25 = vld [vmem:[%s6393_s1 + $0xa04] ss:$8 sps:$4 sm:$0xff]  }
  0x87   :  { %2997 = vmatpush1.bf16.msra.mxu1 %v4431_v23  ;;  %v4525_v23 = vld [vmem:[%s6394_s0 + $0x10] ss:$108 sps:$4 sm:$0xff]  }
  0x88   :  { %3354 = vmatpush1.bf16.msra.mxu0 %v4434_v24  ;;  %2998 = vmatprep.subr.bf16.mxu1 %v4439_v26  ;;  %v4531_v24 = vld [vmem:[%s6394_s0 + $0x48] ss:$108 sps:$4 sm:$0xff]  }
  0x89   :  { %3355 = vmatprep.subr.bf16.mxu0 %v4442_v27  ;;  %v45_v26 = vld [vmem:[%s6394_s0 + $0xe8] sm:$0xff]  ;;  %v52_v27 = vld [vmem:[%s6394_s0 + $0x120] sm:$0xff] }
  0x8a   :  { %2986 = vmatmul.mubr.bf16.gmra.mrb[4].mxu1 %v3651_v30  ;;  %v4539_v30 = vld [vmem:[%s6393_s1 + $0x314] ss:$8 sps:$4 sm:$0xff]  }
  0x8b   :  { %3343 = vmatmul.mubr.bf16.gmra.mrb[4].mxu0 %v3665_v31  ;;  %2999 = vmatpush1.bf16.msra.mxu1 %v4437_v28  ;;  %v4528_v28 = vld [vmem:[%s6393_s1 + $0x300] ss:$8 sps:$4 sm:$0xff]   ;;  %v4542_v31 = vld [vmem:[%s6393_s1 + $0xa14] ss:$8 sps:$4 sm:$0xff]  }
  0x8c   :  { %3356 = vmatpush1.bf16.msra.mxu0 %v4440_v29  ;;  %3000 = vmatprep.subr.bf16.mxu1 %v4445_v32  ;;  %v4534_v29 = vld [vmem:[%s6393_s1 + $0xa00] ss:$8 sps:$4 sm:$0xff]   ;;  %v3654_v32 = vcombine.high %v45_v26, %v45_v26 }
  0x8d   :  { %3357 = vmatprep.subr.bf16.mxu0 %v4448_v33  ;;  %3026 = vmatprep.mubr.bf16.mxu1 %v4527_v34  ;;  %v3668_v33 = vcombine.high %v52_v27, %v52_v27  ;;  %v4537_v34 = vld [vmem:[%s6393_s1 + $0x310] ss:$8 sps:$4 sm:$0xff]  }
  0x8e   :  { %3383 = vmatprep.mubr.bf16.mxu0 %v4533_v35  ;;  %v4540_v35 = vld [vmem:[%s6393_s1 + $0xa10] ss:$8 sps:$4 sm:$0xff]  }
  0x8f   :  { %3001 = vmatpush1.bf16.msra.mxu1 %v4443_v36  ;;  %v4545_v36 = vld [vmem:[%s6393_s1 + $0x324] ss:$8 sps:$4 sm:$0xff]  }
  0x90   :  { %3358 = vmatpush1.bf16.msra.mxu0 %v4446_v37  ;;  %3002 = vmatprep.subr.bf16.mxu1 %v4451_v38  ;;  %v4548_v37 = vld [vmem:[%s6393_s1 + $0xa24] ss:$8 sps:$4 sm:$0xff]   ;;  %v4543_v38 = vld [vmem:[%s6393_s1 + $0x320] ss:$8 sps:$4 sm:$0xff]  }
  0x91   :  { %3359 = vmatprep.subr.bf16.mxu0 %v4454_v39  ;;  %v3653_v39 = vcombine.low %v45_v26, %v45_v26  ;;  %v4616_v26 = vld [vmem:[%s6393_s1 + $0x3e0] ss:$8 sps:$4 sm:$0xff]  }
  0x93   :  { %3003 = vmatpush1.bf16.msra.mxu1 %v4449_v40  ;;  %v3667_v40 = vcombine.low %v52_v27, %v52_v27  ;;  %v4620_v27 = vld [vmem:[%s6393_s1 + $0xae0] ss:$8 sps:$4 sm:$0xff]  }
  0x94   :  { %3360 = vmatpush1.bf16.msra.mxu0 %v4452_v41  ;;  %3004 = vmatprep.subr.bf16.mxu1 %v4457_v42  ;;  %v4546_v41 = vld [vmem:[%s6393_s1 + $0xa20] ss:$8 sps:$4 sm:$0xff]   ;;  %v4551_v42 = vld [vmem:[%s6393_s1 + $0x334] ss:$8 sps:$4 sm:$0xff]  }
  0x95   :  { %3361 = vmatprep.subr.bf16.mxu0 %v4460_v43  ;;  %v4554_v43 = vld [vmem:[%s6393_s1 + $0xa34] ss:$8 sps:$4 sm:$0xff]  }
  0x97   :  { %3005 = vmatpush1.bf16.msra.mxu1 %v4455_v44  ;;  %v4633_v44 = vld [vmem:[%s6394_s0 + $0x1c] ss:$108 sps:$4 sm:$0xff]  }
  0x98   :  { %3362 = vmatpush1.bf16.msra.mxu0 %v4458_v45  ;;  %3006 = vmatprep.subr.bf16.mxu1 %v4463_v46  ;;  %v4639_v45 = vld [vmem:[%s6394_s0 + $0x54] ss:$108 sps:$4 sm:$0xff]   ;;  %v4549_v46 = vld [vmem:[%s6393_s1 + $0x330] ss:$8 sps:$4 sm:$0xff]  }
  0x99   :  { %3363 = vmatprep.subr.bf16.mxu0 %v4466_v47  ;;  %v4552_v47 = vld [vmem:[%s6393_s1 + $0xa30] ss:$8 sps:$4 sm:$0xff]  }
  0x9b   :  { %3007 = vmatpush1.bf16.msra.mxu1 %v4461_v48  ;;  %v4557_v48 = vld [vmem:[%s6393_s1 + $0x344] ss:$8 sps:$4 sm:$0xff]  }
  0x9c   :  { %3364 = vmatpush1.bf16.msra.mxu0 %v4464_v49  ;;  %3008 = vmatprep.subr.bf16.mxu1 %v4469_v50  ;;  %v4560_v49 = vld [vmem:[%s6393_s1 + $0xa44] ss:$8 sps:$4 sm:$0xff]   ;;  %v4555_v50 = vld [vmem:[%s6393_s1 + $0x340] ss:$8 sps:$4 sm:$0xff]  }
  0x9d   :  { %3365 = vmatprep.subr.bf16.mxu0 %v4472_v51  ;;  %v4558_v51 = vld [vmem:[%s6393_s1 + $0xa40] ss:$8 sps:$4 sm:$0xff]  }
  0x9f   :  { %3009 = vmatpush1.bf16.msra.mxu1 %v4467_v52  ;;  %v4563_v52 = vld [vmem:[%s6393_s1 + $0x354] ss:$8 sps:$4 sm:$0xff]  }
  0xa0   :  { %3366 = vmatpush1.bf16.msra.mxu0 %v4470_v53  ;;  %3010 = vmatprep.subr.bf16.mxu1 %v4475_v54  ;;  %v4566_v53 = vld [vmem:[%s6393_s1 + $0xa54] ss:$8 sps:$4 sm:$0xff]   ;;  %v4561_v54 = vld [vmem:[%s6393_s1 + $0x350] ss:$8 sps:$4 sm:$0xff]  }
  0xa1   :  { %3367 = vmatprep.subr.bf16.mxu0 %v4478_v55  ;;  %v4564_v55 = vld [vmem:[%s6393_s1 + $0xa50] ss:$8 sps:$4 sm:$0xff]  }
  0xa3   :  { %3011 = vmatpush1.bf16.msra.mxu1 %v4473_v56  ;;  %v4569_v56 = vld [vmem:[%s6393_s1 + $0x364] ss:$8 sps:$4 sm:$0xff]  }
  0xa4   :  { %3368 = vmatpush1.bf16.msra.mxu0 %v4476_v57  ;;  %3012 = vmatprep.subr.bf16.mxu1 %v4481_v58  ;;  %v4572_v57 = vld [vmem:[%s6393_s1 + $0xa64] ss:$8 sps:$4 sm:$0xff]   ;;  %v4567_v58 = vld [vmem:[%s6393_s1 + $0x360] ss:$8 sps:$4 sm:$0xff]  }
  0xa5   :  { %3369 = vmatprep.subr.bf16.mxu0 %v4484_v59  ;;  %v4570_v59 = vld [vmem:[%s6393_s1 + $0xa60] ss:$8 sps:$4 sm:$0xff]  }
  0xa7   :  { %3013 = vmatpush1.bf16.msra.mxu1 %v4479_v60  ;;  %v4575_v60 = vld [vmem:[%s6393_s1 + $0x374] ss:$8 sps:$4 sm:$0xff]  }
  0xa8   :  { %3370 = vmatpush1.bf16.msra.mxu0 %v4482_v61  ;;  %3014 = vmatprep.subr.bf16.mxu1 %v4487_v62  ;;  %v4578_v61 = vld [vmem:[%s6393_s1 + $0xa74] ss:$8 sps:$4 sm:$0xff]   ;;  %v4573_v62 = vld [vmem:[%s6393_s1 + $0x370] ss:$8 sps:$4 sm:$0xff]  }
  0xa9   :  { %3371 = vmatprep.subr.bf16.mxu0 %v4490_v63  ;;  %v4576_v63 = vld [vmem:[%s6393_s1 + $0xa70] ss:$8 sps:$4 sm:$0xff]  }
  0xab   :  { %3015 = vmatpush1.bf16.msra.mxu1 %v4485_v0  ;;  %v4581_v0 = vld [vmem:[%s6393_s1 + $0x384] ss:$8 sps:$4 sm:$0xff]  }
  0xac   :  { %3372 = vmatpush1.bf16.msra.mxu0 %v4488_v1  ;;  %3016 = vmatprep.subr.bf16.mxu1 %v4493_v2  ;;  %v4584_v1 = vld [vmem:[%s6393_s1 + $0xa84] ss:$8 sps:$4 sm:$0xff]   ;;  %v4579_v2 = vld [vmem:[%s6393_s1 + $0x380] ss:$8 sps:$4 sm:$0xff]  }
  0xad   :  { %3373 = vmatprep.subr.bf16.mxu0 %v4496_v3  ;;  %v4582_v3 = vld [vmem:[%s6393_s1 + $0xa80] ss:$8 sps:$4 sm:$0xff]  }
  0xaf   :  { %3017 = vmatpush1.bf16.msra.mxu1 %v4491_v4  ;;  %v4587_v4 = vld [vmem:[%s6393_s1 + $0x394] ss:$8 sps:$4 sm:$0xff]  }
  0xb0   :  { %3374 = vmatpush1.bf16.msra.mxu0 %v4494_v5  ;;  %3018 = vmatprep.subr.bf16.mxu1 %v4499_v6  ;;  %v4590_v5 = vld [vmem:[%s6393_s1 + $0xa94] ss:$8 sps:$4 sm:$0xff]   ;;  %v4585_v6 = vld [vmem:[%s6393_s1 + $0x390] ss:$8 sps:$4 sm:$0xff]  }
  0xb1   :  { %3375 = vmatprep.subr.bf16.mxu0 %v4502_v7  ;;  %v4588_v7 = vld [vmem:[%s6393_s1 + $0xa90] ss:$8 sps:$4 sm:$0xff]  }
  0xb3   :  { %3019 = vmatpush1.bf16.msra.mxu1 %v4497_v8  ;;  %v4593_v8 = vld [vmem:[%s6393_s1 + $0x3a4] ss:$8 sps:$4 sm:$0xff]  }
  0xb4   :  { %3376 = vmatpush1.bf16.msra.mxu0 %v4500_v9  ;;  %3020 = vmatprep.subr.bf16.mxu1 %v4505_v10  ;;  %v4596_v9 = vld [vmem:[%s6393_s1 + $0xaa4] ss:$8 sps:$4 sm:$0xff]   ;;  %v4591_v10 = vld [vmem:[%s6393_s1 + $0x3a0] ss:$8 sps:$4 sm:$0xff]  }
  0xb5   :  { %3377 = vmatprep.subr.bf16.mxu0 %v4508_v11  ;;  %v4594_v11 = vld [vmem:[%s6393_s1 + $0xaa0] ss:$8 sps:$4 sm:$0xff]  }
  0xb7   :  { %3021 = vmatpush1.bf16.msra.mxu1 %v4503_v12  ;;  %v4599_v12 = vld [vmem:[%s6393_s1 + $0x3b4] ss:$8 sps:$4 sm:$0xff]  }
  0xb8   :  { %3378 = vmatpush1.bf16.msra.mxu0 %v4506_v13  ;;  %3022 = vmatprep.subr.bf16.mxu1 %v4512_v14  ;;  %v4602_v13 = vld [vmem:[%s6393_s1 + $0xab4] ss:$8 sps:$4 sm:$0xff]   ;;  %v4597_v14 = vld [vmem:[%s6393_s1 + $0x3b0] ss:$8 sps:$4 sm:$0xff]  }
  0xb9   :  { %3379 = vmatprep.subr.bf16.mxu0 %v4516_v15  ;;  %v4600_v15 = vld [vmem:[%s6393_s1 + $0xab0] ss:$8 sps:$4 sm:$0xff]  }
  0xbb   :  { %3023 = vmatpush1.bf16.msra.mxu1 %v4510_v16  ;;  %v4605_v16 = vld [vmem:[%s6393_s1 + $0x3c4] ss:$8 sps:$4 sm:$0xff]  }
  0xbc   :  { %3380 = vmatpush1.bf16.msra.mxu0 %v4514_v17  ;;  %3024 = vmatprep.subr.bf16.mxu1 %v4521_v18  ;;  %v4608_v17 = vld [vmem:[%s6393_s1 + $0xac4] ss:$8 sps:$4 sm:$0xff]   ;;  %v4603_v18 = vld [vmem:[%s6393_s1 + $0x3c0] ss:$8 sps:$4 sm:$0xff]  }
  0xbd   :  { %3381 = vmatprep.subr.bf16.mxu0 %v4524_v19  ;;  %v4606_v19 = vld [vmem:[%s6393_s1 + $0xac0] ss:$8 sps:$4 sm:$0xff]  }
  0xbf   :  { %3025 = vmatpush1.bf16.msra.mxu1 %v4519_v20  ;;  %v4611_v20 = vld [vmem:[%s6393_s1 + $0x3d4] ss:$8 sps:$4 sm:$0xff]  }
  0xc0   :  { %3382 = vmatpush1.bf16.msra.mxu0 %v4522_v21  ;;  %3045 = vmatprep.subr.bf16.mxu1 %v4530_v22  ;;  %v4614_v21 = vld [vmem:[%s6393_s1 + $0xad4] ss:$8 sps:$4 sm:$0xff]   ;;  %v4609_v22 = vld [vmem:[%s6393_s1 + $0x3d0] ss:$8 sps:$4 sm:$0xff]  }
  0xc1   :  { %3402 = vmatprep.subr.bf16.mxu0 %v4536_v25  ;;  %v4622_v25 = vld [vmem:[%s6393_s1 + $0xae4] ss:$8 sps:$4 sm:$0xff]  }
  0xc2   :  { %3027 = vmatmul.mubr.bf16.vlgmr.msra.gmra.mrb[0].mxu1 %v4525_v23  ;;  %v4612_v23 = vld [vmem:[%s6393_s1 + $0xad0] ss:$8 sps:$4 sm:$0xff]  }
  0xc3   :  { %3384 = vmatmul.mubr.bf16.vlgmr.msra.gmra.mrb[0].mxu0 %v4531_v24  ;;  %3046 = vmatpush1.bf16.msra.mxu1 %v4528_v28  ;;  %v4618_v24 = vld [vmem:[%s6393_s1 + $0x3e4] ss:$8 sps:$4 sm:$0xff]   ;;  %v4627_v28 = vld [vmem:[%s6393_s1 + $0x3f4] ss:$8 sps:$4 sm:$0xff]  }
  0xc4   :  { %3403 = vmatpush1.bf16.msra.mxu0 %v4534_v29  ;;  %3047 = vmatprep.subr.bf16.mxu1 %v4539_v30  ;;  %v4630_v29 = vld [vmem:[%s6393_s1 + $0xaf4] ss:$8 sps:$4 sm:$0xff]   ;;  %v4625_v30 = vld [vmem:[%s6393_s1 + $0x3f0] ss:$8 sps:$4 sm:$0xff]  }
  0xc5   :  { %3404 = vmatprep.subr.bf16.mxu0 %v4542_v31  ;;  %3036 = vmatprep.mubr.bf16.mxu1 %v3654_v32  ;;  %v4628_v31 = vld [vmem:[%s6393_s1 + $0xaf0] ss:$8 sps:$4 sm:$0xff]   ;;  %v4636_v32 = vld [vmem:[%s6393_s1 + $0x404] ss:$8 sps:$4 sm:$0xff]  }
  0xc6   :  { %3393 = vmatprep.mubr.bf16.mxu0 %v3668_v33  ;;  %v4631_v33 = vld [vmem:[%s6394_s0 + $0x18] ss:$108 sps:$4 sm:$0xff]  }
  0xc7   :  { %3048 = vmatpush1.bf16.msra.mxu1 %v4537_v34  ;;  %v4642_v34 = vld [vmem:[%s6393_s1 + $0xb04] ss:$8 sps:$4 sm:$0xff]  }
  0xc8   :  { %3405 = vmatpush1.bf16.msra.mxu0 %v4540_v35  ;;  %3049 = vmatprep.subr.bf16.mxu1 %v4545_v36  ;;  %v4634_v35 = vld [vmem:[%s6393_s1 + $0x400] ss:$8 sps:$4 sm:$0xff]   ;;  %v4637_v36 = vld [vmem:[%s6394_s0 + $0x50] ss:$108 sps:$4 sm:$0xff]  }
  0xc9   :  { %3406 = vmatprep.subr.bf16.mxu0 %v4548_v37  ;;  %v4640_v37 = vld [vmem:[%s6393_s1 + $0xb00] ss:$8 sps:$4 sm:$0xff]  }
  0xca   :  { %3037 = vmatmul.mubr.bf16.gmra.mrb[4].mxu1 %v3653_v39  ;;  %v53_v39 = vld [vmem:[%s6394_s0 + $0x128] sm:$0xff] }
  0xcb   :  { %3394 = vmatmul.mubr.bf16.gmra.mrb[4].mxu0 %v3667_v40  ;;  %3050 = vmatpush1.bf16.msra.mxu1 %v4543_v38  ;;  %v46_v38 = vld [vmem:[%s6394_s0 + $0xf0] sm:$0xff] }
  0xcc   :  { %3407 = vmatpush1.bf16.msra.mxu0 %v4546_v41  ;;  %3051 = vmatprep.subr.bf16.mxu1 %v4551_v42  ;;  %v4645_v40 = vld [vmem:[%s6393_s1 + $0x414] ss:$8 sps:$4 sm:$0xff]   ;;  %v3656_v42 = vcombine.high %v46_v38, %v46_v38 }
  0xcd   :  { %3408 = vmatprep.subr.bf16.mxu0 %v4554_v43  ;;  %3077 = vmatprep.mubr.bf16.mxu1 %v4633_v44  ;;  %v4648_v41 = vld [vmem:[%s6393_s1 + $0xb14] ss:$8 sps:$4 sm:$0xff]   ;;  %v3670_v43 = vcombine.high %v53_v39, %v53_v39  ;;  %v4643_v44 = vld [vmem:[%s6393_s1 + $0x410] ss:$8 sps:$4 sm:$0xff]  }
  0xce   :  { %3434 = vmatprep.mubr.bf16.mxu0 %v4639_v45  ;;  %v4646_v45 = vld [vmem:[%s6393_s1 + $0xb10] ss:$8 sps:$4 sm:$0xff]  }
  0xcf   :  { %3052 = vmatpush1.bf16.msra.mxu1 %v4549_v46  ;;  %v4651_v46 = vld [vmem:[%s6393_s1 + $0x424] ss:$8 sps:$4 sm:$0xff]  }
  0xd0   :  { %3409 = vmatpush1.bf16.msra.mxu0 %v4552_v47  ;;  %3053 = vmatprep.subr.bf16.mxu1 %v4557_v48  ;;  %v4654_v47 = vld [vmem:[%s6393_s1 + $0xb24] ss:$8 sps:$4 sm:$0xff]   ;;  %v4649_v48 = vld [vmem:[%s6393_s1 + $0x420] ss:$8 sps:$4 sm:$0xff]  }
  0xd1   :  { %3410 = vmatprep.subr.bf16.mxu0 %v4560_v49  ;;  %v4652_v49 = vld [vmem:[%s6393_s1 + $0xb20] ss:$8 sps:$4 sm:$0xff]  }
  0xd3   :  { %3054 = vmatpush1.bf16.msra.mxu1 %v4555_v50  ;;  %v3655_v50 = vcombine.low %v46_v38, %v46_v38  ;;  %v4733_v38 = vld [vmem:[%s6393_s1 + $0x4f4] ss:$8 sps:$4 sm:$0xff]  }
  0xd4   :  { %3411 = vmatpush1.bf16.msra.mxu0 %v4558_v51  ;;  %3055 = vmatprep.subr.bf16.mxu1 %v4563_v52  ;;  %v3669_v51 = vcombine.low %v53_v39, %v53_v39  ;;  %v4657_v52 = vld [vmem:[%s6393_s1 + $0x434] ss:$8 sps:$4 sm:$0xff]  }
  0xd5   :  { %3412 = vmatprep.subr.bf16.mxu0 %v4566_v53  ;;  %v4660_v53 = vld [vmem:[%s6393_s1 + $0xb34] ss:$8 sps:$4 sm:$0xff]  }
  0xd6   :  { %v4736_v39 = vld [vmem:[%s6393_s1 + $0xbf4] ss:$8 sps:$4 sm:$0xff]  }
  0xd7   :  { %3056 = vmatpush1.bf16.msra.mxu1 %v4561_v54  ;;  %v4739_v54 = vld [vmem:[%s6394_s0 + $0x24] ss:$108 sps:$4 sm:$0xff]  }
  0xd8   :  { %3413 = vmatpush1.bf16.msra.mxu0 %v4564_v55  ;;  %3057 = vmatprep.subr.bf16.mxu1 %v4569_v56  ;;  %v4745_v55 = vld [vmem:[%s6394_s0 + $0x5c] ss:$108 sps:$4 sm:$0xff]   ;;  %v4655_v56 = vld [vmem:[%s6393_s1 + $0x430] ss:$8 sps:$4 sm:$0xff]  }
  0xd9   :  { %3414 = vmatprep.subr.bf16.mxu0 %v4572_v57  ;;  %v4658_v57 = vld [vmem:[%s6393_s1 + $0xb30] ss:$8 sps:$4 sm:$0xff]  }
  0xdb   :  { %3058 = vmatpush1.bf16.msra.mxu1 %v4567_v58  ;;  %v4663_v58 = vld [vmem:[%s6393_s1 + $0x444] ss:$8 sps:$4 sm:$0xff]  }
  0xdc   :  { %3415 = vmatpush1.bf16.msra.mxu0 %v4570_v59  ;;  %3059 = vmatprep.subr.bf16.mxu1 %v4575_v60  ;;  %v4666_v59 = vld [vmem:[%s6393_s1 + $0xb44] ss:$8 sps:$4 sm:$0xff]   ;;  %v4661_v60 = vld [vmem:[%s6393_s1 + $0x440] ss:$8 sps:$4 sm:$0xff]  }
  0xdd   :  { %3416 = vmatprep.subr.bf16.mxu0 %v4578_v61  ;;  %v4664_v61 = vld [vmem:[%s6393_s1 + $0xb40] ss:$8 sps:$4 sm:$0xff]  }
  0xdf   :  { %3060 = vmatpush1.bf16.msra.mxu1 %v4573_v62  ;;  %v4669_v62 = vld [vmem:[%s6393_s1 + $0x454] ss:$8 sps:$4 sm:$0xff]  }
  0xe0   :  { %3417 = vmatpush1.bf16.msra.mxu0 %v4576_v63  ;;  %3061 = vmatprep.subr.bf16.mxu1 %v4581_v0  ;;  %v4672_v63 = vld [vmem:[%s6393_s1 + $0xb54] ss:$8 sps:$4 sm:$0xff]   ;;  %v4667_v0 = vld [vmem:[%s6393_s1 + $0x450] ss:$8 sps:$4 sm:$0xff]  }
  0xe1   :  { %3418 = vmatprep.subr.bf16.mxu0 %v4584_v1  ;;  %v4670_v1 = vld [vmem:[%s6393_s1 + $0xb50] ss:$8 sps:$4 sm:$0xff]  }
  0xe3   :  { %3062 = vmatpush1.bf16.msra.mxu1 %v4579_v2  ;;  %v4675_v2 = vld [vmem:[%s6393_s1 + $0x464] ss:$8 sps:$4 sm:$0xff]  }
  0xe4   :  { %3419 = vmatpush1.bf16.msra.mxu0 %v4582_v3  ;;  %3063 = vmatprep.subr.bf16.mxu1 %v4587_v4  ;;  %v4678_v3 = vld [vmem:[%s6393_s1 + $0xb64] ss:$8 sps:$4 sm:$0xff]   ;;  %v4673_v4 = vld [vmem:[%s6393_s1 + $0x460] ss:$8 sps:$4 sm:$0xff]  }
  0xe5   :  { %3420 = vmatprep.subr.bf16.mxu0 %v4590_v5  ;;  %v4676_v5 = vld [vmem:[%s6393_s1 + $0xb60] ss:$8 sps:$4 sm:$0xff]  }
  0xe7   :  { %3064 = vmatpush1.bf16.msra.mxu1 %v4585_v6  ;;  %v4681_v6 = vld [vmem:[%s6393_s1 + $0x474] ss:$8 sps:$4 sm:$0xff]  }
  0xe8   :  { %3421 = vmatpush1.bf16.msra.mxu0 %v4588_v7  ;;  %3065 = vmatprep.subr.bf16.mxu1 %v4593_v8  ;;  %v4684_v7 = vld [vmem:[%s6393_s1 + $0xb74] ss:$8 sps:$4 sm:$0xff]   ;;  %v4679_v8 = vld [vmem:[%s6393_s1 + $0x470] ss:$8 sps:$4 sm:$0xff]  }
  0xe9   :  { %3422 = vmatprep.subr.bf16.mxu0 %v4596_v9  ;;  %v4682_v9 = vld [vmem:[%s6393_s1 + $0xb70] ss:$8 sps:$4 sm:$0xff]  }
  0xeb   :  { %3066 = vmatpush1.bf16.msra.mxu1 %v4591_v10  ;;  %v4687_v10 = vld [vmem:[%s6393_s1 + $0x484] ss:$8 sps:$4 sm:$0xff]  }
  0xec   :  { %3423 = vmatpush1.bf16.msra.mxu0 %v4594_v11  ;;  %3067 = vmatprep.subr.bf16.mxu1 %v4599_v12  ;;  %v4690_v11 = vld [vmem:[%s6393_s1 + $0xb84] ss:$8 sps:$4 sm:$0xff]   ;;  %v4685_v12 = vld [vmem:[%s6393_s1 + $0x480] ss:$8 sps:$4 sm:$0xff]  }
  0xed   :  { %3424 = vmatprep.subr.bf16.mxu0 %v4602_v13  ;;  %v4688_v13 = vld [vmem:[%s6393_s1 + $0xb80] ss:$8 sps:$4 sm:$0xff]  }
  0xef   :  { %3068 = vmatpush1.bf16.msra.mxu1 %v4597_v14  ;;  %v4693_v14 = vld [vmem:[%s6393_s1 + $0x494] ss:$8 sps:$4 sm:$0xff]  }
  0xf0   :  { %3425 = vmatpush1.bf16.msra.mxu0 %v4600_v15  ;;  %3069 = vmatprep.subr.bf16.mxu1 %v4605_v16  ;;  %v4696_v15 = vld [vmem:[%s6393_s1 + $0xb94] ss:$8 sps:$4 sm:$0xff]   ;;  %v4691_v16 = vld [vmem:[%s6393_s1 + $0x490] ss:$8 sps:$4 sm:$0xff]  }
  0xf1   :  { %3426 = vmatprep.subr.bf16.mxu0 %v4608_v17  ;;  %v4694_v17 = vld [vmem:[%s6393_s1 + $0xb90] ss:$8 sps:$4 sm:$0xff]  }
  0xf3   :  { %3070 = vmatpush1.bf16.msra.mxu1 %v4603_v18  ;;  %v4699_v18 = vld [vmem:[%s6393_s1 + $0x4a4] ss:$8 sps:$4 sm:$0xff]  }
  0xf4   :  { %3427 = vmatpush1.bf16.msra.mxu0 %v4606_v19  ;;  %3071 = vmatprep.subr.bf16.mxu1 %v4611_v20  ;;  %v4702_v19 = vld [vmem:[%s6393_s1 + $0xba4] ss:$8 sps:$4 sm:$0xff]   ;;  %v4697_v20 = vld [vmem:[%s6393_s1 + $0x4a0] ss:$8 sps:$4 sm:$0xff]  }
  0xf5   :  { %3428 = vmatprep.subr.bf16.mxu0 %v4614_v21  ;;  %v4700_v21 = vld [vmem:[%s6393_s1 + $0xba0] ss:$8 sps:$4 sm:$0xff]  }
  0xf7   :  { %3072 = vmatpush1.bf16.msra.mxu1 %v4609_v22  ;;  %v4705_v22 = vld [vmem:[%s6393_s1 + $0x4b4] ss:$8 sps:$4 sm:$0xff]  }
  0xf8   :  { %3429 = vmatpush1.bf16.msra.mxu0 %v4612_v23  ;;  %3073 = vmatprep.subr.bf16.mxu1 %v4618_v24  ;;  %v4708_v23 = vld [vmem:[%s6393_s1 + $0xbb4] ss:$8 sps:$4 sm:$0xff]   ;;  %v4703_v24 = vld [vmem:[%s6393_s1 + $0x4b0] ss:$8 sps:$4 sm:$0xff]  }
  0xf9   :  { %3430 = vmatprep.subr.bf16.mxu0 %v4622_v25  ;;  %v4706_v25 = vld [vmem:[%s6393_s1 + $0xbb0] ss:$8 sps:$4 sm:$0xff]  }
  0xfb   :  { %3074 = vmatpush1.bf16.msra.mxu1 %v4616_v26  ;;  %v4711_v26 = vld [vmem:[%s6393_s1 + $0x4c4] ss:$8 sps:$4 sm:$0xff]  }
  0xfc   :  { %3431 = vmatpush1.bf16.msra.mxu0 %v4620_v27  ;;  %3075 = vmatprep.subr.bf16.mxu1 %v4627_v28  ;;  %v4714_v27 = vld [vmem:[%s6393_s1 + $0xbc4] ss:$8 sps:$4 sm:$0xff]   ;;  %v4709_v28 = vld [vmem:[%s6393_s1 + $0x4c0] ss:$8 sps:$4 sm:$0xff]  }
  0xfd   :  { %3432 = vmatprep.subr.bf16.mxu0 %v4630_v29  ;;  %v4712_v29 = vld [vmem:[%s6393_s1 + $0xbc0] ss:$8 sps:$4 sm:$0xff]  }
  0xff   :  { %3076 = vmatpush1.bf16.msra.mxu1 %v4625_v30  ;;  %v4717_v30 = vld [vmem:[%s6393_s1 + $0x4d4] ss:$8 sps:$4 sm:$0xff]  }
 0x100   :  { %3433 = vmatpush1.bf16.msra.mxu0 %v4628_v31  ;;  %3096 = vmatprep.subr.bf16.mxu1 %v4636_v32  ;;  %v4720_v31 = vld [vmem:[%s6393_s1 + $0xbd4] ss:$8 sps:$4 sm:$0xff]   ;;  %v4715_v32 = vld [vmem:[%s6393_s1 + $0x4d0] ss:$8 sps:$4 sm:$0xff]  }
 0x101   :  { %3453 = vmatprep.subr.bf16.mxu0 %v4642_v34  ;;  %v4724_v34 = vld [vmem:[%s6393_s1 + $0x4e4] ss:$8 sps:$4 sm:$0xff]  }
 0x102   :  { %3078 = vmatmul.mubr.bf16.vlgmr.msra.gmra.mrb[0].mxu1 %v4631_v33  ;;  %v4718_v33 = vld [vmem:[%s6393_s1 + $0xbd0] ss:$8 sps:$4 sm:$0xff]  }
 0x103   :  { %3435 = vmatmul.mubr.bf16.vlgmr.msra.gmra.mrb[0].mxu0 %v4637_v36  ;;  %3097 = vmatpush1.bf16.msra.mxu1 %v4634_v35  ;;  %v4728_v35 = vld [vmem:[%s6393_s1 + $0xbe4] ss:$8 sps:$4 sm:$0xff]   ;;  %v4722_v36 = vld [vmem:[%s6393_s1 + $0x4e0] ss:$8 sps:$4 sm:$0xff]  }
 0x104   :  { %3454 = vmatpush1.bf16.msra.mxu0 %v4640_v37  ;;  %3098 = vmatprep.subr.bf16.mxu1 %v4645_v40  ;;  %v4726_v37 = vld [vmem:[%s6393_s1 + $0xbe0] ss:$8 sps:$4 sm:$0xff]   ;;  %v4731_v40 = vld [vmem:[%s6393_s1 + $0x4f0] ss:$8 sps:$4 sm:$0xff]  }
 0x105   :  { %3455 = vmatprep.subr.bf16.mxu0 %v4648_v41  ;;  %3087 = vmatprep.mubr.bf16.mxu1 %v3656_v42  ;;  %v4734_v41 = vld [vmem:[%s6393_s1 + $0xbf0] ss:$8 sps:$4 sm:$0xff]   ;;  %v4742_v42 = vld [vmem:[%s6393_s1 + $0x504] ss:$8 sps:$4 sm:$0xff]  }
 0x106   :  { %3444 = vmatprep.mubr.bf16.mxu0 %v3670_v43  ;;  %v4748_v43 = vld [vmem:[%s6393_s1 + $0xc04] ss:$8 sps:$4 sm:$0xff]  }
 0x107   :  { %3099 = vmatpush1.bf16.msra.mxu1 %v4643_v44  ;;  %v4737_v44 = vld [vmem:[%s6394_s0 + $0x20] ss:$108 sps:$4 sm:$0xff]  }
 0x108   :  { %3456 = vmatpush1.bf16.msra.mxu0 %v4646_v45  ;;  %3100 = vmatprep.subr.bf16.mxu1 %v4651_v46  ;;  %v4743_v45 = vld [vmem:[%s6394_s0 + $0x58] ss:$108 sps:$4 sm:$0xff]  }
 0x109   :  { %3457 = vmatprep.subr.bf16.mxu0 %v4654_v47  ;;  %v47_v46 = vld [vmem:[%s6394_s0 + $0xf8] sm:$0xff]  ;;  %v54_v47 = vld [vmem:[%s6394_s0 + $0x130] sm:$0xff] }
 0x10a   :  { %3088 = vmatmul.mubr.bf16.gmra.mrb[4].mxu1 %v3655_v50  ;;  %v4751_v50 = vld [vmem:[%s6393_s1 + $0x514] ss:$8 sps:$4 sm:$0xff]  }
 0x10b   :  { %3445 = vmatmul.mubr.bf16.gmra.mrb[4].mxu0 %v3669_v51  ;;  %3101 = vmatpush1.bf16.msra.mxu1 %v4649_v48  ;;  %v4740_v48 = vld [vmem:[%s6393_s1 + $0x500] ss:$8 sps:$4 sm:$0xff]   ;;  %v4754_v51 = vld [vmem:[%s6393_s1 + $0xc14] ss:$8 sps:$4 sm:$0xff]  }
 0x10c   :  { %3458 = vmatpush1.bf16.msra.mxu0 %v4652_v49  ;;  %3102 = vmatprep.subr.bf16.mxu1 %v4657_v52  ;;  %v4746_v49 = vld [vmem:[%s6393_s1 + $0xc00] ss:$8 sps:$4 sm:$0xff]   ;;  %v3658_v52 = vcombine.high %v47_v46, %v47_v46 }
 0x10d   :  { %3459 = vmatprep.subr.bf16.mxu0 %v4660_v53  ;;  %3128 = vmatprep.mubr.bf16.mxu1 %v4739_v54  ;;  %v3672_v53 = vcombine.high %v54_v47, %v54_v47  ;;  %v4749_v54 = vld [vmem:[%s6393_s1 + $0x510] ss:$8 sps:$4 sm:$0xff]  }
 0x10e   :  { %3485 = vmatprep.mubr.bf16.mxu0 %v4745_v55  ;;  %v4752_v55 = vld [vmem:[%s6393_s1 + $0xc10] ss:$8 sps:$4 sm:$0xff]  }
 0x10f   :  { %3103 = vmatpush1.bf16.msra.mxu1 %v4655_v56  ;;  %v4757_v56 = vld [vmem:[%s6393_s1 + $0x524] ss:$8 sps:$4 sm:$0xff]  }
 0x110   :  { %3460 = vmatpush1.bf16.msra.mxu0 %v4658_v57  ;;  %3104 = vmatprep.subr.bf16.mxu1 %v4663_v58  ;;  %v4760_v57 = vld [vmem:[%s6393_s1 + $0xc24] ss:$8 sps:$4 sm:$0xff]   ;;  %v3657_v58 = vcombine.low %v47_v46, %v47_v46  ;;  %v4828_v46 = vld [vmem:[%s6393_s1 + $0x5e0] ss:$8 sps:$4 sm:$0xff]  }
 0x111   :  { %3461 = vmatprep.subr.bf16.mxu0 %v4666_v59  ;;  %v3671_v59 = vcombine.low %v54_v47, %v54_v47  ;;  %v4832_v47 = vld [vmem:[%s6393_s1 + $0xce0] ss:$8 sps:$4 sm:$0xff]  }
 0x113   :  { %3105 = vmatpush1.bf16.msra.mxu1 %v4661_v60  ;;  %v4755_v60 = vld [vmem:[%s6393_s1 + $0x520] ss:$8 sps:$4 sm:$0xff]  }
 0x114   :  { %3462 = vmatpush1.bf16.msra.mxu0 %v4664_v61  ;;  %3106 = vmatprep.subr.bf16.mxu1 %v4669_v62  ;;  %v4758_v61 = vld [vmem:[%s6393_s1 + $0xc20] ss:$8 sps:$4 sm:$0xff]   ;;  %v4763_v62 = vld [vmem:[%s6393_s1 + $0x534] ss:$8 sps:$4 sm:$0xff]  }
 0x115   :  { %3463 = vmatprep.subr.bf16.mxu0 %v4672_v63  ;;  %v4766_v63 = vld [vmem:[%s6393_s1 + $0xc34] ss:$8 sps:$4 sm:$0xff]  }
 0x117   :  { %3107 = vmatpush1.bf16.msra.mxu1 %v4667_v0  ;;  %v4845_v0 = vld [vmem:[%s6394_s0 + $0x2c] ss:$108 sps:$4 sm:$0xff]  }
 0x118   :  { %3464 = vmatpush1.bf16.msra.mxu0 %v4670_v1  ;;  %3108 = vmatprep.subr.bf16.mxu1 %v4675_v2  ;;  %v4851_v1 = vld [vmem:[%s6394_s0 + $0x64] ss:$108 sps:$4 sm:$0xff]  }
 0x119   :  { %3465 = vmatprep.subr.bf16.mxu0 %v4678_v3  ;;  %v4761_v2 = vld [vmem:[%s6393_s1 + $0x530] ss:$8 sps:$4 sm:$0xff]  }
 0x11a   :  { %v4764_v3 = vld [vmem:[%s6393_s1 + $0xc30] ss:$8 sps:$4 sm:$0xff]  }
 0x11b   :  { %3109 = vmatpush1.bf16.msra.mxu1 %v4673_v4  ;;  %v4769_v4 = vld [vmem:[%s6393_s1 + $0x544] ss:$8 sps:$4 sm:$0xff]  }
 0x11c   :  { %3466 = vmatpush1.bf16.msra.mxu0 %v4676_v5  ;;  %3110 = vmatprep.subr.bf16.mxu1 %v4681_v6  ;;  %v4772_v5 = vld [vmem:[%s6393_s1 + $0xc44] ss:$8 sps:$4 sm:$0xff]   ;;  %v4767_v6 = vld [vmem:[%s6393_s1 + $0x540] ss:$8 sps:$4 sm:$0xff]  }
 0x11d   :  { %3467 = vmatprep.subr.bf16.mxu0 %v4684_v7  ;;  %v4770_v7 = vld [vmem:[%s6393_s1 + $0xc40] ss:$8 sps:$4 sm:$0xff]  }
 0x11f   :  { %3111 = vmatpush1.bf16.msra.mxu1 %v4679_v8  ;;  %v4775_v8 = vld [vmem:[%s6393_s1 + $0x554] ss:$8 sps:$4 sm:$0xff]  }
 0x120   :  { %3468 = vmatpush1.bf16.msra.mxu0 %v4682_v9  ;;  %3112 = vmatprep.subr.bf16.mxu1 %v4687_v10  ;;  %v4778_v9 = vld [vmem:[%s6393_s1 + $0xc54] ss:$8 sps:$4 sm:$0xff]   ;;  %v4773_v10 = vld [vmem:[%s6393_s1 + $0x550] ss:$8 sps:$4 sm:$0xff]  }
 0x121   :  { %3469 = vmatprep.subr.bf16.mxu0 %v4690_v11  ;;  %v4776_v11 = vld [vmem:[%s6393_s1 + $0xc50] ss:$8 sps:$4 sm:$0xff]  }
 0x123   :  { %3113 = vmatpush1.bf16.msra.mxu1 %v4685_v12  ;;  %v4781_v12 = vld [vmem:[%s6393_s1 + $0x564] ss:$8 sps:$4 sm:$0xff]  }
 0x124   :  { %3470 = vmatpush1.bf16.msra.mxu0 %v4688_v13  ;;  %3114 = vmatprep.subr.bf16.mxu1 %v4693_v14  ;;  %v4784_v13 = vld [vmem:[%s6393_s1 + $0xc64] ss:$8 sps:$4 sm:$0xff]   ;;  %v4779_v14 = vld [vmem:[%s6393_s1 + $0x560] ss:$8 sps:$4 sm:$0xff]  }
 0x125   :  { %3471 = vmatprep.subr.bf16.mxu0 %v4696_v15  ;;  %v4782_v15 = vld [vmem:[%s6393_s1 + $0xc60] ss:$8 sps:$4 sm:$0xff]  }
 0x127   :  { %3115 = vmatpush1.bf16.msra.mxu1 %v4691_v16  ;;  %v4787_v16 = vld [vmem:[%s6393_s1 + $0x574] ss:$8 sps:$4 sm:$0xff]  }
 0x128   :  { %3472 = vmatpush1.bf16.msra.mxu0 %v4694_v17  ;;  %3116 = vmatprep.subr.bf16.mxu1 %v4699_v18  ;;  %v4790_v17 = vld [vmem:[%s6393_s1 + $0xc74] ss:$8 sps:$4 sm:$0xff]   ;;  %v4785_v18 = vld [vmem:[%s6393_s1 + $0x570] ss:$8 sps:$4 sm:$0xff]  }
 0x129   :  { %3473 = vmatprep.subr.bf16.mxu0 %v4702_v19  ;;  %v4788_v19 = vld [vmem:[%s6393_s1 + $0xc70] ss:$8 sps:$4 sm:$0xff]  }
 0x12b   :  { %3117 = vmatpush1.bf16.msra.mxu1 %v4697_v20  ;;  %v4793_v20 = vld [vmem:[%s6393_s1 + $0x584] ss:$8 sps:$4 sm:$0xff]  }
 0x12c   :  { %3474 = vmatpush1.bf16.msra.mxu0 %v4700_v21  ;;  %3118 = vmatprep.subr.bf16.mxu1 %v4705_v22  ;;  %v4796_v21 = vld [vmem:[%s6393_s1 + $0xc84] ss:$8 sps:$4 sm:$0xff]   ;;  %v4791_v22 = vld [vmem:[%s6393_s1 + $0x580] ss:$8 sps:$4 sm:$0xff]  }
 0x12d   :  { %3475 = vmatprep.subr.bf16.mxu0 %v4708_v23  ;;  %v4794_v23 = vld [vmem:[%s6393_s1 + $0xc80] ss:$8 sps:$4 sm:$0xff]  }
 0x12f   :  { %3119 = vmatpush1.bf16.msra.mxu1 %v4703_v24  ;;  %v4799_v24 = vld [vmem:[%s6393_s1 + $0x594] ss:$8 sps:$4 sm:$0xff]  }
 0x130   :  { %3476 = vmatpush1.bf16.msra.mxu0 %v4706_v25  ;;  %3120 = vmatprep.subr.bf16.mxu1 %v4711_v26  ;;  %v4802_v25 = vld [vmem:[%s6393_s1 + $0xc94] ss:$8 sps:$4 sm:$0xff]   ;;  %v4797_v26 = vld [vmem:[%s6393_s1 + $0x590] ss:$8 sps:$4 sm:$0xff]  }
 0x131   :  { %3477 = vmatprep.subr.bf16.mxu0 %v4714_v27  ;;  %v4800_v27 = vld [vmem:[%s6393_s1 + $0xc90] ss:$8 sps:$4 sm:$0xff]  }
 0x133   :  { %3121 = vmatpush1.bf16.msra.mxu1 %v4709_v28  ;;  %v4805_v28 = vld [vmem:[%s6393_s1 + $0x5a4] ss:$8 sps:$4 sm:$0xff]  }
 0x134   :  { %3478 = vmatpush1.bf16.msra.mxu0 %v4712_v29  ;;  %3122 = vmatprep.subr.bf16.mxu1 %v4717_v30  ;;  %v4808_v29 = vld [vmem:[%s6393_s1 + $0xca4] ss:$8 sps:$4 sm:$0xff]   ;;  %v4803_v30 = vld [vmem:[%s6393_s1 + $0x5a0] ss:$8 sps:$4 sm:$0xff]  }
 0x135   :  { %3479 = vmatprep.subr.bf16.mxu0 %v4720_v31  ;;  %v4806_v31 = vld [vmem:[%s6393_s1 + $0xca0] ss:$8 sps:$4 sm:$0xff]  }
 0x137   :  { %3123 = vmatpush1.bf16.msra.mxu1 %v4715_v32  ;;  %v4811_v32 = vld [vmem:[%s6393_s1 + $0x5b4] ss:$8 sps:$4 sm:$0xff]  }
 0x138   :  { %3480 = vmatpush1.bf16.msra.mxu0 %v4718_v33  ;;  %3124 = vmatprep.subr.bf16.mxu1 %v4724_v34  ;;  %v4814_v33 = vld [vmem:[%s6393_s1 + $0xcb4] ss:$8 sps:$4 sm:$0xff]   ;;  %v4809_v34 = vld [vmem:[%s6393_s1 + $0x5b0] ss:$8 sps:$4 sm:$0xff]  }
 0x139   :  { %3481 = vmatprep.subr.bf16.mxu0 %v4728_v35  ;;  %v4812_v35 = vld [vmem:[%s6393_s1 + $0xcb0] ss:$8 sps:$4 sm:$0xff]  }
 0x13b   :  { %3125 = vmatpush1.bf16.msra.mxu1 %v4722_v36  ;;  %v4817_v36 = vld [vmem:[%s6393_s1 + $0x5c4] ss:$8 sps:$4 sm:$0xff]  }
 0x13c   :  { %3482 = vmatpush1.bf16.msra.mxu0 %v4726_v37  ;;  %3126 = vmatprep.subr.bf16.mxu1 %v4733_v38  ;;  %v4820_v37 = vld [vmem:[%s6393_s1 + $0xcc4] ss:$8 sps:$4 sm:$0xff]   ;;  %v4815_v38 = vld [vmem:[%s6393_s1 + $0x5c0] ss:$8 sps:$4 sm:$0xff]  }
 0x13d   :  { %3483 = vmatprep.subr.bf16.mxu0 %v4736_v39  ;;  %v4818_v39 = vld [vmem:[%s6393_s1 + $0xcc0] ss:$8 sps:$4 sm:$0xff]  }
 0x13f   :  { %3127 = vmatpush1.bf16.msra.mxu1 %v4731_v40  ;;  %v4823_v40 = vld [vmem:[%s6393_s1 + $0x5d4] ss:$8 sps:$4 sm:$0xff]  }
 0x140   :  { %3484 = vmatpush1.bf16.msra.mxu0 %v4734_v41  ;;  %3147 = vmatprep.subr.bf16.mxu1 %v4742_v42  ;;  %v4826_v41 = vld [vmem:[%s6393_s1 + $0xcd4] ss:$8 sps:$4 sm:$0xff]   ;;  %v4821_v42 = vld [vmem:[%s6393_s1 + $0x5d0] ss:$8 sps:$4 sm:$0xff]  }
 0x141   :  { %3504 = vmatprep.subr.bf16.mxu0 %v4748_v43  ;;  %v4824_v43 = vld [vmem:[%s6393_s1 + $0xcd0] ss:$8 sps:$4 sm:$0xff]  }
 0x142   :  { %3129 = vmatmul.mubr.bf16.vlgmr.msra.gmra.mrb[0].mxu1 %v4737_v44  ;;  %v4830_v44 = vld [vmem:[%s6393_s1 + $0x5e4] ss:$8 sps:$4 sm:$0xff]  }
 0x143   :  { %3486 = vmatmul.mubr.bf16.vlgmr.msra.gmra.mrb[0].mxu0 %v4743_v45  ;;  %3148 = vmatpush1.bf16.msra.mxu1 %v4740_v48  ;;  %v4834_v45 = vld [vmem:[%s6393_s1 + $0xce4] ss:$8 sps:$4 sm:$0xff]   ;;  %v4839_v48 = vld [vmem:[%s6393_s1 + $0x5f4] ss:$8 sps:$4 sm:$0xff]  }
 0x144   :  { %3505 = vmatpush1.bf16.msra.mxu0 %v4746_v49  ;;  %3149 = vmatprep.subr.bf16.mxu1 %v4751_v50  ;;  %v4842_v49 = vld [vmem:[%s6393_s1 + $0xcf4] ss:$8 sps:$4 sm:$0xff]   ;;  %v4837_v50 = vld [vmem:[%s6393_s1 + $0x5f0] ss:$8 sps:$4 sm:$0xff]  }
 0x145   :  { %3506 = vmatprep.subr.bf16.mxu0 %v4754_v51  ;;  %3138 = vmatprep.mubr.bf16.mxu1 %v3658_v52  ;;  %v4840_v51 = vld [vmem:[%s6393_s1 + $0xcf0] ss:$8 sps:$4 sm:$0xff]   ;;  %v4848_v52 = vld [vmem:[%s6393_s1 + $0x604] ss:$8 sps:$4 sm:$0xff]  }
 0x146   :  { %3495 = vmatprep.mubr.bf16.mxu0 %v3672_v53  ;;  %v4854_v53 = vld [vmem:[%s6393_s1 + $0xd04] ss:$8 sps:$4 sm:$0xff]  }
 0x147   :  { %3150 = vmatpush1.bf16.msra.mxu1 %v4749_v54  ;;  %v4843_v54 = vld [vmem:[%s6394_s0 + $0x28] ss:$108 sps:$4 sm:$0xff]  }
 0x148   :  { %3507 = vmatpush1.bf16.msra.mxu0 %v4752_v55  ;;  %3151 = vmatprep.subr.bf16.mxu1 %v4757_v56  ;;  %v4849_v55 = vld [vmem:[%s6394_s0 + $0x60] ss:$108 sps:$4 sm:$0xff]   ;;  %v55_v56 = vld [vmem:[%s6394_s0 + $0x138] sm:$0xff] }
 0x149   :  { %3508 = vmatprep.subr.bf16.mxu0 %v4760_v57  ;;  %v48_v57 = vld [vmem:[%s6394_s0 + $0x100] sm:$0xff] }
 0x14a   :  { %3139 = vmatmul.mubr.bf16.gmra.mrb[4].mxu1 %v3657_v58  ;;  %v4846_v58 = vld [vmem:[%s6393_s1 + $0x600] ss:$8 sps:$4 sm:$0xff]  }
 0x14b   :  { %3496 = vmatmul.mubr.bf16.gmra.mrb[4].mxu0 %v3671_v59  ;;  %3152 = vmatpush1.bf16.msra.mxu1 %v4755_v60  ;;  %v4852_v59 = vld [vmem:[%s6393_s1 + $0xd00] ss:$8 sps:$4 sm:$0xff]   ;;  %v4857_v60 = vld [vmem:[%s6393_s1 + $0x614] ss:$8 sps:$4 sm:$0xff]  }
 0x14c   :  { %3509 = vmatpush1.bf16.msra.mxu0 %v4758_v61  ;;  %3153 = vmatprep.subr.bf16.mxu1 %v4763_v62  ;;  %v4860_v61 = vld [vmem:[%s6393_s1 + $0xd14] ss:$8 sps:$4 sm:$0xff]   ;;  %v3674_v62 = vcombine.high %v55_v56, %v55_v56 }
 0x14d   :  { %3510 = vmatprep.subr.bf16.mxu0 %v4766_v63  ;;  %3179 = vmatprep.mubr.bf16.mxu1 %v4845_v0  ;;  %v3660_v63 = vcombine.high %v48_v57, %v48_v57  ;;  %v4855_v0 = vld [vmem:[%s6393_s1 + $0x610] ss:$8 sps:$4 sm:$0xff]  }
 0x14e   :  { %3536 = vmatprep.mubr.bf16.mxu0 %v4851_v1  ;;  %v4858_v1 = vld [vmem:[%s6393_s1 + $0xd10] ss:$8 sps:$4 sm:$0xff]  }
 0x14f   :  { %3154 = vmatpush1.bf16.msra.mxu1 %v4761_v2  ;;  %v4863_v2 = vld [vmem:[%s6393_s1 + $0x624] ss:$8 sps:$4 sm:$0xff]  }
 0x150   :  { %3511 = vmatpush1.bf16.msra.mxu0 %v4764_v3  ;;  %3155 = vmatprep.subr.bf16.mxu1 %v4769_v4  ;;  %v4866_v3 = vld [vmem:[%s6393_s1 + $0xd24] ss:$8 sps:$4 sm:$0xff]   ;;  %v3673_v4 = vcombine.low %v55_v56, %v55_v56 }
 0x151   :  { %3512 = vmatprep.subr.bf16.mxu0 %v4772_v5  ;;  %v3659_v5 = vcombine.low %v48_v57, %v48_v57 }
 0x153   :  { %3156 = vmatpush1.bf16.msra.mxu1 %v4767_v6  ;;  %v4861_v6 = vld [vmem:[%s6393_s1 + $0x620] ss:$8 sps:$4 sm:$0xff]  }
 0x154   :  { %3513 = vmatpush1.bf16.msra.mxu0 %v4770_v7  ;;  %3157 = vmatprep.subr.bf16.mxu1 %v4775_v8  ;;  %v4864_v7 = vld [vmem:[%s6393_s1 + $0xd20] ss:$8 sps:$4 sm:$0xff]   ;;  %v4869_v8 = vld [vmem:[%s6393_s1 + $0x634] ss:$8 sps:$4 sm:$0xff]  }
 0x155   :  { %3514 = vmatprep.subr.bf16.mxu0 %v4778_v9  ;;  %v4872_v9 = vld [vmem:[%s6393_s1 + $0xd34] ss:$8 sps:$4 sm:$0xff]  }
 0x157   :  { %3158 = vmatpush1.bf16.msra.mxu1 %v4773_v10  ;;  %v4929_v10 = vld [vmem:[%s6394_s0 + $0x34] ss:$108 sps:$4 sm:$0xff]  }
 0x158   :  { %3515 = vmatpush1.bf16.msra.mxu0 %v4776_v11  ;;  %3159 = vmatprep.subr.bf16.mxu1 %v4781_v12  ;;  %v4867_v11 = vld [vmem:[%s6393_s1 + $0x630] ss:$8 sps:$4 sm:$0xff]  }
 0x159   :  { %3516 = vmatprep.subr.bf16.mxu0 %v4784_v13  ;;  %v4870_v12 = vld [vmem:[%s6393_s1 + $0xd30] ss:$8 sps:$4 sm:$0xff]   ;;  %v4875_v13 = vld [vmem:[%s6393_s1 + $0x644] ss:$8 sps:$4 sm:$0xff]  }
 0x15b   :  { %3160 = vmatpush1.bf16.msra.mxu1 %v4779_v14  ;;  %v4878_v14 = vld [vmem:[%s6393_s1 + $0xd44] ss:$8 sps:$4 sm:$0xff]  }
 0x15c   :  { %3517 = vmatpush1.bf16.msra.mxu0 %v4782_v15  ;;  %3161 = vmatprep.subr.bf16.mxu1 %v4787_v16  ;;  %v4932_v15 = vmov 0   ;;  %v4873_v16 = vld [vmem:[%s6393_s1 + $0x640] ss:$8 sps:$4 sm:$0xff]  }
 0x15d   :  { %3518 = vmatprep.subr.bf16.mxu0 %v4790_v17  ;;  %v4876_v17 = vld [vmem:[%s6393_s1 + $0xd40] ss:$8 sps:$4 sm:$0xff]  }
 0x15f   :  { %3162 = vmatpush1.bf16.msra.mxu1 %v4785_v18  ;;  %v4881_v18 = vld [vmem:[%s6393_s1 + $0x654] ss:$8 sps:$4 sm:$0xff]  }
 0x160   :  { %3519 = vmatpush1.bf16.msra.mxu0 %v4788_v19  ;;  %3163 = vmatprep.subr.bf16.mxu1 %v4793_v20  ;;  %v4884_v19 = vld [vmem:[%s6393_s1 + $0xd54] ss:$8 sps:$4 sm:$0xff]   ;;  %v4879_v20 = vld [vmem:[%s6393_s1 + $0x650] ss:$8 sps:$4 sm:$0xff]  }
 0x161   :  { %3520 = vmatprep.subr.bf16.mxu0 %v4796_v21  ;;  %v4882_v21 = vld [vmem:[%s6393_s1 + $0xd50] ss:$8 sps:$4 sm:$0xff]  }
 0x163   :  { %3164 = vmatpush1.bf16.msra.mxu1 %v4791_v22  ;;  %v4888_v22 = vld [vmem:[%s6393_s1 + $0x664] ss:$8 sps:$4 sm:$0xff]  }
 0x164   :  { %3521 = vmatpush1.bf16.msra.mxu0 %v4794_v23  ;;  %3165 = vmatprep.subr.bf16.mxu1 %v4799_v24  ;;  %v4892_v23 = vld [vmem:[%s6393_s1 + $0xd64] ss:$8 sps:$4 sm:$0xff]   ;;  %v4886_v24 = vld [vmem:[%s6393_s1 + $0x660] ss:$8 sps:$4 sm:$0xff]  }
 0x165   :  { %3522 = vmatprep.subr.bf16.mxu0 %v4802_v25  ;;  %v4890_v25 = vld [vmem:[%s6393_s1 + $0xd60] ss:$8 sps:$4 sm:$0xff]  }
 0x167   :  { %3166 = vmatpush1.bf16.msra.mxu1 %v4797_v26  ;;  %v4895_v26 = vld [vmem:[%s6393_s1 + $0x674] ss:$8 sps:$4 sm:$0xff]  }
 0x168   :  { %3523 = vmatpush1.bf16.msra.mxu0 %v4800_v27  ;;  %3167 = vmatprep.subr.bf16.mxu1 %v4805_v28  ;;  %v4898_v27 = vld [vmem:[%s6393_s1 + $0xd74] ss:$8 sps:$4 sm:$0xff]   ;;  %v4893_v28 = vld [vmem:[%s6393_s1 + $0x670] ss:$8 sps:$4 sm:$0xff]  }
 0x169   :  { %3524 = vmatprep.subr.bf16.mxu0 %v4808_v29  ;;  %v4896_v29 = vld [vmem:[%s6393_s1 + $0xd70] ss:$8 sps:$4 sm:$0xff]  }
 0x16b   :  { %3168 = vmatpush1.bf16.msra.mxu1 %v4803_v30  ;;  %v4901_v30 = vld [vmem:[%s6393_s1 + $0x684] ss:$8 sps:$4 sm:$0xff]  }
 0x16c   :  { %3525 = vmatpush1.bf16.msra.mxu0 %v4806_v31  ;;  %3169 = vmatprep.subr.bf16.mxu1 %v4811_v32  ;;  %v4902_v31 = vld [vmem:[%s6394_s0 + $0x68] ss:$108 sps:$4 sm:$0xff]  }
 0x16d   :  { %3526 = vmatprep.subr.bf16.mxu0 %v4814_v33  ;;  %v4899_v32 = vld [vmem:[%s6393_s1 + $0x680] ss:$8 sps:$4 sm:$0xff]   ;;  %v4905_v33 = vld [vmem:[%s6393_s1 + $0x694] ss:$8 sps:$4 sm:$0xff]  }
 0x16f   :  { %3170 = vmatpush1.bf16.msra.mxu1 %v4809_v34  ;;  %v4903_v34 = vld [vmem:[%s6393_s1 + $0x690] ss:$8 sps:$4 sm:$0xff]  }
 0x170   :  { %3527 = vmatpush1.bf16.msra.mxu0 %v4812_v35  ;;  %3171 = vmatprep.subr.bf16.mxu1 %v4817_v36  ;;  %v4908_v35 = vld [vmem:[%s6393_s1 + $0x6a4] ss:$8 sps:$4 sm:$0xff]   ;;  %v4909_v36 = vld [vmem:[%s6394_s0 + $0x140] ss:$0 sps:$4 sm:$0xff]  }
 0x171   :  { %3528 = vmatprep.subr.bf16.mxu0 %v4820_v37  ;;  %v4906_v37 = vld [vmem:[%s6393_s1 + $0x6a0] ss:$8 sps:$4 sm:$0xff]  }
 0x173   :  { %3172 = vmatpush1.bf16.msra.mxu1 %v4815_v38  ;;  %v4912_v38 = vld [vmem:[%s6393_s1 + $0x6b4] ss:$8 sps:$4 sm:$0xff]  }
 0x174   :  { %3529 = vmatpush1.bf16.msra.mxu0 %v4818_v39  ;;  %3173 = vmatprep.subr.bf16.mxu1 %v4823_v40  ;;  %v4910_v39 = vld [vmem:[%s6393_s1 + $0x6b0] ss:$8 sps:$4 sm:$0xff]   ;;  %v4915_v40 = vld [vmem:[%s6393_s1 + $0x6c4] ss:$8 sps:$4 sm:$0xff]  }
 0x175   :  { %3530 = vmatprep.subr.bf16.mxu0 %v4826_v41  ;;  %v4913_v41 = vld [vmem:[%s6393_s1 + $0x6c0] ss:$8 sps:$4 sm:$0xff]  }
 0x177   :  { %3174 = vmatpush1.bf16.msra.mxu1 %v4821_v42  ;;  %v4918_v42 = vld [vmem:[%s6393_s1 + $0x6d4] ss:$8 sps:$4 sm:$0xff]  }
 0x178   :  { %3531 = vmatpush1.bf16.msra.mxu0 %v4824_v43  ;;  %3175 = vmatprep.subr.bf16.mxu1 %v4830_v44  ;;  %v4916_v43 = vld [vmem:[%s6393_s1 + $0x6d0] ss:$8 sps:$4 sm:$0xff]   ;;  %v4923_v44 = vld [vmem:[%s6393_s1 + $0x6e4] ss:$8 sps:$4 sm:$0xff]  }
 0x179   :  { %3532 = vmatprep.subr.bf16.mxu0 %v4834_v45  ;;  %v4921_v45 = vld [vmem:[%s6393_s1 + $0x6e0] ss:$8 sps:$4 sm:$0xff]  }
 0x17b   :  { %3176 = vmatpush1.bf16.msra.mxu1 %v4828_v46  ;;  %v4926_v46 = vld [vmem:[%s6393_s1 + $0x6f4] ss:$8 sps:$4 sm:$0xff]  }
 0x17c   :  { %3533 = vmatpush1.bf16.msra.mxu0 %v4832_v47  ;;  %3177 = vmatprep.subr.bf16.mxu1 %v4839_v48  ;;  %v4924_v47 = vld [vmem:[%s6393_s1 + $0x6f0] ss:$8 sps:$4 sm:$0xff]   ;;  %v49_v48 = vld [vmem:[%s6394_s0 + $0x108] sm:$0xff] }
 0x17d   :  { %3534 = vmatprep.subr.bf16.mxu0 %v4842_v49  ;;  %v4927_v49 = vld [vmem:[%s6394_s0 + $0x30] ss:$108 sps:$4 sm:$0xff]  }
 0x17f   :  { %3178 = vmatpush1.bf16.msra.mxu1 %v4837_v50  ;;  %v3662_v50 = vcombine.high %v49_v48, %v49_v48 }
 0x180   :  { %3535 = vmatpush1.bf16.msra.mxu0 %v4840_v51  ;;  %3198 = vmatprep.subr.bf16.mxu1 %v4848_v52  ;;  %v3661_v51 = vcombine.low %v49_v48, %v49_v48 }
 0x181   :  { %3555 = vmatprep.subr.bf16.mxu0 %v4854_v53 }
 0x182   :  { %3180 = vmatmul.mubr.bf16.vlgmr.msra.gmra.mrb[0].mxu1 %v4843_v54 }
 0x183   :  { %3537 = vmatmul.mubr.bf16.vlgmr.msra.gmra.mrb[0].mxu0 %v4849_v55  ;;  %3199 = vmatpush1.bf16.msra.mxu1 %v4846_v58 }
 0x184   :  { %3556 = vmatpush1.bf16.msra.mxu0 %v4852_v59  ;;  %3200 = vmatprep.subr.bf16.mxu1 %v4857_v60  ;;  %v491_v60 = vlaneseq }
 0x185   :  { %3557 = vmatprep.subr.bf16.mxu0 %v4860_v61  ;;  %3546 = vmatprep.mubr.bf16.mxu0 %v3674_v62 }
 0x186   :  { %3189 = vmatprep.mubr.bf16.mxu1 %v3660_v63  ;;  %v492_v61 = vshrl.u32 %v491_v60, 7  ;;  %v489_v63 = vld [vmem:[%s6395_s2] sm:$0x3] }
 0x187   :  { %3201 = vmatpush1.bf16.msra.mxu1 %v4855_v0 }
 0x188   :  { %3558 = vmatpush1.bf16.msra.mxu0 %v4858_v1  ;;  %3202 = vmatprep.subr.bf16.mxu1 %v4863_v2  ;;  %v493_v62 = vsub.s32 0, %v492_v61  ;;  %v497_v0 = vsub.s32 1, %v492_v61 }
 0x189   :  { %3559 = vmatprep.subr.bf16.mxu0 %v4866_v3 }
 0x18a   :  { %3190 = vmatmul.mubr.bf16.gmra.mrb[4].mxu1 %v3659_v5  ;;  %v494_v1 = vrot.slane %v489_v63, %v493_v62  ;;  %v498_v2 = vrot.slane %v489_v63, %v497_v0 }
 0x18b   :  { %3547 = vmatmul.mubr.bf16.gmra.mrb[4].mxu0 %v3673_v4  ;;  %3203 = vmatpush1.bf16.msra.mxu1 %v4861_v6 }
 0x18c   :  { %3560 = vmatpush1.bf16.msra.mxu0 %v4864_v7  ;;  %3204 = vmatprep.subr.bf16.mxu1 %v4869_v8 }
 0x18d   :  { %3561 = vmatprep.subr.bf16.mxu0 %v4872_v9  ;;  %3587 = vmatprep.mubr.bf16.mxu0 %v4932_v15 }
 0x18e   :  { %3230 = vmatprep.mubr.bf16.mxu1 %v4929_v10 }
 0x18f   :  { %3205 = vmatpush1.bf16.msra.mxu1 %v4867_v11 }
 0x190   :  { %3562 = vmatpush1.bf16.msra.mxu0 %v4870_v12  ;;  %3206 = vmatprep.subr.bf16.mxu1 %v4875_v13 }
 0x191   :  { %3563 = vmatprep.subr.bf16.mxu0 %v4878_v14 }
 0x193   :  { %3207 = vmatpush1.bf16.msra.mxu1 %v4873_v16 }
 0x194   :  { %3564 = vmatpush1.bf16.msra.mxu0 %v4876_v17  ;;  %3208 = vmatprep.subr.bf16.mxu1 %v4881_v18 }
 0x195   :  { %3565 = vmatprep.subr.bf16.mxu0 %v4884_v19 }
 0x197   :  { %3209 = vmatpush1.bf16.msra.mxu1 %v4879_v20 }
 0x198   :  { %3566 = vmatpush1.bf16.msra.mxu0 %v4882_v21  ;;  %3210 = vmatprep.subr.bf16.mxu1 %v4888_v22 }
 0x199   :  { %3567 = vmatprep.subr.bf16.mxu0 %v4892_v23 }
 0x19b   :  { %3211 = vmatpush1.bf16.msra.mxu1 %v4886_v24 }
 0x19c   :  { %3568 = vmatpush1.bf16.msra.mxu0 %v4890_v25  ;;  %3212 = vmatprep.subr.bf16.mxu1 %v4895_v26 }
 0x19d   :  { %3569 = vmatprep.subr.bf16.mxu0 %v4898_v27 }
 0x19f   :  { %3213 = vmatpush1.bf16.msra.mxu1 %v4893_v28 }
 0x1a0   :  { %3570 = vmatpush1.bf16.msra.mxu0 %v4896_v29  ;;  %3214 = vmatprep.subr.bf16.mxu1 %v4901_v30 }
 0x1a3   :  { %3588 = vmatmul.mubr.bf16.vlgmr.msra.gmra.mrb[0].mxu0 %v4902_v31  ;;  %3215 = vmatpush1.bf16.msra.mxu1 %v4899_v32 }
 0x1a4   :  { %3597 = vmatprep.mubr.bf16.mxu0 %v4932_v15  ;;  %3216 = vmatprep.subr.bf16.mxu1 %v4905_v33 }
 0x1a7   :  { %3217 = vmatpush1.bf16.msra.mxu1 %v4903_v34 }
 0x1a8   :  { %3218 = vmatprep.subr.bf16.mxu1 %v4908_v35 }
 0x1ab   :  { %3598 = vmatmul.mubr.bf16.gmra.mrb[4].mxu0 %v4909_v36  ;;  %3219 = vmatpush1.bf16.msra.mxu1 %v4906_v37 }
 0x1ac   :  { %3220 = vmatprep.subr.bf16.mxu1 %v4912_v38 }
 0x1af   :  { %3221 = vmatpush1.bf16.msra.mxu1 %v4910_v39 }
 0x1b0   :  { %3222 = vmatprep.subr.bf16.mxu1 %v4915_v40 }
 0x1b3   :  { %3223 = vmatpush1.bf16.msra.mxu1 %v4913_v41 }
 0x1b4   :  { %3224 = vmatprep.subr.bf16.mxu1 %v4918_v42 }
 0x1b7   :  { %3225 = vmatpush1.bf16.msra.mxu1 %v4916_v43 }
 0x1b8   :  { %3226 = vmatprep.subr.bf16.mxu1 %v4923_v44 }
 0x1bb   :  { %3227 = vmatpush1.bf16.msra.mxu1 %v4921_v45 }
 0x1bc   :  { %3228 = vmatprep.subr.bf16.mxu1 %v4926_v46 }
 0x1bf   :  { %3229 = vmatpush1.bf16.msra.mxu1 %v4924_v47 }
 0x1c2   :  { %3231 = vmatmul.mubr.bf16.vlgmr.msra.gmra.mrb[0].mxu1 %v4927_v49 }
 0x1c3   :  { %3240 = vmatprep.mubr.bf16.mxu1 %v3662_v50 }
 0x1ca   :  { %3241 = vmatmul.mubr.bf16.gmra.mrb[4].mxu1 %v3661_v51 }
 0x276   :  { %v3589_v52 = vpop.f32.mrb[0].mxu0 }
 0x277   :  { %v3591_v53 = vpop.f32.mrb[1].mxu0 }
 0x278   :  { %v3593_v54 = vpop.f32.mrb[2].mxu0 }
 0x279   :  { %v3595_v55 = vpop.f32.mrb[3].mxu0 }
 0x27e   :  { %v3599_v56 = vpop.f32.mrb[4].mxu0 }
 0x27f   :  { %v3601_v57 = vpop.f32.mrb[5].mxu0 }
 0x280   :  { %v3603_v58 = vpop.f32.mrb[6].mxu0 }
 0x281   :  { %v3604_v59 = vpop.f32.mrb[7].mxu0 }
 0x295   :  { %v3232_v3 = vpop.f32.mrb[0].mxu1 }
 0x296   :  { %v4108_v4 = vadd.f32 %v3232_v3, %v494_v1  ;;  %v3234_v5 = vpop.f32.mrb[1].mxu1 }
 0x297   :  { %v4110_v6 = vadd.f32 %v3234_v5, %v498_v2  ;;  %v3236_v7 = vpop.f32.mrb[2].mxu1 }
 0x298   :  { %v4109_v8 = vadd.f32 %v4108_v4, %v3589_v52  ;;  %v4112_v9 = vadd.f32 %v3236_v7, %v494_v1  ;;  %v3238_v10 = vpop.f32.mrb[3].mxu1 }
 0x299   :  { %v4111_v11 = vadd.f32 %v4110_v6, %v3591_v53  ;;  %v4114_v12 = vadd.f32 %v3238_v10, %v498_v2 }
 0x29a   :  { %v3606_v13 = vmax.f32 %v4109_v8, 0.0  ;;  %v4113_v14 = vadd.f32 %v4112_v9, %v3593_v54 }
 0x29b   :  { %v3607_v15 = vmax.f32 %v4111_v11, 0.0  ;;  %v4115_v16 = vadd.f32 %v4114_v12, %v3595_v55 }
 0x29c   :  { %3612 = vst [vmem:[%s6396_s3] sm:$0xff] %v3606_v13  ;;  %v3608_v17 = vmax.f32 %v4113_v14, 0.0 }
 0x29d   :  { %3613 = vst [vmem:[%s6396_s3 + $0x8] sm:$0xff] %v3607_v15  ;;  %v3609_v18 = vmax.f32 %v4115_v16, 0.0  ;;  %v3242_v19 = vpop.f32.mrb[4].mxu1 }
 0x29e   :  { %3614 = vst [vmem:[%s6396_s3 + $0x10] sm:$0xff] %v3608_v17  ;;  %v4116_v20 = vadd.f32 %v3242_v19, %v494_v1  ;;  %v3244_v21 = vpop.f32.mrb[5].mxu1 }
 0x29f   :  { %3615 = vst [vmem:[%s6396_s3 + $0x18] sm:$0xff] %v3609_v18  ;;  %v4118_v22 = vadd.f32 %v3244_v21, %v498_v2  ;;  %v3246_v23 = vpop.f32.mrb[6].mxu1 }
 0x2a0   :  { %v4117_v24 = vadd.f32 %v4116_v20, %v3599_v56  ;;  %v3247_v25 = vpop.f32.mrb[7].mxu1 }
 0x2a1   :  { %v4119_v26 = vadd.f32 %v4118_v22, %v3601_v57 }
 0x2a2   :  { %v3610_v27 = vmax.f32 %v4117_v24, 0.0 }
 0x2a3   :  { %v3611_v28 = vmax.f32 %v4119_v26, 0.0 }
 0x2a4   :  { %3616 = vst [vmem:[%s6396_s3 + $0x20] sm:$0xff] %v3610_v27 }
 0x2a5   :  { %3617 = vst [vmem:[%s6396_s3 + $0x28] sm:$0xff] %v3611_v28 }

</bundles_post_ra>
